<compile_context>
chip_gen: v7x
topology: tpu7x:2x2x1
jax: 0.10.0
libtpu: 0.0.40
codegen_flags: <defaults>
</compile_context>

<pallas_src>
import functools

import jax
import jax.numpy as jnp
import numpy as np
from jax.experimental import pallas as pl
from jax.experimental.pallas import tpu as pltpu


# ---------------------------------------------------------------------------
# Fused decoder kernel
# ---------------------------------------------------------------------------
def _fused_decoder_kernel(x_ref, w1_ref, b1_ref, w2_ref, b2_ref, w3_ref, b3_ref,
                          o_ref, y1_ref, *, th):
    """One (batch n, row-strip h) step of the fused decoder.

    x_ref : (1, H+4, W+2, Cin)  bf16, row-padded by 2, col-padded by 1
    w1_ref: (3, 3, Cin, C1)     bf16 (dy, dx, ci, co)
    w2_ref: (3, 3*C1, C2)       bf16 (dy, dx*C1+ci, co)
    w3_ref: (C2, nc_pad)        bf16
    b*_ref: (1, C*)             f32
    o_ref : (1, nc_pad, th*W)   f32 (lane-dense)
    y1_ref: (th+2, W+16, C1)    bf16 VMEM staging scratch for conv1 output
    """
    h = pl.program_id(1)
    n_strips = pl.num_programs(1)
    w_img = x_ref.shape[2] - 2            # true image width
    cin = x_ref.shape[3]
    c1 = w1_ref.shape[3]
    row0 = pl.multiple_of(h * th, th)     # first padded-input row of this strip

    # ------------------ conv1: 3x3, Cin -> C1, + ReLU ----------------------
    # 9 accumulating dots, K = Cin = 256 each; no im2col concat materialized.
    m1 = (th + 2) * w_img
    acc = None
    for dx in range(3):
        tap = x_ref[0, pl.ds(row0, th + 4), dx:dx + w_img, :]   # (th+4, W, Cin)
        for dy in range(3):
            part = jnp.dot(tap[dy:dy + th + 2].reshape(m1, cin), w1_ref[dy, dx],
                           preferred_element_type=jnp.float32)
            acc = part if acc is None else acc + part
    acc = acc + b1_ref[...]                                     # f32 bias
    y1 = jnp.maximum(acc, 0.0).reshape(th + 2, w_img, c1).astype(jnp.bfloat16)

    # Stage y1 in VMEM with single zeroed halo columns (cols 7 and 8+W) so
    # conv2's horizontal taps are plain offset reads that see true 'same'
    # zero padding at the left/right image borders.  The interior store at
    # column offset 8 is sublane-aligned.  Every read column is rewritten
    # each step, so the scratch never needs zero-initialization.
    zcol = jnp.zeros((th + 2, 1, c1), jnp.bfloat16)
    y1_ref[:, 7:8, :] = zcol
    y1_ref[:, 8 + w_img:9 + w_img, :] = zcol
    y1_ref[:, 8:8 + w_img, :] = y1

    # Only the first / last strip can produce out-of-image rows (strip rows 0
    # and th+1); zero just those rows instead of masking every element.
    zrow = jnp.zeros((1, w_img, c1), jnp.bfloat16)

    @pl.when(h == 0)
    def _():
        y1_ref[0:1, 8:8 + w_img, :] = zrow

    @pl.when(h == n_strips - 1)
    def _():
        y1_ref[th + 1:th + 2, 8:8 + w_img, :] = zrow

    # ------------------ conv2: 3x3, C1 -> C2, + ReLU -----------------------
    # K = 3*C1 = 384 per dy dot (fewer MXU K-passes than nine K=128 dots on
    # v6e/v7x); the dx taps come straight from the zero-bordered scratch.
    c2 = w2_ref.shape[2]
    taps2 = [y1_ref[:, 7 + dx:7 + dx + w_img, :] for dx in range(3)]
    ycat = jnp.concatenate(taps2, axis=-1)                      # (th+2, W, 3*C1)
    k2 = ycat.shape[-1]
    m2 = th * w_img
    acc2 = jnp.dot(ycat[0:th].reshape(m2, k2), w2_ref[0],
                   preferred_element_type=jnp.float32)
    for dy in (1, 2):
        acc2 = acc2 + jnp.dot(ycat[dy:dy + th].reshape(m2, k2), w2_ref[dy],
                              preferred_element_type=jnp.float32)
    acc2 = acc2 + b2_ref[...]
    y2 = jnp.maximum(acc2, 0.0).astype(jnp.bfloat16)            # (th*W, C2)

    # ------------------ conv3: 1x1, C2 -> num_classes (padded) -------------
    y3 = jnp.dot(y2, w3_ref[...], preferred_element_type=jnp.float32)
    y3 = y3 + b3_ref[...]                                       # (th*W, nc_pad)
    # lane-dense store: (nc_pad, th*W), th*W is a multiple of 128.
    o_ref[0] = y3.T.astype(o_ref.dtype)


# ---------------------------------------------------------------------------
# Strip-size selection
# ---------------------------------------------------------------------------
def _step_vmem_bytes(th, h, w, cin, c1, c2, nc_pad):
    """Conservative per-step VMEM working-set estimate (bytes)."""
    inp = 2 * (h + 4) * (w + 2) * cin * 2                # double-buffered image
    scr = (th + 2) * (w + 16) * c1 * 2                   # y1 staging scratch
    out = 2 * nc_pad * th * w * 4                        # double-buffered output
    wts = 2 * 2 * (9 * cin * c1 + 9 * c1 * c2 + c2 * nc_pad)
    tmp = (3 * (th + 4) * w * cin * 2                    # conv1 dx taps
           + (th + 2) * w * (c1 * 4 + c1 * 2 + 3 * c1 * 2)   # acc1, y1, ycat
           + th * w * (c2 * 4 + c2 * 2 + 2 * nc_pad * 4))    # acc2, y2, y3/y3.T
    return inp + scr + out + wts + tmp


def _pick_tile_rows(n, h, w, cin, c1, c2, nc_pad, budget=20 * 1024 * 1024):
    """Largest th with H % th == 0 and (th*W) % 128 == 0 (lane-dense stores)
    that fits the VMEM budget, while keeping >=2 total grid steps for v7x."""
    cands = [th for th in range(1, h + 1)
             if h % th == 0 and (th * w) % 128 == 0
             and _step_vmem_bytes(th, h, w, cin, c1, c2, nc_pad) <= budget]
    if not cands:
        raise ValueError(
            "no row-strip size keeps (th*W) % 128 == 0 within the VMEM budget; "
            "lane-dense output stores would degrade to masked partial stores")
    th = max(cands)
    if n * (h // th) < 2:        # keep >=2 grid steps so v7x's 2nd TC has work
        multi = [t for t in cands if n * (h // t) >= 2]
        if multi:
            th = max(multi)
    return th


# ---------------------------------------------------------------------------
# Wrapper
# ---------------------------------------------------------------------------
def simple_sam_decoder_forward(x_nchw, params):
    """Full decoder forward. Input/output NCHW to mirror PyTorch."""
    n, c, h, w = x_nchw.shape
    c1 = params["w1"].shape[-1]
    c2 = params["w2"].shape[-1]
    num_classes = params["w3"].shape[-1]
    assert h % 8 == 0 and w % 8 == 0, "feature-map dims must be 8-aligned"

    nc_pad = max(8, ((num_classes + 7) // 8) * 8)
    th = _pick_tile_rows(n, h, w, c, c1, c2, nc_pad)

    # NCHW -> NHWC, bf16 cast and zero pad (2 rows / 1 col each side) in one
    # fused XLA pass over the input (the relayout/cast pass is needed anyway).
    # TODO(synk): if callers can hand over NHWC bf16 features, drop this.
    feats = jnp.transpose(x_nchw, (0, 2, 3, 1)).astype(jnp.bfloat16)
    feats = jnp.pad(feats, ((0, 0), (2, 2), (1, 1), (0, 0)))

    # Weights: conv1 kept as (dy, dx, Cin, C1) for the 9-dot K=Cin formulation;
    # conv2 packed as (dy, dx*C1+ci, C2) for the K=3*C1 dy dots.
    w1c = params["w1"].astype(jnp.bfloat16)
    w2c = params["w2"].reshape(3, 3 * c1, c2).astype(jnp.bfloat16)
    b1 = params["b1"].reshape(1, c1).astype(jnp.float32)
    b2 = params["b2"].reshape(1, c2).astype(jnp.float32)

    # Pad num_classes to a sublane-friendly width; sliced away after the call.
    w3p = jnp.zeros((c2, nc_pad), jnp.bfloat16).at[:, :num_classes].set(
        params["w3"].astype(jnp.bfloat16))
    b3p = jnp.zeros((1, nc_pad), jnp.float32).at[:, :num_classes].set(
        params["b3"].reshape(1, num_classes).astype(jnp.float32))

    kernel = functools.partial(_fused_decoder_kernel, th=th)

    out_flat = pl.pallas_call(
        kernel,
        out_shape=jax.ShapeDtypeStruct((n, nc_pad, h * w), jnp.float32),
        grid_spec=pltpu.PrefetchScalarGridSpec(
            num_scalar_prefetch=0,
            grid=(n, h // th),
            in_specs=[
                # Whole padded image per batch item; constant index over the
                # strip axis, so it is DMA'd once per n and reused across h.
                # TODO(synk): row-tile the input for >~160x160 maps on v7x
                # (64 MiB VMEM) instead of the whole-image block.
                pl.BlockSpec((1, h + 4, w + 2, c), lambda i, j: (i, 0, 0, 0)),
                # TODO(synk): pipeline_mode=pl.Buffered(1) on the constant
                # weight/bias blocks would free ~0.8 MB of dead double-buffer.
                pl.BlockSpec((3, 3, c, c1), lambda i, j: (0, 0, 0, 0)),
                pl.BlockSpec((1, c1), lambda i, j: (0, 0)),
                pl.BlockSpec((3, 3 * c1, c2), lambda i, j: (0, 0, 0)),
                pl.BlockSpec((1, c2), lambda i, j: (0, 0)),
                pl.BlockSpec((c2, nc_pad), lambda i, j: (0, 0)),
                pl.BlockSpec((1, nc_pad), lambda i, j: (0, 0)),
            ],
            out_specs=pl.BlockSpec((1, nc_pad, th * w), lambda i, j: (i, 0, j)),
            scratch_shapes=[pltpu.VMEM((th + 2, w + 16, c1), jnp.bfloat16)],
        ),
        compiler_params=pltpu.CompilerParams(
            # TODO(synk): verify in a trace that this shards the grid across
            # v7x's two TensorCores; otherwise switch the batch axis to
            # pltpu.CORE_PARALLEL (or pl.core_map).
            dimension_semantics=("parallel", "parallel"),
            vmem_limit_bytes=32 * 1024 * 1024),
    )(feats, w1c, b1, w2c, b2, w3p, b3p)

    # (N, nc_pad, H*W) -> (N, num_classes, H, W): tiny slice + free reshape.
    return out_flat[:, :num_classes, :].reshape(n, num_classes, h, w)


# ---------------------------------------------------------------------------
# Deterministic parameter init (shapes from the module's __init__)
# ---------------------------------------------------------------------------
def init_params(key, num_classes=1):
    k1, k2, k3, k4, k5, k6 = jax.random.split(key, 6)

    def uinit(k, shape, fan_in):
        bound = 1.0 / np.sqrt(fan_in)
        return jax.random.uniform(k, shape, jnp.float32, -bound, bound)

    # conv weights stored as (kh, kw, Cin, Cout); 1x1 as (Cin, Cout)
    return {
        "w1": uinit(k1, (3, 3, 256, 128), 256 * 9),
        "b1": uinit(k2, (128,), 256 * 9),
        "w2": uinit(k3, (3, 3, 128, 64), 128 * 9),
        "b2": uinit(k4, (64,), 128 * 9),
        "w3": uinit(k5, (64, num_classes), 64),
        "b3": uinit(k6, (num_classes,), 64),
    }


# ---------------------------------------------------------------------------
# Pure-JAX f32 reference (correctness sanity check)
# ---------------------------------------------------------------------------
def _ref_forward(x_nchw, params):
    x = jnp.transpose(x_nchw, (0, 2, 3, 1))
    dn = ("NHWC", "HWIO", "NHWC")
    y = jax.lax.conv_general_dilated(x, params["w1"], (1, 1), "SAME",
                                     dimension_numbers=dn) + params["b1"]
    y = jnp.maximum(y, 0.0)
    y = jax.lax.conv_general_dilated(y, params["w2"], (1, 1), "SAME",
                                     dimension_numbers=dn) + params["b2"]
    y = jnp.maximum(y, 0.0)
    w3 = params["w3"][None, None]  # (1,1,Cin,Cout)
    o = jax.lax.conv_general_dilated(y, w3, (1, 1), "SAME",
                                     dimension_numbers=dn) + params["b3"]
    return jnp.transpose(o, (0, 3, 1, 2))


if __name__ == "__main__":
    key = jax.random.PRNGKey(0)
    kx, kp = jax.random.split(key)

    N, C, H, W = 2, 256, 16, 16  # 256-channel SAM-encoder-style feature map
    num_classes = 1
    x = jax.random.normal(kx, (N, C, H, W), dtype=jnp.float32)
    params = init_params(kp, num_classes)

    fwd = jax.jit(simple_sam_decoder_forward)
    out = jax.block_until_ready(fwd(x, params))
    assert out.shape == (N, num_classes, H, W), out.shape

    ref = jax.block_until_ready(_ref_forward(x, params))
    # Kernel uses bf16 operands with f32 accumulation -> loosened tolerance
    # vs. the pure-f32 reference (structural bugs would be O(0.1), not O(1e-3)).
    np.testing.assert_allclose(np.asarray(out), np.asarray(ref),
                               rtol=2e-2, atol=2e-2)

    print("KERNEL_OK")
</pallas_src>

<mosaic_0001>
module attributes {stable_mosaic.version = 11 : i64} {
  func.func @_fused_decoder_kernel(%arg0: i32, %arg1: i32, %arg2: memref<1x20x18x256xbf16, #tpu.memory_space<vmem>>, %arg3: memref<3x3x256x128xbf16, #tpu.memory_space<vmem>>, %arg4: memref<1x128xf32, #tpu.memory_space<vmem>>, %arg5: memref<3x384x64xbf16, #tpu.memory_space<vmem>>, %arg6: memref<1x64xf32, #tpu.memory_space<vmem>>, %arg7: memref<64x8xbf16, #tpu.memory_space<vmem>>, %arg8: memref<1x8xf32, #tpu.memory_space<vmem>>, %arg9: memref<1x8x256xf32, #tpu.memory_space<vmem>>, %arg10: memref<18x32x128xbf16, #tpu.memory_space<vmem>>) attributes {dimension_semantics = [#tpu.dimension_semantics<parallel>, #tpu.dimension_semantics<parallel>], iteration_bounds = array<i64: 2, 1>, scalar_prefetch = 0 : i64, scratch_operands = 1 : i64, tpu.core_type = #tpu.core_type<tc>, window_params = [{transform_indices = @transform_0, window_bounds = array<i64: 1, 20, 18, 256>}, {pipeline_mode = #tpu.pipeline_mode<synchronous>, transform_indices = @transform_1, window_bounds = array<i64: 3, 3, 256, 128>}, {pipeline_mode = #tpu.pipeline_mode<synchronous>, transform_indices = @transform_2, window_bounds = array<i64: 1, 128>}, {pipeline_mode = #tpu.pipeline_mode<synchronous>, transform_indices = @transform_3, window_bounds = array<i64: 3, 384, 64>}, {pipeline_mode = #tpu.pipeline_mode<synchronous>, transform_indices = @transform_4, window_bounds = array<i64: 1, 64>}, {pipeline_mode = #tpu.pipeline_mode<synchronous>, transform_indices = @transform_5, window_bounds = array<i64: 64, 8>}, {pipeline_mode = #tpu.pipeline_mode<synchronous>, transform_indices = @transform_6, window_bounds = array<i64: 1, 8>}, {transform_indices = @transform_7, window_bounds = array<i64: 1, 8, 256>}]} {
    %c16_i32 = arith.constant 16 : i32
    %0 = arith.muli %arg1, %c16_i32 : i32
    %1 = tpu.assume_multiple %0, 16 : i32
    %c0 = arith.constant 0 : index
    %2 = arith.index_cast %1 : i32 to index
    %c0_0 = arith.constant 0 : index
    %c0_1 = arith.constant 0 : index
    %3 = vector.load %arg2[%c0, %2, %c0_0, %c0_1] : memref<1x20x18x256xbf16, #tpu.memory_space<vmem>>, vector<1x20x16x256xbf16>
    %4 = vector.shape_cast %3 : vector<1x20x16x256xbf16> to vector<20x16x256xbf16>
    %5 = vector.extract_strided_slice %4 {offsets = [0, 0, 0], sizes = [18, 16, 256], strides = [1, 1, 1]} : vector<20x16x256xbf16> to vector<18x16x256xbf16>
    %6 = vector.shape_cast %5 : vector<18x16x256xbf16> to vector<288x256xbf16>
    %c0_2 = arith.constant 0 : index
    %c0_3 = arith.constant 0 : index
    %c0_4 = arith.constant 0 : index
    %c0_5 = arith.constant 0 : index
    %7 = vector.load %arg3[%c0_2, %c0_3, %c0_4, %c0_5] : memref<3x3x256x128xbf16, #tpu.memory_space<vmem>>, vector<1x1x256x128xbf16>
    %8 = vector.shape_cast %7 : vector<1x1x256x128xbf16> to vector<256x128xbf16>
    %cst = arith.constant dense<0.000000e+00> : vector<288x128xf32>
    %9 = tpu.matmul %6, %8, %cst {dimension_numbers = #tpu.dot_dimension_numbers<[1], [0], [0], [1], [0, 0, 1, 1], [], []>} : vector<288x256xbf16>, vector<256x128xbf16>, vector<288x128xf32> -> vector<288x128xf32>
    %10 = vector.extract_strided_slice %4 {offsets = [1, 0, 0], sizes = [18, 16, 256], strides = [1, 1, 1]} : vector<20x16x256xbf16> to vector<18x16x256xbf16>
    %11 = vector.shape_cast %10 : vector<18x16x256xbf16> to vector<288x256xbf16>
    %c1 = arith.constant 1 : index
    %c0_6 = arith.constant 0 : index
    %c0_7 = arith.constant 0 : index
    %c0_8 = arith.constant 0 : index
    %12 = vector.load %arg3[%c1, %c0_6, %c0_7, %c0_8] : memref<3x3x256x128xbf16, #tpu.memory_space<vmem>>, vector<1x1x256x128xbf16>
    %13 = vector.shape_cast %12 : vector<1x1x256x128xbf16> to vector<256x128xbf16>
    %cst_9 = arith.constant dense<0.000000e+00> : vector<288x128xf32>
    %14 = tpu.matmul %11, %13, %cst_9 {dimension_numbers = #tpu.dot_dimension_numbers<[1], [0], [0], [1], [0, 0, 1, 1], [], []>} : vector<288x256xbf16>, vector<256x128xbf16>, vector<288x128xf32> -> vector<288x128xf32>
    %15 = arith.addf %9, %14 : vector<288x128xf32>
    %16 = vector.extract_strided_slice %4 {offsets = [2, 0, 0], sizes = [18, 16, 256], strides = [1, 1, 1]} : vector<20x16x256xbf16> to vector<18x16x256xbf16>
    %17 = vector.shape_cast %16 : vector<18x16x256xbf16> to vector<288x256xbf16>
    %c2 = arith.constant 2 : index
    %c0_10 = arith.constant 0 : index
    %c0_11 = arith.constant 0 : index
    %c0_12 = arith.constant 0 : index
    %18 = vector.load %arg3[%c2, %c0_10, %c0_11, %c0_12] : memref<3x3x256x128xbf16, #tpu.memory_space<vmem>>, vector<1x1x256x128xbf16>
    %19 = vector.shape_cast %18 : vector<1x1x256x128xbf16> to vector<256x128xbf16>
    %cst_13 = arith.constant dense<0.000000e+00> : vector<288x128xf32>
    %20 = tpu.matmul %17, %19, %cst_13 {dimension_numbers = #tpu.dot_dimension_numbers<[1], [0], [0], [1], [0, 0, 1, 1], [], []>} : vector<288x256xbf16>, vector<256x128xbf16>, vector<288x128xf32> -> vector<288x128xf32>
    %21 = arith.addf %15, %20 : vector<288x128xf32>
    %c0_14 = arith.constant 0 : index
    %22 = arith.index_cast %1 : i32 to index
    %c1_15 = arith.constant 1 : index
    %c0_16 = arith.constant 0 : index
    %23 = vector.load %arg2[%c0_14, %22, %c1_15, %c0_16] : memref<1x20x18x256xbf16, #tpu.memory_space<vmem>>, vector<1x20x16x256xbf16>
    %24 = vector.shape_cast %23 : vector<1x20x16x256xbf16> to vector<20x16x256xbf16>
    %25 = vector.extract_strided_slice %24 {offsets = [0, 0, 0], sizes = [18, 16, 256], strides = [1, 1, 1]} : vector<20x16x256xbf16> to vector<18x16x256xbf16>
    %26 = vector.shape_cast %25 : vector<18x16x256xbf16> to vector<288x256xbf16>
    %c0_17 = arith.constant 0 : index
    %c1_18 = arith.constant 1 : index
    %c0_19 = arith.constant 0 : index
    %c0_20 = arith.constant 0 : index
    %27 = vector.load %arg3[%c0_17, %c1_18, %c0_19, %c0_20] : memref<3x3x256x128xbf16, #tpu.memory_space<vmem>>, vector<1x1x256x128xbf16>
    %28 = vector.shape_cast %27 : vector<1x1x256x128xbf16> to vector<256x128xbf16>
    %cst_21 = arith.constant dense<0.000000e+00> : vector<288x128xf32>
    %29 = tpu.matmul %26, %28, %cst_21 {dimension_numbers = #tpu.dot_dimension_numbers<[1], [0], [0], [1], [0, 0, 1, 1], [], []>} : vector<288x256xbf16>, vector<256x128xbf16>, vector<288x128xf32> -> vector<288x128xf32>
    %30 = arith.addf %21, %29 : vector<288x128xf32>
    %31 = vector.extract_strided_slice %24 {offsets = [1, 0, 0], sizes = [18, 16, 256], strides = [1, 1, 1]} : vector<20x16x256xbf16> to vector<18x16x256xbf16>
    %32 = vector.shape_cast %31 : vector<18x16x256xbf16> to vector<288x256xbf16>
    %c1_22 = arith.constant 1 : index
    %c1_23 = arith.constant 1 : index
    %c0_24 = arith.constant 0 : index
    %c0_25 = arith.constant 0 : index
    %33 = vector.load %arg3[%c1_22, %c1_23, %c0_24, %c0_25] : memref<3x3x256x128xbf16, #tpu.memory_space<vmem>>, vector<1x1x256x128xbf16>
    %34 = vector.shape_cast %33 : vector<1x1x256x128xbf16> to vector<256x128xbf16>
    %cst_26 = arith.constant dense<0.000000e+00> : vector<288x128xf32>
    %35 = tpu.matmul %32, %34, %cst_26 {dimension_numbers = #tpu.dot_dimension_numbers<[1], [0], [0], [1], [0, 0, 1, 1], [], []>} : vector<288x256xbf16>, vector<256x128xbf16>, vector<288x128xf32> -> vector<288x128xf32>
    %36 = arith.addf %30, %35 : vector<288x128xf32>
    %37 = vector.extract_strided_slice %24 {offsets = [2, 0, 0], sizes = [18, 16, 256], strides = [1, 1, 1]} : vector<20x16x256xbf16> to vector<18x16x256xbf16>
    %38 = vector.shape_cast %37 : vector<18x16x256xbf16> to vector<288x256xbf16>
    %c2_27 = arith.constant 2 : index
    %c1_28 = arith.constant 1 : index
    %c0_29 = arith.constant 0 : index
    %c0_30 = arith.constant 0 : index
    %39 = vector.load %arg3[%c2_27, %c1_28, %c0_29, %c0_30] : memref<3x3x256x128xbf16, #tpu.memory_space<vmem>>, vector<1x1x256x128xbf16>
    %40 = vector.shape_cast %39 : vector<1x1x256x128xbf16> to vector<256x128xbf16>
    %cst_31 = arith.constant dense<0.000000e+00> : vector<288x128xf32>
    %41 = tpu.matmul %38, %40, %cst_31 {dimension_numbers = #tpu.dot_dimension_numbers<[1], [0], [0], [1], [0, 0, 1, 1], [], []>} : vector<288x256xbf16>, vector<256x128xbf16>, vector<288x128xf32> -> vector<288x128xf32>
    %42 = arith.addf %36, %41 : vector<288x128xf32>
    %c0_32 = arith.constant 0 : index
    %43 = arith.index_cast %1 : i32 to index
    %c2_33 = arith.constant 2 : index
    %c0_34 = arith.constant 0 : index
    %44 = vector.load %arg2[%c0_32, %43, %c2_33, %c0_34] : memref<1x20x18x256xbf16, #tpu.memory_space<vmem>>, vector<1x20x16x256xbf16>
    %45 = vector.shape_cast %44 : vector<1x20x16x256xbf16> to vector<20x16x256xbf16>
    %46 = vector.extract_strided_slice %45 {offsets = [0, 0, 0], sizes = [18, 16, 256], strides = [1, 1, 1]} : vector<20x16x256xbf16> to vector<18x16x256xbf16>
    %47 = vector.shape_cast %46 : vector<18x16x256xbf16> to vector<288x256xbf16>
    %c0_35 = arith.constant 0 : index
    %c2_36 = arith.constant 2 : index
    %c0_37 = arith.constant 0 : index
    %c0_38 = arith.constant 0 : index
    %48 = vector.load %arg3[%c0_35, %c2_36, %c0_37, %c0_38] : memref<3x3x256x128xbf16, #tpu.memory_space<vmem>>, vector<1x1x256x128xbf16>
    %49 = vector.shape_cast %48 : vector<1x1x256x128xbf16> to vector<256x128xbf16>
    %cst_39 = arith.constant dense<0.000000e+00> : vector<288x128xf32>
    %50 = tpu.matmul %47, %49, %cst_39 {dimension_numbers = #tpu.dot_dimension_numbers<[1], [0], [0], [1], [0, 0, 1, 1], [], []>} : vector<288x256xbf16>, vector<256x128xbf16>, vector<288x128xf32> -> vector<288x128xf32>
    %51 = arith.addf %42, %50 : vector<288x128xf32>
    %52 = vector.extract_strided_slice %45 {offsets = [1, 0, 0], sizes = [18, 16, 256], strides = [1, 1, 1]} : vector<20x16x256xbf16> to vector<18x16x256xbf16>
    %53 = vector.shape_cast %52 : vector<18x16x256xbf16> to vector<288x256xbf16>
    %c1_40 = arith.constant 1 : index
    %c2_41 = arith.constant 2 : index
    %c0_42 = arith.constant 0 : index
    %c0_43 = arith.constant 0 : index
    %54 = vector.load %arg3[%c1_40, %c2_41, %c0_42, %c0_43] : memref<3x3x256x128xbf16, #tpu.memory_space<vmem>>, vector<1x1x256x128xbf16>
    %55 = vector.shape_cast %54 : vector<1x1x256x128xbf16> to vector<256x128xbf16>
    %cst_44 = arith.constant dense<0.000000e+00> : vector<288x128xf32>
    %56 = tpu.matmul %53, %55, %cst_44 {dimension_numbers = #tpu.dot_dimension_numbers<[1], [0], [0], [1], [0, 0, 1, 1], [], []>} : vector<288x256xbf16>, vector<256x128xbf16>, vector<288x128xf32> -> vector<288x128xf32>
    %57 = arith.addf %51, %56 : vector<288x128xf32>
    %58 = vector.extract_strided_slice %45 {offsets = [2, 0, 0], sizes = [18, 16, 256], strides = [1, 1, 1]} : vector<20x16x256xbf16> to vector<18x16x256xbf16>
    %59 = vector.shape_cast %58 : vector<18x16x256xbf16> to vector<288x256xbf16>
    %c2_45 = arith.constant 2 : index
    %c2_46 = arith.constant 2 : index
    %c0_47 = arith.constant 0 : index
    %c0_48 = arith.constant 0 : index
    %60 = vector.load %arg3[%c2_45, %c2_46, %c0_47, %c0_48] : memref<3x3x256x128xbf16, #tpu.memory_space<vmem>>, vector<1x1x256x128xbf16>
    %61 = vector.shape_cast %60 : vector<1x1x256x128xbf16> to vector<256x128xbf16>
    %cst_49 = arith.constant dense<0.000000e+00> : vector<288x128xf32>
    %62 = tpu.matmul %59, %61, %cst_49 {dimension_numbers = #tpu.dot_dimension_numbers<[1], [0], [0], [1], [0, 0, 1, 1], [], []>} : vector<288x256xbf16>, vector<256x128xbf16>, vector<288x128xf32> -> vector<288x128xf32>
    %63 = arith.addf %57, %62 : vector<288x128xf32>
    %c0_50 = arith.constant 0 : index
    %c0_51 = arith.constant 0 : index
    %64 = vector.load %arg4[%c0_50, %c0_51] : memref<1x128xf32, #tpu.memory_space<vmem>>, vector<1x128xf32>
    %65 = vector.broadcast %64 : vector<1x128xf32> to vector<288x128xf32>
    %66 = arith.addf %63, %65 : vector<288x128xf32>
    %cst_52 = arith.constant 0.000000e+00 : f32
    %67 = vector.broadcast %cst_52 : f32 to vector<288x128xf32>
    %68 = arith.maximumf %66, %67 : vector<288x128xf32>
    %69 = vector.shape_cast %68 : vector<288x128xf32> to vector<18x16x128xf32>
    %70 = arith.truncf %69 : vector<18x16x128xf32> to vector<18x16x128xbf16>
    %cst_53 = arith.constant 0.000000e+00 : bf16
    %71 = vector.broadcast %cst_53 : bf16 to vector<18x1x128xbf16>
    %c0_54 = arith.constant 0 : index
    %c7 = arith.constant 7 : index
    %c0_55 = arith.constant 0 : index
    %72 = vector.load %arg10[%c0_54, %c7, %c0_55] : memref<18x32x128xbf16, #tpu.memory_space<vmem>>, vector<18x1x128xbf16>
    tpu.vector_store %arg10[%c0_54, %c7, %c0_55], %71 {strides = array<i32>} : memref<18x32x128xbf16, #tpu.memory_space<vmem>>, vector<18x1x128xbf16>,
    %c0_56 = arith.constant 0 : index
    %c24 = arith.constant 24 : index
    %c0_57 = arith.constant 0 : index
    %73 = vector.load %arg10[%c0_56, %c24, %c0_57] : memref<18x32x128xbf16, #tpu.memory_space<vmem>>, vector<18x1x128xbf16>
    tpu.vector_store %arg10[%c0_56, %c24, %c0_57], %71 {strides = array<i32>} : memref<18x32x128xbf16, #tpu.memory_space<vmem>>, vector<18x1x128xbf16>,
    %c0_58 = arith.constant 0 : index
    %c8 = arith.constant 8 : index
    %c0_59 = arith.constant 0 : index
    %74 = vector.load %arg10[%c0_58, %c8, %c0_59] : memref<18x32x128xbf16, #tpu.memory_space<vmem>>, vector<18x16x128xbf16>
    tpu.vector_store %arg10[%c0_58, %c8, %c0_59], %70 {strides = array<i32>} : memref<18x32x128xbf16, #tpu.memory_space<vmem>>, vector<18x16x128xbf16>,
    %cst_60 = arith.constant 0.000000e+00 : bf16
    %75 = vector.broadcast %cst_60 : bf16 to vector<1x16x128xbf16>
    %c0_i32 = arith.constant 0 : i32
    %76 = arith.cmpi eq, %arg1, %c0_i32 : i32
    %77 = arith.extui %76 : i1 to i32
    %c0_i32_61 = arith.constant 0 : i32
    %78 = arith.cmpi ne, %77, %c0_i32_61 : i32
    scf.if %78 {
      %c0_95 = arith.constant 0 : index
      %c8_96 = arith.constant 8 : index
      %c0_97 = arith.constant 0 : index
      %118 = vector.load %arg10[%c0_95, %c8_96, %c0_97] : memref<18x32x128xbf16, #tpu.memory_space<vmem>>, vector<1x16x128xbf16>
      tpu.vector_store %arg10[%c0_95, %c8_96, %c0_97], %75 {strides = array<i32>} : memref<18x32x128xbf16, #tpu.memory_space<vmem>>, vector<1x16x128xbf16>,
    } else {
    }
    %c0_i32_62 = arith.constant 0 : i32
    %79 = arith.cmpi eq, %arg1, %c0_i32_62 : i32
    %80 = arith.extui %79 : i1 to i32
    %c0_i32_63 = arith.constant 0 : i32
    %81 = arith.cmpi ne, %80, %c0_i32_63 : i32
    scf.if %81 {
      %c17 = arith.constant 17 : index
      %c8_95 = arith.constant 8 : index
      %c0_96 = arith.constant 0 : index
      %118 = vector.load %arg10[%c17, %c8_95, %c0_96] : memref<18x32x128xbf16, #tpu.memory_space<vmem>>, vector<1x16x128xbf16>
      tpu.vector_store %arg10[%c17, %c8_95, %c0_96], %75 {strides = array<i32>} : memref<18x32x128xbf16, #tpu.memory_space<vmem>>, vector<1x16x128xbf16>,
    } else {
    }
    %c0_64 = arith.constant 0 : index
    %c7_65 = arith.constant 7 : index
    %c0_66 = arith.constant 0 : index
    %82 = vector.load %arg10[%c0_64, %c7_65, %c0_66] : memref<18x32x128xbf16, #tpu.memory_space<vmem>>, vector<18x16x128xbf16>
    %c0_67 = arith.constant 0 : index
    %c8_68 = arith.constant 8 : index
    %c0_69 = arith.constant 0 : index
    %83 = vector.load %arg10[%c0_67, %c8_68, %c0_69] : memref<18x32x128xbf16, #tpu.memory_space<vmem>>, vector<18x16x128xbf16>
    %c0_70 = arith.constant 0 : index
    %c9 = arith.constant 9 : index
    %c0_71 = arith.constant 0 : index
    %84 = vector.load %arg10[%c0_70, %c9, %c0_71] : memref<18x32x128xbf16, #tpu.memory_space<vmem>>, vector<18x16x128xbf16>
    %85 = tpu.concatenate %82, %83, %84 in 2 : vector<18x16x128xbf16>, vector<18x16x128xbf16>, vector<18x16x128xbf16> -> vector<18x16x384xbf16>
    %86 = vector.extract_strided_slice %85 {offsets = [0, 0, 0], sizes = [16, 16, 384], strides = [1, 1, 1]} : vector<18x16x384xbf16> to vector<16x16x384xbf16>
    %87 = vector.shape_cast %86 : vector<16x16x384xbf16> to vector<256x384xbf16>
    %c0_72 = arith.constant 0 : index
    %c0_73 = arith.constant 0 : index
    %c0_74 = arith.constant 0 : index
    %88 = vector.load %arg5[%c0_72, %c0_73, %c0_74] : memref<3x384x64xbf16, #tpu.memory_space<vmem>>, vector<1x384x64xbf16>
    %89 = vector.shape_cast %88 : vector<1x384x64xbf16> to vector<384x64xbf16>
    %cst_75 = arith.constant dense<0.000000e+00> : vector<256x64xf32>
    %90 = tpu.matmul %87, %89, %cst_75 {dimension_numbers = #tpu.dot_dimension_numbers<[1], [0], [0], [1], [0, 0, 1, 1], [], []>} : vector<256x384xbf16>, vector<384x64xbf16>, vector<256x64xf32> -> vector<256x64xf32>
    %91 = vector.extract_strided_slice %85 {offsets = [1, 0, 0], sizes = [16, 16, 384], strides = [1, 1, 1]} : vector<18x16x384xbf16> to vector<16x16x384xbf16>
    %92 = vector.shape_cast %91 : vector<16x16x384xbf16> to vector<256x384xbf16>
    %c1_76 = arith.constant 1 : index
    %c0_77 = arith.constant 0 : index
    %c0_78 = arith.constant 0 : index
    %93 = vector.load %arg5[%c1_76, %c0_77, %c0_78] : memref<3x384x64xbf16, #tpu.memory_space<vmem>>, vector<1x384x64xbf16>
    %94 = vector.shape_cast %93 : vector<1x384x64xbf16> to vector<384x64xbf16>
    %cst_79 = arith.constant dense<0.000000e+00> : vector<256x64xf32>
    %95 = tpu.matmul %92, %94, %cst_79 {dimension_numbers = #tpu.dot_dimension_numbers<[1], [0], [0], [1], [0, 0, 1, 1], [], []>} : vector<256x384xbf16>, vector<384x64xbf16>, vector<256x64xf32> -> vector<256x64xf32>
    %96 = arith.addf %90, %95 : vector<256x64xf32>
    %97 = vector.extract_strided_slice %85 {offsets = [2, 0, 0], sizes = [16, 16, 384], strides = [1, 1, 1]} : vector<18x16x384xbf16> to vector<16x16x384xbf16>
    %98 = vector.shape_cast %97 : vector<16x16x384xbf16> to vector<256x384xbf16>
    %c2_80 = arith.constant 2 : index
    %c0_81 = arith.constant 0 : index
    %c0_82 = arith.constant 0 : index
    %99 = vector.load %arg5[%c2_80, %c0_81, %c0_82] : memref<3x384x64xbf16, #tpu.memory_space<vmem>>, vector<1x384x64xbf16>
    %100 = vector.shape_cast %99 : vector<1x384x64xbf16> to vector<384x64xbf16>
    %cst_83 = arith.constant dense<0.000000e+00> : vector<256x64xf32>
    %101 = tpu.matmul %98, %100, %cst_83 {dimension_numbers = #tpu.dot_dimension_numbers<[1], [0], [0], [1], [0, 0, 1, 1], [], []>} : vector<256x384xbf16>, vector<384x64xbf16>, vector<256x64xf32> -> vector<256x64xf32>
    %102 = arith.addf %96, %101 : vector<256x64xf32>
    %c0_84 = arith.constant 0 : index
    %c0_85 = arith.constant 0 : index
    %103 = vector.load %arg6[%c0_84, %c0_85] : memref<1x64xf32, #tpu.memory_space<vmem>>, vector<1x64xf32>
    %104 = vector.broadcast %103 : vector<1x64xf32> to vector<256x64xf32>
    %105 = arith.addf %102, %104 : vector<256x64xf32>
    %cst_86 = arith.constant 0.000000e+00 : f32
    %106 = vector.broadcast %cst_86 : f32 to vector<256x64xf32>
    %107 = arith.maximumf %105, %106 : vector<256x64xf32>
    %108 = arith.truncf %107 : vector<256x64xf32> to vector<256x64xbf16>
    %c0_87 = arith.constant 0 : index
    %c0_88 = arith.constant 0 : index
    %109 = vector.load %arg7[%c0_87, %c0_88] : memref<64x8xbf16, #tpu.memory_space<vmem>>, vector<64x8xbf16>
    %cst_89 = arith.constant dense<0.000000e+00> : vector<256x8xf32>
    %110 = tpu.matmul %108, %109, %cst_89 {dimension_numbers = #tpu.dot_dimension_numbers<[1], [0], [0], [1], [0, 0, 1, 1], [], []>} : vector<256x64xbf16>, vector<64x8xbf16>, vector<256x8xf32> -> vector<256x8xf32>
    %c0_90 = arith.constant 0 : index
    %c0_91 = arith.constant 0 : index
    %111 = vector.load %arg8[%c0_90, %c0_91] : memref<1x8xf32, #tpu.memory_space<vmem>>, vector<1x8xf32>
    %112 = vector.broadcast %111 : vector<1x8xf32> to vector<256x8xf32>
    %113 = arith.addf %110, %112 : vector<256x8xf32>
    %114 = tpu.transpose %113, [1, 0] : vector<256x8xf32> -> vector<8x256xf32>
    %c0_92 = arith.constant 0 : index
    %c0_93 = arith.constant 0 : index
    %c0_94 = arith.constant 0 : index
    %115 = vector.load %arg9[%c0_92, %c0_93, %c0_94] : memref<1x8x256xf32, #tpu.memory_space<vmem>>, vector<1x8x256xf32>
    %116 = vector.shape_cast %115 : vector<1x8x256xf32> to vector<8x256xf32>
    %117 = vector.shape_cast %114 : vector<8x256xf32> to vector<1x8x256xf32>
    tpu.vector_store %arg9[%c0_92, %c0_93, %c0_94], %117 {strides = array<i32>} : memref<1x8x256xf32, #tpu.memory_space<vmem>>, vector<1x8x256xf32>,
    return
  }
  func.func @transform_0(%arg0: i32, %arg1: i32) -> (i32, i32, i32, i32) {
    %c0_i32 = arith.constant 0 : i32
    %c0_i32_0 = arith.constant 0 : i32
    %c0_i32_1 = arith.constant 0 : i32
    %c0_i32_2 = arith.constant 0 : i32
    return %arg0, %c0_i32, %c0_i32_0, %c0_i32_1 : i32, i32, i32, i32
  }
  func.func @transform_1(%arg0: i32, %arg1: i32) -> (i32, i32, i32, i32) {
    %c0_i32 = arith.constant 0 : i32
    %c0_i32_0 = arith.constant 0 : i32
    %c0_i32_1 = arith.constant 0 : i32
    %c0_i32_2 = arith.constant 0 : i32
    %c0_i32_3 = arith.constant 0 : i32
    return %c0_i32, %c0_i32_0, %c0_i32_1, %c0_i32_2 : i32, i32, i32, i32
  }
  func.func @transform_2(%arg0: i32, %arg1: i32) -> (i32, i32) {
    %c0_i32 = arith.constant 0 : i32
    %c0_i32_0 = arith.constant 0 : i32
    %c0_i32_1 = arith.constant 0 : i32
    return %c0_i32, %c0_i32_0 : i32, i32
  }
  func.func @transform_3(%arg0: i32, %arg1: i32) -> (i32, i32, i32) {
    %c0_i32 = arith.constant 0 : i32
    %c0_i32_0 = arith.constant 0 : i32
    %c0_i32_1 = arith.constant 0 : i32
    %c0_i32_2 = arith.constant 0 : i32
    return %c0_i32, %c0_i32_0, %c0_i32_1 : i32, i32, i32
  }
  func.func @transform_4(%arg0: i32, %arg1: i32) -> (i32, i32) {
    %c0_i32 = arith.constant 0 : i32
    %c0_i32_0 = arith.constant 0 : i32
    %c0_i32_1 = arith.constant 0 : i32
    return %c0_i32, %c0_i32_0 : i32, i32
  }
  func.func @transform_5(%arg0: i32, %arg1: i32) -> (i32, i32) {
    %c0_i32 = arith.constant 0 : i32
    %c0_i32_0 = arith.constant 0 : i32
    %c0_i32_1 = arith.constant 0 : i32
    return %c0_i32, %c0_i32_0 : i32, i32
  }
  func.func @transform_6(%arg0: i32, %arg1: i32) -> (i32, i32) {
    %c0_i32 = arith.constant 0 : i32
    %c0_i32_0 = arith.constant 0 : i32
    %c0_i32_1 = arith.constant 0 : i32
    return %c0_i32, %c0_i32_0 : i32, i32
  }
  func.func @transform_7(%arg0: i32, %arg1: i32) -> (i32, i32, i32) {
    %c0_i32 = arith.constant 0 : i32
    %c0_i32_0 = arith.constant 0 : i32
    return %arg0, %c0_i32, %arg1 : i32, i32, i32
  }
}

</mosaic_0001>

<bundles_post_ra>
// kernel: simple_sam_decoder_forward.1
= control target key start
LH: loop header
LB: loop body
LE: loop exit
PB: predicated region body
PF: predicated region fallthrough
CT: control target
= control target key end

     0   :  { %s10286_s24 = smov 0   ;;  %s10288_s25 = smov 0   ;;  %s13537_s0 = inlined_call_operand.vmem [shape: bf16[2,20,18,256], index: 0, kind: input, shape index: {}]   ;;  %s13538_s1 = inlined_call_operand.vmem [shape: bf16[3,3,256,128], index: 1, kind: input, shape index: {}]   ;;  %s13539_s2 = inlined_call_operand.vmem [shape: f32[1,128], index: 2, kind: input, shape index: {}]   ;;  %s13540_s3 = inlined_call_operand.vmem [shape: bf16[3,384,64], index: 3, kind: input, shape index: {}]   ;;  %s13541_s4 = inlined_call_operand.vmem [shape: f32[1,64], index: 4, kind: input, shape index: {}]   ;;  %s13542_s5 = inlined_call_operand.vmem [shape: bf16[64,8], index: 5, kind: input, shape index: {}]   ;;  %s13543_s6 = inlined_call_operand.vmem [shape: f32[1,8], index: 6, kind: input, shape index: {}]   ;;  %s13544_s7 = inlined_call_operand.vmem [shape: f32[2,8,256], index: 7, kind: output, shape index: {}]  }
   0x1   :  { %s10290_s26 = smov 0  }
   0x2 LB: > { %s29_s27 = sadd.s32 1, %s10239_s25  ;;  %p8329_p0 = scmp.ge.s32.totalorder %s10243_s26, 1  ;;  %s10243_s26 = sphi %s10290_s26, %s17_s26   ;;  %s10239_s25 = sphi %s10288_s25, %s13716_s25   ;;  %s10235_s24 = sphi %s10286_s24, %s13715_s24  }
   0x3   : > { %p31_p1 = scmp.ge.s32.totalorder %s29_s27, 2  ;;  %p251_p2 = scmp.lt.s32.totalorder %s10243_s26, 3 }
   0x5   : > { %s13718_s27 = smov (%p31_p1, %s29_s27), 0  ;;  %p252_p3 = pnand %p8329_p0, %p251_p2 }
   0x7   : > { %255 = sbr.rel (%p252_p3) target bundleno = 1926 (0x786), region = 48 }
   0xe   : > { %v9881_v0 = vld [vmem:[%s13538_s1 + $0x180] sm:$0xff]   ;;  %v13545_v1 = vmov 0   ;;  %v9883_v3 = vld [vmem:[%s13538_s1 + $0x188] sm:$0xff]   ;;  %v9885_v5 = vld [vmem:[%s13538_s1 + $0x190] sm:$0xff]   ;;  %p287_p4 = scmp.lt.s32.totalorder %s10235_s24, 1  ;;  %vm3303_vm3 = vcmask 1042432  }
   0xf   : > { %688 = vmatprep.subr.bf16.mxu0 %v13545_v1  ;;  %971 = vmatprep.subr.bf16.mxu1 %v13545_v1  ;;  %v9882_v2 = vld [vmem:[%s13538_s1] sm:$0xff]   ;;  %v9884_v4 = vld [vmem:[%s13538_s1 + $0x8] sm:$0xff]   ;;  %v9886_v6 = vld [vmem:[%s13538_s1 + $0x10] sm:$0xff]   ;;  %vm1560_vm0 = vsmask.f32 3328  ;;  %vm3304_vm4 = vcmask 1046532  }
  0x10   : > { %689 = vmatpush1.bf16.msra.mxu0 %v9881_v0  ;;  %972 = vmatpush1.bf16.msra.mxu1 %v9882_v2  ;;  %v9887_v7 = vld [vmem:[%s13538_s1 + $0x198] sm:$0xff]   ;;  %v9889_v9 = vld [vmem:[%s13538_s1 + $0x1a0] sm:$0xff]   ;;  %v9891_v11 = vld [vmem:[%s13538_s1 + $0x1a8] sm:$0xff]   ;;  %s13720_s24 = smov (!%p287_p4, %s10235_s24), 1  ;;  %vm1561_vm1 = vsmask.f32 7440 }
  0x11   : > { %690 = vmatprep.subr.bf16.mxu0 %v13545_v1  ;;  %973 = vmatprep.subr.bf16.mxu1 %v13545_v1  ;;  %v9888_v8 = vld [vmem:[%s13538_s1 + $0x18] sm:$0xff]   ;;  %v9890_v10 = vld [vmem:[%s13538_s1 + $0x20] sm:$0xff]   ;;  %v9892_v12 = vld [vmem:[%s13538_s1 + $0x28] sm:$0xff]   ;;  %s9855_s14 = smul.u32 480, %s13720_s24  ;;  %vm4735_vm6 = vcmask 1043459   ;;  %vm4792_vm10 = vcmask 1044484  }
  0x12   : > { %v9893_v13 = vld [vmem:[%s13538_s1 + $0x1b0] sm:$0xff]   ;;  %v9895_v15 = vld [vmem:[%s13538_s1 + $0x1b8] sm:$0xff]   ;;  %v9897_v17 = vld [vmem:[%s13538_s1 + $0x1c0] sm:$0xff]   ;;  %vm4736_vm7 = vsmask.f32 7950  ;;  %vm5327_vm13 = vcmask 1046528  }
  0x13   : > { %v9894_v14 = vld [vmem:[%s13538_s1 + $0x30] sm:$0xff]   ;;  %v9896_v16 = vld [vmem:[%s13538_s1 + $0x38] sm:$0xff]   ;;  %s10378_s21 = scalar_lea.vmem %s13537_s0, %s9855_s14  ;;  %v9898_v18 = vld [vmem:[%s13538_s1 + $0x40] sm:$0xff]   ;;  %vm4793_vm9 = vsmask.f32 4352  ;;  %vm7966_vm14 = vcmask 523264  }
  0x14   : > { %691 = vmatpush1.bf16.msra.mxu0 %v9883_v3  ;;  %974 = vmatpush1.bf16.msra.mxu1 %v9884_v4  ;;  %v10389_v19 = vld [vmem:[%s10378_s21 + $0x18] sm:$0xff]  ;;  %v310_v20 = vld [vmem:[%s10378_s21 + $0x20] sm:$0xff]  ;;  %v10399_v23 = vld [vmem:[%s10378_s21 + $0x8] sm:$0xff]  ;;  %vm5020_vm12 = vsmask.f32 7424  ;;  %s9066_s17 = sshll.u32 %s13720_s24, 4 }
  0x15   : > { %692 = vmatprep.subr.bf16.mxu0 %v13545_v1  ;;  %975 = vmatprep.subr.bf16.mxu1 %v13545_v1  ;;  %v10393_v21 = vld [vmem:[%s10378_s21] sm:$0xff]  ;;  %v10396_v22 = vcombine.high %v10389_v19, %v310_v20  ;;  %v9899_v24 = vld [vmem:[%s13538_s1 + $0x1c8] sm:$0xff]   ;;  %v9901_v27 = vld [vmem:[%s13538_s1 + $0x1d0] sm:$0xff]   ;;  %v8365_v41 = vcombine.low %v10389_v19, %v310_v20  ;;  %s300_s20 = scalar_lea.vmem %s13544_s7, %s9066_s17 }
  0x16   : > { %v8418_v25 = vcombine.high %v10393_v21, %v10399_v23  ;;  %v9900_v26 = vld [vmem:[%s13538_s1 + $0x48] sm:$0xff]   ;;  %v9902_v28 = vld [vmem:[%s13538_s1 + $0x50] sm:$0xff]   ;;  %v9903_v29 = vld [vmem:[%s13538_s1 + $0x1d8] sm:$0xff]   ;;  %v8417_v42 = vcombine.low %v10393_v21, %v10399_v23 }
  0x17   : > { %720 = vmatprep.mubr.bf16.mxu0 %v10396_v22  ;;  %v9904_v30 = vld [vmem:[%s13538_s1 + $0x58] sm:$0xff]   ;;  %v9905_v31 = vld [vmem:[%s13538_s1 + $0x1e0] sm:$0xff]   ;;  %v9907_v33 = vld [vmem:[%s13538_s1 + $0x1e8] sm:$0xff]  }
  0x18   : > { %693 = vmatpush1.bf16.msra.mxu0 %v9885_v5  ;;  %976 = vmatpush1.bf16.msra.mxu1 %v9886_v6  ;;  %v9906_v32 = vld [vmem:[%s13538_s1 + $0x60] sm:$0xff]   ;;  %v9908_v34 = vld [vmem:[%s13538_s1 + $0x68] sm:$0xff]   ;;  %v9909_v35 = vld [vmem:[%s13538_s1 + $0x1f0] sm:$0xff]  }
  0x19   : > { %694 = vmatprep.subr.bf16.mxu0 %v13545_v1  ;;  %977 = vmatprep.subr.bf16.mxu1 %v13545_v1  ;;  %v9910_v36 = vld [vmem:[%s13538_s1 + $0x70] sm:$0xff]   ;;  %v9911_v37 = vld [vmem:[%s13538_s1 + $0x1f8] sm:$0xff]   ;;  %v9917_v43 = vld [vmem:[%s13538_s1 + $0x300] sm:$0xff]  }
  0x1a   : > { %1003 = vmatprep.mubr.bf16.mxu1 %v8418_v25  ;;  %v9912_v38 = vld [vmem:[%s13538_s1 + $0x78] sm:$0xff]   ;;  %v10460_v39 = vld [vmem:[%s10378_s21 + $0x30] sm:$0xff]  ;;  %v9948_v45 = vld [vmem:[%s13538_s1 + $0x80] sm:$0xff]  }
  0x1b   : > { %v10464_v40 = vld [vmem:[%s10378_s21 + $0x38] sm:$0xff]  ;;  %v9920_v46 = vld [vmem:[%s13538_s1 + $0x308] sm:$0xff]   ;;  %v10490_v48 = vld [vmem:[%s10378_s21 + $0x50] sm:$0xff] }
  0x1c   : > { %695 = vmatpush1.bf16.msra.mxu0 %v9887_v7  ;;  %978 = vmatpush1.bf16.msra.mxu1 %v9888_v8  ;;  %v10475_v44 = vcombine.high %v10460_v39, %v10464_v40  ;;  %v10485_v47 = vld [vmem:[%s10378_s21 + $0x48] sm:$0xff]  ;;  %v10498_v50 = vcombine.low %v10460_v39, %v10464_v40  ;;  %v9923_v52 = vld [vmem:[%s13538_s1 + $0x310] sm:$0xff]   ;;  %v10516_v54 = vld [vmem:[%s10378_s21 + $0x60] sm:$0xff] }
  0x1d   : > { %696 = vmatprep.subr.bf16.mxu0 %v13545_v1  ;;  %979 = vmatprep.subr.bf16.mxu1 %v13545_v1  ;;  %v9951_v49 = vld [vmem:[%s13538_s1 + $0x88] sm:$0xff]   ;;  %v10503_v51 = vcombine.high %v10485_v47, %v10490_v48  ;;  %v9954_v53 = vld [vmem:[%s13538_s1 + $0x90] sm:$0xff]   ;;  %v9926_v56 = vld [vmem:[%s13538_s1 + $0x318] sm:$0xff]   ;;  %v10531_v58 = vcombine.low %v10485_v47, %v10490_v48 }
  0x1e   : > { %v10520_v55 = vld [vmem:[%s10378_s21 + $0x68] sm:$0xff]  ;;  %v9957_v57 = vld [vmem:[%s13538_s1 + $0x98] sm:$0xff]   ;;  %v9929_v60 = vld [vmem:[%s13538_s1 + $0x320] sm:$0xff]  }
  0x1f   : > { %v10536_v59 = vcombine.high %v10516_v54, %v10520_v55  ;;  %v9959_v61 = vld [vmem:[%s13538_s1 + $0xa0] sm:$0xff]   ;;  %v10550_v62 = vld [vmem:[%s10378_s21 + $0x78] sm:$0xff]  ;;  %v9932_v0 = vld [vmem:[%s13538_s1 + $0x328] sm:$0xff]   ;;  %v10565_v3 = vcombine.low %v10516_v54, %v10520_v55 }
  0x20   : > { %697 = vmatpush1.bf16.msra.mxu0 %v9889_v9  ;;  %980 = vmatpush1.bf16.msra.mxu1 %v9890_v10  ;;  %v10553_v63 = vld [vmem:[%s10378_s21 + $0x80] sm:$0xff]  ;;  %v9963_v2 = vld [vmem:[%s13538_s1 + $0xa8] sm:$0xff]   ;;  %v9936_v5 = vld [vmem:[%s13538_s1 + $0x330] sm:$0xff]  }
  0x21   : > { %698 = vmatprep.subr.bf16.mxu0 %v13545_v1  ;;  %981 = vmatprep.subr.bf16.mxu1 %v13545_v1  ;;  %v10570_v4 = vcombine.high %v10550_v62, %v10553_v63  ;;  %v9965_v6 = vld [vmem:[%s13538_s1 + $0xb0] sm:$0xff]   ;;  %v10588_v8 = vld [vmem:[%s10378_s21 + $0x98] sm:$0xff]  ;;  %vm10789_vm2 = vmor %vm1560_vm0, %vm1561_vm1 }
  0x22   : > { %v10585_v7 = vld [vmem:[%s10378_s21 + $0x90] sm:$0xff]  ;;  %v9940_v9 = vld [vmem:[%s13538_s1 + $0x338] sm:$0xff]   ;;  %vm11615_vm5 = vmor %vm3303_vm3, %vm3304_vm4 }
  0x23   : > { %v9969_v10 = vld [vmem:[%s13538_s1 + $0xb8] sm:$0xff]   ;;  %v10633_v20 = vcombine.low %v10585_v7, %v10588_v8  ;;  %v9977_v25 = vld [vmem:[%s13538_s1 + $0xd0] sm:$0xff]   ;;  %vm12199_vm8 = vmand %vm4735_vm6, %vm4736_vm7 }
  0x24   : > { %699 = vmatpush1.bf16.msra.mxu0 %v9891_v11  ;;  %982 = vmatpush1.bf16.msra.mxu1 %v9892_v12  ;;  %v10599_v11 = vcombine.low %v10550_v62, %v10553_v63  ;;  %v10604_v12 = vcombine.high %v10585_v7, %v10588_v8  ;;  %vm12226_vm11 = vmand %vm4792_vm10, %vm4793_vm9 }
  0x25   : > { %700 = vmatprep.subr.bf16.mxu0 %v13545_v1  ;;  %983 = vmatprep.subr.bf16.mxu1 %v13545_v1 }
  0x28   : > { %701 = vmatpush1.bf16.msra.mxu0 %v9893_v13  ;;  %984 = vmatpush1.bf16.msra.mxu1 %v9894_v14  ;;  %v9943_v13 = vld [vmem:[%s13538_s1 + $0x340] sm:$0xff]  }
  0x29   : > { %702 = vmatprep.subr.bf16.mxu0 %v13545_v1  ;;  %985 = vmatprep.subr.bf16.mxu1 %v13545_v1  ;;  %v9971_v14 = vld [vmem:[%s13538_s1 + $0xc0] sm:$0xff]  }
  0x2c   : > { %703 = vmatpush1.bf16.msra.mxu0 %v9895_v15  ;;  %986 = vmatpush1.bf16.msra.mxu1 %v9896_v16  ;;  %v10618_v15 = vld [vmem:[%s10378_s21 + $0xa8] sm:$0xff]  ;;  %v10622_v16 = vld [vmem:[%s10378_s21 + $0xb0] sm:$0xff] }
  0x2d   : > { %704 = vmatprep.subr.bf16.mxu0 %v13545_v1  ;;  %987 = vmatprep.subr.bf16.mxu1 %v13545_v1 }
  0x30   : > { %705 = vmatpush1.bf16.msra.mxu0 %v9897_v17  ;;  %988 = vmatpush1.bf16.msra.mxu1 %v9898_v18  ;;  %v9947_v17 = vld [vmem:[%s13538_s1 + $0x348] sm:$0xff]  }
  0x31   : > { %706 = vmatprep.subr.bf16.mxu0 %v13545_v1  ;;  %989 = vmatprep.subr.bf16.mxu1 %v13545_v1  ;;  %v9975_v18 = vld [vmem:[%s13538_s1 + $0xc8] sm:$0xff]  }
  0x34   : > { %707 = vmatpush1.bf16.msra.mxu0 %v9899_v24  ;;  %990 = vmatpush1.bf16.msra.mxu1 %v9900_v26  ;;  %v9953_v24 = vld [vmem:[%s13538_s1 + $0x350] sm:$0xff]   ;;  %v10652_v26 = vld [vmem:[%s10378_s21 + $0xc0] sm:$0xff] }
  0x35   : > { %708 = vmatprep.subr.bf16.mxu0 %v13545_v1  ;;  %991 = vmatprep.subr.bf16.mxu1 %v13545_v1 }
  0x38   : > { %709 = vmatpush1.bf16.msra.mxu0 %v9901_v27  ;;  %992 = vmatpush1.bf16.msra.mxu1 %v9902_v28  ;;  %v10656_v27 = vld [vmem:[%s10378_s21 + $0xc8] sm:$0xff]  ;;  %v9960_v28 = vld [vmem:[%s13538_s1 + $0x358] sm:$0xff]  }
  0x39   : > { %710 = vmatprep.subr.bf16.mxu0 %v13545_v1  ;;  %993 = vmatprep.subr.bf16.mxu1 %v13545_v1 }
  0x3c   : > { %711 = vmatpush1.bf16.msra.mxu0 %v9903_v29  ;;  %994 = vmatpush1.bf16.msra.mxu1 %v9904_v30  ;;  %v9981_v29 = vld [vmem:[%s13538_s1 + $0xd8] sm:$0xff]   ;;  %v10667_v30 = vcombine.low %v10618_v15, %v10622_v16 }
  0x3d   : > { %712 = vmatprep.subr.bf16.mxu0 %v13545_v1  ;;  %995 = vmatprep.subr.bf16.mxu1 %v13545_v1 }
  0x40   : > { %713 = vmatpush1.bf16.msra.mxu0 %v9905_v31  ;;  %996 = vmatpush1.bf16.msra.mxu1 %v9906_v32  ;;  %v10672_v31 = vcombine.high %v10652_v26, %v10656_v27  ;;  %v9966_v32 = vld [vmem:[%s13538_s1 + $0x360] sm:$0xff]  }
  0x41   : > { %714 = vmatprep.subr.bf16.mxu0 %v13545_v1  ;;  %997 = vmatprep.subr.bf16.mxu1 %v13545_v1 }
  0x44   : > { %715 = vmatpush1.bf16.msra.mxu0 %v9907_v33  ;;  %998 = vmatpush1.bf16.msra.mxu1 %v9908_v34  ;;  %v9983_v33 = vld [vmem:[%s13538_s1 + $0xe0] sm:$0xff]   ;;  %v325_v34 = vld [vmem:[%s10378_s21 + $0xd8] sm:$0xff] }
  0x45   : > { %716 = vmatprep.subr.bf16.mxu0 %v13545_v1  ;;  %999 = vmatprep.subr.bf16.mxu1 %v13545_v1 }
  0x48   : > { %717 = vmatpush1.bf16.msra.mxu0 %v9909_v35  ;;  %1000 = vmatpush1.bf16.msra.mxu1 %v9910_v36  ;;  %v326_v35 = vld [vmem:[%s10378_s21 + $0xe0] sm:$0xff]  ;;  %v9972_v36 = vld [vmem:[%s13538_s1 + $0x368] sm:$0xff]  }
  0x49   : > { %718 = vmatprep.subr.bf16.mxu0 %v13545_v1  ;;  %1001 = vmatprep.subr.bf16.mxu1 %v13545_v1 }
  0x4c   : > { %719 = vmatpush1.bf16.msra.mxu0 %v9911_v37  ;;  %1002 = vmatpush1.bf16.msra.mxu1 %v9912_v38  ;;  %v9986_v37 = vld [vmem:[%s13538_s1 + $0xe8] sm:$0xff]   ;;  %v10697_v38 = vcombine.low %v10652_v26, %v10656_v27 }
  0x4d   : > { %1287 = vmatprep.subr.bf16.mxu0 %v13545_v1  ;;  %2268 = vmatprep.subr.bf16.mxu1 %v13545_v1 }
  0x4f   : > { %721 = vmatmul.mubr.bf16.vlgmr.msra.gmra.mrb[0].mxu0 %v8365_v41  ;;  %1004 = vmatmul.mubr.bf16.vlgmr.msra.gmra.mrb[0].mxu1 %v8417_v42  ;;  %v9980_v42 = vld [vmem:[%s13538_s1 + $0x370] sm:$0xff]  }
  0x50   : > { %1288 = vmatpush1.bf16.msra.mxu0 %v9917_v43  ;;  %728 = vmatprep.mubr.bf16.mxu0 %v10475_v44  ;;  %v9989_v43 = vld [vmem:[%s13538_s1 + $0xf0] sm:$0xff]  }
  0x51   : > { %1011 = vmatprep.mubr.bf16.mxu1 %v10396_v22  ;;  %1289 = vmatprep.subr.bf16.mxu0 %v13545_v1  ;;  %v10638_v22 = vcombine.high %v10618_v15, %v10622_v16 }
  0x52   : > { %2269 = vmatpush1.bf16.msra.mxu1 %v9948_v45  ;;  %v327_v45 = vld [vmem:[%s10378_s21 + $0xf0] sm:$0xff] }
  0x53   : > { %2270 = vmatprep.subr.bf16.mxu1 %v13545_v1 }
  0x54   : > { %1290 = vmatpush1.bf16.msra.mxu0 %v9920_v46  ;;  %v328_v46 = vld [vmem:[%s10378_s21 + $0xf8] sm:$0xff] }
  0x55   : > { %1291 = vmatprep.subr.bf16.mxu0 %v13545_v1 }
  0x56   : > { %2271 = vmatpush1.bf16.msra.mxu1 %v9951_v49  ;;  %v9988_v49 = vld [vmem:[%s13538_s1 + $0x378] sm:$0xff]  }
  0x57   : > { %729 = vmatmul.mubr.bf16.gmra.mrb[4].mxu0 %v10498_v50  ;;  %2272 = vmatprep.subr.bf16.mxu1 %v13545_v1 }
  0x58   : > { %1012 = vmatmul.mubr.bf16.gmra.mrb[4].mxu1 %v8365_v41  ;;  %736 = vmatprep.mubr.bf16.mxu0 %v10503_v51  ;;  %v10700_v41 = vcombine.high %v325_v34, %v326_v35 }
  0x59   : > { %1019 = vmatprep.mubr.bf16.mxu1 %v10475_v44  ;;  %1292 = vmatpush1.bf16.msra.mxu0 %v9923_v52  ;;  %v9990_v52 = vld [vmem:[%s13538_s1 + $0xf8] sm:$0xff]  }
  0x5a   : > { %1293 = vmatprep.subr.bf16.mxu0 %v13545_v1  ;;  %2273 = vmatpush1.bf16.msra.mxu1 %v9954_v53  ;;  %v10723_v53 = vcombine.low %v325_v34, %v326_v35 }
  0x5b   : > { %2274 = vmatprep.subr.bf16.mxu1 %v13545_v1 }
  0x5d   : > { %1294 = vmatpush1.bf16.msra.mxu0 %v9926_v56  ;;  %v10726_v56 = vcombine.high %v327_v45, %v328_v46 }
  0x5e   : > { %1295 = vmatprep.subr.bf16.mxu0 %v13545_v1  ;;  %2275 = vmatpush1.bf16.msra.mxu1 %v9957_v57  ;;  %v10734_v57 = vcombine.low %v327_v45, %v328_v46 }
  0x5f   : > { %737 = vmatmul.mubr.bf16.gmra.mrb[8].mxu0 %v10531_v58  ;;  %2276 = vmatprep.subr.bf16.mxu1 %v13545_v1 }
  0x60   : > { %1020 = vmatmul.mubr.bf16.gmra.mrb[8].mxu1 %v10498_v50  ;;  %744 = vmatprep.mubr.bf16.mxu0 %v10536_v59  ;;  %13572 = vst [vmem:[#allocation3_spill] sm:$0xff] %v10734_v57 }
  0x61   : > { %1027 = vmatprep.mubr.bf16.mxu1 %v10503_v51  ;;  %1296 = vmatpush1.bf16.msra.mxu0 %v9929_v60  ;;  %v9944_v60 = vld [vmem:[%s10378_s21 + $0x10c] ss:$8 sps:$4 sm:$0xff]  }
  0x62   : > { %1297 = vmatprep.subr.bf16.mxu0 %v13545_v1  ;;  %2277 = vmatpush1.bf16.msra.mxu1 %v9959_v61  ;;  %v9946_v61 = vld [vmem:[%s10378_s21 + $0x108] ss:$8 sps:$4 sm:$0xff]  }
  0x63   : > { %2278 = vmatprep.subr.bf16.mxu1 %v13545_v1 }
  0x65   : > { %1298 = vmatpush1.bf16.msra.mxu0 %v9932_v0  ;;  %v9949_v0 = vld [vmem:[%s10378_s21 + $0x124] ss:$8 sps:$4 sm:$0xff]  }
  0x66   : > { %1299 = vmatprep.subr.bf16.mxu0 %v13545_v1  ;;  %2279 = vmatpush1.bf16.msra.mxu1 %v9963_v2  ;;  %v9952_v2 = vld [vmem:[%s10378_s21 + $0x120] ss:$8 sps:$4 sm:$0xff]  }
  0x67   : > { %745 = vmatmul.mubr.bf16.gmra.mrb[12].mxu0 %v10565_v3  ;;  %2280 = vmatprep.subr.bf16.mxu1 %v13545_v1 }
  0x68   : > { %1028 = vmatmul.mubr.bf16.gmra.mrb[12].mxu1 %v10531_v58  ;;  %752 = vmatprep.mubr.bf16.mxu0 %v10570_v4 }
  0x69   : > { %1035 = vmatprep.mubr.bf16.mxu1 %v10536_v59  ;;  %1300 = vmatpush1.bf16.msra.mxu0 %v9936_v5  ;;  %v9955_v5 = vld [vmem:[%s10378_s21 + $0x13c] ss:$8 sps:$4 sm:$0xff]  }
  0x6a   : > { %1301 = vmatprep.subr.bf16.mxu0 %v13545_v1  ;;  %2281 = vmatpush1.bf16.msra.mxu1 %v9965_v6  ;;  %v9958_v6 = vld [vmem:[%s10378_s21 + $0x138] ss:$8 sps:$4 sm:$0xff]  }
  0x6b   : > { %2282 = vmatprep.subr.bf16.mxu1 %v13545_v1 }
  0x6d   : > { %1302 = vmatpush1.bf16.msra.mxu0 %v9940_v9  ;;  %v9961_v9 = vld [vmem:[%s10378_s21 + $0x154] ss:$8 sps:$4 sm:$0xff]  }
  0x6e   : > { %1303 = vmatprep.subr.bf16.mxu0 %v13545_v1  ;;  %2283 = vmatpush1.bf16.msra.mxu1 %v9969_v10  ;;  %v9964_v10 = vld [vmem:[%s10378_s21 + $0x150] ss:$8 sps:$4 sm:$0xff]  }
  0x6f   : > { %753 = vmatmul.mubr.bf16.gmra.mrb[16].mxu0 %v10599_v11  ;;  %2284 = vmatprep.subr.bf16.mxu1 %v13545_v1 }
  0x70   : > { %1036 = vmatmul.mubr.bf16.gmra.mrb[16].mxu1 %v10565_v3  ;;  %760 = vmatprep.mubr.bf16.mxu0 %v10604_v12 }
  0x71   : > { %1043 = vmatprep.mubr.bf16.mxu1 %v10570_v4  ;;  %1304 = vmatpush1.bf16.msra.mxu0 %v9943_v13  ;;  %v9967_v13 = vld [vmem:[%s10378_s21 + $0x16c] ss:$8 sps:$4 sm:$0xff]  }
  0x72   : > { %1305 = vmatprep.subr.bf16.mxu0 %v13545_v1  ;;  %2285 = vmatpush1.bf16.msra.mxu1 %v9971_v14  ;;  %v1564_v14 = vshrl.u32 %v10393_v21, 16 }
  0x73   : > { %2286 = vmatprep.subr.bf16.mxu1 %v13545_v1 }
  0x74   : > { %v1566_v34 = vrot.slane %v1564_v14, 4 }
  0x75   : > { %1306 = vmatpush1.bf16.msra.mxu0 %v9947_v17  ;;  %v1567_v17 = vshll.u32 %v10393_v21, 16 }
  0x76   : > { %1307 = vmatprep.subr.bf16.mxu0 %v13545_v1  ;;  %2287 = vmatpush1.bf16.msra.mxu1 %v9975_v18  ;;  %v1573_v18 = vshll.u32 %v10399_v23, 16 }
  0x77   : > { %761 = vmatmul.mubr.bf16.gmra.mrb[20].mxu0 %v10633_v20  ;;  %2288 = vmatprep.subr.bf16.mxu1 %v13545_v1  ;;  %v1569_v35 = vrot.slane %v1567_v17, 5 }
  0x78   : > { %1044 = vmatmul.mubr.bf16.gmra.mrb[20].mxu1 %v10599_v11  ;;  %768 = vmatprep.mubr.bf16.mxu0 %v10638_v22  ;;  %v10758_v21 = vrot.slane %v1573_v18, 5 }
  0x79   : > { %1051 = vmatprep.mubr.bf16.mxu1 %v10604_v12  ;;  %1308 = vmatpush1.bf16.msra.mxu0 %v9953_v24  ;;  %v1577_v24 = vshrl.u32 %v10399_v23, 16 }
  0x7a   : > { %1309 = vmatprep.subr.bf16.mxu0 %v13545_v1  ;;  %2289 = vmatpush1.bf16.msra.mxu1 %v9977_v25  ;;  %v9970_v25 = vld [vmem:[%s10378_s21 + $0x168] ss:$8 sps:$4 sm:$0xff]  }
  0x7b   : > { %2290 = vmatprep.subr.bf16.mxu1 %v13545_v1 }
  0x7d   : > { %1310 = vmatpush1.bf16.msra.mxu0 %v9960_v28  ;;  %v1588_v28 = vshrl.u32 %v10389_v19, 16 }
  0x7e   : > { %1311 = vmatprep.subr.bf16.mxu0 %v13545_v1  ;;  %2291 = vmatpush1.bf16.msra.mxu1 %v9981_v29  ;;  %v1591_v29 = vshll.u32 %v10389_v19, 16  ;;  %v10149_v19 = vld [vmem:[%s10378_s21 + $0x20] sm:$0xff] }
  0x7f   : > { %769 = vmatmul.mubr.bf16.gmra.mrb[24].mxu0 %v10667_v30  ;;  %2292 = vmatprep.subr.bf16.mxu1 %v13545_v1  ;;  %v1597_v46 = vshll.u32 %v10149_v19, 16 }
  0x80   : > { %1052 = vmatmul.mubr.bf16.gmra.mrb[24].mxu1 %v10633_v20  ;;  %776 = vmatprep.mubr.bf16.mxu0 %v10672_v31  ;;  %v1593_v23 = vrot.slane %v1591_v29, 5  ;;  %v1508_v29 = vld [vmem:[%s10378_s21 + $0x40] sm:$0x11] }
  0x81   : > { %1059 = vmatprep.mubr.bf16.mxu1 %v10638_v22  ;;  %1312 = vmatpush1.bf16.msra.mxu0 %v9966_v32  ;;  %v9973_v32 = vld [vmem:[%s10378_s21 + $0x184] ss:$8 sps:$4 sm:$0xff]  }
  0x82   : > { %1313 = vmatprep.subr.bf16.mxu0 %v13545_v1  ;;  %2293 = vmatpush1.bf16.msra.mxu1 %v9983_v33  ;;  %v1502_v33 = vld [vmem:[%s10378_s21 + $0x10] sm:$0x11] }
  0x83   : > { %2294 = vmatprep.subr.bf16.mxu1 %v13545_v1 }
  0x85   : > { %1314 = vmatpush1.bf16.msra.mxu0 %v9972_v36  ;;  %v1579_v36 = vrot.slane %v1577_v24, 4 }
  0x86   : > { %1315 = vmatprep.subr.bf16.mxu0 %v13545_v1  ;;  %2295 = vmatpush1.bf16.msra.mxu1 %v9986_v37  ;;  %v1583_v37 = vshll.u32 %v1502_v33, 16 }
  0x87   : > { %777 = vmatmul.mubr.bf16.gmra.mrb[28].mxu0 %v10697_v38  ;;  %2296 = vmatprep.subr.bf16.mxu1 %v13545_v1  ;;  %v1580_v45 = vor.u32 %v1579_v36, %v10758_v21 }
  0x88   : > { %1060 = vmatmul.mubr.bf16.gmra.mrb[28].mxu1 %v10667_v30  ;;  %784 = vmatprep.mubr.bf16.mxu0 %v10700_v41  ;;  %v1585_v24 = vrot.slane %v1583_v37, 5  ;;  %v9982_v37 = vld [vmem:[%s10378_s21 + $0x198] ss:$8 sps:$4 sm:$0xff]  }
  0x89   : > { %1067 = vmatprep.mubr.bf16.mxu1 %v10672_v31  ;;  %1316 = vmatpush1.bf16.msra.mxu0 %v9980_v42  ;;  %v1590_v42 = vrot.slane %v1588_v28, 4  ;;  %v1581_v18 = vrot.slane %v1580_v45, 4  ;;  %v10771_v28 = vrot.slane %v1597_v46, 5  ;;  %v1631_v45 = vshll.u32 %v1508_v29, 16 }
  0x8a   : > { %1317 = vmatprep.subr.bf16.mxu0 %v13545_v1  ;;  %2297 = vmatpush1.bf16.msra.mxu1 %v9989_v43  ;;  %v1570_v43 = vor.u32 %v1569_v35, %v1566_v34  ;;  %v1649_v46 = vshrl.u32 %v10490_v48, 16 }
  0x8b   : > { %2298 = vmatprep.subr.bf16.mxu1 %v13545_v1 }
  0x8c   : > { %v1571_v14 = vrot.slane %v1570_v43, 4  ;;  %v1651_v29 = vrot.slane %v1649_v46, 4 }
  0x8d   : > { %1318 = vmatpush1.bf16.msra.mxu0 %v9988_v49  ;;  %v1601_v49 = vshrl.u32 %v10149_v19, 16  ;;  %v1645_v19 = vshll.u32 %v10490_v48, 16  ;;  %v1669_v48 = vshll.u32 %v10520_v55, 16 }
  0x8e   : > { %2299 = vmatpush1.bf16.msra.mxu1 %v9990_v52  ;;  %2642 = vmatprep.subr.bf16.mxu0 %v13545_v1  ;;  %v9976_v52 = vld [vmem:[%s10378_s21 + $0x180] ss:$8 sps:$4 sm:$0xff]  }
  0x8f   : > { %785 = vmatmul.mubr.bf16.gmra.mrb[32].mxu0 %v10723_v53  ;;  %3016 = vmatprep.subr.bf16.mxu1 %v13545_v1  ;;  %v1523_v1 = vld [vmem:[%s10378_s21 + $0xb8] sm:$0x11] }
  0x90   : > { %1068 = vmatmul.mubr.bf16.gmra.mrb[32].mxu1 %v10697_v38  ;;  %792 = vmatprep.mubr.bf16.mxu0 %v10726_v56 }
  0x91   : > { %1075 = vmatprep.mubr.bf16.mxu1 %v10700_v41 }
  0x97   : > { %793 = vmatmul.mubr.bf16.gmra.mrb[36].mxu0 %v10734_v57 }
  0x98   : > { %1076 = vmatmul.mubr.bf16.gmra.mrb[36].mxu1 %v10723_v53  ;;  %800 = vmatprep.mubr.bf16.mxu0 %v9944_v60 }
  0x99   : > { %1083 = vmatprep.mubr.bf16.mxu1 %v10726_v56 }
  0x9f   : > { %801 = vmatmul.mubr.bf16.gmra.mrb[40].mxu0 %v9946_v61 }
  0xa0   : > { %1084 = vmatmul.mubr.bf16.gmra.mrb[40].mxu1 %v10734_v57  ;;  %808 = vmatprep.mubr.bf16.mxu0 %v9949_v0 }
  0xa1   : > { %1091 = vmatprep.mubr.bf16.mxu1 %v9944_v60  ;;  %v1505_v60 = vld [vmem:[%s10378_s21 + $0x28] sm:$0x11] }
  0xa2   : > { %v1607_v17 = vshll.u32 %v1505_v60, 16 }
  0xa7   : > { %809 = vmatmul.mubr.bf16.gmra.mrb[44].mxu0 %v9952_v2 }
  0xa8   : > { %1092 = vmatmul.mubr.bf16.gmra.mrb[44].mxu1 %v9946_v61  ;;  %816 = vmatprep.mubr.bf16.mxu0 %v9955_v5  ;;  %v1612_v61 = vshrl.u32 %v10460_v39, 16 }
  0xa9   : > { %1099 = vmatprep.mubr.bf16.mxu1 %v9949_v0  ;;  %v1615_v0 = vshll.u32 %v10460_v39, 16  ;;  %v1603_v39 = vrot.slane %v1601_v49, 4  ;;  %v9984_v49 = vld [vmem:[%s10378_s21 + $0x1b4] ss:$8 sps:$4 sm:$0xff]  }
  0xaa   : > { %v1614_v33 = vrot.slane %v1612_v61, 4 }
  0xab   : > { %v1617_v34 = vrot.slane %v1615_v0, 5  ;;  %v1604_v43 = vor.u32 %v1603_v39, %v10771_v28  ;;  %v10783_v0 = vld [vmem:[%s10378_s21 + $0x58] sm:$0x11] }
  0xad   : > { %v1618_v60 = vor.u32 %v1617_v34, %v1614_v33  ;;  %v1655_v34 = vshll.u32 %v10783_v0, 16  ;;  %v1711_v0 = vshll.u32 %v10585_v7, 16 }
  0xaf   : > { %817 = vmatmul.mubr.bf16.gmra.mrb[48].mxu0 %v9958_v6 }
  0xb0   : > { %1100 = vmatmul.mubr.bf16.gmra.mrb[48].mxu1 %v9952_v2  ;;  %824 = vmatprep.mubr.bf16.mxu0 %v9961_v9  ;;  %v1621_v2 = vshll.u32 %v10464_v40, 16 }
  0xb1   : > { %1107 = vmatprep.mubr.bf16.mxu1 %v9955_v5  ;;  %v1625_v5 = vshrl.u32 %v10464_v40, 16 }
  0xb2   : > { %v10774_v40 = vrot.slane %v1621_v2, 5 }
  0xb3   : > { %v1627_v35 = vrot.slane %v1625_v5, 4  ;;  %v1663_v5 = vshll.u32 %v10516_v54, 16 }
  0xb5   : > { %v1628_v61 = vor.u32 %v1627_v35, %v10774_v40  ;;  %v1586_v35 = vsel %vm10789_vm2, %v1581_v18, %v1585_v24 }
  0xb7   : > { %825 = vmatmul.mubr.bf16.gmra.mrb[52].mxu0 %v9964_v10  ;;  %v10799_v39 = vrot.slane %v1628_v61, 4  ;;  %v1517_v61 = vld [vmem:[%s10378_s21 + $0x88] sm:$0x11] }
  0xb8   : > { %1108 = vmatmul.mubr.bf16.gmra.mrb[52].mxu1 %v9958_v6  ;;  %832 = vmatprep.mubr.bf16.mxu0 %v9967_v13  ;;  %v9978_v6 = vld [vmem:[%s10378_s21 + $0x19c] ss:$8 sps:$4 sm:$0xff]  }
  0xb9   : > { %1115 = vmatprep.mubr.bf16.mxu1 %v9961_v9  ;;  %v1636_v9 = vshrl.u32 %v10485_v47, 16 }
  0xbf   : > { %833 = vmatmul.mubr.bf16.gmra.mrb[56].mxu0 %v9970_v25 }
  0xc0   : > { %1116 = vmatmul.mubr.bf16.gmra.mrb[56].mxu1 %v9964_v10  ;;  %840 = vmatprep.mubr.bf16.mxu0 %v9973_v32  ;;  %v1639_v10 = vshll.u32 %v10485_v47, 16  ;;  %v1638_v47 = vrot.slane %v1636_v9, 4  ;;  %v1605_v9 = vrot.slane %v1604_v43, 4  ;;  %v9987_v43 = vld [vmem:[%s10378_s21 + $0x1b0] ss:$8 sps:$4 sm:$0xff]  }
  0xc1   : > { %1123 = vmatprep.mubr.bf16.mxu1 %v9967_v13  ;;  %v1594_v13 = vor.u32 %v1593_v23, %v1590_v42  ;;  %v1609_v23 = vrot.slane %v1607_v17, 5  ;;  %v10797_v17 = vrot.slane %v1618_v60, 4  ;;  %v1693_v60 = vshll.u32 %v10553_v63, 16 }
  0xc2   : > { %v1641_v36 = vrot.slane %v1639_v10, 5  ;;  %v10793_v10 = vrot.slane %v1631_v45, 5  ;;  %v1514_v45 = vld [vmem:[%s10378_s21 + $0x70] sm:$0x11] }
  0xc3   : > { %v1595_v42 = vrot.slane %v1594_v13, 4  ;;  %v1673_v13 = vshrl.u32 %v10520_v55, 16  ;;  %v10809_v55 = vsel %vm10789_vm2, %v1571_v14, %v10758_v21  ;;  %v1697_v21 = vshrl.u32 %v10553_v63, 16 }
  0xc4   : > { %v1642_v2 = vor.u32 %v1641_v36, %v1638_v47  ;;  %v1665_v36 = vrot.slane %v1663_v5, 5  ;;  %v8518_v14 = vcombine.high %v10809_v55, %v1586_v35  ;;  %v1679_v18 = vshll.u32 %v1514_v45, 16 }
  0xc5   : > { %v1675_v46 = vrot.slane %v1673_v13, 4  ;;  %v1717_v5 = vshll.u32 %v10588_v8, 16  ;;  %v1703_v13 = vshll.u32 %v1517_v61, 16  ;;  %v1600_v63 = vsel %vm10789_vm2, %v1595_v42, %v10771_v28  ;;  %v9991_v28 = vld [vmem:[%s13538_s1 + $0x200] sm:$0xff]  }
  0xc6   : > { %v10803_v33 = vrot.slane %v1642_v2, 4  ;;  %v1732_v45 = vshrl.u32 %v10618_v15, 16 }
  0xc7   : > { %841 = vmatmul.mubr.bf16.gmra.mrb[60].mxu0 %v9976_v52 }
  0xc8   : > { %1124 = vmatmul.mubr.bf16.gmra.mrb[60].mxu1 %v9970_v25  ;;  %848 = vmatprep.mubr.bf16.mxu0 %v9978_v6  ;;  %v1660_v25 = vshrl.u32 %v10516_v54, 16  ;;  %v10801_v54 = vrot.slane %v1645_v19, 5  ;;  %v10815_v19 = vrot.slane %v1669_v48, 5  ;;  %v1699_v48 = vrot.slane %v1697_v21, 4 }
  0xc9   : > { %1131 = vmatprep.mubr.bf16.mxu1 %v9973_v32 }
  0xca   : > { %v1662_v47 = vrot.slane %v1660_v25, 4  ;;  %v10825_v25 = vrot.slane %v1693_v60, 5  ;;  %v1652_v42 = vor.u32 %v1651_v29, %v10801_v54  ;;  %v8517_v60 = vcombine.low %v10809_v55, %v1586_v35  ;;  %v10001_v35 = vld [vmem:[%s13538_s1 + $0x380] sm:$0xff]  }
  0xcf   : > { %849 = vmatmul.mubr.bf16.gmra.mrb[64].mxu0 %v9982_v37 }
  0xd0   : > { %1132 = vmatmul.mubr.bf16.gmra.mrb[64].mxu1 %v9976_v52  ;;  %856 = vmatprep.mubr.bf16.mxu0 %v9984_v49  ;;  %v1684_v52 = vshrl.u32 %v10550_v62, 16  ;;  %v1687_v49 = vshll.u32 %v10550_v62, 16  ;;  %v1721_v62 = vshrl.u32 %v10588_v8, 16  ;;  %v1713_v8 = vrot.slane %v1711_v0, 5  ;;  %v1520_v0 = vld [vmem:[%s10378_s21 + $0xa0] sm:$0x11] }
  0xd1   : > { %1139 = vmatprep.mubr.bf16.mxu1 %v9978_v6  ;;  %v1708_v6 = vshrl.u32 %v10585_v7, 16  ;;  %v1610_v7 = vsel %vm10789_vm2, %v1605_v9, %v1609_v23  ;;  %v1666_v23 = vor.u32 %v1665_v36, %v1662_v47  ;;  %v10843_v9 = vrot.slane %v1717_v5, 5  ;;  %v9992_v47 = vld [vmem:[%s13538_s1 + $0x208] sm:$0xff]  }
  0xd2   : > { %v1686_v24 = vrot.slane %v1684_v52, 4  ;;  %v1689_v2 = vrot.slane %v1687_v49, 5  ;;  %v1735_v52 = vshll.u32 %v10618_v15, 16  ;;  %v1676_v15 = vor.u32 %v1675_v46, %v10815_v19 }
  0xd3   : > { %v1710_v49 = vrot.slane %v1708_v6, 4  ;;  %v10847_v21 = vcombine.high %v1600_v63, %v1610_v7  ;;  %v1653_v36 = vrot.slane %v1652_v42, 4  ;;  %v1657_v46 = vrot.slane %v1655_v34, 5 }
  0xd4   : > { %v1737_v61 = vrot.slane %v1735_v52, 5  ;;  %v1690_v6 = vor.u32 %v1689_v2, %v1686_v24  ;;  %v10857_v5 = vrot.slane %v1666_v23, 4  ;;  %v10863_v24 = vrot.slane %v1676_v15, 4  ;;  %v9994_v23 = vld [vmem:[%s13538_s1 + $0x218] sm:$0xff]  }
  0xd5   : > { %v1714_v55 = vor.u32 %v1713_v8, %v1710_v49  ;;  %v10865_v2 = vrot.slane %v1679_v18, 5  ;;  %v1751_v34 = vshll.u32 %v1523_v1, 16  ;;  %v13575_v8 = vmov 0  }
  0xd6   : > { %v10870_v52 = vrot.slane %v1690_v6, 4  ;;  %v1634_v1 = vsel %vm10789_vm2, %v10799_v39, %v10793_v10  ;;  %v1759_v15 = vshll.u32 %v10652_v26, 16 }
  0xd7   : > { %857 = vmatmul.mubr.bf16.gmra.mrb[68].mxu0 %v9987_v43  ;;  %v1723_v43 = vrot.slane %v1721_v62, 4  ;;  %v10903_v39 = vrot.slane %v1751_v34, 5 }
  0xd8   : > { %1140 = vmatmul.mubr.bf16.gmra.mrb[68].mxu1 %v9982_v37  ;;  %1319 = vmatprep.mubr.bf16.mxu0 %v10475_v44  ;;  %v1741_v37 = vshll.u32 %v10622_v16, 16  ;;  %v1745_v44 = vshrl.u32 %v10622_v16, 16  ;;  %v1700_v16 = vor.u32 %v1699_v48, %v10825_v25  ;;  %v1727_v48 = vshll.u32 %v1520_v0, 16 }
  0xd9   : > { %2300 = vmatprep.mubr.bf16.mxu1 %v8518_v14  ;;  %v1734_v14 = vrot.slane %v1732_v45, 4  ;;  %v1724_v62 = vor.u32 %v1723_v43, %v10843_v9  ;;  %v1756_v43 = vshrl.u32 %v10652_v26, 16  ;;  %v1648_v26 = vsel %vm10789_vm2, %v10803_v33, %v10801_v54  ;;  %v10006_v54 = vld [vmem:[%s13538_s1 + $0x3a0] sm:$0xff]   ;;  %v9996_v33 = vld [vmem:[%s13538_s1 + $0x228] sm:$0xff]  }
  0xda   : > { %v10852_v57 = vrot.slane %v1741_v37, 5  ;;  %v1747_v29 = vrot.slane %v1745_v44, 4  ;;  %v10872_v49 = vrot.slane %v1700_v16, 4  ;;  %v1624_v37 = vsel %vm10789_vm2, %v10797_v17, %v10774_v40 }
  0xdb   : > { %v1738_v45 = vor.u32 %v1737_v61, %v1734_v14  ;;  %v10891_v44 = vcombine.low %v1600_v63, %v1610_v7  ;;  %v10897_v40 = vrot.slane %v1724_v62, 4  ;;  %v10899_v17 = vrot.slane %v1727_v48, 5  ;;  %v10004_v7 = vld [vmem:[%s13538_s1 + $0x390] sm:$0xff]   ;;  %v10000_v48 = vld [vmem:[%s13538_s1 + $0x248] sm:$0xff]  }
  0xdc   : > { %v1748_v18 = vor.u32 %v1747_v29, %v10852_v57  ;;  %v10905_v42 = vcombine.high %v1624_v37, %v1634_v1  ;;  %v1658_v14 = vsel %vm10789_vm2, %v1653_v36, %v1657_v46  ;;  %v10938_v61 = vcombine.low %v1624_v37, %v1634_v1 }
  0xdd   : > { %v10901_v10 = vrot.slane %v1738_v45, 4  ;;  %v10940_v6 = vcombine.high %v1648_v26, %v1658_v14  ;;  %v1769_v16 = vshrl.u32 %v10656_v27, 16  ;;  %v10951_v0 = vrot.slane %v1756_v43, 4  ;;  %v10014_v45 = vld [vmem:[%s13538_s1 + $0x3c8] sm:$0xff]  }
  0xde   : > { %v10908_v63 = vrot.slane %v1748_v18, 4  ;;  %v10953_v29 = vrot.slane %v1759_v15, 5  ;;  %v10975_v36 = vcombine.low %v1648_v26, %v1658_v14  ;;  %v1730_v34 = vsel %vm10789_vm2, %v10897_v40, %v10899_v17  ;;  %v10151_v17 = vld [vmem:[%s10378_s21 + $0xe0] sm:$0xff] }
  0xdf   : > { %1320 = vmatmul.mubr.bf16.vlgmr.msra.gmra.mrb[72].mxu0 %v10498_v50  ;;  %v10874_v50 = vrot.slane %v1703_v13, 5  ;;  %v10002_v13 = vld [vmem:[%s13538_s1 + $0x388] sm:$0xff]   ;;  %v1744_v37 = vsel %vm10789_vm2, %v10901_v10, %v10852_v57  ;;  %v1789_v10 = vshll.u32 %v10151_v17, 16 }
  0xe0   : > { %2643 = vmatpush1.bf16.msra.mxu0 %v9991_v28  ;;  %2301 = vmatmul.mubr.bf16.vlgmr.msra.gmra.mrb[72].mxu1 %v8517_v60  ;;  %v9993_v28 = vld [vmem:[%s13538_s1 + $0x210] sm:$0xff]   ;;  %v1765_v60 = vshll.u32 %v10656_v27, 16  ;;  %v10008_v27 = vld [vmem:[%s13538_s1 + $0x3a8] sm:$0xff]   ;;  %v1754_v1 = vsel %vm10789_vm2, %v10908_v63, %v10903_v39  ;;  %v10017_v39 = vld [vmem:[%s13538_s1 + $0x3d8] sm:$0xff]  }
  0xe1   : > { %1327 = vmatprep.mubr.bf16.mxu0 %v10503_v51  ;;  %2308 = vmatprep.mubr.bf16.mxu1 %v10847_v21  ;;  %v10886_v51 = vrot.slane %v1714_v55, 4 }
  0xe2   : > { %2644 = vmatprep.subr.bf16.mxu0 %v13575_v8  ;;  %3017 = vmatpush1.bf16.msra.mxu1 %v10001_v35  ;;  %v10990_v55 = vrot.slane %v1765_v60, 5  ;;  %v10011_v35 = vld [vmem:[%s13538_s1 + $0x3b8] sm:$0xff]  }
  0xe3   : > { %3018 = vmatprep.subr.bf16.mxu1 %v13575_v8 }
  0xe4   : > { %2645 = vmatpush1.bf16.msra.mxu0 %v9992_v47  ;;  %v1682_v47 = vsel %vm10789_vm2, %v10863_v24, %v10865_v2  ;;  %v1706_v24 = vsel %vm10789_vm2, %v10872_v49, %v10874_v50  ;;  %v1526_v49 = vld [vmem:[%s10378_s21 + $0xd0] sm:$0x11]  ;;  %v1771_v50 = vrot.slane %v1769_v16, 4 }
  0xe5   : > { %2646 = vmatprep.subr.bf16.mxu0 %v13575_v8 }
  0xe6   : > { %3019 = vmatpush1.bf16.msra.mxu1 %v10002_v13  ;;  %v1775_v13 = vshll.u32 %v1526_v49, 16  ;;  %v1534_v49 = vld [vmem:[%s10378_s21 + $0x110] sm:$0xff] }
  0xe7   : > { %1328 = vmatmul.mubr.bf16.gmra.mrb[76].mxu0 %v10531_v58  ;;  %3020 = vmatprep.subr.bf16.mxu1 %v13575_v8  ;;  %v10005_v58 = vld [vmem:[%s13538_s1 + $0x398] sm:$0xff]  }
  0xe8   : > { %2309 = vmatmul.mubr.bf16.gmra.mrb[76].mxu1 %v10891_v44  ;;  %1335 = vmatprep.mubr.bf16.mxu0 %v10536_v59  ;;  %v9995_v59 = vld [vmem:[%s13538_s1 + $0x220] sm:$0xff]   ;;  %v1777_v60 = vrot.slane %v1775_v13, 5 }
  0xe9   : > { %2316 = vmatprep.mubr.bf16.mxu1 %v10905_v42  ;;  %2647 = vmatpush1.bf16.msra.mxu0 %v9993_v28  ;;  %v10150_v28 = vld [vmem:[%s10378_s21 + $0xd8] sm:$0xff] }
  0xea   : > { %2648 = vmatprep.subr.bf16.mxu0 %v13575_v8  ;;  %3021 = vmatpush1.bf16.msra.mxu1 %v10004_v7  ;;  %v1780_v57 = vshrl.u32 %v10150_v28, 16  ;;  %v1783_v40 = vshll.u32 %v10150_v28, 16  ;;  %v1793_v7 = vshrl.u32 %v10151_v17, 16  ;;  %v1841_v17 = vshrl.u32 %v1534_v49, 16 }
  0xeb   : > { %3022 = vmatprep.subr.bf16.mxu1 %v13575_v8 }
  0xec   : > { %v1782_v26 = vrot.slane %v1780_v57, 4  ;;  %v1785_v14 = vrot.slane %v1783_v40, 5  ;;  %v1795_v16 = vrot.slane %v1793_v7, 4  ;;  %v1837_v40 = vshll.u32 %v1534_v49, 16 }
  0xed   : > { %2649 = vmatpush1.bf16.msra.mxu0 %v9994_v23  ;;  %v11078_v23 = vcombine.high %v1744_v37, %v1754_v1 }
  0xee   : > { %2650 = vmatprep.subr.bf16.mxu0 %v13575_v8  ;;  %3023 = vmatpush1.bf16.msra.mxu1 %v10005_v58  ;;  %v10010_v58 = vld [vmem:[%s13538_s1 + $0x260] sm:$0xff]  }
  0xef   : > { %1336 = vmatmul.mubr.bf16.gmra.mrb[80].mxu0 %v10565_v3  ;;  %3024 = vmatprep.subr.bf16.mxu1 %v13575_v8  ;;  %v1672_v3 = vsel %vm10789_vm2, %v10857_v5, %v10815_v19  ;;  %v10009_v19 = vld [vmem:[%s13538_s1 + $0x3b0] sm:$0xff]   ;;  %v9998_v5 = vld [vmem:[%s13538_s1 + $0x238] sm:$0xff]  }
  0xf0   : > { %2317 = vmatmul.mubr.bf16.gmra.mrb[80].mxu1 %v10938_v61  ;;  %1343 = vmatprep.mubr.bf16.mxu0 %v10570_v4  ;;  %v9997_v4 = vld [vmem:[%s13538_s1 + $0x230] sm:$0xff]   ;;  %v10980_v46 = vcombine.high %v1672_v3, %v1682_v47  ;;  %v11009_v2 = vcombine.low %v1672_v3, %v1682_v47  ;;  %v10153_v3 = vld [vmem:[%s10378_s21 + $0xf8] sm:$0xff] }
  0xf1   : > { %2324 = vmatprep.mubr.bf16.mxu1 %v10940_v6  ;;  %2651 = vmatpush1.bf16.msra.mxu0 %v9995_v59  ;;  %v1791_v59 = vrot.slane %v1789_v10, 5  ;;  %v1813_v47 = vshll.u32 %v10153_v3, 16 }
  0xf2   : > { %2652 = vmatprep.subr.bf16.mxu0 %v13575_v8  ;;  %3025 = vmatpush1.bf16.msra.mxu1 %v10006_v54  ;;  %v10018_v54 = vld [vmem:[%s13538_s1 + $0x3e0] sm:$0xff]  }
  0xf3   : > { %3026 = vmatprep.subr.bf16.mxu1 %v13575_v8 }
  0xf5   : > { %2653 = vmatpush1.bf16.msra.mxu0 %v9996_v33  ;;  %v1529_v33 = vld [vmem:[%s10378_s21 + $0xe8] sm:$0x11] }
  0xf6   : > { %2654 = vmatprep.subr.bf16.mxu0 %v13575_v8  ;;  %3027 = vmatpush1.bf16.msra.mxu1 %v10008_v27 }
  0xf7   : > { %1344 = vmatmul.mubr.bf16.gmra.mrb[84].mxu0 %v10599_v11  ;;  %3028 = vmatprep.subr.bf16.mxu1 %v13575_v8  ;;  %v1696_v11 = vsel %vm10789_vm2, %v10870_v52, %v10825_v25  ;;  %v10012_v25 = vld [vmem:[%s13538_s1 + $0x3c0] sm:$0xff]  }
  0xf8   : > { %2325 = vmatmul.mubr.bf16.gmra.mrb[84].mxu1 %v10975_v36  ;;  %1351 = vmatprep.mubr.bf16.mxu0 %v10604_v12  ;;  %v9999_v12 = vld [vmem:[%s13538_s1 + $0x240] sm:$0xff]   ;;  %v11014_v62 = vcombine.high %v1696_v11, %v1706_v24  ;;  %v11041_v52 = vcombine.low %v1696_v11, %v1706_v24  ;;  %v1796_v11 = vor.u32 %v1795_v16, %v1791_v59 }
  0xf9   : > { %2332 = vmatprep.mubr.bf16.mxu1 %v10980_v46  ;;  %2655 = vmatpush1.bf16.msra.mxu0 %v9997_v4  ;;  %v1817_v4 = vshrl.u32 %v10153_v3, 16  ;;  %v10154_v3 = vld [vmem:[%s10378_s21 + $0x10c] ss:$8 sps:$4 sm:$0xff]  }
  0xfa   : > { %2656 = vmatprep.subr.bf16.mxu0 %v13575_v8  ;;  %3029 = vmatpush1.bf16.msra.mxu1 %v10009_v19 }
  0xfb   : > { %3030 = vmatprep.subr.bf16.mxu1 %v13575_v8 }
  0xfd   : > { %2657 = vmatpush1.bf16.msra.mxu0 %v9998_v5 }
  0xfe   : > { %2658 = vmatprep.subr.bf16.mxu0 %v13575_v8  ;;  %3031 = vmatpush1.bf16.msra.mxu1 %v10011_v35  ;;  %v1786_v35 = vor.u32 %v1785_v14, %v1782_v26  ;;  %v1839_v14 = vrot.slane %v1837_v40, 5 }
  0xff   : > { %1352 = vmatmul.mubr.bf16.gmra.mrb[88].mxu0 %v10633_v20  ;;  %3032 = vmatprep.subr.bf16.mxu1 %v13575_v8  ;;  %v1720_v20 = vsel %vm10789_vm2, %v10886_v51, %v10843_v9  ;;  %v10015_v9 = vld [vmem:[%s13538_s1 + $0x3d0] sm:$0xff]   ;;  %v1772_v51 = vor.u32 %v1771_v50, %v10990_v55 }
 0x100   : > { %2333 = vmatmul.mubr.bf16.gmra.mrb[88].mxu1 %v11009_v2  ;;  %1359 = vmatprep.mubr.bf16.mxu0 %v10638_v22  ;;  %v10003_v22 = vld [vmem:[%s13538_s1 + $0x250] sm:$0xff]   ;;  %v11047_v18 = vcombine.high %v1720_v20, %v1730_v34  ;;  %v11076_v63 = vcombine.low %v1720_v20, %v1730_v34  ;;  %v1532_v20 = vld [vmem:[%s10378_s21 + $0x100] sm:$0x11] }
 0x101   : > { %2340 = vmatprep.mubr.bf16.mxu1 %v11014_v62  ;;  %2659 = vmatpush1.bf16.msra.mxu0 %v9999_v12  ;;  %v1773_v15 = vrot.slane %v1772_v51, 4  ;;  %v10016_v50 = vld [vmem:[%s13538_s1 + $0x270] sm:$0xff]  }
 0x102   : > { %2660 = vmatprep.subr.bf16.mxu0 %v13575_v8  ;;  %3033 = vmatpush1.bf16.msra.mxu1 %v10012_v25  ;;  %v1815_v25 = vrot.slane %v1813_v47, 5 }
 0x103   : > { %3034 = vmatprep.subr.bf16.mxu1 %v13575_v8  ;;  %v1778_v5 = vsel %vm10789_vm2, %v1773_v15, %v1777_v60 }
 0x105   : > { %2661 = vmatpush1.bf16.msra.mxu0 %v10000_v48  ;;  %v1819_v48 = vrot.slane %v1817_v4, 4 }
 0x106   : > { %2662 = vmatprep.subr.bf16.mxu0 %v13575_v8  ;;  %3035 = vmatpush1.bf16.msra.mxu1 %v10014_v45  ;;  %v11108_v45 = vcombine.low %v1744_v37, %v1754_v1  ;;  %v10023_v37 = vld [vmem:[%s13538_s1 + $0x3f0] sm:$0xff]  }
 0x107   : > { %1360 = vmatmul.mubr.bf16.gmra.mrb[92].mxu0 %v10667_v30  ;;  %3036 = vmatprep.subr.bf16.mxu1 %v13575_v8  ;;  %v1762_v30 = vor.u32 %v10953_v29, %v10951_v0  ;;  %v10152_v0 = vld [vmem:[%s10378_s21 + $0xf0] sm:$0xff]  ;;  %v1820_v13 = vor.u32 %v1819_v48, %v1815_v25 }
 0x108   : > { %2341 = vmatmul.mubr.bf16.gmra.mrb[92].mxu1 %v11041_v52  ;;  %1367 = vmatprep.mubr.bf16.mxu0 %v10672_v31  ;;  %v10007_v31 = vld [vmem:[%s13538_s1 + $0x258] sm:$0xff]   ;;  %v1804_v29 = vshrl.u32 %v10152_v0, 16  ;;  %v1807_v27 = vshll.u32 %v10152_v0, 16  ;;  %v1537_v0 = vld [vmem:[%s10378_s21 + $0x128] sm:$0xff] }
 0x109   : > { %2348 = vmatprep.mubr.bf16.mxu1 %v11047_v18  ;;  %2663 = vmatpush1.bf16.msra.mxu0 %v10003_v22  ;;  %v1763_v43 = vrot.slane %v1762_v30, 4  ;;  %v1533_v22 = vld [vmem:[%s10378_s21 + $0x108] sm:$0xff]  ;;  %v1797_v30 = vrot.slane %v1796_v11, 4  ;;  %v1821_v15 = vrot.slane %v1820_v13, 4  ;;  %v1861_v11 = vshll.u32 %v1537_v0, 16 }
 0x10a   : > { %2664 = vmatprep.subr.bf16.mxu0 %v13575_v8  ;;  %3037 = vmatpush1.bf16.msra.mxu1 %v10015_v9  ;;  %v1806_v24 = vrot.slane %v1804_v29, 4  ;;  %v1809_v12 = vrot.slane %v1807_v27, 5  ;;  %v1787_v9 = vrot.slane %v1786_v35, 4  ;;  %v1828_v28 = vshrl.u32 %v1533_v22, 16  ;;  %v13576_v29 = vld [vmem:[#allocation3_spill] sm:$0xff] }
 0x10b   : > { %3038 = vmatprep.subr.bf16.mxu1 %v13575_v8  ;;  %v1768_v19 = vsel %vm10789_vm2, %v1763_v43, %v10990_v55  ;;  %v10020_v55 = vld [vmem:[%s13538_s1 + $0x3e8] sm:$0xff]   ;;  %v1831_v57 = vshll.u32 %v1533_v22, 16 }
 0x10c   : > { %v11111_v34 = vcombine.high %v1768_v19, %v1778_v5  ;;  %v1810_v1 = vor.u32 %v1809_v12, %v1806_v24  ;;  %v1792_v10 = vsel %vm10789_vm2, %v1787_v9, %v1791_v59  ;;  %v1843_v59 = vrot.slane %v1841_v17, 4  ;;  %v1538_v17 = vld [vmem:[%s10378_s21 + $0x130] sm:$0x11] }
 0x10d   : > { %2665 = vmatpush1.bf16.msra.mxu0 %v10007_v31  ;;  %v1823_v31 = vshll.u32 %v1532_v20, 16  ;;  %v1833_v26 = vrot.slane %v1831_v57, 5 }
 0x10e   : > { %2666 = vmatprep.subr.bf16.mxu0 %v13575_v8  ;;  %3039 = vmatpush1.bf16.msra.mxu1 %v10017_v39  ;;  %v11138_v39 = vcombine.low %v1768_v19, %v1778_v5  ;;  %v1811_v43 = vrot.slane %v1810_v1, 4  ;;  %v1844_v19 = vor.u32 %v1843_v59, %v1839_v14 }
 0x10f   : > { %1368 = vmatmul.mubr.bf16.gmra.mrb[96].mxu0 %v10697_v38  ;;  %3040 = vmatprep.subr.bf16.mxu1 %v13575_v8  ;;  %v10013_v38 = vld [vmem:[%s13538_s1 + $0x268] sm:$0xff]   ;;  %v1825_v60 = vrot.slane %v1823_v31, 5  ;;  %v1863_v31 = vrot.slane %v1861_v11, 5  ;;  %v1542_v11 = vld [vmem:[%s10378_s21 + $0x150] sm:$0xff] }
 0x110   : > { %2349 = vmatmul.mubr.bf16.gmra.mrb[96].mxu1 %v11076_v63  ;;  %1375 = vmatprep.mubr.bf16.mxu0 %v10700_v41  ;;  %v1799_v41 = vshll.u32 %v1529_v33, 16  ;;  %v1536_v33 = vld [vmem:[%s10378_s21 + $0x120] sm:$0xff]  ;;  %v1816_v27 = vsel %vm10789_vm2, %v1811_v43, %v1815_v25  ;;  %v1845_v9 = vrot.slane %v1844_v19, 4 }
 0x111   : > { %2356 = vmatprep.mubr.bf16.mxu1 %v11078_v23  ;;  %2667 = vmatpush1.bf16.msra.mxu0 %v10010_v58  ;;  %v1830_v58 = vrot.slane %v1828_v28, 4  ;;  %v1826_v47 = vsel %vm10789_vm2, %v1821_v15, %v1825_v60  ;;  %v1852_v5 = vshrl.u32 %v1536_v33, 16  ;;  %v1855_v35 = vshll.u32 %v1536_v33, 16 }
 0x112   : > { %2668 = vmatprep.subr.bf16.mxu0 %v13575_v8  ;;  %3041 = vmatpush1.bf16.msra.mxu1 %v10018_v54  ;;  %v1801_v51 = vrot.slane %v1799_v41, 5  ;;  %v1535_v54 = vld [vmem:[%s10378_s21 + $0x118] sm:$0x11]  ;;  %v1865_v41 = vshrl.u32 %v1537_v0, 16  ;;  %v11158_v48 = vcombine.high %v1816_v27, %v1826_v47 }
 0x113   : > { %3042 = vmatprep.subr.bf16.mxu1 %v13575_v8  ;;  %v1834_v4 = vor.u32 %v1833_v26, %v1830_v58  ;;  %v1854_v1 = vrot.slane %v1852_v5, 4  ;;  %v1857_v13 = vrot.slane %v1855_v35, 5  ;;  %v1871_v26 = vshll.u32 %v1538_v17, 16 }
 0x114   : > { %v1802_v7 = vsel %vm10789_vm2, %v1797_v30, %v1801_v51  ;;  %v1867_v28 = vrot.slane %v1865_v41, 4  ;;  %v11177_v5 = vcombine.low %v1816_v27, %v1826_v47  ;;  %v1543_v41 = vld [vmem:[%s10378_s21 + $0x158] sm:$0xff]  ;;  %v10157_v27 = vld [vmem:[%s10378_s21 + $0x120] ss:$8 sps:$4 sm:$0xff]  }
 0x115   : > { %2669 = vmatpush1.bf16.msra.mxu0 %v10013_v38  ;;  %v11141_v16 = vcombine.high %v1792_v10, %v1802_v7  ;;  %v1847_v38 = vshll.u32 %v1535_v54, 16  ;;  %v11156_v25 = vcombine.low %v1792_v10, %v1802_v7  ;;  %v10155_v10 = vld [vmem:[%s10378_s21 + $0x108] ss:$8 sps:$4 sm:$0xff]   ;;  %v1540_v7 = vld [vmem:[%s10378_s21 + $0x140] sm:$0xff]  ;;  %v1858_v60 = vor.u32 %v1857_v13, %v1854_v1 }
 0x116   : > { %2670 = vmatprep.subr.bf16.mxu0 %v13575_v8  ;;  %3043 = vmatpush1.bf16.msra.mxu1 %v10020_v55  ;;  %v1868_v58 = vor.u32 %v1867_v28, %v1863_v31  ;;  %v1885_v0 = vshll.u32 %v1540_v7, 16  ;;  %v1541_v47 = vld [vmem:[%s10378_s21 + $0x148] sm:$0x11]  ;;  %v1900_v13 = vshrl.u32 %v1542_v11, 16  ;;  %v1903_v28 = vshll.u32 %v1542_v11, 16 }
 0x117   : > { %1376 = vmatmul.mubr.bf16.gmra.mrb[100].mxu0 %v10723_v53  ;;  %3044 = vmatprep.subr.bf16.mxu1 %v13575_v8  ;;  %v10022_v53 = vld [vmem:[%s13538_s1 + $0x278] sm:$0xff]   ;;  %v1849_v30 = vrot.slane %v1847_v38, 5  ;;  %v1913_v17 = vshrl.u32 %v1543_v41, 16  ;;  %v1544_v11 = vld [vmem:[%s10378_s21 + $0x160] sm:$0x11] }
 0x118   : > { %2357 = vmatmul.mubr.bf16.gmra.mrb[100].mxu1 %v11108_v45  ;;  %1383 = vmatprep.mubr.bf16.mxu0 %v10726_v56  ;;  %v10024_v56 = vld [vmem:[%s13538_s1 + $0x3f8] sm:$0xff]  }
 0x119   : > { %2364 = vmatprep.mubr.bf16.mxu1 %v11111_v34  ;;  %2671 = vmatpush1.bf16.msra.mxu0 %v10016_v50  ;;  %v1835_v50 = vrot.slane %v1834_v4, 4  ;;  %v1850_v15 = vsel %vm10789_vm2, %v1845_v9, %v1849_v30 }
 0x11a   : > { %2672 = vmatprep.subr.bf16.mxu0 %v13575_v8  ;;  %3045 = vmatpush1.bf16.msra.mxu1 %v10023_v37 }
 0x11b   : > { %3046 = vmatprep.subr.bf16.mxu1 %v13575_v8  ;;  %v1840_v43 = vsel %vm10789_vm2, %v1835_v50, %v1839_v14 }
 0x11c   : > { %v11179_v35 = vcombine.high %v1840_v43, %v1850_v15 }
 0x11d   : > { %2673 = vmatpush1.bf16.msra.mxu0 %v10022_v53  ;;  %v1539_v53 = vld [vmem:[%s10378_s21 + $0x138] sm:$0xff] }
 0x11e   : > { %3047 = vmatpush1.bf16.msra.mxu1 %v10024_v56  ;;  %3705 = vmatprep.subr.bf16.mxu0 %v13575_v8  ;;  %v10156_v56 = vld [vmem:[%s10378_s21 + $0x124] ss:$8 sps:$4 sm:$0xff]   ;;  %v1876_v59 = vshrl.u32 %v1539_v53, 16  ;;  %v1879_v33 = vshll.u32 %v1539_v53, 16 }
 0x11f   : > { %1384 = vmatmul.mubr.bf16.gmra.mrb[104].mxu0 %v13576_v29  ;;  %4065 = vmatprep.subr.bf16.mxu1 %v13575_v8  ;;  %v1889_v29 = vshrl.u32 %v1540_v7, 16  ;;  %v10158_v53 = vld [vmem:[%s10378_s21 + $0x13c] ss:$8 sps:$4 sm:$0xff]  }
 0x120   : > { %2365 = vmatmul.mubr.bf16.gmra.mrb[104].mxu1 %v11138_v39  ;;  %1391 = vmatprep.mubr.bf16.mxu0 %v10154_v3  ;;  %v1878_v50 = vrot.slane %v1876_v59, 4 }
 0x121   : > { %2372 = vmatprep.mubr.bf16.mxu1 %v11141_v16  ;;  %v1891_v1 = vrot.slane %v1889_v29, 4 }
 0x122   : > { %v722_v55 = vpop.f32.mrb[0].mxu0  ;;  %v1005_v24 = vpop.f32.mrb[0].mxu1 }
 0x123   : > { %v724_v12 = vpop.f32.mrb[1].mxu0  ;;  %v11160_v20 = vadd.f32 %v1005_v24, %v722_v55  ;;  %v1007_v22 = vpop.f32.mrb[1].mxu1 }
 0x124   : > { %v725_v49 = vpop.f32.mrb[2].mxu0  ;;  %v1008_v51 = vpop.f32.mrb[2].mxu1  ;;  %v1859_v12 = vrot.slane %v1858_v60, 4  ;;  %v1869_v22 = vrot.slane %v1868_v58, 4 }
 0x125   : > { %v727_v37 = vpop.f32.mrb[3].mxu0  ;;  %v11162_v57 = vadd.f32 %v1008_v51, %v725_v49  ;;  %v1010_v40 = vpop.f32.mrb[3].mxu1  ;;  %v1873_v49 = vrot.slane %v1871_v26, 5  ;;  %v1881_v51 = vrot.slane %v1879_v33, 5  ;;  %v1895_v26 = vshll.u32 %v1541_v47, 16 }
 0x126   : > { %v1887_v37 = vrot.slane %v1885_v0, 5  ;;  %v1909_v40 = vshll.u32 %v1543_v41, 16  ;;  %v1902_v33 = vrot.slane %v1900_v13, 4  ;;  %v1905_v0 = vrot.slane %v1903_v28, 5  ;;  %v1545_v41 = vld [vmem:[%s10378_s21 + $0x168] sm:$0xff] }
 0x127   : > { %1392 = vmatmul.mubr.bf16.gmra.mrb[108].mxu0 %v10155_v10  ;;  %v1864_v10 = vsel %vm10789_vm2, %v1859_v12, %v1863_v31  ;;  %v1882_v60 = vor.u32 %v1881_v51, %v1878_v50  ;;  %v10160_v28 = vld [vmem:[%s10378_s21 + $0x154] ss:$8 sps:$4 sm:$0xff]  }
 0x128   : > { %2373 = vmatmul.mubr.bf16.gmra.mrb[108].mxu1 %v11156_v25  ;;  %1399 = vmatprep.mubr.bf16.mxu0 %v10156_v56  ;;  %v1874_v56 = vsel %vm10789_vm2, %v1869_v22, %v1873_v49  ;;  %v1892_v58 = vor.u32 %v1891_v1, %v1887_v37  ;;  %v1911_v29 = vrot.slane %v1909_v40, 5  ;;  %v1546_v22 = vld [vmem:[%s10378_s21 + $0x170] sm:$0xff]  ;;  %v1897_v1 = vrot.slane %v1895_v26, 5 }
 0x129   : > { %2380 = vmatprep.mubr.bf16.mxu1 %v11158_v48  ;;  %v11200_v12 = vcombine.high %v1864_v10, %v1874_v56  ;;  %v1906_v47 = vor.u32 %v1905_v0, %v1902_v33  ;;  %v1927_v40 = vshll.u32 %v1545_v41, 16 }
 0x12a   : > { %v730_v54 = vpop.f32.mrb[4].mxu0  ;;  %v1893_v51 = vrot.slane %v1892_v58, 4 }
 0x12b   : > { %v1013_v3 = vpop.f32.mrb[4].mxu1  ;;  %v732_v4 = vpop.f32.mrb[5].mxu0  ;;  %v1907_v33 = vrot.slane %v1906_v47, 4  ;;  %v10161_v47 = vld [vmem:[%s10378_s21 + $0x150] ss:$8 sps:$4 sm:$0xff]  }
 0x12c   : > { %v11175_v19 = vadd.f32 %v1013_v3, %v730_v54  ;;  %v1015_v14 = vpop.f32.mrb[5].mxu1  ;;  %v733_v38 = vpop.f32.mrb[6].mxu0  ;;  %v1915_v3 = vrot.slane %v1913_v17, 4  ;;  %v1933_v17 = vshll.u32 %v1546_v22, 16  ;;  %v1898_v58 = vsel %vm10789_vm2, %v1893_v51, %v1897_v1  ;;  %v1548_v1 = vld [vmem:[%s10378_s21 + $0x180] sm:$0xff] }
 0x12d   : > { %v1016_v55 = vpop.f32.mrb[6].mxu1  ;;  %v735_v24 = vpop.f32.mrb[7].mxu0 }
 0x12e   : > { %v11183_v9 = vadd.f32 %v1016_v55, %v733_v38  ;;  %v1018_v30 = vpop.f32.mrb[7].mxu1  ;;  %v11196_v38 = vcombine.low %v1840_v43, %v1850_v15  ;;  %v1916_v13 = vor.u32 %v1915_v3, %v1911_v29  ;;  %v1919_v43 = vshll.u32 %v1544_v11, 16 }
 0x12f   : > { %1400 = vmatmul.mubr.bf16.gmra.mrb[112].mxu0 %v10157_v27  ;;  %v1883_v30 = vrot.slane %v1882_v60, 4  ;;  %v10159_v27 = vld [vmem:[%s10378_s21 + $0x138] ss:$8 sps:$4 sm:$0xff]   ;;  %v1924_v15 = vshrl.u32 %v1545_v41, 16  ;;  %v1929_v11 = vrot.slane %v1927_v40, 5 }
 0x130   : > { %2381 = vmatmul.mubr.bf16.gmra.mrb[112].mxu1 %v11177_v5  ;;  %1407 = vmatprep.mubr.bf16.mxu0 %v10158_v53  ;;  %v1937_v53 = vshrl.u32 %v1546_v22, 16  ;;  %v1917_v0 = vrot.slane %v1916_v13, 4  ;;  %v1921_v3 = vrot.slane %v1919_v43, 5  ;;  %v1912_v13 = vsel %vm10789_vm2, %v1907_v33, %v1911_v29  ;;  %v10162_v43 = vld [vmem:[%s10378_s21 + $0x16c] ss:$8 sps:$4 sm:$0xff]  }
 0x131   : > { %2388 = vmatprep.mubr.bf16.mxu1 %v11179_v35  ;;  %v1888_v60 = vsel %vm10789_vm2, %v1883_v30, %v1887_v37  ;;  %v1935_v37 = vrot.slane %v1933_v17, 5 }
 0x132   : > { %v738_v7 = vpop.f32.mrb[8].mxu0  ;;  %v1939_v41 = vrot.slane %v1937_v53, 4  ;;  %v11217_v22 = vcombine.high %v1888_v60, %v1898_v58  ;;  %v1948_v53 = vshrl.u32 %v1548_v1, 16  ;;  %v11232_v29 = vcombine.low %v1888_v60, %v1898_v58 }
 0x133   : > { %v1021_v59 = vpop.f32.mrb[8].mxu1  ;;  %v740_v54 = vpop.f32.mrb[9].mxu0 }
 0x134   : > { %v11194_v4 = vadd.f32 %v1021_v59, %v738_v7  ;;  %v1023_v31 = vpop.f32.mrb[9].mxu1  ;;  %v741_v14 = vpop.f32.mrb[10].mxu0  ;;  %v11209_v59 = vcombine.low %v1864_v10, %v1874_v56  ;;  %v1940_v40 = vor.u32 %v1939_v41, %v1935_v37 }
 0x135   : > { %v1024_v55 = vpop.f32.mrb[10].mxu1  ;;  %v743_v24 = vpop.f32.mrb[11].mxu0  ;;  %v1926_v31 = vrot.slane %v1924_v15, 4  ;;  %v1922_v15 = vsel %vm10789_vm2, %v1917_v0, %v1921_v3 }
 0x136   : > { %v11203_v49 = vadd.f32 %v1024_v55, %v741_v14  ;;  %v1026_v50 = vpop.f32.mrb[11].mxu1  ;;  %v11234_v33 = vcombine.high %v1912_v13, %v1922_v15 }
 0x137   : > { %1408 = vmatmul.mubr.bf16.gmra.mrb[116].mxu0 %v10159_v27  ;;  %v1547_v50 = vld [vmem:[%s10378_s21 + $0x178] sm:$0x11]  ;;  %v1549_v27 = vld [vmem:[%s10378_s21 + $0x188] sm:$0xff] }
 0x138   : > { %2389 = vmatmul.mubr.bf16.gmra.mrb[116].mxu1 %v11196_v38  ;;  %1415 = vmatprep.mubr.bf16.mxu0 %v10160_v28  ;;  %v1930_v28 = vor.u32 %v1929_v11, %v1926_v31  ;;  %v1943_v17 = vshll.u32 %v1547_v50, 16  ;;  %v1941_v11 = vrot.slane %v1940_v40, 4 }
 0x139   : > { %2396 = vmatprep.mubr.bf16.mxu1 %v11200_v12 }
 0x13a   : > { %v746_v7 = vpop.f32.mrb[12].mxu0  ;;  %v1931_v31 = vrot.slane %v1930_v28, 4  ;;  %v1945_v41 = vrot.slane %v1943_v17, 5  ;;  %v10164_v28 = vld [vmem:[%s10378_s21 + $0x184] ss:$8 sps:$4 sm:$0xff]  }
 0x13b   : > { %v1029_v26 = vpop.f32.mrb[12].mxu1  ;;  %v748_v54 = vpop.f32.mrb[13].mxu0 }
 0x13c   : > { %v11215_v14 = vadd.f32 %v1029_v26, %v746_v7  ;;  %v1031_v10 = vpop.f32.mrb[13].mxu1  ;;  %v749_v56 = vpop.f32.mrb[14].mxu0  ;;  %v1951_v7 = vshll.u32 %v1548_v1, 16  ;;  %v1957_v26 = vshll.u32 %v1549_v27, 16  ;;  %v1961_v54 = vshrl.u32 %v1549_v27, 16 }
 0x13d   : > { %v1032_v55 = vpop.f32.mrb[14].mxu1  ;;  %v751_v24 = vpop.f32.mrb[15].mxu0  ;;  %v1950_v1 = vrot.slane %v1948_v53, 4  ;;  %v1936_v40 = vsel %vm10789_vm2, %v1931_v31, %v1935_v37  ;;  %v1946_v17 = vsel %vm10789_vm2, %v1941_v11, %v1945_v41  ;;  %v11253_v31 = vcombine.low %v1912_v13, %v1922_v15  ;;  %v10166_v13 = vld [vmem:[%s10378_s21 + $0x19c] ss:$8 sps:$4 sm:$0xff]  }
 0x13e   : > { %v11220_v30 = vadd.f32 %v1032_v55, %v749_v56  ;;  %v1034_v51 = vpop.f32.mrb[15].mxu1  ;;  %v1953_v27 = vrot.slane %v1951_v7, 5  ;;  %v1959_v60 = vrot.slane %v1957_v26, 5  ;;  %v1963_v58 = vrot.slane %v1961_v54, 4 }
 0x13f   : > { %1416 = vmatmul.mubr.bf16.gmra.mrb[120].mxu0 %v10161_v47  ;;  %v11255_v11 = vcombine.high %v1936_v40, %v1946_v17 }
 0x140   : > { %13577 = vst [vmem:[#allocation3_spill] sm:$0xff] %v11220_v30  ;;  %2397 = vmatmul.mubr.bf16.gmra.mrb[120].mxu1 %v11209_v59  ;;  %1423 = vmatprep.mubr.bf16.mxu0 %v10162_v43  ;;  %v1954_v53 = vor.u32 %v1953_v27, %v1950_v1  ;;  %v1964_v7 = vor.u32 %v1963_v58, %v1959_v60  ;;  %v1553_v30 = vld [vmem:[%s10378_s21 + $0x1a8] sm:$0x11] }
 0x141   : > { %2404 = vmatprep.mubr.bf16.mxu1 %v11217_v22 }
 0x142   : > { %v754_v10 = vpop.f32.mrb[16].mxu0  ;;  %v1955_v27 = vrot.slane %v1954_v53, 4  ;;  %v1965_v58 = vrot.slane %v1964_v7, 4 }
 0x143   : > { %v1037_v56 = vpop.f32.mrb[16].mxu1  ;;  %v756_v55 = vpop.f32.mrb[17].mxu0 }
 0x144   : > { %v11236_v24 = vadd.f32 %v1037_v56, %v754_v10  ;;  %v1039_v0 = vpop.f32.mrb[17].mxu1  ;;  %v757_v3 = vpop.f32.mrb[18].mxu0  ;;  %v1550_v55 = vld [vmem:[%s10378_s21 + $0x190] sm:$0x11]  ;;  %v1551_v10 = vld [vmem:[%s10378_s21 + $0x198] sm:$0xff]  ;;  %v1960_v15 = vsel %vm10789_vm2, %v1955_v27, %v1959_v60 }
 0x145   : > { %v1040_v50 = vpop.f32.mrb[18].mxu1  ;;  %v759_v51 = vpop.f32.mrb[19].mxu0  ;;  %v10163_v56 = vld [vmem:[%s10378_s21 + $0x168] ss:$8 sps:$4 sm:$0xff]   ;;  %v1552_v0 = vld [vmem:[%s10378_s21 + $0x1a0] sm:$0xff]  ;;  %v1967_v26 = vshll.u32 %v1550_v55, 16 }
 0x146   : > { %13578 = vst [vmem:[#allocation4_spill] sm:$0xff] %v11236_v24  ;;  %v11238_v47 = vadd.f32 %v1040_v50, %v757_v3  ;;  %v1042_v43 = vpop.f32.mrb[19].mxu1  ;;  %v1972_v54 = vshrl.u32 %v1551_v10, 16  ;;  %v1975_v50 = vshll.u32 %v1551_v10, 16  ;;  %v1981_v51 = vshll.u32 %v1552_v0, 16 }
 0x147   : > { %1424 = vmatmul.mubr.bf16.gmra.mrb[124].mxu0 %v10163_v56  ;;  %v1985_v43 = vshrl.u32 %v1552_v0, 16  ;;  %v1969_v55 = vrot.slane %v1967_v26, 5 }
 0x148   : > { %13579 = vst [vmem:[#allocation5_spill] sm:$0xff] %v11238_v47  ;;  %2405 = vmatmul.mubr.bf16.gmra.mrb[124].mxu1 %v11232_v29  ;;  %1431 = vmatprep.mubr.bf16.mxu0 %v10164_v28  ;;  %v1974_v10 = vrot.slane %v1972_v54, 4 }
 0x149   : > { %2412 = vmatprep.mubr.bf16.mxu1 %v11234_v33  ;;  %v1970_v7 = vsel %vm10789_vm2, %v1965_v58, %v1969_v55 }
 0x14a   : > { %v762_v3 = vpop.f32.mrb[20].mxu0 }
 0x14b   : > { %v1045_v56 = vpop.f32.mrb[20].mxu1  ;;  %v764_v47 = vpop.f32.mrb[21].mxu0 }
 0x14c   : > { %v11251_v24 = vadd.f32 %v1045_v56, %v762_v3  ;;  %v1047_v28 = vpop.f32.mrb[21].mxu1  ;;  %v765_v37 = vpop.f32.mrb[22].mxu0  ;;  %v1977_v3 = vrot.slane %v1975_v50, 5  ;;  %v1983_v56 = vrot.slane %v1981_v51, 5  ;;  %v1991_v50 = vshll.u32 %v1553_v30, 16 }
 0x14d   : > { %v1048_v41 = vpop.f32.mrb[22].mxu1  ;;  %v767_v1 = vpop.f32.mrb[23].mxu0  ;;  %v10165_v28 = vld [vmem:[%s10378_s21 + $0x180] ss:$8 sps:$4 sm:$0xff]  }
 0x14e   : > { %13580 = vst [vmem:[#allocation6_spill] sm:$0xff] %v11251_v24  ;;  %v11257_v0 = vadd.f32 %v1048_v41, %v765_v37  ;;  %v1050_v47 = vpop.f32.mrb[23].mxu1  ;;  %v1987_v24 = vrot.slane %v1985_v43, 4  ;;  %v1978_v26 = vor.u32 %v1977_v3, %v1974_v10  ;;  %v1993_v10 = vrot.slane %v1991_v50, 5  ;;  %v10167_v3 = vld [vmem:[%s10378_s21 + $0x198] ss:$8 sps:$4 sm:$0xff]  }
 0x14f   : > { %1432 = vmatmul.mubr.bf16.gmra.mrb[128].mxu0 %v10165_v28  ;;  %v11270_v47 = vcombine.low %v1936_v40, %v1946_v17  ;;  %v11272_v28 = vcombine.high %v1960_v15, %v1970_v7  ;;  %v11281_v40 = vld [vmem:[%s10378_s21 + $0x1c8] sm:$0xff]  ;;  %v11284_v17 = vld [vmem:[%s10378_s21 + $0x1d0] sm:$0xff] }
 0x150   : > { %2413 = vmatmul.mubr.bf16.gmra.mrb[128].mxu1 %v11253_v31  ;;  %1439 = vmatprep.mubr.bf16.mxu0 %v10166_v13  ;;  %v1988_v54 = vor.u32 %v1987_v24, %v1983_v56  ;;  %v1979_v55 = vrot.slane %v1978_v26, 4  ;;  %v10168_v13 = vld [vmem:[%s10378_s21 + $0x1b4] ss:$8 sps:$4 sm:$0xff]  }
 0x151   : > { %2420 = vmatprep.mubr.bf16.mxu1 %v11255_v11 }
 0x152   : > { %v770_v53 = vpop.f32.mrb[24].mxu0  ;;  %v1989_v30 = vrot.slane %v1988_v54, 4 }
 0x153   : > { %v1053_v51 = vpop.f32.mrb[24].mxu1  ;;  %v772_v43 = vpop.f32.mrb[25].mxu0 }
 0x154   : > { %v11268_v37 = vadd.f32 %v1053_v51, %v770_v53  ;;  %v1055_v41 = vpop.f32.mrb[25].mxu1  ;;  %v773_v1 = vpop.f32.mrb[26].mxu0  ;;  %v1984_v51 = vsel %vm10789_vm2, %v1979_v55, %v1983_v56  ;;  %v1994_v26 = vsel %vm10789_vm2, %v1989_v30, %v1993_v10  ;;  %v10169_v55 = vld [vmem:[%s10378_s21 + $0x1b0] ss:$8 sps:$4 sm:$0xff]   ;;  %v8467_v10 = vcombine.low %v11281_v40, %v11284_v17 }
 0x155   : > { %v1056_v60 = vpop.f32.mrb[26].mxu1  ;;  %v775_v27 = vpop.f32.mrb[27].mxu0 }
 0x156   : > { %v11274_v58 = vadd.f32 %v1056_v60, %v773_v1  ;;  %v1058_v24 = vpop.f32.mrb[27].mxu1  ;;  %v11292_v60 = vcombine.low %v1960_v15, %v1970_v7  ;;  %v8468_v27 = vcombine.high %v11281_v40, %v11284_v17 }
 0x157   : > { %1440 = vmatmul.mubr.bf16.gmra.mrb[132].mxu0 %v10167_v3 }
 0x158   : > { %13581 = vst [vmem:[#allocation7_spill] sm:$0xff] %v11274_v58  ;;  %2421 = vmatmul.mubr.bf16.gmra.mrb[132].mxu1 %v11270_v47  ;;  %1447 = vmatprep.mubr.bf16.mxu0 %v10168_v13  ;;  %v11296_v13 = vcombine.high %v1984_v51, %v1994_v26 }
 0x159   : > { %2428 = vmatprep.mubr.bf16.mxu1 %v11272_v28 }
 0x15a   : > { %v778_v53 = vpop.f32.mrb[28].mxu0 }
 0x15b   : > { %v1061_v54 = vpop.f32.mrb[28].mxu1  ;;  %v780_v50 = vpop.f32.mrb[29].mxu0 }
 0x15c   : > { %v11290_v43 = vadd.f32 %v1061_v54, %v778_v53  ;;  %v1063_v41 = vpop.f32.mrb[29].mxu1  ;;  %v781_v1 = vpop.f32.mrb[30].mxu0 }
 0x15d   : > { %v1064_v24 = vpop.f32.mrb[30].mxu1  ;;  %v783_v3 = vpop.f32.mrb[31].mxu0  ;;  %v11307_v41 = vcombine.low %v1984_v51, %v1994_v26  ;;  %v10025_v26 = vld [vmem:[%s13538_s1 + $0x100] sm:$0xff]  }
 0x15e   : > { %v11298_v58 = vadd.f32 %v1064_v24, %v781_v1  ;;  %v1066_v56 = vpop.f32.mrb[31].mxu1 }
 0x15f   : > { %1448 = vmatmul.mubr.bf16.gmra.mrb[136].mxu0 %v10169_v55 }
 0x160   : > { %2429 = vmatmul.mubr.bf16.gmra.mrb[136].mxu1 %v11292_v60  ;;  %1455 = vmatprep.mubr.bf16.mxu0 %v8468_v27 }
 0x161   : > { %2436 = vmatprep.mubr.bf16.mxu1 %v11296_v13 }
 0x162   : > { %v786_v30 = vpop.f32.mrb[32].mxu0 }
 0x163   : > { %v1069_v15 = vpop.f32.mrb[32].mxu1  ;;  %v788_v7 = vpop.f32.mrb[33].mxu0 }
 0x164   : > { %v11305_v53 = vadd.f32 %v1069_v15, %v786_v30  ;;  %v1071_v54 = vpop.f32.mrb[33].mxu1  ;;  %v789_v50 = vpop.f32.mrb[34].mxu0 }
 0x165   : > { %v1072_v1 = vpop.f32.mrb[34].mxu1  ;;  %v791_v24 = vpop.f32.mrb[35].mxu0 }
 0x166   : > { %v11309_v3 = vadd.f32 %v1072_v1, %v789_v50  ;;  %v1074_v56 = vpop.f32.mrb[35].mxu1  ;;  %v10026_v24 = vld [vmem:[%s13538_s1 + $0x108] sm:$0xff]  }
 0x167   : > { %1456 = vmatmul.mubr.bf16.gmra.mrb[140].mxu0 %v8467_v10 }
 0x168   : > { %2437 = vmatmul.mubr.bf16.gmra.mrb[140].mxu1 %v11307_v41  ;;  %2674 = vmatprep.mubr.bf16.mxu0 %v10847_v21  ;;  %v10035_v21 = vld [vmem:[%s13538_s1 + $0x280] sm:$0xff]  }
 0x169   : > { %3048 = vmatprep.mubr.bf16.mxu1 %v10905_v42 }
 0x16a   : > { %v794_v27 = vpop.f32.mrb[36].mxu0 }
 0x16b   : > { %v1077_v55 = vpop.f32.mrb[36].mxu1  ;;  %v796_v30 = vpop.f32.mrb[37].mxu0 }
 0x16c   : > { %v11314_v15 = vadd.f32 %v1077_v55, %v794_v27  ;;  %v1079_v7 = vpop.f32.mrb[37].mxu1  ;;  %v797_v51 = vpop.f32.mrb[38].mxu0  ;;  %v10036_v27 = vld [vmem:[%s13538_s1 + $0x288] sm:$0xff]  }
 0x16d   : > { %v1080_v54 = vpop.f32.mrb[38].mxu1  ;;  %v799_v50 = vpop.f32.mrb[39].mxu0 }
 0x16e   : > { %v11319_v10 = vadd.f32 %v1080_v54, %v797_v51  ;;  %v1082_v1 = vpop.f32.mrb[39].mxu1  ;;  %v10027_v54 = vld [vmem:[%s13538_s1 + $0x110] sm:$0xff]  }
 0x16f   : > { %2675 = vmatmul.mubr.bf16.vlgmr.msra.gmra.mrb[144].mxu0 %v10891_v44 }
 0x170   : > { %3706 = vmatpush1.bf16.msra.mxu0 %v10025_v26  ;;  %3049 = vmatmul.mubr.bf16.vlgmr.msra.gmra.mrb[144].mxu1 %v10938_v61 }
 0x171   : > { %2682 = vmatprep.mubr.bf16.mxu0 %v10905_v42  ;;  %3056 = vmatprep.mubr.bf16.mxu1 %v10940_v6 }
 0x172   : > { %v802_v56 = vpop.f32.mrb[40].mxu0  ;;  %3707 = vmatprep.subr.bf16.mxu0 %v13575_v8  ;;  %4066 = vmatpush1.bf16.msra.mxu1 %v10035_v21  ;;  %v10038_v21 = vld [vmem:[%s13538_s1 + $0x290] sm:$0xff]  }
 0x173   : > { %v1085_v44 = vpop.f32.mrb[40].mxu1  ;;  %v804_v55 = vpop.f32.mrb[41].mxu0  ;;  %4067 = vmatprep.subr.bf16.mxu1 %v13575_v8 }
 0x174   : > { %v11336_v30 = vadd.f32 %v1085_v44, %v802_v56  ;;  %v1087_v7 = vpop.f32.mrb[41].mxu1  ;;  %v805_v51 = vpop.f32.mrb[42].mxu0  ;;  %3708 = vmatpush1.bf16.msra.mxu0 %v10026_v24  ;;  %v10028_v24 = vld [vmem:[%s13538_s1 + $0x118] sm:$0xff]  }
 0x175   : > { %v1088_v42 = vpop.f32.mrb[42].mxu1  ;;  %v807_v26 = vpop.f32.mrb[43].mxu0  ;;  %3709 = vmatprep.subr.bf16.mxu0 %v13575_v8 }
 0x176   : > { %v11342_v50 = vadd.f32 %v1088_v42, %v805_v51  ;;  %v1090_v1 = vpop.f32.mrb[43].mxu1  ;;  %4068 = vmatpush1.bf16.msra.mxu1 %v10036_v27  ;;  %v10029_v26 = vld [vmem:[%s13538_s1 + $0x120] sm:$0xff]  }
 0x177   : > { %2683 = vmatmul.mubr.bf16.gmra.mrb[148].mxu0 %v10938_v61  ;;  %4069 = vmatprep.subr.bf16.mxu1 %v13575_v8  ;;  %v10039_v61 = vld [vmem:[%s13538_s1 + $0x298] sm:$0xff]  }
 0x178   : > { %3057 = vmatmul.mubr.bf16.gmra.mrb[148].mxu1 %v10975_v36  ;;  %2690 = vmatprep.mubr.bf16.mxu0 %v10940_v6 }
 0x179   : > { %3064 = vmatprep.mubr.bf16.mxu1 %v10980_v46  ;;  %3710 = vmatpush1.bf16.msra.mxu0 %v10027_v54 }
 0x17a   : > { %v810_v56 = vpop.f32.mrb[44].mxu0  ;;  %3711 = vmatprep.subr.bf16.mxu0 %v13575_v8  ;;  %4070 = vmatpush1.bf16.msra.mxu1 %v10038_v21  ;;  %v10040_v21 = vld [vmem:[%s13538_s1 + $0x2a0] sm:$0xff]  }
 0x17b   : > { %v1093_v27 = vpop.f32.mrb[44].mxu1  ;;  %v812_v44 = vpop.f32.mrb[45].mxu0  ;;  %4071 = vmatprep.subr.bf16.mxu1 %v13575_v8 }
 0x17c   : > { %v11360_v6 = vadd.f32 %v1093_v27, %v810_v56  ;;  %v1095_v55 = vpop.f32.mrb[45].mxu1  ;;  %v813_v7 = vpop.f32.mrb[46].mxu0 }
 0x17d   : > { %v1096_v51 = vpop.f32.mrb[46].mxu1  ;;  %v815_v42 = vpop.f32.mrb[47].mxu0  ;;  %3712 = vmatpush1.bf16.msra.mxu0 %v10028_v24  ;;  %v10030_v24 = vld [vmem:[%s13538_s1 + $0x128] sm:$0xff]  }
 0x17e   : > { %v11365_v54 = vadd.f32 %v1096_v51, %v813_v7  ;;  %v1098_v1 = vpop.f32.mrb[47].mxu1  ;;  %3713 = vmatprep.subr.bf16.mxu0 %v13575_v8  ;;  %4072 = vmatpush1.bf16.msra.mxu1 %v10039_v61  ;;  %v10031_v42 = vld [vmem:[%s13538_s1 + $0x130] sm:$0xff]  }
 0x17f   : > { %2691 = vmatmul.mubr.bf16.gmra.mrb[152].mxu0 %v10975_v36  ;;  %4073 = vmatprep.subr.bf16.mxu1 %v13575_v8  ;;  %v10042_v36 = vld [vmem:[%s13538_s1 + $0x2a8] sm:$0xff]  }
 0x180   : > { %3065 = vmatmul.mubr.bf16.gmra.mrb[152].mxu1 %v11009_v2  ;;  %2698 = vmatprep.mubr.bf16.mxu0 %v10980_v46 }
 0x181   : > { %3072 = vmatprep.mubr.bf16.mxu1 %v11014_v62  ;;  %3714 = vmatpush1.bf16.msra.mxu0 %v10029_v26 }
 0x182   : > { %v818_v56 = vpop.f32.mrb[48].mxu0  ;;  %3715 = vmatprep.subr.bf16.mxu0 %v13575_v8  ;;  %4074 = vmatpush1.bf16.msra.mxu1 %v10040_v21  ;;  %v10043_v21 = vld [vmem:[%s13538_s1 + $0x2b0] sm:$0xff]  }
 0x183   : > { %v1101_v61 = vpop.f32.mrb[48].mxu1  ;;  %v820_v27 = vpop.f32.mrb[49].mxu0  ;;  %4075 = vmatprep.subr.bf16.mxu1 %v13575_v8 }
 0x184   : > { %v11384_v46 = vadd.f32 %v1101_v61, %v818_v56  ;;  %v1103_v44 = vpop.f32.mrb[49].mxu1  ;;  %v821_v55 = vpop.f32.mrb[50].mxu0 }
 0x185   : > { %v1104_v7 = vpop.f32.mrb[50].mxu1  ;;  %v823_v51 = vpop.f32.mrb[51].mxu0  ;;  %3716 = vmatpush1.bf16.msra.mxu0 %v10030_v24  ;;  %v10032_v24 = vld [vmem:[%s13538_s1 + $0x138] sm:$0xff]  }
 0x186   : > { %v11389_v26 = vadd.f32 %v1104_v7, %v821_v55  ;;  %v1106_v1 = vpop.f32.mrb[51].mxu1  ;;  %3717 = vmatprep.subr.bf16.mxu0 %v13575_v8  ;;  %4076 = vmatpush1.bf16.msra.mxu1 %v10042_v36  ;;  %v10033_v51 = vld [vmem:[%s13538_s1 + $0x140] sm:$0xff]  }
 0x187   : > { %2699 = vmatmul.mubr.bf16.gmra.mrb[156].mxu0 %v11009_v2  ;;  %4077 = vmatprep.subr.bf16.mxu1 %v13575_v8  ;;  %v10045_v2 = vld [vmem:[%s13538_s1 + $0x2b8] sm:$0xff]  }
 0x188   : > { %3073 = vmatmul.mubr.bf16.gmra.mrb[156].mxu1 %v11041_v52  ;;  %2706 = vmatprep.mubr.bf16.mxu0 %v11014_v62 }
 0x189   : > { %3080 = vmatprep.mubr.bf16.mxu1 %v11047_v18  ;;  %3718 = vmatpush1.bf16.msra.mxu0 %v10031_v42 }
 0x18a   : > { %v826_v56 = vpop.f32.mrb[52].mxu0  ;;  %3719 = vmatprep.subr.bf16.mxu0 %v13575_v8  ;;  %4078 = vmatpush1.bf16.msra.mxu1 %v10043_v21  ;;  %v10046_v21 = vld [vmem:[%s13538_s1 + $0x2c0] sm:$0xff]  }
 0x18b   : > { %v1109_v36 = vpop.f32.mrb[52].mxu1  ;;  %v828_v61 = vpop.f32.mrb[53].mxu0  ;;  %4079 = vmatprep.subr.bf16.mxu1 %v13575_v8 }
 0x18c   : > { %v11408_v62 = vadd.f32 %v1109_v36, %v826_v56  ;;  %v1111_v27 = vpop.f32.mrb[53].mxu1  ;;  %v829_v44 = vpop.f32.mrb[54].mxu0 }
 0x18d   : > { %v1112_v55 = vpop.f32.mrb[54].mxu1  ;;  %v831_v7 = vpop.f32.mrb[55].mxu0  ;;  %3720 = vmatpush1.bf16.msra.mxu0 %v10032_v24  ;;  %v10034_v24 = vld [vmem:[%s13538_s1 + $0x148] sm:$0xff]  }
 0x18e   : > { %v11413_v42 = vadd.f32 %v1112_v55, %v829_v44  ;;  %v1114_v1 = vpop.f32.mrb[55].mxu1  ;;  %3721 = vmatprep.subr.bf16.mxu0 %v13575_v8  ;;  %4080 = vmatpush1.bf16.msra.mxu1 %v10045_v2  ;;  %v10037_v7 = vld [vmem:[%s13538_s1 + $0x150] sm:$0xff]  }
 0x18f   : > { %2707 = vmatmul.mubr.bf16.gmra.mrb[160].mxu0 %v11041_v52  ;;  %4081 = vmatprep.subr.bf16.mxu1 %v13575_v8  ;;  %v10048_v52 = vld [vmem:[%s13538_s1 + $0x2c8] sm:$0xff]  }
 0x190   : > { %3081 = vmatmul.mubr.bf16.gmra.mrb[160].mxu1 %v11076_v63  ;;  %2714 = vmatprep.mubr.bf16.mxu0 %v11047_v18 }
 0x191   : > { %3088 = vmatprep.mubr.bf16.mxu1 %v11078_v23  ;;  %3722 = vmatpush1.bf16.msra.mxu0 %v10033_v51 }
 0x192   : > { %v834_v56 = vpop.f32.mrb[56].mxu0  ;;  %3723 = vmatprep.subr.bf16.mxu0 %v13575_v8  ;;  %4082 = vmatpush1.bf16.msra.mxu1 %v10046_v21  ;;  %v10049_v21 = vld [vmem:[%s13538_s1 + $0x2d0] sm:$0xff]  }
 0x193   : > { %v1117_v2 = vpop.f32.mrb[56].mxu1  ;;  %v836_v36 = vpop.f32.mrb[57].mxu0  ;;  %4083 = vmatprep.subr.bf16.mxu1 %v13575_v8 }
 0x194   : > { %v11432_v18 = vadd.f32 %v1117_v2, %v834_v56  ;;  %v1119_v61 = vpop.f32.mrb[57].mxu1  ;;  %v837_v27 = vpop.f32.mrb[58].mxu0 }
 0x195   : > { %v1120_v44 = vpop.f32.mrb[58].mxu1  ;;  %v839_v55 = vpop.f32.mrb[59].mxu0  ;;  %3724 = vmatpush1.bf16.msra.mxu0 %v10034_v24  ;;  %v10041_v24 = vld [vmem:[%s13538_s1 + $0x158] sm:$0xff]  }
 0x196   : > { %v11437_v51 = vadd.f32 %v1120_v44, %v837_v27  ;;  %v1122_v1 = vpop.f32.mrb[59].mxu1  ;;  %3725 = vmatprep.subr.bf16.mxu0 %v13575_v8  ;;  %4084 = vmatpush1.bf16.msra.mxu1 %v10048_v52  ;;  %v10044_v55 = vld [vmem:[%s13538_s1 + $0x160] sm:$0xff]  }
 0x197   : > { %2715 = vmatmul.mubr.bf16.gmra.mrb[164].mxu0 %v11076_v63  ;;  %4085 = vmatprep.subr.bf16.mxu1 %v13575_v8  ;;  %v10051_v63 = vld [vmem:[%s13538_s1 + $0x2d8] sm:$0xff]  }
 0x198   : > { %3089 = vmatmul.mubr.bf16.gmra.mrb[164].mxu1 %v11108_v45  ;;  %2722 = vmatprep.mubr.bf16.mxu0 %v11078_v23 }
 0x199   : > { %3096 = vmatprep.mubr.bf16.mxu1 %v11111_v34  ;;  %3726 = vmatpush1.bf16.msra.mxu0 %v10037_v7 }
 0x19a   : > { %v842_v56 = vpop.f32.mrb[60].mxu0  ;;  %3727 = vmatprep.subr.bf16.mxu0 %v13575_v8  ;;  %4086 = vmatpush1.bf16.msra.mxu1 %v10049_v21  ;;  %v10052_v21 = vld [vmem:[%s13538_s1 + $0x2e0] sm:$0xff]  }
 0x19b   : > { %v1125_v52 = vpop.f32.mrb[60].mxu1  ;;  %v844_v2 = vpop.f32.mrb[61].mxu0  ;;  %4087 = vmatprep.subr.bf16.mxu1 %v13575_v8 }
 0x19c   : > { %v11456_v23 = vadd.f32 %v1125_v52, %v842_v56  ;;  %v1127_v36 = vpop.f32.mrb[61].mxu1  ;;  %v845_v61 = vpop.f32.mrb[62].mxu0 }
 0x19d   : > { %v1128_v27 = vpop.f32.mrb[62].mxu1  ;;  %v847_v44 = vpop.f32.mrb[63].mxu0  ;;  %3728 = vmatpush1.bf16.msra.mxu0 %v10041_v24  ;;  %v10047_v24 = vld [vmem:[%s13538_s1 + $0x168] sm:$0xff]  }
 0x19e   : > { %v11461_v7 = vadd.f32 %v1128_v27, %v845_v61  ;;  %v1130_v1 = vpop.f32.mrb[63].mxu1  ;;  %3729 = vmatprep.subr.bf16.mxu0 %v13575_v8  ;;  %4088 = vmatpush1.bf16.msra.mxu1 %v10051_v63  ;;  %v10050_v44 = vld [vmem:[%s13538_s1 + $0x170] sm:$0xff]  }
 0x19f   : > { %2723 = vmatmul.mubr.bf16.gmra.mrb[168].mxu0 %v11108_v45  ;;  %4089 = vmatprep.subr.bf16.mxu1 %v13575_v8  ;;  %v10053_v45 = vld [vmem:[%s13538_s1 + $0x2e8] sm:$0xff]  }
 0x1a0   : > { %3097 = vmatmul.mubr.bf16.gmra.mrb[168].mxu1 %v11138_v39  ;;  %2730 = vmatprep.mubr.bf16.mxu0 %v11111_v34 }
 0x1a1   : > { %3104 = vmatprep.mubr.bf16.mxu1 %v11141_v16  ;;  %3730 = vmatpush1.bf16.msra.mxu0 %v10044_v55 }
 0x1a2   : > { %v850_v56 = vpop.f32.mrb[64].mxu0  ;;  %3731 = vmatprep.subr.bf16.mxu0 %v13575_v8  ;;  %4090 = vmatpush1.bf16.msra.mxu1 %v10052_v21  ;;  %v10055_v21 = vld [vmem:[%s13538_s1 + $0x2f0] sm:$0xff]  }
 0x1a3   : > { %v1133_v63 = vpop.f32.mrb[64].mxu1  ;;  %v852_v52 = vpop.f32.mrb[65].mxu0  ;;  %4091 = vmatprep.subr.bf16.mxu1 %v13575_v8 }
 0x1a4   : > { %v11480_v34 = vadd.f32 %v1133_v63, %v850_v56  ;;  %v1135_v2 = vpop.f32.mrb[65].mxu1  ;;  %v853_v36 = vpop.f32.mrb[66].mxu0 }
 0x1a5   : > { %v1136_v61 = vpop.f32.mrb[66].mxu1  ;;  %v855_v27 = vpop.f32.mrb[67].mxu0  ;;  %3732 = vmatpush1.bf16.msra.mxu0 %v10047_v24  ;;  %v10054_v24 = vld [vmem:[%s13538_s1 + $0x178] sm:$0xff]  }
 0x1a6   : > { %v11485_v55 = vadd.f32 %v1136_v61, %v853_v36  ;;  %v1138_v1 = vpop.f32.mrb[67].mxu1  ;;  %3733 = vmatprep.subr.bf16.mxu0 %v13575_v8  ;;  %4092 = vmatpush1.bf16.msra.mxu1 %v10053_v45 }
 0x1a7   : > { %2731 = vmatmul.mubr.bf16.gmra.mrb[172].mxu0 %v11138_v39  ;;  %4093 = vmatprep.subr.bf16.mxu1 %v13575_v8  ;;  %v10056_v39 = vld [vmem:[%s13538_s1 + $0x2f8] sm:$0xff]  }
 0x1a8   : > { %3105 = vmatmul.mubr.bf16.gmra.mrb[172].mxu1 %v11156_v25  ;;  %2738 = vmatprep.mubr.bf16.mxu0 %v11141_v16 }
 0x1a9   : > { %3112 = vmatprep.mubr.bf16.mxu1 %v11158_v48  ;;  %3734 = vmatpush1.bf16.msra.mxu0 %v10050_v44 }
 0x1aa   : > { %v858_v56 = vpop.f32.mrb[68].mxu0  ;;  %3735 = vmatprep.subr.bf16.mxu0 %v13575_v8  ;;  %4094 = vmatpush1.bf16.msra.mxu1 %v10055_v21 }
 0x1ab   : > { %v1141_v45 = vpop.f32.mrb[68].mxu1  ;;  %v860_v63 = vpop.f32.mrb[69].mxu0  ;;  %4095 = vmatprep.subr.bf16.mxu1 %v13575_v8 }
 0x1ac   : > { %v1143_v16 = vpop.f32.mrb[69].mxu1  ;;  %v861_v52 = vpop.f32.mrb[70].mxu0  ;;  %v11504_v2 = vadd.f32 %v1141_v45, %v858_v56 }
 0x1ad   : > { %v1144_v36 = vpop.f32.mrb[70].mxu1  ;;  %v863_v61 = vpop.f32.mrb[71].mxu0  ;;  %3736 = vmatpush1.bf16.msra.mxu0 %v10054_v24 }
 0x1ae   : > { %v1146_v27 = vpop.f32.mrb[71].mxu1  ;;  %4096 = vmatpush1.bf16.msra.mxu1 %v10056_v39  ;;  %4425 = vmatprep.subr.bf16.mxu0 %v13575_v8  ;;  %v11507_v44 = vadd.f32 %v1144_v36, %v861_v52 }
 0x1af   : > { %2739 = vmatmul.mubr.bf16.gmra.mrb[176].mxu0 %v11156_v25 }
 0x1b0   : > { %3113 = vmatmul.mubr.bf16.gmra.mrb[176].mxu1 %v11177_v5  ;;  %2746 = vmatprep.mubr.bf16.mxu0 %v11158_v48 }
 0x1b1   : > { %3120 = vmatprep.mubr.bf16.mxu1 %v11179_v35 }
 0x1b2   : > { %v1321_v1 = vpop.f32.mrb[72].mxu0 }
 0x1b3   : > { %v1464_v21 = vadd.f32 %v1321_v1, %v11160_v20  ;;  %v1323_v56 = vpop.f32.mrb[73].mxu0  ;;  %v2302_v45 = vpop.f32.mrb[72].mxu1 }
 0x1b4   : > { %v1324_v24 = vpop.f32.mrb[74].mxu0  ;;  %v2304_v63 = vpop.f32.mrb[73].mxu1 }
 0x1b5   : > { %v1465_v39 = vadd.f32 %v1324_v24, %v11162_v57  ;;  %v1326_v16 = vpop.f32.mrb[75].mxu0  ;;  %v2305_v52 = vpop.f32.mrb[74].mxu1  ;;  %v11515_v36 = vadd.f32 %v2302_v45, %v1464_v21 }
 0x1b6   : > { %v2307_v25 = vpop.f32.mrb[75].mxu1 }
 0x1b7   : > { %2747 = vmatmul.mubr.bf16.gmra.mrb[180].mxu0 %v11177_v5  ;;  %v11518_v61 = vadd.f32 %v2305_v52, %v1465_v39 }
 0x1b8   : > { %3121 = vmatmul.mubr.bf16.gmra.mrb[180].mxu1 %v11196_v38  ;;  %2754 = vmatprep.mubr.bf16.mxu0 %v11179_v35 }
 0x1b9   : > { %3128 = vmatprep.mubr.bf16.mxu1 %v11200_v12 }
 0x1ba   : > { %v1329_v48 = vpop.f32.mrb[76].mxu0 }
 0x1bb   : > { %v1466_v20 = vadd.f32 %v1329_v48, %v11175_v19  ;;  %v1331_v27 = vpop.f32.mrb[77].mxu0  ;;  %v2310_v57 = vpop.f32.mrb[76].mxu1 }
 0x1bc   : > { %v1332_v1 = vpop.f32.mrb[78].mxu0  ;;  %v2312_v56 = vpop.f32.mrb[77].mxu1 }
 0x1bd   : > { %v1467_v21 = vadd.f32 %v1332_v1, %v11183_v9  ;;  %v1334_v45 = vpop.f32.mrb[79].mxu0  ;;  %v2313_v24 = vpop.f32.mrb[78].mxu1  ;;  %v11525_v5 = vadd.f32 %v2310_v57, %v1466_v20 }
 0x1be   : > { %v2315_v63 = vpop.f32.mrb[79].mxu1 }
 0x1bf   : > { %2755 = vmatmul.mubr.bf16.gmra.mrb[184].mxu0 %v11196_v38  ;;  %v11528_v39 = vadd.f32 %v2313_v24, %v1467_v21  ;;  %v1554_v24 = vld [vmem:[%s10378_s21 + $0x1b0] sm:$0xff]  ;;  %v13582_v63 = vld [vmem:[#allocation3_spill] sm:$0xff] }
 0x1c0   : > { %3129 = vmatmul.mubr.bf16.gmra.mrb[184].mxu1 %v11209_v59  ;;  %2762 = vmatprep.mubr.bf16.mxu0 %v11200_v12 }
 0x1c1   : > { %3136 = vmatprep.mubr.bf16.mxu1 %v11217_v22 }
 0x1c2   : > { %v1337_v19 = vpop.f32.mrb[80].mxu0 }
 0x1c3   : > { %v1468_v35 = vadd.f32 %v1337_v19, %v11194_v4  ;;  %v1339_v16 = vpop.f32.mrb[81].mxu0  ;;  %v2318_v9 = vpop.f32.mrb[80].mxu1 }
 0x1c4   : > { %v1340_v52 = vpop.f32.mrb[82].mxu0  ;;  %v2320_v25 = vpop.f32.mrb[81].mxu1  ;;  %v1555_v16 = vld [vmem:[%s10378_s21 + $0x1b8] sm:$0xff] }
 0x1c5   : > { %v1469_v48 = vadd.f32 %v1340_v52, %v11203_v49  ;;  %v1342_v20 = vpop.f32.mrb[83].mxu0  ;;  %v2321_v38 = vpop.f32.mrb[82].mxu1  ;;  %v11535_v27 = vadd.f32 %v2318_v9, %v1468_v35  ;;  %v2485_v25 = vshll.u32 %v1554_v24, 16 }
 0x1c6   : > { %v2323_v57 = vpop.f32.mrb[83].mxu1  ;;  %v2495_v20 = vshrl.u32 %v1555_v16, 16 }
 0x1c7   : > { %2763 = vmatmul.mubr.bf16.gmra.mrb[188].mxu0 %v11209_v59  ;;  %v11538_v12 = vadd.f32 %v2321_v38, %v1469_v48  ;;  %v13585_v57 = vld [vmem:[#allocation4_spill] sm:$0xff] }
 0x1c8   : > { %3137 = vmatmul.mubr.bf16.gmra.mrb[188].mxu1 %v11232_v29  ;;  %2770 = vmatprep.mubr.bf16.mxu0 %v11217_v22  ;;  %v2482_v22 = vshrl.u32 %v1554_v24, 16 }
 0x1c9   : > { %3144 = vmatprep.mubr.bf16.mxu1 %v11234_v33 }
 0x1ca   : > { %v1345_v4 = vpop.f32.mrb[84].mxu0 }
 0x1cb   : > { %v1470_v49 = vadd.f32 %v1345_v4, %v11215_v14  ;;  %v1347_v1 = vpop.f32.mrb[85].mxu0  ;;  %v2326_v56 = vpop.f32.mrb[84].mxu1  ;;  %v2491_v14 = vshll.u32 %v1555_v16, 16 }
 0x1cc   : > { %v1348_v21 = vpop.f32.mrb[86].mxu0  ;;  %v2328_v45 = vpop.f32.mrb[85].mxu1 }
 0x1cd   : > { %v1471_v19 = vadd.f32 %v1348_v21, %v13582_v63  ;;  %v1350_v35 = vpop.f32.mrb[87].mxu0  ;;  %v2329_v59 = vpop.f32.mrb[86].mxu1  ;;  %v11547_v9 = vadd.f32 %v2326_v56, %v1470_v49  ;;  %v2484_v56 = vrot.slane %v2482_v22, 4  ;;  %v2493_v24 = vrot.slane %v2491_v14, 5 }
 0x1ce   : > { %v2331_v52 = vpop.f32.mrb[87].mxu1  ;;  %v2497_v63 = vrot.slane %v2495_v20, 4  ;;  %v2856_v14 = vshrl.u32 %v11281_v40, 16  ;;  %v2859_v20 = vshll.u32 %v11281_v40, 16 }
 0x1cf   : > { %13583 = vst [vmem:[#allocation3_spill] sm:$0xff] %v11547_v9  ;;  %2771 = vmatmul.mubr.bf16.gmra.mrb[192].mxu0 %v11232_v29  ;;  %v11550_v48 = vadd.f32 %v2329_v59, %v1471_v19  ;;  %v2487_v29 = vrot.slane %v2485_v25, 5  ;;  %v13586_v19 = vld [vmem:[#allocation5_spill] sm:$0xff]  ;;  %v1556_v52 = vld [vmem:[%s10378_s21 + $0x1c0] sm:$0x11] }
 0x1d0   : > { %3145 = vmatmul.mubr.bf16.gmra.mrb[192].mxu1 %v11253_v31  ;;  %2778 = vmatprep.mubr.bf16.mxu0 %v11234_v33  ;;  %v2498_v22 = vor.u32 %v2497_v63, %v2493_v24  ;;  %v2501_v25 = vshll.u32 %v1556_v52, 16 }
 0x1d1   : > { %13584 = vst [vmem:[#allocation8_spill] sm:$0xff] %v11550_v48  ;;  %3152 = vmatprep.mubr.bf16.mxu1 %v11255_v11  ;;  %v2488_v9 = vor.u32 %v2487_v29, %v2484_v56 }
 0x1d2   : > { %v1353_v38 = vpop.f32.mrb[88].mxu0  ;;  %v2499_v63 = vrot.slane %v2498_v22, 4 }
 0x1d3   : > { %v1472_v4 = vadd.f32 %v1353_v38, %v13585_v57  ;;  %v1355_v49 = vpop.f32.mrb[89].mxu0  ;;  %v2334_v1 = vpop.f32.mrb[88].mxu1  ;;  %v2865_v57 = vshll.u32 %v11284_v17, 16 }
 0x1d4   : > { %v1356_v21 = vpop.f32.mrb[90].mxu0  ;;  %v2336_v45 = vpop.f32.mrb[89].mxu1  ;;  %v13589_v49 = vld [vmem:[#allocation6_spill] sm:$0xff] }
 0x1d5   : > { %v1473_v35 = vadd.f32 %v1356_v21, %v13586_v19  ;;  %v1358_v59 = vpop.f32.mrb[91].mxu0  ;;  %v2337_v33 = vpop.f32.mrb[90].mxu1  ;;  %v11558_v48 = vadd.f32 %v2334_v1, %v1472_v4  ;;  %v2869_v4 = vshrl.u32 %v11284_v17, 16  ;;  %v2489_v21 = vrot.slane %v2488_v9, 4 }
 0x1d6   : > { %v2339_v16 = vpop.f32.mrb[91].mxu1  ;;  %v2503_v19 = vrot.slane %v2501_v25, 5  ;;  %v2861_v59 = vrot.slane %v2859_v20, 5 }
 0x1d7   : > { %13587 = vst [vmem:[#allocation4_spill] sm:$0xff] %v11558_v48  ;;  %2779 = vmatmul.mubr.bf16.gmra.mrb[196].mxu0 %v11253_v31  ;;  %v11561_v38 = vadd.f32 %v2337_v33, %v1473_v35  ;;  %v2858_v35 = vrot.slane %v2856_v14, 4  ;;  %v2867_v16 = vrot.slane %v2865_v57, 5 }
 0x1d8   : > { %3153 = vmatmul.mubr.bf16.gmra.mrb[196].mxu1 %v11270_v47  ;;  %2786 = vmatprep.mubr.bf16.mxu0 %v11255_v11  ;;  %v2504_v22 = vsel %vm10789_vm2, %v2499_v63, %v2503_v19 }
 0x1d9   : > { %13588 = vst [vmem:[#allocation5_spill] sm:$0xff] %v11561_v38  ;;  %3160 = vmatprep.mubr.bf16.mxu1 %v11272_v28  ;;  %v2871_v38 = vrot.slane %v2869_v4, 4  ;;  %v2862_v9 = vor.u32 %v2861_v59, %v2858_v35 }
 0x1da   : > { %v1361_v31 = vpop.f32.mrb[92].mxu0 }
 0x1db   : > { %v1474_v1 = vadd.f32 %v1361_v31, %v13589_v49  ;;  %v1363_v56 = vpop.f32.mrb[93].mxu0  ;;  %v2342_v29 = vpop.f32.mrb[92].mxu1  ;;  %v1559_v31 = vld [vmem:[%s10378_s21 + $0x1d8] sm:$0x11]  ;;  %v2872_v25 = vor.u32 %v2871_v38, %v2867_v16 }
 0x1dc   : > { %v1364_v11 = vpop.f32.mrb[94].mxu0  ;;  %v2344_v45 = vpop.f32.mrb[93].mxu1 }
 0x1dd   : > { %v1475_v40 = vadd.f32 %v1364_v11, %v11257_v0  ;;  %v1366_v33 = vpop.f32.mrb[95].mxu0  ;;  %v2345_v52 = vpop.f32.mrb[94].mxu1  ;;  %v11572_v17 = vadd.f32 %v2342_v29, %v1474_v1  ;;  %v2494_v0 = vsel %vm10789_vm2, %v2489_v21, %v2493_v24  ;;  %v13590_v29 = vld [vmem:[#allocation7_spill] sm:$0xff]  ;;  %v2873_v21 = vrot.slane %v2872_v25, 4 }
 0x1de   : > { %v2347_v48 = vpop.f32.mrb[95].mxu1  ;;  %v8602_v56 = vcombine.high %v2494_v0, %v2504_v22  ;;  %v10170_v33 = vld [vmem:[%s10378_s21 + $0x8] sm:$0xff]  ;;  %v8601_v32 = vcombine.low %v2494_v0, %v2504_v22 }
 0x1df   : > { %2787 = vmatmul.mubr.bf16.gmra.mrb[200].mxu0 %v11270_v47  ;;  %v11576_v49 = vadd.f32 %v2345_v52, %v1475_v40  ;;  %v2875_v48 = vshll.u32 %v1559_v31, 16  ;;  %v3229_v40 = vld [vmem:[%s10378_s21] sm:$0xee]  ;;  %v3308_v52 = vrot.slane %v10170_v33, 5 }
 0x1e0   : > { %3161 = vmatmul.mubr.bf16.gmra.mrb[200].mxu1 %v11292_v60  ;;  %2794 = vmatprep.mubr.bf16.mxu0 %v11272_v28  ;;  %v2863_v28 = vrot.slane %v2862_v9, 4  ;;  %v10171_v31 = vld [vmem:[%s10378_s21 + $0x20] sm:$0xff] }
 0x1e1   : > { %3168 = vmatprep.mubr.bf16.mxu1 %v11296_v13  ;;  %v2877_v63 = vrot.slane %v2875_v48, 5  ;;  %v3315_v9 = vrot.slane %v10171_v31, 5 }
 0x1e2   : > { %v1369_v14 = vpop.f32.mrb[96].mxu0  ;;  %v11596_v35 = vsel %vm10789_vm2, %v2863_v28, %v2867_v16 }
 0x1e3   : > { %v1476_v47 = vadd.f32 %v1369_v14, %v11268_v37  ;;  %v1371_v20 = vpop.f32.mrb[97].mxu0  ;;  %v2350_v57 = vpop.f32.mrb[96].mxu1  ;;  %v11600_v59 = vsel %vm10789_vm2, %v2873_v21, %v2877_v63  ;;  %v3230_v14 = vld [vmem:[%s10378_s21 + $0x18] sm:$0xee]  ;;  %v3317_v22 = vrot.slane %v3315_v9, 4 }
 0x1e4   : > { %v1372_v4 = vpop.f32.mrb[98].mxu0  ;;  %v2352_v1 = vpop.f32.mrb[97].mxu1  ;;  %v8652_v20 = vcombine.high %v11596_v35, %v11600_v59  ;;  %v8670_v0 = vrot.slane %v3230_v14, 9  ;;  %v10173_v63 = vld [vmem:[%s10378_s21 + $0x28] sm:$0x11] }
 0x1e5   : > { %v1477_v11 = vadd.f32 %v1372_v4, %v13590_v29  ;;  %v1374_v45 = vpop.f32.mrb[99].mxu0  ;;  %v2353_v24 = vpop.f32.mrb[98].mxu1  ;;  %v11587_v38 = vadd.f32 %v2350_v57, %v1476_v47  ;;  %v8669_v57 = vrot.slane %v3229_v40, 9  ;;  %v3310_v29 = vrot.slane %v3308_v52, 4 }
 0x1e6   : > { %v2355_v19 = vpop.f32.mrb[99].mxu1  ;;  %v3316_v31 = vsel %vm11615_vm5, %v8670_v0, %v3315_v9 }
 0x1e7   : > { %2795 = vmatmul.mubr.bf16.gmra.mrb[204].mxu0 %v11292_v60  ;;  %v11590_v37 = vadd.f32 %v2353_v24, %v1477_v11  ;;  %v10172_v11 = vld [vmem:[%s10378_s21 + $0x10] sm:$0x11]  ;;  %v3318_v19 = vrot.slane %v10173_v63, 5  ;;  %v3309_v40 = vsel %vm11615_vm5, %v8669_v57, %v3308_v52 }
 0x1e8   : > { %3169 = vmatmul.mubr.bf16.gmra.mrb[204].mxu1 %v11307_v41  ;;  %2802 = vmatprep.mubr.bf16.mxu0 %v11296_v13  ;;  %v3311_v45 = vrot.slane %v10172_v11, 5  ;;  %v10176_v63 = vld [vmem:[%s10378_s21 + $0x50] sm:$0xff] }
 0x1e9   : > { %3176 = vmatprep.mubr.bf16.mxu1 %v8602_v56 }
 0x1ea   : > { %v1377_v60 = vpop.f32.mrb[100].mxu0  ;;  %v3312_v33 = vsel %vm11615_vm5, %v3310_v29, %v3311_v45 }
 0x1eb   : > { %v1478_v25 = vadd.f32 %v1377_v60, %v11290_v43  ;;  %v1379_v48 = vpop.f32.mrb[101].mxu0  ;;  %v2358_v13 = vpop.f32.mrb[100].mxu1  ;;  %v8720_v57 = vcombine.high %v3309_v40, %v3312_v33 }
 0x1ec   : > { %v1380_v16 = vpop.f32.mrb[102].mxu0  ;;  %v2360_v47 = vpop.f32.mrb[101].mxu1  ;;  %v10174_v48 = vld [vmem:[%s10378_s21 + $0x38] sm:$0xff] }
 0x1ed   : > { %v1479_v4 = vadd.f32 %v1380_v16, %v11298_v58  ;;  %v11610_v1 = vadd.f32 %v2358_v13, %v1478_v25  ;;  %v1382_v28 = vpop.f32.mrb[103].mxu0  ;;  %v2361_v43 = vpop.f32.mrb[102].mxu1  ;;  %v3319_v25 = vsel %vm11615_vm5, %v3317_v22, %v3318_v19  ;;  %v3322_v13 = vrot.slane %v10174_v48, 5  ;;  %v3231_v16 = vld [vmem:[%s10378_s21 + $0x30] sm:$0xee] }
 0x1ee   : > { %v2363_v24 = vpop.f32.mrb[103].mxu1  ;;  %v8722_v29 = vcombine.high %v3316_v31, %v3319_v25  ;;  %v3329_v19 = vrot.slane %v10176_v63, 5 }
 0x1ef   : > { %v11620_v58 = vadd.f32 %v2361_v43, %v1479_v4  ;;  %2803 = vmatmul.mubr.bf16.gmra.mrb[208].mxu0 %v11307_v41  ;;  %v3324_v45 = vrot.slane %v3322_v13, 4  ;;  %v10175_v24 = vld [vmem:[%s10378_s21 + $0x40] sm:$0x11] }
 0x1f0   : > { %3177 = vmatmul.mubr.bf16.gmra.mrb[208].mxu1 %v8601_v32  ;;  %2810 = vmatprep.mubr.bf16.mxu0 %v8602_v56  ;;  %v3325_v0 = vrot.slane %v10175_v24, 5  ;;  %v10178_v24 = vld [vmem:[%s10378_s21 + $0x68] sm:$0xff] }
 0x1f1   : > { %3184 = vmatprep.mubr.bf16.mxu1 %v8652_v20  ;;  %v8651_v20 = vcombine.low %v11596_v35, %v11600_v59 }
 0x1f2   : > { %v1385_v60 = vpop.f32.mrb[104].mxu0  ;;  %v3326_v59 = vsel %vm11615_vm5, %v3324_v45, %v3325_v0  ;;  %v3336_v0 = vrot.slane %v10178_v24, 5 }
 0x1f3   : > { %v1480_v41 = vadd.f32 %v1385_v60, %v11305_v53  ;;  %v1387_v56 = vpop.f32.mrb[105].mxu0  ;;  %v2366_v14 = vpop.f32.mrb[104].mxu1  ;;  %v8671_v53 = vrot.slane %v3231_v16, 9 }
 0x1f4   : > { %v1388_v47 = vpop.f32.mrb[106].mxu0  ;;  %v2368_v52 = vpop.f32.mrb[105].mxu1  ;;  %v8719_v56 = vcombine.low %v3309_v40, %v3312_v33  ;;  %v3331_v40 = vrot.slane %v3329_v19, 4  ;;  %v10177_v33 = vld [vmem:[%s10378_s21 + $0x58] sm:$0x11] }
 0x1f5   : > { %v1481_v4 = vadd.f32 %v1388_v47, %v11309_v3  ;;  %v11637_v9 = vadd.f32 %v2366_v14, %v1480_v41  ;;  %v1390_v28 = vpop.f32.mrb[107].mxu0  ;;  %v2369_v43 = vpop.f32.mrb[106].mxu1  ;;  %v3323_v3 = vsel %vm11615_vm5, %v8671_v53, %v3322_v13  ;;  %v3232_v14 = vld [vmem:[%s10378_s21 + $0x48] sm:$0xee]  ;;  %v8721_v47 = vcombine.low %v3316_v31, %v3319_v25  ;;  %v10057_v52 = vld [vmem:[%s13538_s1 + $0x400] sm:$0xff]  }
 0x1f6   : > { %v2371_v11 = vpop.f32.mrb[107].mxu1  ;;  %v11655_v28 = vcombine.high %v3323_v3, %v3326_v59 }
 0x1f7   : > { %v11640_v22 = vadd.f32 %v2369_v43, %v1481_v4  ;;  %2811 = vmatmul.mubr.bf16.gmra.mrb[212].mxu0 %v8601_v32  ;;  %v8672_v43 = vrot.slane %v3232_v14, 9  ;;  %v3332_v11 = vrot.slane %v10177_v33, 5 }
 0x1f8   : > { %3185 = vmatmul.mubr.bf16.gmra.mrb[212].mxu1 %v8651_v20  ;;  %3737 = vmatprep.mubr.bf16.mxu0 %v8720_v57 }
 0x1f9   : > { %4097 = vmatprep.mubr.bf16.mxu1 %v8722_v29  ;;  %v3330_v25 = vsel %vm11615_vm5, %v8672_v43, %v3329_v19  ;;  %v3333_v45 = vsel %vm11615_vm5, %v3331_v40, %v3332_v11 }
 0x1fa   : > { %v1393_v35 = vpop.f32.mrb[108].mxu0 }
 0x1fb   : > { %v1482_v60 = vadd.f32 %v1393_v35, %v11314_v15  ;;  %v1395_v48 = vpop.f32.mrb[109].mxu0  ;;  %v2374_v41 = vpop.f32.mrb[108].mxu1 }
 0x1fc   : > { %v1396_v32 = vpop.f32.mrb[110].mxu0  ;;  %v2376_v16 = vpop.f32.mrb[109].mxu1  ;;  %v3233_v48 = vld [vmem:[%s10378_s21 + $0x60] sm:$0xee] }
 0x1fd   : > { %v1483_v13 = vadd.f32 %v1396_v32, %v11319_v10  ;;  %v11653_v20 = vadd.f32 %v2374_v41, %v1482_v60  ;;  %v1398_v57 = vpop.f32.mrb[111].mxu0  ;;  %v2377_v4 = vpop.f32.mrb[110].mxu1  ;;  %v10058_v10 = vld [vmem:[%s13538_s1 + $0x408] sm:$0xff]  }
 0x1fe   : > { %v2379_v15 = vpop.f32.mrb[111].mxu1  ;;  %v8673_v57 = vrot.slane %v3233_v48, 9  ;;  %v11700_v48 = vcombine.low %v3330_v25, %v3333_v45 }
 0x1ff   : > { %v11658_v53 = vadd.f32 %v2377_v4, %v1483_v13  ;;  %3738 = vmatmul.mubr.bf16.vlgmr.msra.gmra.mrb[216].mxu0 %v8719_v56  ;;  %v11672_v56 = vcombine.low %v3323_v3, %v3326_v59  ;;  %v3338_v3 = vrot.slane %v3336_v0, 4  ;;  %v10179_v59 = vld [vmem:[%s10378_s21 + $0x70] sm:$0x11] }
 0x200   : > { %4426 = vmatpush1.bf16.msra.mxu0 %v10057_v52  ;;  %4098 = vmatmul.mubr.bf16.vlgmr.msra.gmra.mrb[216].mxu1 %v8721_v47  ;;  %v11677_v52 = vcombine.high %v3330_v25, %v3333_v45  ;;  %v3339_v4 = vrot.slane %v10179_v59, 5  ;;  %v3337_v40 = vsel %vm11615_vm5, %v8673_v57, %v3336_v0  ;;  %v10181_v57 = vld [vmem:[%s10378_s21 + $0x88] sm:$0x11] }
 0x201   : > { %3745 = vmatprep.mubr.bf16.mxu0 %v8722_v29  ;;  %4105 = vmatprep.mubr.bf16.mxu1 %v11655_v28  ;;  %v3346_v25 = vrot.slane %v10181_v57, 5  ;;  %v10062_v45 = vld [vmem:[%s13538_s1 + $0x428] sm:$0xff]   ;;  %v10183_v57 = vld [vmem:[%s10378_s21 + $0xa0] sm:$0x11] }
 0x202   : > { %v1401_v31 = vpop.f32.mrb[112].mxu0  ;;  %4427 = vmatprep.subr.bf16.mxu0 %v13575_v8  ;;  %v3340_v33 = vsel %vm11615_vm5, %v3338_v3, %v3339_v4 }
 0x203   : > { %v1484_v35 = vadd.f32 %v1401_v31, %v11336_v30  ;;  %v1403_v63 = vpop.f32.mrb[113].mxu0  ;;  %v2382_v60 = vpop.f32.mrb[112].mxu1  ;;  %v10059_v30 = vld [vmem:[%s13538_s1 + $0x410] sm:$0xff]  }
 0x204   : > { %v1404_v29 = vpop.f32.mrb[114].mxu0  ;;  %v2384_v41 = vpop.f32.mrb[113].mxu1  ;;  %4428 = vmatpush1.bf16.msra.mxu0 %v10058_v10 }
 0x205   : > { %v1485_v14 = vadd.f32 %v1404_v29, %v11342_v50  ;;  %v11675_v32 = vadd.f32 %v2382_v60, %v1484_v35  ;;  %v1406_v19 = vpop.f32.mrb[115].mxu0  ;;  %v2385_v16 = vpop.f32.mrb[114].mxu1  ;;  %4429 = vmatprep.subr.bf16.mxu0 %v13575_v8  ;;  %v10060_v50 = vld [vmem:[%s13538_s1 + $0x418] sm:$0xff]  }
 0x206   : > { %v2387_v13 = vpop.f32.mrb[115].mxu1  ;;  %v3234_v35 = vld [vmem:[%s10378_s21 + $0x78] sm:$0xee]  ;;  %v11705_v19 = vcombine.high %v3337_v40, %v3340_v33 }
 0x207   : > { %v11684_v15 = vadd.f32 %v2385_v16, %v1485_v14  ;;  %3746 = vmatmul.mubr.bf16.gmra.mrb[220].mxu0 %v8721_v47  ;;  %v10180_v47 = vld [vmem:[%s10378_s21 + $0x80] sm:$0xff] }
 0x208   : > { %4106 = vmatmul.mubr.bf16.gmra.mrb[220].mxu1 %v11672_v56  ;;  %3753 = vmatprep.mubr.bf16.mxu0 %v11655_v28  ;;  %v3343_v11 = vrot.slane %v10180_v47, 5 }
 0x209   : > { %4113 = vmatprep.mubr.bf16.mxu1 %v11677_v52  ;;  %4430 = vmatpush1.bf16.msra.mxu0 %v10059_v30  ;;  %v8674_v30 = vrot.slane %v3234_v35, 9 }
 0x20a   : > { %v1409_v43 = vpop.f32.mrb[116].mxu0  ;;  %4431 = vmatprep.subr.bf16.mxu0 %v13575_v8  ;;  %v3345_v13 = vrot.slane %v3343_v11, 4 }
 0x20b   : > { %v1486_v10 = vadd.f32 %v1409_v43, %v11360_v6  ;;  %v1411_v31 = vpop.f32.mrb[117].mxu0  ;;  %v2390_v24 = vpop.f32.mrb[116].mxu1  ;;  %v10061_v6 = vld [vmem:[%s13538_s1 + $0x420] sm:$0xff]   ;;  %v3344_v59 = vsel %vm11615_vm5, %v8674_v30, %v3343_v11 }
 0x20c   : > { %v1412_v63 = vpop.f32.mrb[118].mxu0  ;;  %v2392_v60 = vpop.f32.mrb[117].mxu1  ;;  %v3347_v4 = vsel %vm11615_vm5, %v3345_v13, %v3346_v25 }
 0x20d   : > { %v1487_v29 = vadd.f32 %v1412_v63, %v11365_v54  ;;  %v11703_v0 = vadd.f32 %v2390_v24, %v1486_v10  ;;  %v1414_v41 = vpop.f32.mrb[119].mxu0  ;;  %v2393_v14 = vpop.f32.mrb[118].mxu1  ;;  %4432 = vmatpush1.bf16.msra.mxu0 %v10060_v50  ;;  %v10182_v50 = vld [vmem:[%s10378_s21 + $0x98] sm:$0xff]  ;;  %v3235_v24 = vld [vmem:[%s10378_s21 + $0x90] sm:$0xee]  ;;  %v11729_v60 = vcombine.low %v3337_v40, %v3340_v33  ;;  %v3353_v40 = vrot.slane %v10183_v57, 5 }
 0x20e   : > { %v2395_v16 = vpop.f32.mrb[119].mxu1  ;;  %4433 = vmatprep.subr.bf16.mxu0 %v13575_v8  ;;  %v3350_v43 = vrot.slane %v10182_v50, 5  ;;  %v8675_v30 = vrot.slane %v3235_v24, 9  ;;  %v10064_v33 = vld [vmem:[%s13538_s1 + $0x438] sm:$0xff]   ;;  %v10184_v50 = vld [vmem:[%s10378_s21 + $0xb0] sm:$0xff] }
 0x20f   : > { %v11712_v54 = vadd.f32 %v2393_v14, %v1487_v29  ;;  %3754 = vmatmul.mubr.bf16.gmra.mrb[224].mxu0 %v11672_v56 }
 0x210   : > { %4114 = vmatmul.mubr.bf16.gmra.mrb[224].mxu1 %v11700_v48  ;;  %3761 = vmatprep.mubr.bf16.mxu0 %v11677_v52  ;;  %v3352_v13 = vrot.slane %v3350_v43, 4 }
 0x211   : > { %4121 = vmatprep.mubr.bf16.mxu1 %v11705_v19  ;;  %4434 = vmatpush1.bf16.msra.mxu0 %v10061_v6  ;;  %v11734_v6 = vcombine.high %v3344_v59, %v3347_v4 }
 0x212   : > { %v1417_v3 = vpop.f32.mrb[120].mxu0  ;;  %4435 = vmatprep.subr.bf16.mxu0 %v13575_v8 }
 0x213   : > { %v1488_v47 = vadd.f32 %v1417_v3, %v11384_v46  ;;  %v1419_v10 = vpop.f32.mrb[121].mxu0  ;;  %v2398_v31 = vpop.f32.mrb[120].mxu1  ;;  %v10063_v46 = vld [vmem:[%s13538_s1 + $0x430] sm:$0xff]   ;;  %v3354_v3 = vsel %vm11615_vm5, %v3352_v13, %v3353_v40 }
 0x214   : > { %v1420_v35 = vpop.f32.mrb[122].mxu0  ;;  %v2400_v63 = vpop.f32.mrb[121].mxu1 }
 0x215   : > { %v1489_v29 = vadd.f32 %v1420_v35, %v11389_v26  ;;  %v11732_v11 = vadd.f32 %v2398_v31, %v1488_v47  ;;  %v1422_v41 = vpop.f32.mrb[123].mxu0  ;;  %v2401_v14 = vpop.f32.mrb[122].mxu1  ;;  %4436 = vmatpush1.bf16.msra.mxu0 %v10062_v45  ;;  %v3351_v45 = vsel %vm11615_vm5, %v8675_v30, %v3350_v43  ;;  %v3357_v47 = vrot.slane %v10184_v50, 5  ;;  %v3236_v35 = vld [vmem:[%s10378_s21 + $0xa8] sm:$0xee] }
 0x216   : > { %v2403_v16 = vpop.f32.mrb[123].mxu1  ;;  %4437 = vmatprep.subr.bf16.mxu0 %v13575_v8  ;;  %v11758_v41 = vcombine.low %v3344_v59, %v3347_v4  ;;  %v11763_v30 = vcombine.high %v3351_v45, %v3354_v3  ;;  %v8676_v57 = vrot.slane %v3236_v35, 9  ;;  %v10066_v4 = vld [vmem:[%s13538_s1 + $0x448] sm:$0xff]  }
 0x217   : > { %v11741_v26 = vadd.f32 %v2401_v14, %v1489_v29  ;;  %3762 = vmatmul.mubr.bf16.gmra.mrb[228].mxu0 %v11700_v48  ;;  %v3359_v40 = vrot.slane %v3357_v47, 4 }
 0x218   : > { %4122 = vmatmul.mubr.bf16.gmra.mrb[228].mxu1 %v11729_v60  ;;  %3769 = vmatprep.mubr.bf16.mxu0 %v11705_v19  ;;  %v3358_v50 = vsel %vm11615_vm5, %v8676_v57, %v3357_v47 }
 0x219   : > { %4129 = vmatprep.mubr.bf16.mxu1 %v11734_v6  ;;  %4438 = vmatpush1.bf16.msra.mxu0 %v10063_v46 }
 0x21a   : > { %v1425_v25 = vpop.f32.mrb[124].mxu0  ;;  %4439 = vmatprep.subr.bf16.mxu0 %v13575_v8 }
 0x21b   : > { %v1490_v10 = vadd.f32 %v1425_v25, %v11408_v62  ;;  %v1427_v31 = vpop.f32.mrb[125].mxu0  ;;  %v2406_v24 = vpop.f32.mrb[124].mxu1  ;;  %v10065_v62 = vld [vmem:[%s13538_s1 + $0x440] sm:$0xff]   ;;  %v10185_v25 = vld [vmem:[%s10378_s21 + $0xb8] sm:$0x11] }
 0x21c   : > { %v1428_v63 = vpop.f32.mrb[126].mxu0  ;;  %v2408_v29 = vpop.f32.mrb[125].mxu1  ;;  %v3360_v59 = vrot.slane %v10185_v25, 5  ;;  %v10186_v31 = vld [vmem:[%s10378_s21 + $0xc8] sm:$0xff] }
 0x21d   : > { %v1491_v14 = vadd.f32 %v1428_v63, %v11413_v42  ;;  %v11761_v43 = vadd.f32 %v2406_v24, %v1490_v10  ;;  %v1430_v46 = vpop.f32.mrb[127].mxu0  ;;  %v2409_v16 = vpop.f32.mrb[126].mxu1  ;;  %4440 = vmatpush1.bf16.msra.mxu0 %v10064_v33  ;;  %v3364_v24 = vrot.slane %v10186_v31, 5 }
 0x21e   : > { %v2411_v13 = vpop.f32.mrb[127].mxu1  ;;  %4441 = vmatprep.subr.bf16.mxu0 %v13575_v8  ;;  %v3361_v10 = vsel %vm11615_vm5, %v3359_v40, %v3360_v59 }
 0x21f   : > { %v11770_v42 = vadd.f32 %v2409_v16, %v1491_v14  ;;  %3770 = vmatmul.mubr.bf16.gmra.mrb[232].mxu0 %v11729_v60  ;;  %v3237_v14 = vld [vmem:[%s10378_s21 + $0xc0] sm:$0xee]  ;;  %v11792_v25 = vcombine.high %v3358_v50, %v3361_v10  ;;  %v3366_v31 = vrot.slane %v3364_v24, 4 }
 0x220   : > { %4130 = vmatmul.mubr.bf16.gmra.mrb[232].mxu1 %v11758_v41  ;;  %3777 = vmatprep.mubr.bf16.mxu0 %v11734_v6 }
 0x221   : > { %4137 = vmatprep.mubr.bf16.mxu1 %v11763_v30  ;;  %4442 = vmatpush1.bf16.msra.mxu0 %v10065_v62  ;;  %v11787_v62 = vcombine.low %v3351_v45, %v3354_v3  ;;  %v10068_v3 = vld [vmem:[%s13538_s1 + $0x458] sm:$0xff]  }
 0x222   : > { %v1433_v33 = vpop.f32.mrb[128].mxu0  ;;  %4443 = vmatprep.subr.bf16.mxu0 %v13575_v8 }
 0x223   : > { %v1492_v35 = vadd.f32 %v1433_v33, %v11432_v18  ;;  %v1435_v63 = vpop.f32.mrb[129].mxu0  ;;  %v2414_v29 = vpop.f32.mrb[128].mxu1  ;;  %v10067_v18 = vld [vmem:[%s13538_s1 + $0x450] sm:$0xff]   ;;  %v8677_v33 = vrot.slane %v3237_v14, 9  ;;  %v10188_v14 = vld [vmem:[%s10378_s21 + $0xe0] sm:$0xff] }
 0x224   : > { %v1436_v46 = vpop.f32.mrb[130].mxu0  ;;  %v2416_v16 = vpop.f32.mrb[129].mxu1  ;;  %v10187_v63 = vld [vmem:[%s10378_s21 + $0xd0] sm:$0x11] }
 0x225   : > { %v1493_v13 = vadd.f32 %v1436_v46, %v11437_v51  ;;  %v11790_v47 = vadd.f32 %v2414_v29, %v1492_v35  ;;  %v1438_v57 = vpop.f32.mrb[131].mxu0  ;;  %v2417_v40 = vpop.f32.mrb[130].mxu1  ;;  %4444 = vmatpush1.bf16.msra.mxu0 %v10066_v4  ;;  %v3367_v45 = vrot.slane %v10187_v63, 5  ;;  %v3365_v35 = vsel %vm11615_vm5, %v8677_v33, %v3364_v24 }
 0x226   : > { %v2419_v59 = vpop.f32.mrb[131].mxu1  ;;  %4445 = vmatprep.subr.bf16.mxu0 %v13575_v8  ;;  %v3371_v46 = vrot.slane %v10188_v14, 5  ;;  %v11816_v63 = vcombine.low %v3358_v50, %v3361_v10  ;;  %v10070_v10 = vld [vmem:[%s13538_s1 + $0x468] sm:$0xff]  }
 0x227   : > { %v11799_v51 = vadd.f32 %v2417_v40, %v1493_v13  ;;  %3778 = vmatmul.mubr.bf16.gmra.mrb[236].mxu0 %v11758_v41  ;;  %v3368_v29 = vsel %vm11615_vm5, %v3366_v31, %v3367_v45  ;;  %v3238_v40 = vld [vmem:[%s10378_s21 + $0xd8] sm:$0xee] }
 0x228   : > { %4138 = vmatmul.mubr.bf16.gmra.mrb[236].mxu1 %v11787_v62  ;;  %3785 = vmatprep.mubr.bf16.mxu0 %v11763_v30  ;;  %v11821_v45 = vcombine.high %v3365_v35, %v3368_v29  ;;  %v8678_v14 = vrot.slane %v3238_v40, 9 }
 0x229   : > { %13593 = vst [vmem:[#allocation6_spill] sm:$0xff] %v11799_v51  ;;  %4145 = vmatprep.mubr.bf16.mxu1 %v11792_v25  ;;  %4446 = vmatpush1.bf16.msra.mxu0 %v10067_v18 }
 0x22a   : > { %v1441_v4 = vpop.f32.mrb[132].mxu0  ;;  %4447 = vmatprep.subr.bf16.mxu0 %v13575_v8  ;;  %13595 = vst [vmem:[#allocation9_spill] sm:$0xff] %v11821_v45 }
 0x22b   : > { %v1494_v16 = vadd.f32 %v1441_v4, %v11456_v23  ;;  %v1443_v13 = vpop.f32.mrb[133].mxu0  ;;  %v2422_v57 = vpop.f32.mrb[132].mxu1  ;;  %v10069_v23 = vld [vmem:[%s13538_s1 + $0x460] sm:$0xff]  }
 0x22c   : > { %v1444_v18 = vpop.f32.mrb[134].mxu0  ;;  %v2424_v59 = vpop.f32.mrb[133].mxu1  ;;  %v3373_v13 = vrot.slane %v3371_v46, 4 }
 0x22d   : > { %v1495_v51 = vadd.f32 %v1444_v18, %v11461_v7  ;;  %v11819_v24 = vadd.f32 %v2422_v57, %v1494_v16  ;;  %v1446_v33 = vpop.f32.mrb[135].mxu0  ;;  %v2425_v31 = vpop.f32.mrb[134].mxu1  ;;  %4448 = vmatpush1.bf16.msra.mxu0 %v10068_v3  ;;  %v10189_v59 = vld [vmem:[%s10378_s21 + $0xe8] sm:$0x11]  ;;  %v3372_v16 = vsel %vm11615_vm5, %v8678_v14, %v3371_v46  ;;  %v10190_v57 = vld [vmem:[%s10378_s21 + $0xf8] sm:$0xff] }
 0x22e   : > { %v2427_v4 = vpop.f32.mrb[135].mxu1  ;;  %v3374_v50 = vrot.slane %v10189_v59, 5  ;;  %4449 = vmatprep.subr.bf16.mxu0 %v13575_v8  ;;  %v3378_v40 = vrot.slane %v10190_v57, 5 }
 0x22f   : > { %13594 = vst [vmem:[#allocation7_spill] sm:$0xff] %v11819_v24  ;;  %v11828_v7 = vadd.f32 %v2425_v31, %v1495_v51  ;;  %3786 = vmatmul.mubr.bf16.gmra.mrb[240].mxu0 %v11787_v62 }
 0x230   : > { %4146 = vmatmul.mubr.bf16.gmra.mrb[240].mxu1 %v11816_v63  ;;  %3793 = vmatprep.mubr.bf16.mxu0 %v11792_v25  ;;  %v3375_v51 = vsel %vm11615_vm5, %v3373_v13, %v3374_v50 }
 0x231   : > { %13596 = vst [vmem:[#allocation10_spill] sm:$0xff] %v11828_v7  ;;  %4153 = vmatprep.mubr.bf16.mxu1 %v11821_v45  ;;  %4450 = vmatpush1.bf16.msra.mxu0 %v10069_v23  ;;  %v3239_v23 = vld [vmem:[%s10378_s21 + $0xf0] sm:$0xee]  ;;  %v11845_v7 = vcombine.low %v3365_v35, %v3368_v29  ;;  %v11850_v50 = vcombine.high %v3372_v16, %v3375_v51  ;;  %v10072_v29 = vld [vmem:[%s13538_s1 + $0x478] sm:$0xff]  }
 0x232   : > { %v1449_v3 = vpop.f32.mrb[136].mxu0  ;;  %4451 = vmatprep.subr.bf16.mxu0 %v13575_v8  ;;  %v8679_v57 = vrot.slane %v3239_v23, 9 }
 0x233   : > { %v1496_v18 = vadd.f32 %v1449_v3, %v11480_v34  ;;  %v1451_v33 = vpop.f32.mrb[137].mxu0  ;;  %v2430_v31 = vpop.f32.mrb[136].mxu1  ;;  %v10071_v34 = vld [vmem:[%s13538_s1 + $0x470] sm:$0xff]  }
 0x234   : > { %v1452_v4 = vpop.f32.mrb[138].mxu0  ;;  %v2432_v59 = vpop.f32.mrb[137].mxu1  ;;  %v3380_v33 = vrot.slane %v3378_v40, 4 }
 0x235   : > { %v1497_v24 = vadd.f32 %v1452_v4, %v11485_v55  ;;  %v11848_v46 = vadd.f32 %v2430_v31, %v1496_v18  ;;  %v1454_v14 = vpop.f32.mrb[139].mxu0  ;;  %v2433_v13 = vpop.f32.mrb[138].mxu1  ;;  %4452 = vmatpush1.bf16.msra.mxu0 %v10070_v10  ;;  %v10191_v59 = vld [vmem:[%s10378_s21 + $0x100] sm:$0x11]  ;;  %v3379_v18 = vsel %vm11615_vm5, %v8679_v57, %v3378_v40  ;;  %v10192_v31 = vld [vmem:[%s10378_s21 + $0x110] sm:$0xff] }
 0x236   : > { %v2435_v3 = vpop.f32.mrb[139].mxu1  ;;  %v3381_v35 = vrot.slane %v10191_v59, 5  ;;  %4453 = vmatprep.subr.bf16.mxu0 %v13575_v8  ;;  %v3385_v23 = vrot.slane %v10192_v31, 5 }
 0x237   : > { %13597 = vst [vmem:[#allocation11_spill] sm:$0xff] %v11848_v46  ;;  %v11857_v55 = vadd.f32 %v2433_v13, %v1497_v24  ;;  %3794 = vmatmul.mubr.bf16.gmra.mrb[244].mxu0 %v11816_v63 }
 0x238   : > { %4154 = vmatmul.mubr.bf16.gmra.mrb[244].mxu1 %v11845_v7  ;;  %3801 = vmatprep.mubr.bf16.mxu0 %v11821_v45  ;;  %v3382_v24 = vsel %vm11615_vm5, %v3380_v33, %v3381_v35 }
 0x239   : > { %13598 = vst [vmem:[#allocation12_spill] sm:$0xff] %v11857_v55  ;;  %4161 = vmatprep.mubr.bf16.mxu1 %v11850_v50  ;;  %4454 = vmatpush1.bf16.msra.mxu0 %v10071_v34  ;;  %v3240_v34 = vld [vmem:[%s10378_s21 + $0x108] sm:$0xee]  ;;  %v11874_v55 = vcombine.low %v3372_v16, %v3375_v51  ;;  %v11879_v35 = vcombine.high %v3379_v18, %v3382_v24 }
 0x23a   : > { %v1457_v10 = vpop.f32.mrb[140].mxu0  ;;  %4455 = vmatprep.subr.bf16.mxu0 %v13575_v8 }
 0x23b   : > { %v1498_v4 = vadd.f32 %v1457_v10, %v11504_v2  ;;  %v1459_v14 = vpop.f32.mrb[141].mxu0  ;;  %v2438_v13 = vpop.f32.mrb[140].mxu1  ;;  %v8680_v2 = vrot.slane %v3240_v34, 9  ;;  %v3387_v10 = vrot.slane %v3385_v23, 4 }
 0x23c   : > { %v1460_v3 = vpop.f32.mrb[142].mxu0  ;;  %v2440_v59 = vpop.f32.mrb[141].mxu1  ;;  %v10193_v14 = vld [vmem:[%s10378_s21 + $0x118] sm:$0x11] }
 0x23d   : > { %v1499_v46 = vadd.f32 %v1460_v3, %v11507_v44  ;;  %v11877_v40 = vadd.f32 %v2438_v13, %v1498_v4  ;;  %v1462_v57 = vpop.f32.mrb[143].mxu0  ;;  %v2441_v33 = vpop.f32.mrb[142].mxu1  ;;  %4456 = vmatpush1.bf16.msra.mxu0 %v10072_v29  ;;  %v3388_v8 = vrot.slane %v10193_v14, 5  ;;  %v3386_v16 = vsel %vm11615_vm5, %v8680_v2, %v3385_v23  ;;  %v10194_v29 = vld [vmem:[%s10378_s21 + $0x128] sm:$0xff]  ;;  %v3241_v3 = vld [vmem:[%s10378_s21 + $0x120] sm:$0xee] }
 0x23e   : > { %v2443_v31 = vpop.f32.mrb[143].mxu1  ;;  %v3392_v4 = vrot.slane %v10194_v29, 5  ;;  %v8681_v29 = vrot.slane %v3241_v3, 9 }
 0x23f   : > { %v11882_v45 = vadd.f32 %v2441_v33, %v1499_v46  ;;  %3802 = vmatmul.mubr.bf16.gmra.mrb[248].mxu0 %v11845_v7  ;;  %v3389_v51 = vsel %vm11615_vm5, %v3387_v10, %v3388_v8  ;;  %v11895_v33 = vcombine.low %v3379_v18, %v3382_v24 }
 0x240   : > { %4162 = vmatmul.mubr.bf16.gmra.mrb[248].mxu1 %v11874_v55  ;;  %3809 = vmatprep.mubr.bf16.mxu0 %v11850_v50  ;;  %v11900_v8 = vcombine.high %v3386_v16, %v3389_v51  ;;  %v3393_v18 = vsel %vm11615_vm5, %v8681_v29, %v3392_v4 }
 0x241   : > { %13599 = vst [vmem:[#allocation13_spill] sm:$0xff] %v11882_v45  ;;  %4169 = vmatprep.mubr.bf16.mxu1 %v11879_v35  ;;  %v3394_v45 = vrot.slane %v3392_v4, 4 }
 0x242   : > { %v2676_v44 = vpop.f32.mrb[144].mxu0 }
 0x243   : > { %v2819_v46 = vadd.f32 %v2676_v44, %v11515_v36  ;;  %v2678_v13 = vpop.f32.mrb[145].mxu0  ;;  %v3050_v34 = vpop.f32.mrb[144].mxu1  ;;  %v10195_v36 = vld [vmem:[%s10378_s21 + $0x130] sm:$0x11] }
 0x244   : > { %v2679_v59 = vpop.f32.mrb[146].mxu0  ;;  %v3052_v57 = vpop.f32.mrb[145].mxu1  ;;  %v3395_v44 = vrot.slane %v10195_v36, 5 }
 0x245   : > { %v2820_v31 = vadd.f32 %v2679_v59, %v11518_v61  ;;  %v11898_v14 = vadd.f32 %v3050_v34, %v2819_v46  ;;  %v2681_v23 = vpop.f32.mrb[147].mxu0  ;;  %v3053_v2 = vpop.f32.mrb[146].mxu1  ;;  %v10196_v46 = vld [vmem:[%s10378_s21 + $0x140] sm:$0xff] }
 0x246   : > { %v3055_v10 = vpop.f32.mrb[147].mxu1  ;;  %v3396_v24 = vsel %vm11615_vm5, %v3394_v45, %v3395_v44  ;;  %v3399_v34 = vrot.slane %v10196_v46, 5 }
 0x247   : > { %13600 = vst [vmem:[#allocation14_spill] sm:$0xff] %v11898_v14  ;;  %v11903_v13 = vadd.f32 %v3053_v2, %v2820_v31  ;;  %3810 = vmatmul.mubr.bf16.gmra.mrb[252].mxu0 %v11874_v55  ;;  %v3242_v31 = vld [vmem:[%s10378_s21 + $0x138] sm:$0xee]  ;;  %v11916_v10 = vcombine.low %v3386_v16, %v3389_v51  ;;  %v11921_v45 = vcombine.high %v3393_v18, %v3396_v24 }
 0x248   : > { %4170 = vmatmul.mubr.bf16.gmra.mrb[252].mxu1 %v11895_v33  ;;  %3817 = vmatprep.mubr.bf16.mxu0 %v11879_v35  ;;  %v8682_v46 = vrot.slane %v3242_v31, 9  ;;  %v3401_v14 = vrot.slane %v3399_v34, 4 }
 0x249   : > { %13601 = vst [vmem:[#allocation15_spill] sm:$0xff] %v11903_v13  ;;  %4177 = vmatprep.mubr.bf16.mxu1 %v11900_v8  ;;  %13602 = vst [vmem:[#allocation16_spill] sm:$0xff] %v11916_v10 }
 0x24a   : > { %v2684_v61 = vpop.f32.mrb[148].mxu0  ;;  %13604 = vst [vmem:[#allocation18_spill] sm:$0xff] %v11921_v45  ;;  %v3400_v16 = vsel %vm11615_vm5, %v8682_v46, %v3399_v34 }
 0x24b   : > { %v2821_v3 = vadd.f32 %v2684_v61, %v11525_v5  ;;  %v2686_v59 = vpop.f32.mrb[149].mxu0  ;;  %v3058_v57 = vpop.f32.mrb[148].mxu1  ;;  %v10197_v5 = vld [vmem:[%s10378_s21 + $0x148] sm:$0x11] }
 0x24c   : > { %v2687_v23 = vpop.f32.mrb[150].mxu0  ;;  %v3060_v2 = vpop.f32.mrb[149].mxu1  ;;  %v3402_v61 = vrot.slane %v10197_v5, 5 }
 0x24d   : > { %v2822_v36 = vadd.f32 %v2687_v23, %v11528_v39  ;;  %v11919_v13 = vadd.f32 %v3058_v57, %v2821_v3  ;;  %v2689_v4 = vpop.f32.mrb[151].mxu0  ;;  %v3061_v29 = vpop.f32.mrb[150].mxu1  ;;  %v10198_v3 = vld [vmem:[%s10378_s21 + $0x158] sm:$0xff] }
 0x24e   : > { %v3063_v44 = vpop.f32.mrb[151].mxu1  ;;  %v3403_v51 = vsel %vm11615_vm5, %v3401_v14, %v3402_v61  ;;  %v3406_v57 = vrot.slane %v10198_v3, 5 }
 0x24f   : > { %13603 = vst [vmem:[#allocation17_spill] sm:$0xff] %v11919_v13  ;;  %v11924_v59 = vadd.f32 %v3061_v29, %v2822_v36  ;;  %3818 = vmatmul.mubr.bf16.gmra.mrb[0].mxu0 %v11895_v33  ;;  %v3243_v36 = vld [vmem:[%s10378_s21 + $0x150] sm:$0xee]  ;;  %v11937_v44 = vcombine.low %v3393_v18, %v3396_v24  ;;  %v11942_v14 = vcombine.high %v3400_v16, %v3403_v51 }
 0x250   : > { %4178 = vmatmul.mubr.bf16.gmra.mrb[0].mxu1 %v11916_v10  ;;  %3825 = vmatprep.mubr.bf16.mxu0 %v11900_v8  ;;  %v8683_v3 = vrot.slane %v3243_v36, 9  ;;  %v3408_v13 = vrot.slane %v3406_v57, 4  ;;  %v13610_v36 = vld [vmem:[#allocation3_spill] sm:$0xff] }
 0x251   : > { %13605 = vst [vmem:[#allocation19_spill] sm:$0xff] %v11924_v59  ;;  %4185 = vmatprep.mubr.bf16.mxu1 %v11921_v45  ;;  %13606 = vst [vmem:[#allocation20_spill] sm:$0xff] %v11937_v44 }
 0x252   : > { %v2692_v39 = vpop.f32.mrb[152].mxu0  ;;  %13608 = vst [vmem:[#allocation22_spill] sm:$0xff] %v11942_v14  ;;  %v3407_v18 = vsel %vm11615_vm5, %v8683_v3, %v3406_v57 }
 0x253   : > { %v2823_v31 = vadd.f32 %v2692_v39, %v11535_v27  ;;  %v2694_v23 = vpop.f32.mrb[153].mxu0  ;;  %v3066_v2 = vpop.f32.mrb[152].mxu1  ;;  %v10199_v27 = vld [vmem:[%s10378_s21 + $0x160] sm:$0x11] }
 0x254   : > { %v2695_v4 = vpop.f32.mrb[154].mxu0  ;;  %v3068_v29 = vpop.f32.mrb[153].mxu1  ;;  %v3409_v39 = vrot.slane %v10199_v27, 5  ;;  %v11958_v27 = vcombine.low %v3400_v16, %v3403_v51 }
 0x255   : > { %v2824_v5 = vadd.f32 %v2695_v4, %v11538_v12  ;;  %v11940_v59 = vadd.f32 %v3066_v2, %v2823_v31  ;;  %v2697_v34 = vpop.f32.mrb[155].mxu0  ;;  %v3069_v46 = vpop.f32.mrb[154].mxu1  ;;  %v10200_v31 = vld [vmem:[%s10378_s21 + $0x170] sm:$0xff] }
 0x256   : > { %v3071_v61 = vpop.f32.mrb[155].mxu1  ;;  %v3410_v24 = vsel %vm11615_vm5, %v3408_v13, %v3409_v39  ;;  %v3413_v2 = vrot.slane %v10200_v31, 5  ;;  %v3244_v34 = vld [vmem:[%s10378_s21 + $0x168] sm:$0xee] }
 0x257   : > { %13607 = vst [vmem:[#allocation21_spill] sm:$0xff] %v11940_v59  ;;  %v11945_v23 = vadd.f32 %v3069_v46, %v2824_v5  ;;  %3826 = vmatmul.mubr.bf16.gmra.mrb[4].mxu0 %v11916_v10  ;;  %v11961_v57 = vcombine.high %v3407_v18, %v3410_v24  ;;  %v8684_v39 = vrot.slane %v3244_v34, 9 }
 0x258   : > { %4186 = vmatmul.mubr.bf16.gmra.mrb[4].mxu1 %v11937_v44  ;;  %3833 = vmatprep.mubr.bf16.mxu0 %v11921_v45  ;;  %v3415_v31 = vrot.slane %v3413_v2, 4 }
 0x259   : > { %13609 = vst [vmem:[#allocation23_spill] sm:$0xff] %v11945_v23  ;;  %4193 = vmatprep.mubr.bf16.mxu1 %v11942_v14  ;;  %v13611_v23 = vld [vmem:[#allocation8_spill] sm:$0xff]  ;;  %v3414_v16 = vsel %vm11615_vm5, %v8684_v39, %v3413_v2 }
 0x25a   : > { %v2700_v12 = vpop.f32.mrb[156].mxu0 }
 0x25b   : > { %v2825_v4 = vadd.f32 %v2700_v12, %v13610_v36  ;;  %v2702_v29 = vpop.f32.mrb[157].mxu0  ;;  %v3074_v5 = vpop.f32.mrb[156].mxu1  ;;  %v10201_v12 = vld [vmem:[%s10378_s21 + $0x178] sm:$0x11] }
 0x25c   : > { %v2703_v46 = vpop.f32.mrb[158].mxu0  ;;  %v3076_v61 = vpop.f32.mrb[157].mxu1  ;;  %v3416_v36 = vrot.slane %v10201_v12, 5  ;;  %v11979_v12 = vcombine.low %v3407_v18, %v3410_v24 }
 0x25d   : > { %v2826_v59 = vadd.f32 %v2703_v46, %v13611_v23  ;;  %v2705_v45 = vpop.f32.mrb[159].mxu0  ;;  %v3077_v10 = vpop.f32.mrb[158].mxu1  ;;  %v11963_v13 = vadd.f32 %v3074_v5, %v2825_v4  ;;  %v10202_v23 = vld [vmem:[%s10378_s21 + $0x188] sm:$0xff]  ;;  %v3245_v46 = vld [vmem:[%s10378_s21 + $0x180] sm:$0xee] }
 0x25e   : > { %v3079_v3 = vpop.f32.mrb[159].mxu1  ;;  %v3417_v51 = vsel %vm11615_vm5, %v3415_v31, %v3416_v36  ;;  %v3420_v4 = vrot.slane %v10202_v23, 5  ;;  %v13614_v5 = vld [vmem:[#allocation4_spill] sm:$0xff]  ;;  %v8685_v36 = vrot.slane %v3245_v46, 9  ;;  %v3246_v46 = vld [vmem:[%s10378_s21 + $0x198] sm:$0xee] }
 0x25f   : > { %13612 = vst [vmem:[#allocation3_spill] sm:$0xff] %v11963_v13  ;;  %3834 = vmatmul.mubr.bf16.gmra.mrb[8].mxu0 %v11937_v44  ;;  %v11967_v29 = vadd.f32 %v3077_v10, %v2826_v59  ;;  %v11982_v2 = vcombine.high %v3414_v16, %v3417_v51 }
 0x260   : > { %4194 = vmatmul.mubr.bf16.gmra.mrb[8].mxu1 %v11958_v27  ;;  %3841 = vmatprep.mubr.bf16.mxu0 %v11942_v14  ;;  %v3422_v23 = vrot.slane %v3420_v4, 4  ;;  %v3421_v18 = vsel %vm11615_vm5, %v8685_v36, %v3420_v4 }
 0x261   : > { %13613 = vst [vmem:[#allocation8_spill] sm:$0xff] %v11967_v29  ;;  %4201 = vmatprep.mubr.bf16.mxu1 %v11961_v57  ;;  %v13615_v29 = vld [vmem:[#allocation5_spill] sm:$0xff]  ;;  %13616 = vst [vmem:[#allocation4_spill] sm:$0xff] %v11982_v2 }
 0x262   : > { %v2708_v45 = vpop.f32.mrb[160].mxu0 }
 0x263   : > { %v2827_v34 = vadd.f32 %v2708_v45, %v13614_v5  ;;  %v2710_v10 = vpop.f32.mrb[161].mxu0  ;;  %v3082_v59 = vpop.f32.mrb[160].mxu1  ;;  %v10203_v45 = vld [vmem:[%s10378_s21 + $0x190] sm:$0x11] }
 0x264   : > { %v2711_v61 = vpop.f32.mrb[162].mxu0  ;;  %v3084_v3 = vpop.f32.mrb[161].mxu1  ;;  %v3423_v5 = vrot.slane %v10203_v45, 5 }
 0x265   : > { %v2828_v13 = vadd.f32 %v2711_v61, %v13615_v29  ;;  %v2713_v14 = vpop.f32.mrb[163].mxu0  ;;  %v3085_v44 = vpop.f32.mrb[162].mxu1  ;;  %v11984_v39 = vadd.f32 %v3082_v59, %v2827_v34  ;;  %v10204_v29 = vld [vmem:[%s10378_s21 + $0x1a0] sm:$0xff] }
 0x266   : > { %v3087_v31 = vpop.f32.mrb[163].mxu1  ;;  %v3424_v24 = vsel %vm11615_vm5, %v3422_v23, %v3423_v5  ;;  %v3427_v34 = vrot.slane %v10204_v29, 5  ;;  %v8686_v29 = vrot.slane %v3246_v46, 9 }
 0x267   : > { %13617 = vst [vmem:[#allocation5_spill] sm:$0xff] %v11984_v39  ;;  %3842 = vmatmul.mubr.bf16.gmra.mrb[12].mxu0 %v11958_v27  ;;  %v11988_v10 = vadd.f32 %v3085_v44, %v2828_v13  ;;  %v12000_v31 = vcombine.low %v3414_v16, %v3417_v51  ;;  %v12005_v23 = vcombine.high %v3421_v18, %v3424_v24 }
 0x268   : > { %4202 = vmatmul.mubr.bf16.gmra.mrb[12].mxu1 %v11979_v12  ;;  %3849 = vmatprep.mubr.bf16.mxu0 %v11961_v57  ;;  %v3428_v16 = vsel %vm11615_vm5, %v8686_v29, %v3427_v34 }
 0x269   : > { %13618 = vst [vmem:[#allocation24_spill] sm:$0xff] %v11988_v10  ;;  %4209 = vmatprep.mubr.bf16.mxu1 %v11982_v2 }
 0x26a   : > { %v2716_v14 = vpop.f32.mrb[164].mxu0 }
 0x26b   : > { %v2718_v59 = vpop.f32.mrb[165].mxu0  ;;  %v2829_v44 = vadd.f32 %v2716_v14, %v11572_v17  ;;  %v3090_v13 = vpop.f32.mrb[164].mxu1  ;;  %v10205_v17 = vld [vmem:[%s10378_s21 + $0x1a8] sm:$0x11] }
 0x26c   : > { %v2719_v61 = vpop.f32.mrb[166].mxu0  ;;  %v3092_v3 = vpop.f32.mrb[165].mxu1  ;;  %v3429_v59 = vrot.slane %v3427_v34, 4  ;;  %v3430_v14 = vrot.slane %v10205_v17, 5 }
 0x26d   : > { %v12002_v45 = vadd.f32 %v3090_v13, %v2829_v44  ;;  %v2721_v10 = vpop.f32.mrb[167].mxu0  ;;  %v2830_v4 = vadd.f32 %v2719_v61, %v11576_v49  ;;  %v3093_v36 = vpop.f32.mrb[166].mxu1  ;;  %v3247_v3 = vld [vmem:[%s10378_s21 + $0x1b0] sm:$0xee] }
 0x26e   : > { %v3095_v5 = vpop.f32.mrb[167].mxu1  ;;  %v3431_v51 = vsel %vm11615_vm5, %v3429_v59, %v3430_v14  ;;  %v10206_v10 = vld [vmem:[%s10378_s21 + $0x1b8] sm:$0xff]  ;;  %v8771_v14 = vrot.slane %v3247_v3, 9 }
 0x26f   : > { %13619 = vst [vmem:[#allocation25_spill] sm:$0xff] %v12002_v45  ;;  %v12008_v39 = vadd.f32 %v3093_v36, %v2830_v4  ;;  %3850 = vmatmul.mubr.bf16.gmra.mrb[16].mxu0 %v11979_v12  ;;  %v3923_v44 = vrot.slane %v10206_v10, 5  ;;  %v12021_v5 = vcombine.low %v3421_v18, %v3424_v24  ;;  %v12026_v45 = vcombine.high %v3428_v16, %v3431_v51 }
 0x270   : > { %4210 = vmatmul.mubr.bf16.gmra.mrb[16].mxu1 %v12000_v31  ;;  %3857 = vmatprep.mubr.bf16.mxu0 %v11982_v2 }
 0x271   : > { %13620 = vst [vmem:[#allocation26_spill] sm:$0xff] %v12008_v39  ;;  %4217 = vmatprep.mubr.bf16.mxu1 %v12005_v23  ;;  %v3925_v10 = vrot.slane %v3923_v44, 4 }
 0x272   : > { %v2724_v49 = vpop.f32.mrb[168].mxu0 }
 0x273   : > { %v2726_v13 = vpop.f32.mrb[169].mxu0  ;;  %v2831_v46 = vadd.f32 %v2724_v49, %v11587_v38  ;;  %v3098_v61 = vpop.f32.mrb[168].mxu1 }
 0x274   : > { %v2727_v4 = vpop.f32.mrb[170].mxu0  ;;  %v3100_v36 = vpop.f32.mrb[169].mxu1  ;;  %v10207_v13 = vld [vmem:[%s10378_s21 + $0x1c0] sm:$0x11] }
 0x275   : > { %v12023_v17 = vadd.f32 %v3098_v61, %v2831_v46  ;;  %v2729_v39 = vpop.f32.mrb[171].mxu0  ;;  %v2832_v34 = vadd.f32 %v2727_v4, %v11590_v37  ;;  %v3101_v29 = vpop.f32.mrb[170].mxu1  ;;  %v3926_v2 = vrot.slane %v10207_v13, 5  ;;  %v3924_v37 = vsel %vm11615_vm5, %v8771_v14, %v3923_v44 }
 0x276   : > { %v3103_v59 = vpop.f32.mrb[171].mxu1  ;;  %v12040_v4 = vcombine.low %v3428_v16, %v3431_v51 }
 0x277   : > { %v12029_v38 = vadd.f32 %v3101_v29, %v2832_v34  ;;  %3858 = vmatmul.mubr.bf16.gmra.mrb[20].mxu0 %v12000_v31  ;;  %v3927_v18 = vsel %vm11615_vm5, %v3925_v10, %v3926_v2 }
 0x278   : > { %4218 = vmatmul.mubr.bf16.gmra.mrb[20].mxu1 %v12021_v5  ;;  %3865 = vmatprep.mubr.bf16.mxu0 %v12005_v23  ;;  %v12045_v13 = vcombine.high %v3924_v37, %v3927_v18 }
 0x279   : > { %4225 = vmatprep.mubr.bf16.mxu1 %v12026_v45 }
 0x27a   : > { %v2732_v39 = vpop.f32.mrb[172].mxu0 }
 0x27b   : > { %v2734_v24 = vpop.f32.mrb[173].mxu0  ;;  %v2833_v49 = vadd.f32 %v2732_v39, %v11610_v1  ;;  %v3106_v46 = vpop.f32.mrb[172].mxu1  ;;  %v12054_v39 = vcombine.low %v3924_v37, %v3927_v18 }
 0x27c   : > { %v2735_v61 = vpop.f32.mrb[174].mxu0  ;;  %v3108_v3 = vpop.f32.mrb[173].mxu1 }
 0x27d   : > { %v12042_v36 = vadd.f32 %v3106_v46, %v2833_v49  ;;  %v2737_v34 = vpop.f32.mrb[175].mxu0  ;;  %v2834_v29 = vadd.f32 %v2735_v61, %v11620_v58  ;;  %v3109_v59 = vpop.f32.mrb[174].mxu1 }
 0x27e   : > { %v3111_v44 = vpop.f32.mrb[175].mxu1 }
 0x27f   : > { %v12047_v14 = vadd.f32 %v3109_v59, %v2834_v29  ;;  %3866 = vmatmul.mubr.bf16.gmra.mrb[24].mxu0 %v12021_v5 }
 0x280   : > { %4226 = vmatmul.mubr.bf16.gmra.mrb[24].mxu1 %v12040_v4  ;;  %3873 = vmatprep.mubr.bf16.mxu0 %v12026_v45 }
 0x281   : > { %4233 = vmatprep.mubr.bf16.mxu1 %v12045_v13 }
 0x282   : > { %v2740_v1 = vpop.f32.mrb[176].mxu0 }
 0x283   : > { %v2742_v2 = vpop.f32.mrb[177].mxu0  ;;  %v2835_v16 = vadd.f32 %v2740_v1, %v11637_v9  ;;  %v3114_v51 = vpop.f32.mrb[176].mxu1 }
 0x284   : > { %v2743_v58 = vpop.f32.mrb[178].mxu0  ;;  %v3116_v10 = vpop.f32.mrb[177].mxu1 }
 0x285   : > { %v12056_v24 = vadd.f32 %v3114_v51, %v2835_v16  ;;  %v2745_v49 = vpop.f32.mrb[179].mxu0  ;;  %v2836_v46 = vadd.f32 %v2743_v58, %v11640_v22  ;;  %v3117_v61 = vpop.f32.mrb[178].mxu1 }
 0x286   : > { %v3119_v3 = vpop.f32.mrb[179].mxu1 }
 0x287   : > { %v12059_v34 = vadd.f32 %v3117_v61, %v2836_v46  ;;  %3874 = vmatmul.mubr.bf16.gmra.mrb[28].mxu0 %v12040_v4 }
 0x288   : > { %4234 = vmatmul.mubr.bf16.gmra.mrb[28].mxu1 %v12054_v39  ;;  %4457 = vmatprep.mubr.bf16.mxu0 %v11655_v28 }
 0x28a   : > { %v2748_v9 = vpop.f32.mrb[180].mxu0 }
 0x28b   : > { %v2750_v29 = vpop.f32.mrb[181].mxu0  ;;  %v2837_v37 = vadd.f32 %v2748_v9, %v11653_v20  ;;  %v3122_v18 = vpop.f32.mrb[180].mxu1 }
 0x28c   : > { %v2751_v59 = vpop.f32.mrb[182].mxu0  ;;  %v3124_v44 = vpop.f32.mrb[181].mxu1 }
 0x28d   : > { %v12065_v1 = vadd.f32 %v3122_v18, %v2837_v37  ;;  %v2753_v22 = vpop.f32.mrb[183].mxu0  ;;  %v2838_v2 = vadd.f32 %v2751_v59, %v11658_v53  ;;  %v3125_v16 = vpop.f32.mrb[182].mxu1 }
 0x28e   : > { %v3127_v51 = vpop.f32.mrb[183].mxu1 }
 0x28f   : > { %v12068_v58 = vadd.f32 %v3125_v16, %v2838_v2  ;;  %4458 = vmatmul.mubr.bf16.vlgmr.msra.gmra.mrb[32].mxu0 %v11672_v56 }
 0x290   : > { %4465 = vmatprep.mubr.bf16.mxu0 %v11677_v52 }
 0x292   : > { %v2756_v28 = vpop.f32.mrb[184].mxu0 }
 0x293   : > { %v2758_v10 = vpop.f32.mrb[185].mxu0  ;;  %v2839_v20 = vadd.f32 %v2756_v28, %v11675_v32  ;;  %v3130_v49 = vpop.f32.mrb[184].mxu1 }
 0x294   : > { %v2759_v46 = vpop.f32.mrb[186].mxu0  ;;  %v3132_v61 = vpop.f32.mrb[185].mxu1 }
 0x295   : > { %v12073_v3 = vadd.f32 %v3130_v49, %v2839_v20  ;;  %v2761_v9 = vpop.f32.mrb[187].mxu0  ;;  %v2840_v53 = vadd.f32 %v2759_v46, %v11684_v15  ;;  %v3133_v29 = vpop.f32.mrb[186].mxu1 }
 0x296   : > { %v3135_v37 = vpop.f32.mrb[187].mxu1 }
 0x297   : > { %v12076_v18 = vadd.f32 %v3133_v29, %v2840_v53  ;;  %4466 = vmatmul.mubr.bf16.gmra.mrb[36].mxu0 %v11700_v48 }
 0x298   : > { %4473 = vmatprep.mubr.bf16.mxu0 %v11705_v19 }
 0x29a   : > { %v2764_v56 = vpop.f32.mrb[188].mxu0 }
 0x29b   : > { %v2766_v52 = vpop.f32.mrb[189].mxu0  ;;  %v2841_v32 = vadd.f32 %v2764_v56, %v11703_v0  ;;  %v3138_v59 = vpop.f32.mrb[188].mxu1 }
 0x29c   : > { %v2767_v44 = vpop.f32.mrb[190].mxu0  ;;  %v3140_v22 = vpop.f32.mrb[189].mxu1 }
 0x29d   : > { %v12081_v2 = vadd.f32 %v3138_v59, %v2841_v32  ;;  %v2769_v16 = vpop.f32.mrb[191].mxu0  ;;  %v2842_v15 = vadd.f32 %v2767_v44, %v11712_v54  ;;  %v3141_v51 = vpop.f32.mrb[190].mxu1 }
 0x29e   : > { %v3143_v28 = vpop.f32.mrb[191].mxu1 }
 0x29f   : > { %v12084_v10 = vadd.f32 %v3141_v51, %v2842_v15  ;;  %4474 = vmatmul.mubr.bf16.gmra.mrb[40].mxu0 %v11729_v60 }
 0x2a0   : > { %4481 = vmatprep.mubr.bf16.mxu0 %v11734_v6 }
 0x2a2   : > { %v2772_v48 = vpop.f32.mrb[192].mxu0 }
 0x2a3   : > { %v2774_v19 = vpop.f32.mrb[193].mxu0  ;;  %v2843_v0 = vadd.f32 %v2772_v48, %v11732_v11  ;;  %v3146_v20 = vpop.f32.mrb[192].mxu1 }
 0x2a4   : > { %v2775_v49 = vpop.f32.mrb[194].mxu0  ;;  %v3148_v46 = vpop.f32.mrb[193].mxu1 }
 0x2a5   : > { %v12089_v61 = vadd.f32 %v3146_v20, %v2843_v0  ;;  %v2777_v9 = vpop.f32.mrb[195].mxu0  ;;  %v2844_v54 = vadd.f32 %v2775_v49, %v11741_v26  ;;  %v3149_v53 = vpop.f32.mrb[194].mxu1  ;;  %v13621_v20 = vld [vmem:[#allocation6_spill] sm:$0xff] }
 0x2a6   : > { %v3151_v29 = vpop.f32.mrb[195].mxu1 }
 0x2a7   : > { %v12092_v37 = vadd.f32 %v3149_v53, %v2844_v54  ;;  %4482 = vmatmul.mubr.bf16.gmra.mrb[44].mxu0 %v11758_v41  ;;  %v13623_v29 = vld [vmem:[#allocation7_spill] sm:$0xff] }
 0x2a8   : > { %4489 = vmatprep.mubr.bf16.mxu0 %v11763_v30 }
 0x2aa   : > { %v2780_v60 = vpop.f32.mrb[196].mxu0 }
 0x2ab   : > { %v2782_v6 = vpop.f32.mrb[197].mxu0  ;;  %v2845_v11 = vadd.f32 %v2780_v60, %v11761_v43  ;;  %v3154_v56 = vpop.f32.mrb[196].mxu1 }
 0x2ac   : > { %v2783_v52 = vpop.f32.mrb[198].mxu0  ;;  %v3156_v32 = vpop.f32.mrb[197].mxu1 }
 0x2ad   : > { %v12097_v59 = vadd.f32 %v3154_v56, %v2845_v11  ;;  %v2785_v44 = vpop.f32.mrb[199].mxu0  ;;  %v2846_v26 = vadd.f32 %v2783_v52, %v11770_v42  ;;  %v3157_v22 = vpop.f32.mrb[198].mxu1  ;;  %v13624_v32 = vld [vmem:[#allocation10_spill] sm:$0xff] }
 0x2ae   : > { %v3159_v16 = vpop.f32.mrb[199].mxu1 }
 0x2af   : > { %v12100_v15 = vadd.f32 %v3157_v22, %v2846_v26  ;;  %4490 = vmatmul.mubr.bf16.gmra.mrb[48].mxu0 %v11787_v62  ;;  %v10073_v62 = vld [vmem:[%s13540_s3 + $0x100] sm:$0xff]  }
 0x2b0   : > { %4497 = vmatprep.mubr.bf16.mxu0 %v11792_v25  ;;  %v13622_v25 = vld [vmem:[#allocation9_spill] sm:$0xff]  ;;  %9679 = vmatprep.subr.bf16.mxu1 %v10073_v62 }
 0x2b1   : > { %9067 = vmatprep.subr.bf16.mxu0 %v10073_v62 }
 0x2b2   : > { %v2788_v41 = vpop.f32.mrb[200].mxu0 }
 0x2b3   : > { %v2790_v30 = vpop.f32.mrb[201].mxu0  ;;  %v2847_v43 = vadd.f32 %v2788_v41, %v11790_v47  ;;  %v3162_v51 = vpop.f32.mrb[200].mxu1  ;;  %v10074_v47 = vld [vmem:[%s13540_s3 + $0xc0] sm:$0xff]  }
 0x2b4   : > { %v2791_v28 = vpop.f32.mrb[202].mxu0  ;;  %v3164_v48 = vpop.f32.mrb[201].mxu1  ;;  %9687 = vmatpush3.bf16.msra.mxu1 %v10074_v47  ;;  %9068 = vmatpush3.bf16.msra.mxu0 %v10074_v47 }
 0x2b5   : > { %v12105_v19 = vadd.f32 %v3162_v51, %v2847_v43  ;;  %v2793_v0 = vpop.f32.mrb[203].mxu0  ;;  %v2848_v42 = vadd.f32 %v2791_v28, %v13621_v20  ;;  %v3165_v49 = vpop.f32.mrb[202].mxu1  ;;  %v13625_v43 = vld [vmem:[#allocation11_spill] sm:$0xff] }
 0x2b6   : > { %v3167_v46 = vpop.f32.mrb[203].mxu1 }
 0x2b7   : > { %v12108_v9 = vadd.f32 %v3165_v49, %v2848_v42  ;;  %4498 = vmatmul.mubr.bf16.gmra.mrb[52].mxu0 %v11816_v63  ;;  %v13626_v49 = vld [vmem:[#allocation12_spill] sm:$0xff] }
 0x2b8   : > { %4505 = vmatprep.mubr.bf16.mxu0 %v13622_v25 }
 0x2ba   : > { %v2796_v54 = vpop.f32.mrb[204].mxu0 }
 0x2bb   : > { %v2798_v53 = vpop.f32.mrb[205].mxu0  ;;  %v2849_v60 = vadd.f32 %v2796_v54, %v13623_v29  ;;  %v3170_v6 = vpop.f32.mrb[204].mxu1 }
 0x2bc   : > { %v2799_v63 = vpop.f32.mrb[206].mxu0  ;;  %v3172_v11 = vpop.f32.mrb[205].mxu1 }
 0x2bd   : > { %v12119_v56 = vadd.f32 %v3170_v6, %v2849_v60  ;;  %v2801_v52 = vpop.f32.mrb[207].mxu0  ;;  %v2850_v44 = vadd.f32 %v2799_v63, %v13624_v32  ;;  %v3173_v26 = vpop.f32.mrb[206].mxu1 }
 0x2be   : > { %v3175_v22 = vpop.f32.mrb[207].mxu1  ;;  %v13627_v52 = vld [vmem:[#allocation13_spill] sm:$0xff] }
 0x2bf   : > { %v12122_v16 = vadd.f32 %v3173_v26, %v2850_v44  ;;  %4506 = vmatmul.mubr.bf16.gmra.mrb[56].mxu0 %v11845_v7  ;;  %v10075_v7 = vld [vmem:[%s13540_s3 + $0x108] sm:$0xff]  }
 0x2c0   : > { %4513 = vmatprep.mubr.bf16.mxu0 %v11850_v50  ;;  %v10076_v50 = vld [vmem:[%s13540_s3 + $0xc8] sm:$0xff]   ;;  %9680 = vmatprep.subr.bf16.mxu1 %v10075_v7 }
 0x2c1   : > { %9069 = vmatprep.subr.bf16.mxu0 %v10075_v7  ;;  %9688 = vmatpush3.bf16.msra.mxu1 %v10076_v50  ;;  %v13630_v7 = vld [vmem:[#allocation16_spill] sm:$0xff] }
 0x2c2   : > { %v2804_v41 = vpop.f32.mrb[208].mxu0  ;;  %9070 = vmatpush3.bf16.msra.mxu0 %v10076_v50 }
 0x2c3   : > { %v2806_v30 = vpop.f32.mrb[209].mxu0  ;;  %v2851_v51 = vadd.f32 %v2804_v41, %v13625_v43  ;;  %v3178_v28 = vpop.f32.mrb[208].mxu1 }
 0x2c4   : > { %v2807_v48 = vpop.f32.mrb[210].mxu0  ;;  %v3180_v0 = vpop.f32.mrb[209].mxu1  ;;  %v13628_v30 = vld [vmem:[#allocation14_spill] sm:$0xff] }
 0x2c5   : > { %v12127_v20 = vadd.f32 %v3178_v28, %v2851_v51  ;;  %v2809_v42 = vpop.f32.mrb[211].mxu0  ;;  %v2852_v46 = vadd.f32 %v2807_v48, %v13626_v49  ;;  %v3181_v62 = vpop.f32.mrb[210].mxu1 }
 0x2c6   : > { %v3183_v47 = vpop.f32.mrb[211].mxu1  ;;  %v13629_v42 = vld [vmem:[#allocation15_spill] sm:$0xff] }
 0x2c7   : > { %v12130_v25 = vadd.f32 %v3181_v62, %v2852_v46  ;;  %4514 = vmatmul.mubr.bf16.gmra.mrb[60].mxu0 %v11874_v55 }
 0x2c8   : > { %4521 = vmatprep.mubr.bf16.mxu0 %v11879_v35 }
 0x2ca   : > { %v2812_v54 = vpop.f32.mrb[212].mxu0 }
 0x2cb   : > { %v2814_v53 = vpop.f32.mrb[213].mxu0  ;;  %v2853_v29 = vadd.f32 %v2812_v54, %v11877_v40  ;;  %v3186_v60 = vpop.f32.mrb[212].mxu1  ;;  %v13632_v54 = vld [vmem:[#allocation17_spill] sm:$0xff] }
 0x2cc   : > { %v2815_v55 = vpop.f32.mrb[214].mxu0  ;;  %v3188_v6 = vpop.f32.mrb[213].mxu1 }
 0x2cd   : > { %v12141_v63 = vadd.f32 %v3186_v60, %v2853_v29  ;;  %v2817_v11 = vpop.f32.mrb[215].mxu0  ;;  %v2854_v32 = vadd.f32 %v2815_v55, %v13627_v52  ;;  %v3189_v44 = vpop.f32.mrb[214].mxu1  ;;  %v10077_v60 = vld [vmem:[%s13540_s3 + $0x110] sm:$0xff]  }
 0x2ce   : > { %v3191_v26 = vpop.f32.mrb[215].mxu1  ;;  %v10078_v55 = vld [vmem:[%s13540_s3 + $0xd0] sm:$0xff]   ;;  %9681 = vmatprep.subr.bf16.mxu1 %v10077_v60  ;;  %9071 = vmatprep.subr.bf16.mxu0 %v10077_v60 }
 0x2cf   : > { %v12144_v22 = vadd.f32 %v3189_v44, %v2854_v32  ;;  %4522 = vmatmul.mubr.bf16.gmra.mrb[64].mxu0 %v11895_v33  ;;  %v13631_v33 = vld [vmem:[#allocation18_spill] sm:$0xff]  ;;  %v13633_v44 = vld [vmem:[#allocation19_spill] sm:$0xff]  ;;  %9689 = vmatpush3.bf16.msra.mxu1 %v10078_v55 }
 0x2d0   : > { %4529 = vmatprep.mubr.bf16.mxu0 %v11900_v8  ;;  %9072 = vmatpush3.bf16.msra.mxu0 %v10078_v55  ;;  %v13638_v55 = vld [vmem:[#allocation3_spill] sm:$0xff] }
 0x2d2   : > { %v3739_v35 = vpop.f32.mrb[216].mxu0 }
 0x2d3   : > { %v3741_v41 = vpop.f32.mrb[217].mxu0  ;;  %v3882_v40 = vadd.f32 %v3739_v35, %v13628_v30  ;;  %v4099_v43 = vpop.f32.mrb[216].mxu1 }
 0x2d4   : > { %v3742_v51 = vpop.f32.mrb[218].mxu0  ;;  %v4101_v28 = vpop.f32.mrb[217].mxu1 }
 0x2d5   : > { %v12149_v48 = vadd.f32 %v4099_v43, %v3882_v40  ;;  %v3744_v0 = vpop.f32.mrb[219].mxu0  ;;  %v3883_v49 = vadd.f32 %v3742_v51, %v13629_v42  ;;  %v4102_v46 = vpop.f32.mrb[218].mxu1  ;;  %v13634_v40 = vld [vmem:[#allocation20_spill] sm:$0xff]  ;;  %v13635_v43 = vld [vmem:[#allocation22_spill] sm:$0xff] }
 0x2d6   : > { %v4104_v62 = vpop.f32.mrb[219].mxu1  ;;  %v13636_v0 = vld [vmem:[#allocation21_spill] sm:$0xff] }
 0x2d7   : > { %v12152_v47 = vadd.f32 %v4102_v46, %v3883_v49  ;;  %4530 = vmatmul.mubr.bf16.gmra.mrb[68].mxu0 %v13630_v7 }
 0x2d8   : > { %4537 = vmatprep.mubr.bf16.mxu0 %v13631_v33 }
 0x2da   : > { %v3747_v8 = vpop.f32.mrb[220].mxu0 }
 0x2db   : > { %v3749_v50 = vpop.f32.mrb[221].mxu0  ;;  %v3884_v53 = vadd.f32 %v3747_v8, %v13632_v54  ;;  %v4107_v29 = vpop.f32.mrb[220].mxu1  ;;  %v13637_v8 = vld [vmem:[#allocation23_spill] sm:$0xff] }
 0x2dc   : > { %v3750_v6 = vpop.f32.mrb[222].mxu0  ;;  %v4109_v11 = vpop.f32.mrb[221].mxu1 }
 0x2dd   : > { %v12163_v52 = vadd.f32 %v4107_v29, %v3884_v53  ;;  %v3752_v32 = vpop.f32.mrb[223].mxu0  ;;  %v3885_v26 = vadd.f32 %v3750_v6, %v13633_v44  ;;  %v4110_v35 = vpop.f32.mrb[222].mxu1 }
 0x2de   : > { %v4112_v41 = vpop.f32.mrb[223].mxu1 }
 0x2df   : > { %v12166_v30 = vadd.f32 %v4110_v35, %v3885_v26  ;;  %4538 = vmatmul.mubr.bf16.gmra.mrb[72].mxu0 %v13634_v40  ;;  %v13639_v35 = vld [vmem:[#allocation8_spill] sm:$0xff] }
 0x2e0   : > { %4545 = vmatprep.mubr.bf16.mxu0 %v13635_v43 }
 0x2e2   : > { %v3755_v51 = vpop.f32.mrb[224].mxu0 }
 0x2e3   : > { %v3757_v28 = vpop.f32.mrb[225].mxu0  ;;  %v3886_v42 = vadd.f32 %v3755_v51, %v13636_v0  ;;  %v4115_v49 = vpop.f32.mrb[224].mxu1 }
 0x2e4   : > { %v3758_v46 = vpop.f32.mrb[226].mxu0  ;;  %v4117_v62 = vpop.f32.mrb[225].mxu1 }
 0x2e5   : > { %v12171_v7 = vadd.f32 %v4115_v49, %v3886_v42  ;;  %v3760_v33 = vpop.f32.mrb[227].mxu0  ;;  %v3887_v50 = vadd.f32 %v3758_v46, %v13637_v8  ;;  %v4118_v54 = vpop.f32.mrb[226].mxu1  ;;  %v13641_v42 = vld [vmem:[#allocation5_spill] sm:$0xff] }
 0x2e6   : > { %v4120_v53 = vpop.f32.mrb[227].mxu1 }
 0x2e7   : > { %v12174_v29 = vadd.f32 %v4118_v54, %v3887_v50  ;;  %4546 = vmatmul.mubr.bf16.gmra.mrb[76].mxu0 %v11958_v27  ;;  %v13640_v27 = vld [vmem:[#allocation4_spill] sm:$0xff] }
 0x2e8   : > { %4553 = vmatprep.mubr.bf16.mxu0 %v11961_v57  ;;  %v13642_v50 = vld [vmem:[#allocation24_spill] sm:$0xff] }
 0x2ea   : > { %v3763_v60 = vpop.f32.mrb[228].mxu0 }
 0x2eb   : > { %v3888_v6 = vadd.f32 %v3763_v60, %v13638_v55  ;;  %v3765_v11 = vpop.f32.mrb[229].mxu0  ;;  %v4123_v32 = vpop.f32.mrb[228].mxu1 }
 0x2ec   : > { %v3766_v44 = vpop.f32.mrb[230].mxu0  ;;  %v4125_v26 = vpop.f32.mrb[229].mxu1  ;;  %v4741_v11 = vld [vmem:[#allocation2 + $0x10] sm:$0x8] }
 0x2ed   : > { %v3889_v41 = vadd.f32 %v3766_v44, %v13639_v35  ;;  %v12180_v40 = vadd.f32 %v4123_v32, %v3888_v6  ;;  %v3768_v43 = vpop.f32.mrb[231].mxu0  ;;  %v4126_v51 = vpop.f32.mrb[230].mxu1  ;;  %v10079_v32 = vld [vmem:[%s13540_s3 + $0x118] sm:$0xff]   ;;  %v13643_v26 = vmov 0  ;;  %v4742_v35 = vsel %vm12199_vm8, 0, %v4741_v11  ;;  %v10083_v11 = vld [vmem:[%s13540_s3 + $0x128] sm:$0xff]  }
 0x2ee   : > { %v4128_v28 = vpop.f32.mrb[231].mxu1  ;;  %v10080_v44 = vld [vmem:[%s13540_s3 + $0xd8] sm:$0xff]   ;;  %v13644_v26 = vsel %vm12199_vm8, 4294967295, %v13643_v26  ;;  %9682 = vmatprep.subr.bf16.mxu1 %v10079_v32  ;;  %9073 = vmatprep.subr.bf16.mxu0 %v10079_v32  ;;  %4743 = vst [vmem:[#allocation2 + $0x10] sm:$0x8] %v4742_v35  ;;  %v13648_v32 = vmov 0 }
 0x2ef   : > { %v12182_v0 = vadd.f32 %v4126_v51, %v3889_v41  ;;  %4554 = vmatmul.mubr.bf16.gmra.mrb[80].mxu0 %v11979_v12  ;;  %13645 = vst [vmem:[#allocation6_spill] sm:$0xff] %v13644_v26  ;;  %9690 = vmatpush3.bf16.msra.mxu1 %v10080_v44  ;;  %v13646_v41 = vld [vmem:[#allocation25_spill] sm:$0xff]  ;;  %v13649_v32 = vsel %vm12226_vm11, 4294967295, %v13648_v32 }
 0x2f0   : > { %4561 = vmatprep.mubr.bf16.mxu0 %v13640_v27  ;;  %9074 = vmatpush3.bf16.msra.mxu0 %v10080_v44  ;;  %13650 = vst [vmem:[#allocation9_spill] sm:$0xff] %v13649_v32  ;;  %v4801_v44 = vld [vmem:[#allocation2 + $0x28] sm:$0x10] }
 0x2f1   : > { %v4802_v35 = vsel %vm12226_vm11, 0, %v4801_v44 }
 0x2f2   : > { %v3771_v57 = vpop.f32.mrb[232].mxu0  ;;  %4803 = vst [vmem:[#allocation2 + $0x28] sm:$0x10] %v4802_v35 }
 0x2f3   : > { %v3890_v49 = vadd.f32 %v3771_v57, %v13641_v42  ;;  %v3773_v46 = vpop.f32.mrb[233].mxu0  ;;  %v4131_v62 = vpop.f32.mrb[232].mxu1  ;;  %v13647_v42 = vld [vmem:[#allocation26_spill] sm:$0xff] }
 0x2f4   : > { %v3774_v33 = vpop.f32.mrb[234].mxu0  ;;  %v4133_v8 = vpop.f32.mrb[233].mxu1 }
 0x2f5   : > { %v3891_v54 = vadd.f32 %v3774_v33, %v13642_v50  ;;  %v12188_v53 = vadd.f32 %v4131_v62, %v3890_v49  ;;  %v3776_v60 = vpop.f32.mrb[235].mxu0  ;;  %v4134_v55 = vpop.f32.mrb[234].mxu1  ;;  %v10081_v33 = vld [vmem:[%s13540_s3 + $0x120] sm:$0xff]  }
 0x2f6   : > { %v4136_v6 = vpop.f32.mrb[235].mxu1  ;;  %v10082_v50 = vld [vmem:[%s13540_s3 + $0xe0] sm:$0xff]   ;;  %9075 = vmatprep.subr.bf16.mxu0 %v10081_v33  ;;  %v3248_v60 = vld [vmem:[%s10378_s21 + $0x1c8] sm:$0xee]  ;;  %9683 = vmatprep.subr.bf16.mxu1 %v10081_v33 }
 0x2f7   : > { %v12190_v12 = vadd.f32 %v4134_v55, %v3891_v54  ;;  %4562 = vmatmul.mubr.bf16.gmra.mrb[84].mxu0 %v12000_v31  ;;  %v10208_v55 = vld [vmem:[%s10378_s21 + $0x1d0] sm:$0xff]  ;;  %9691 = vmatpush3.bf16.msra.mxu1 %v10082_v50 }
 0x2f8   : > { %4569 = vmatprep.mubr.bf16.mxu0 %v12005_v23  ;;  %v4283_v6 = vrot.slane %v10208_v55, 5  ;;  %9076 = vmatpush3.bf16.msra.mxu0 %v10082_v50 }
 0x2f9   : > { %9077 = vmatprep.subr.bf16.mxu0 %v10083_v11  ;;  %9684 = vmatprep.subr.bf16.mxu1 %v10083_v11 }
 0x2fa   : > { %v3779_v31 = vpop.f32.mrb[236].mxu0 }
 0x2fb   : > { %v3892_v43 = vadd.f32 %v3779_v31, %v13646_v41  ;;  %v3781_v51 = vpop.f32.mrb[237].mxu0  ;;  %v4139_v28 = vpop.f32.mrb[236].mxu1 }
 0x2fc   : > { %v3782_v27 = vpop.f32.mrb[238].mxu0  ;;  %v4141_v57 = vpop.f32.mrb[237].mxu1 }
 0x2fd   : > { %v3893_v49 = vadd.f32 %v3782_v27, %v13647_v42  ;;  %v12208_v23 = vadd.f32 %v4139_v28, %v3892_v43  ;;  %v3784_v46 = vpop.f32.mrb[239].mxu0  ;;  %v4142_v62 = vpop.f32.mrb[238].mxu1  ;;  %v8822_v27 = vrot.slane %v3248_v60, 9  ;;  %v4285_v57 = vrot.slane %v4283_v6, 4  ;;  %v4744_v42 = vld [vmem:[#allocation2 + $0x20] sm:$0x8] }
 0x2fe   : > { %v4144_v8 = vpop.f32.mrb[239].mxu1  ;;  %v4745_v55 = vsel %vm12199_vm8, 0, %v4744_v42 }
 0x2ff   : > { %v12216_v54 = vadd.f32 %v4142_v62, %v3893_v49  ;;  %4570 = vmatmul.mubr.bf16.gmra.mrb[88].mxu0 %v12021_v5  ;;  %v10209_v8 = vld [vmem:[%s10378_s21 + $0x1d8] sm:$0x11]  ;;  %4746 = vst [vmem:[#allocation2 + $0x20] sm:$0x8] %v4745_v55  ;;  %v4284_v44 = vsel %vm11615_vm5, %v8822_v27, %v4283_v6 }
 0x300   : > { %4577 = vmatprep.mubr.bf16.mxu0 %v12026_v45  ;;  %v10084_v45 = vld [vmem:[%s13540_s3 + $0xe8] sm:$0xff]   ;;  %v4286_v50 = vrot.slane %v10209_v8, 5 }
 0x301   : > { %9078 = vmatpush3.bf16.msra.mxu0 %v10084_v45  ;;  %9692 = vmatpush3.bf16.msra.mxu1 %v10084_v45  ;;  %v10087_v45 = vld [vmem:[%s13540_s3 + $0x138] sm:$0xff]  }
 0x302   : > { %v3787_v5 = vpop.f32.mrb[240].mxu0 }
 0x303   : > { %v3894_v31 = vadd.f32 %v3787_v5, %v12023_v17  ;;  %v3789_v41 = vpop.f32.mrb[241].mxu0  ;;  %v4147_v43 = vpop.f32.mrb[240].mxu1  ;;  %v10085_v17 = vld [vmem:[%s13540_s3 + $0x130] sm:$0xff]   ;;  %v4287_v5 = vsel %vm11615_vm5, %v4285_v57, %v4286_v50 }
 0x304   : > { %v3790_v51 = vpop.f32.mrb[242].mxu0  ;;  %v4149_v28 = vpop.f32.mrb[241].mxu1  ;;  %9079 = vmatprep.subr.bf16.mxu0 %v10085_v17  ;;  %9685 = vmatprep.subr.bf16.mxu1 %v10085_v17  ;;  %v8855_v17 = vcombine.low %v4284_v44, %v4287_v5 }
 0x305   : > { %v3895_v49 = vadd.f32 %v3790_v51, %v12029_v38  ;;  %v12237_v46 = vadd.f32 %v4147_v43, %v3894_v31  ;;  %v3792_v62 = vpop.f32.mrb[243].mxu0  ;;  %v4150_v33 = vpop.f32.mrb[242].mxu1  ;;  %v10086_v38 = vld [vmem:[%s13540_s3 + $0xf0] sm:$0xff]   ;;  %v8856_v43 = vcombine.high %v4284_v44, %v4287_v5 }
 0x306   : > { %v4152_v60 = vpop.f32.mrb[243].mxu1  ;;  %9080 = vmatpush3.bf16.msra.mxu0 %v10086_v38  ;;  %9693 = vmatpush3.bf16.msra.mxu1 %v10086_v38 }
 0x307   : > { %v12248_v11 = vadd.f32 %v4150_v33, %v3895_v49  ;;  %4578 = vmatmul.mubr.bf16.gmra.mrb[92].mxu0 %v12040_v4  ;;  %v10088_v4 = vld [vmem:[%s13540_s3 + $0xf8] sm:$0xff]   ;;  %9081 = vmatprep.subr.bf16.mxu0 %v10087_v45 }
 0x308   : > { %4585 = vmatprep.mubr.bf16.mxu0 %v12045_v13  ;;  %9686 = vmatprep.subr.bf16.mxu1 %v10087_v45 }
 0x30a   : > { %v3795_v35 = vpop.f32.mrb[244].mxu0  ;;  %9082 = vmatpush3.bf16.msra.mxu0 %v10088_v4  ;;  %9694 = vmatpush3.bf16.msra.mxu1 %v10088_v4 }
 0x30b   : > { %v3896_v13 = vadd.f32 %v3795_v35, %v12042_v36  ;;  %v3797_v31 = vpop.f32.mrb[245].mxu0  ;;  %v4155_v41 = vpop.f32.mrb[244].mxu1  ;;  %v4747_v36 = vld [vmem:[#allocation2 + $0x30] sm:$0x8] }
 0x30c   : > { %v3798_v6 = vpop.f32.mrb[246].mxu0  ;;  %v4157_v21 = vpop.f32.mrb[245].mxu1  ;;  %v4748_v62 = vsel %vm12199_vm8, 0, %v4747_v36 }
 0x30d   : > { %v3897_v51 = vadd.f32 %v3798_v6, %v12047_v14  ;;  %v12264_v28 = vadd.f32 %v4155_v41, %v3896_v13  ;;  %v3800_v27 = vpop.f32.mrb[247].mxu0  ;;  %v4158_v57 = vpop.f32.mrb[246].mxu1  ;;  %4749 = vst [vmem:[#allocation2 + $0x30] sm:$0x8] %v4748_v62  ;;  %v4798_v13 = vld [vmem:[#allocation2 + $0x18] sm:$0x10] }
 0x30e   : > { %v4160_v42 = vpop.f32.mrb[247].mxu1  ;;  %v4799_v41 = vsel %vm12226_vm11, 0, %v4798_v13 }
 0x30f   : > { %v12266_v49 = vadd.f32 %v4158_v57, %v3897_v51  ;;  %4586 = vmatmul.mubr.bf16.gmra.mrb[96].mxu0 %v12054_v39  ;;  %4800 = vst [vmem:[#allocation2 + $0x18] sm:$0x10] %v4799_v41 }
 0x310   : > { %4593 = vmatprep.mubr.bf16.mxu0 %v8856_v43 }
 0x312   : > { %v3803_v33 = vpop.f32.mrb[248].mxu0 }
 0x313   : > { %v3898_v14 = vadd.f32 %v3803_v33, %v12056_v24  ;;  %v3805_v8 = vpop.f32.mrb[249].mxu0  ;;  %v4163_v50 = vpop.f32.mrb[248].mxu1  ;;  %v4750_v24 = vld [vmem:[#allocation2 + $0x40] sm:$0x8] }
 0x314   : > { %v3806_v55 = vpop.f32.mrb[250].mxu0  ;;  %v4165_v60 = vpop.f32.mrb[249].mxu1  ;;  %v4751_v44 = vsel %vm12199_vm8, 0, %v4750_v24 }
 0x315   : > { %v3899_v38 = vadd.f32 %v3806_v55, %v12059_v34  ;;  %v12273_v45 = vadd.f32 %v4163_v50, %v3898_v14  ;;  %v3808_v35 = vpop.f32.mrb[251].mxu0  ;;  %v4166_v39 = vpop.f32.mrb[250].mxu1  ;;  %4752 = vst [vmem:[#allocation2 + $0x40] sm:$0x8] %v4751_v44  ;;  %v4753_v14 = vld [vmem:[#allocation2 + $0x50] sm:$0x8] }
 0x316   : > { %v4168_v4 = vpop.f32.mrb[251].mxu1  ;;  %v4754_v50 = vsel %vm12199_vm8, 0, %v4753_v14  ;;  %v4756_v44 = vld [vmem:[#allocation2 + $0x60] sm:$0x8] }
 0x317   : > { %v12275_v31 = vadd.f32 %v4166_v39, %v3899_v38  ;;  %4594 = vmatmul.mubr.bf16.gmra.mrb[100].mxu0 %v8855_v17  ;;  %4755 = vst [vmem:[#allocation2 + $0x50] sm:$0x8] %v4754_v50 }
 0x31a   : > { %v3811_v5 = vpop.f32.mrb[252].mxu0 }
 0x31b   : > { %v3900_v34 = vadd.f32 %v3811_v5, %v12065_v1  ;;  %v3813_v6 = vpop.f32.mrb[253].mxu0  ;;  %v4171_v21 = vpop.f32.mrb[252].mxu1 }
 0x31c   : > { %v3814_v43 = vpop.f32.mrb[254].mxu0  ;;  %v4173_v51 = vpop.f32.mrb[253].mxu1  ;;  %v4757_v6 = vsel %vm12199_vm8, 0, %v4756_v44 }
 0x31d   : > { %v3901_v27 = vadd.f32 %v3814_v43, %v12068_v58  ;;  %v12283_v57 = vadd.f32 %v4171_v21, %v3900_v34  ;;  %v3816_v42 = vpop.f32.mrb[255].mxu0  ;;  %v4174_v36 = vpop.f32.mrb[254].mxu1  ;;  %4758 = vst [vmem:[#allocation2 + $0x60] sm:$0x8] %v4757_v6 }
 0x31e   : > { %v4176_v62 = vpop.f32.mrb[255].mxu1 }
 0x31f   : > { %v12285_v33 = vadd.f32 %v4174_v36, %v3901_v27 }
 0x322   : > { %v3819_v8 = vpop.f32.mrb[0].mxu0 }
 0x323   : > { %v3902_v1 = vadd.f32 %v3819_v8, %v12073_v3  ;;  %v3821_v17 = vpop.f32.mrb[1].mxu0  ;;  %v4179_v55 = vpop.f32.mrb[0].mxu1 }
 0x324   : > { %v3822_v60 = vpop.f32.mrb[2].mxu0  ;;  %v4181_v38 = vpop.f32.mrb[1].mxu1 }
 0x325   : > { %v3903_v58 = vadd.f32 %v3822_v60, %v12076_v18  ;;  %v12291_v35 = vadd.f32 %v4179_v55, %v3902_v1  ;;  %v3824_v39 = vpop.f32.mrb[3].mxu0  ;;  %v4182_v4 = vpop.f32.mrb[2].mxu1 }
 0x326   : > { %v4184_v13 = vpop.f32.mrb[3].mxu1  ;;  %v4759_v39 = vld [vmem:[#allocation2 + $0x70] sm:$0x8] }
 0x327   : > { %v12293_v41 = vadd.f32 %v4182_v4, %v3903_v58  ;;  %v4760_v13 = vsel %vm12199_vm8, 0, %v4759_v39 }
 0x328   : > { %4761 = vst [vmem:[#allocation2 + $0x70] sm:$0x8] %v4760_v13 }
 0x32a   : > { %v3827_v24 = vpop.f32.mrb[4].mxu0 }
 0x32b   : > { %v3904_v5 = vadd.f32 %v3827_v24, %v12081_v2  ;;  %v3829_v34 = vpop.f32.mrb[5].mxu0  ;;  %v4187_v3 = vpop.f32.mrb[4].mxu1  ;;  %v10089_v2 = vld [vmem:[%s13540_s3 + $0x40] sm:$0xff]  }
 0x32c   : > { %v3830_v21 = vpop.f32.mrb[6].mxu0  ;;  %v4189_v43 = vpop.f32.mrb[5].mxu1  ;;  %9203 = vmatprep.subr.bf16.mxu0 %v10089_v2 }
 0x32d   : > { %v3905_v18 = vadd.f32 %v3830_v21, %v12084_v10  ;;  %v12299_v51 = vadd.f32 %v4187_v3, %v3904_v5  ;;  %v3832_v27 = vpop.f32.mrb[7].mxu0  ;;  %v4190_v42 = vpop.f32.mrb[6].mxu1 }
 0x32e   : > { %v4192_v36 = vpop.f32.mrb[7].mxu1 }
 0x32f   : > { %v12301_v62 = vadd.f32 %v4190_v42, %v3905_v18  ;;  %v4762_v42 = vld [vmem:[#allocation2 + $0x80] sm:$0x8] }
 0x330   : > { %v4763_v2 = vsel %vm12199_vm8, 0, %v4762_v42 }
 0x331   : > { %4764 = vst [vmem:[#allocation2 + $0x80] sm:$0x8] %v4763_v2 }
 0x332   : > { %v3835_v14 = vpop.f32.mrb[8].mxu0 }
 0x333   : > { %v3906_v8 = vadd.f32 %v3835_v14, %v12089_v61  ;;  %v3837_v50 = vpop.f32.mrb[9].mxu0  ;;  %v4195_v1 = vpop.f32.mrb[8].mxu1 }
 0x334   : > { %v3838_v17 = vpop.f32.mrb[10].mxu0  ;;  %v4197_v55 = vpop.f32.mrb[9].mxu1 }
 0x335   : > { %v3907_v10 = vadd.f32 %v3838_v17, %v12092_v37  ;;  %v12308_v60 = vadd.f32 %v4195_v1, %v3906_v8  ;;  %v3840_v38 = vpop.f32.mrb[11].mxu0  ;;  %v4198_v58 = vpop.f32.mrb[10].mxu1 }
 0x336   : > { %v4200_v4 = vpop.f32.mrb[11].mxu1 }
 0x337   : > { %v12312_v24 = vadd.f32 %v4198_v58, %v3907_v10 }
 0x33a   : > { %v3843_v44 = vpop.f32.mrb[12].mxu0 }
 0x33b   : > { %v3908_v61 = vadd.f32 %v3843_v44, %v12097_v59  ;;  %v3845_v5 = vpop.f32.mrb[13].mxu0  ;;  %v4203_v34 = vpop.f32.mrb[12].mxu1 }
 0x33c   : > { %v3846_v3 = vpop.f32.mrb[14].mxu0  ;;  %v4205_v6 = vpop.f32.mrb[13].mxu1  ;;  %v4738_v5 = vld [vmem:[#allocation2] sm:$0x8] }
 0x33d   : > { %v3909_v37 = vadd.f32 %v3846_v3, %v12100_v15  ;;  %v12316_v21 = vadd.f32 %v4203_v34, %v3908_v61  ;;  %v3848_v43 = vpop.f32.mrb[15].mxu0  ;;  %v4206_v18 = vpop.f32.mrb[14].mxu1  ;;  %v4739_v3 = vsel %vm12199_vm8, 0, %v4738_v5  ;;  %v4765_v6 = vld [vmem:[#allocation2 + $0x90] sm:$0x8] }
 0x33e   : > { %v4208_v27 = vpop.f32.mrb[15].mxu1  ;;  %4740 = vst [vmem:[#allocation2] sm:$0x8] %v4739_v3  ;;  %v4771_v3 = vld [vmem:[#allocation2 + $0xb0] sm:$0x8] }
 0x33f   : > { %v12318_v36 = vadd.f32 %v4206_v18, %v3909_v37  ;;  %v4766_v27 = vsel %vm12199_vm8, 0, %v4765_v6 }
 0x340   : > { %4767 = vst [vmem:[#allocation2 + $0x90] sm:$0x8] %v4766_v27  ;;  %v4772_v27 = vsel %vm12199_vm8, 0, %v4771_v3 }
 0x341   : > { %4773 = vst [vmem:[#allocation2 + $0xb0] sm:$0x8] %v4772_v27 }
 0x342   : > { %v3851_v14 = vpop.f32.mrb[16].mxu0 }
 0x343   : > { %v3910_v59 = vadd.f32 %v3851_v14, %v12105_v19  ;;  %v3853_v8 = vpop.f32.mrb[17].mxu0  ;;  %v4211_v50 = vpop.f32.mrb[16].mxu1 }
 0x344   : > { %v3854_v1 = vpop.f32.mrb[18].mxu0  ;;  %v4213_v17 = vpop.f32.mrb[17].mxu1 }
 0x345   : > { %v3911_v15 = vadd.f32 %v3854_v1, %v12108_v9  ;;  %v12324_v55 = vadd.f32 %v4211_v50, %v3910_v59  ;;  %v3856_v10 = vpop.f32.mrb[19].mxu0  ;;  %v4214_v38 = vpop.f32.mrb[18].mxu1  ;;  %v4768_v50 = vld [vmem:[#allocation2 + $0xa0] sm:$0x8] }
 0x346   : > { %v4216_v58 = vpop.f32.mrb[19].mxu1  ;;  %v4769_v17 = vsel %vm12199_vm8, 0, %v4768_v50 }
 0x347   : > { %v12326_v39 = vadd.f32 %v4214_v38, %v3911_v15  ;;  %4770 = vst [vmem:[#allocation2 + $0xa0] sm:$0x8] %v4769_v17  ;;  %v4774_v17 = vld [vmem:[#allocation2 + $0xc0] sm:$0x8] }
 0x34a   : > { %v3859_v4 = vpop.f32.mrb[20].mxu0 }
 0x34b   : > { %v3912_v13 = vadd.f32 %v3859_v4, %v12119_v56  ;;  %v3861_v44 = vpop.f32.mrb[21].mxu0  ;;  %v4219_v61 = vpop.f32.mrb[20].mxu1  ;;  %v10105_v4 = vld [vmem:[%s13540_s3 + $0x140] sm:$0xff]  }
 0x34c   : > { %v3862_v19 = vpop.f32.mrb[22].mxu0  ;;  %v4221_v34 = vpop.f32.mrb[21].mxu1  ;;  %9495 = vmatprep.subr.bf16.mxu1 %v10105_v4 }
 0x34d   : > { %v3913_v9 = vadd.f32 %v3862_v19, %v12122_v16  ;;  %v12332_v37 = vadd.f32 %v4219_v61, %v3912_v13  ;;  %v3864_v43 = vpop.f32.mrb[23].mxu0  ;;  %v4222_v18 = vpop.f32.mrb[22].mxu1 }
 0x34e   : > { %v4224_v56 = vpop.f32.mrb[23].mxu1 }
 0x34f   : > { %v12336_v42 = vadd.f32 %v4222_v18, %v3913_v9 }
 0x352   : > { %v3867_v2 = vpop.f32.mrb[24].mxu0 }
 0x353   : > { %v3914_v14 = vadd.f32 %v3867_v2, %v12127_v20  ;;  %v3869_v59 = vpop.f32.mrb[25].mxu0  ;;  %v4227_v8 = vpop.f32.mrb[24].mxu1 }
 0x354   : > { %v3870_v1 = vpop.f32.mrb[26].mxu0  ;;  %v4229_v16 = vpop.f32.mrb[25].mxu1 }
 0x355   : > { %v3915_v15 = vadd.f32 %v3870_v1, %v12130_v25  ;;  %v12342_v10 = vadd.f32 %v4227_v8, %v3914_v14  ;;  %v3872_v38 = vpop.f32.mrb[27].mxu0  ;;  %v4230_v58 = vpop.f32.mrb[26].mxu1 }
 0x356   : > { %v4232_v20 = vpop.f32.mrb[27].mxu1 }
 0x357   : > { %v12347_v13 = vadd.f32 %v4230_v58, %v3915_v15  ;;  %v4775_v15 = vsel %vm12199_vm8, 0, %v4774_v17 }
 0x358   : > { %4776 = vst [vmem:[#allocation2 + $0xc0] sm:$0x8] %v4775_v15 }
 0x35a   : > { %v3875_v44 = vpop.f32.mrb[28].mxu0 }
 0x35b   : > { %v3916_v61 = vadd.f32 %v3875_v44, %v12141_v63  ;;  %v3877_v5 = vpop.f32.mrb[29].mxu0  ;;  %v4235_v19 = vpop.f32.mrb[28].mxu1  ;;  %v12360_v63 = vld [vmem:[%s13539_s2] ss:$0 sm:$0xff] }
 0x35c   : > { %v3878_v34 = vpop.f32.mrb[30].mxu0  ;;  %v4237_v25 = vpop.f32.mrb[29].mxu1 }
 0x35d   : > { %v3917_v6 = vadd.f32 %v3878_v34, %v12144_v22  ;;  %v12351_v9 = vadd.f32 %v4235_v19, %v3916_v61  ;;  %v3880_v43 = vpop.f32.mrb[31].mxu0  ;;  %v4238_v18 = vpop.f32.mrb[30].mxu1 }
 0x35e   : > { %v4240_v56 = vpop.f32.mrb[31].mxu1  ;;  %v13651_v43 = vmov 0  }
 0x35f   : > { %v12355_v2 = vadd.f32 %v4238_v18, %v3917_v6  ;;  %v4777_v6 = vld [vmem:[#allocation2 + $0xd0] sm:$0x8] }
 0x360   : > { %v4778_v18 = vsel %vm12199_vm8, 0, %v4777_v6 }
 0x361   : > { %4779 = vst [vmem:[#allocation2 + $0xd0] sm:$0x8] %v4778_v18 }
 0x362   : > { %v4459_v14 = vpop.f32.mrb[32].mxu0 }
 0x363   : > { %v4602_v59 = vadd.f32 %v4459_v14, %v12149_v48  ;;  %v4461_v22 = vpop.f32.mrb[33].mxu0 }
 0x364   : > { %v4462_v8 = vpop.f32.mrb[34].mxu0 }
 0x365   : > { %v4645_v50 = vadd.f32 %v12360_v63, %v4602_v59  ;;  %v4603_v1 = vadd.f32 %v4462_v8, %v12152_v47  ;;  %v4464_v16 = vpop.f32.mrb[35].mxu0 }
 0x367   : > { %v4646_v38 = vadd.f32 %v12360_v63, %v4603_v1  ;;  %v4681_v58 = vmax.f32 %v4645_v50, 0.0 }
 0x369   : > { %v4682_v4 = vmax.f32 %v4646_v38, 0.0 }
 0x36a   : > { %v4467_v20 = vpop.f32.mrb[36].mxu0 }
 0x36b   : > { %v4717_v44 = vpack.c.bf16 %v4682_v4, %v4681_v58  ;;  %v4604_v48 = vadd.f32 %v4467_v20, %v12163_v52  ;;  %v4469_v61 = vpop.f32.mrb[37].mxu0 }
 0x36c   : > { %v4470_v5 = vpop.f32.mrb[38].mxu0  ;;  %v4780_v61 = vld [vmem:[#allocation2 + $0xe0] sm:$0x8] }
 0x36d   : > { %v4867_v19 = vrot.slane %v4717_v44, 4  ;;  %v4647_v34 = vadd.f32 %v12360_v63, %v4604_v48  ;;  %v4605_v47 = vadd.f32 %v4470_v5, %v12166_v30  ;;  %v4472_v25 = vpop.f32.mrb[39].mxu0 }
 0x36f   : > { %4903 = vst [vmem:[#allocation2 + $0x8] ss:$-4 sps:$4 sm:$0xff] %v4867_v19   ;;  %v4648_v3 = vadd.f32 %v12360_v63, %v4605_v47  ;;  %v4683_v52 = vmax.f32 %v4647_v34, 0.0 }
 0x370   : > { %4943 = vst [vmem:[#allocation2] sm:$0xf0] %v13651_v43  ;;  %4944 = vst [vmem:[#allocation2 + $0x8] sm:$0xf] %v13651_v43 }
 0x371   : > { %v4684_v27 = vmax.f32 %v4648_v3, 0.0 }
 0x372   : > { %v4475_v56 = vpop.f32.mrb[40].mxu0 }
 0x373   : > { %v4718_v14 = vpack.c.bf16 %v4684_v27, %v4683_v52  ;;  %v4606_v59 = vadd.f32 %v4475_v56, %v12171_v7  ;;  %v4477_v30 = vpop.f32.mrb[41].mxu0  ;;  %v4781_v27 = vsel %vm12199_vm8, 0, %v4780_v61 }
 0x374   : > { %v4478_v22 = vpop.f32.mrb[42].mxu0  ;;  %4782 = vst [vmem:[#allocation2 + $0xe0] sm:$0x8] %v4781_v27 }
 0x375   : > { %v4868_v8 = vrot.slane %v4718_v14, 4  ;;  %v4649_v50 = vadd.f32 %v12360_v63, %v4606_v59  ;;  %v4607_v1 = vadd.f32 %v4478_v22, %v12174_v29  ;;  %v4480_v16 = vpop.f32.mrb[43].mxu0 }
 0x377   : > { %4905 = vst [vmem:[#allocation2 + $0x18] ss:$-4 sps:$4 sm:$0xff] %v4868_v8   ;;  %v4650_v17 = vadd.f32 %v12360_v63, %v4607_v1  ;;  %v4949_v15 = vld [vmem:[#allocation2 + $0x8] sm:$0xf]  ;;  %v4984_v38 = vld [vmem:[#allocation2] sm:$0xf0] }
 0x378   : > { %v5024_v58 = vshll.u32 %v4984_v38, 16  ;;  %v5029_v4 = vshll.u32 %v4949_v15, 16  ;;  %v4948_v20 = vld [vmem:[#allocation2] sm:$0xf8]  ;;  %v4685_v44 = vmax.f32 %v4649_v50, 0.0  ;;  %v5022_v5 = vshrl.u32 %v4984_v38, 16 }
 0x379   : > { %v4686_v48 = vmax.f32 %v4650_v17, 0.0  ;;  %v5033_v29 = vshrl.u32 %v4949_v15, 16  ;;  %v5383_v25 = vshrl.u32 %v4948_v20, 16  ;;  %v5386_v52 = vshll.u32 %v4948_v20, 16 }
 0x37a   : > { %v4483_v7 = vpop.f32.mrb[44].mxu0  ;;  %v5026_v6 = vrot.slane %v5024_v58, 1  ;;  %v12381_v18 = vrot.slane %v5029_v4, 1  ;;  %v12390_v17 = vrot.slane %v5029_v4, 4 }
 0x37b   : > { %v4719_v19 = vpack.c.bf16 %v4686_v48, %v4685_v44  ;;  %v4608_v34 = vadd.f32 %v4483_v7, %v12180_v40  ;;  %v4485_v47 = vpop.f32.mrb[45].mxu0  ;;  %v12387_v22 = vrot.slane %v5033_v29, 3  ;;  %v12392_v15 = vrot.slane %v5383_v25, 3 }
 0x37c   : > { %v4486_v3 = vpop.f32.mrb[46].mxu0 }
 0x37d   : > { %v4869_v56 = vrot.slane %v4719_v19, 4  ;;  %v4651_v14 = vadd.f32 %v12360_v63, %v4608_v34  ;;  %v4609_v59 = vadd.f32 %v4486_v3, %v12182_v0  ;;  %v4488_v30 = vpop.f32.mrb[47].mxu0 }
 0x37e   : > { %v4951_v40 = vld [vmem:[#allocation2 + $0x18] sm:$0xf]  ;;  %v4985_v8 = vld [vmem:[#allocation2 + $0x10] sm:$0xf0] }
 0x37f   : > { %v4950_v50 = vld [vmem:[#allocation2 + $0x10] sm:$0xf8]  ;;  %4907 = vst [vmem:[#allocation2 + $0x28] ss:$-4 sps:$4 sm:$0xff] %v4869_v56   ;;  %v4652_v1 = vadd.f32 %v12360_v63, %v4609_v59  ;;  %v5039_v16 = vshll.u32 %v4985_v8, 16  ;;  %v5044_v38 = vshll.u32 %v4951_v40, 16 }
 0x380   : > { %v5048_v58 = vshrl.u32 %v4951_v40, 16  ;;  %v5429_v20 = vshrl.u32 %v4950_v50, 16  ;;  %v5432_v44 = vshll.u32 %v4950_v50, 16  ;;  %v4687_v0 = vmax.f32 %v4651_v14, 0.0 }
 0x381   : > { %v4688_v48 = vmax.f32 %v4652_v1, 0.0  ;;  %v5037_v61 = vshrl.u32 %v4985_v8, 16  ;;  %v5041_v7 = vrot.slane %v5039_v16, 1  ;;  %v5046_v34 = vrot.slane %v5044_v38, 1 }
 0x382   : > { %v4491_v19 = vpop.f32.mrb[48].mxu0  ;;  %v5436_v47 = vrot.slane %v5048_v58, 3  ;;  %v5437_v3 = vrot.slane %v5044_v38, 4  ;;  %v5431_v27 = vrot.slane %v5429_v20, 3  ;;  %v5434_v25 = vrot.slane %v5432_v44, 4 }
 0x383   : > { %v4720_v56 = vpack.c.bf16 %v4688_v48, %v4687_v0  ;;  %v4610_v59 = vadd.f32 %v4491_v19, %v12188_v53  ;;  %v4493_v4 = vpop.f32.mrb[49].mxu0  ;;  %v5042_v30 = vor.u32 %v5041_v7, %v5037_v61  ;;  %v5050_v26 = vor.u32 %v5048_v58, %v5046_v34 }
 0x384   : > { %v4494_v32 = vpop.f32.mrb[50].mxu0  ;;  %v5027_v40 = vor.u32 %v5026_v6, %v5022_v5  ;;  %v12396_v50 = vor.u32 %v5033_v29, %v12381_v18  ;;  %v12398_v14 = vrot.slane %v5386_v52, 4  ;;  %v5438_v29 = vor.u32 %v5437_v3, %v5436_v47 }
 0x385   : > { %v4870_v8 = vrot.slane %v4720_v56, 4  ;;  %v4653_v1 = vadd.f32 %v12360_v63, %v4610_v59  ;;  %v4611_v16 = vadd.f32 %v4494_v32, %v12190_v12  ;;  %v4496_v38 = vpop.f32.mrb[51].mxu0  ;;  %v5047_v20 = vsel %vm5020_vm12, %v5042_v30, %v5046_v34 }
 0x386   : > { %v5441_v53 = vshrl.u32 %v5047_v20, 16  ;;  %v5444_v0 = vshll.u32 %v5047_v20, 16  ;;  %v5449_v48 = vshrl.u32 %v5050_v26, 16  ;;  %v5452_v44 = vshll.u32 %v5050_v26, 16  ;;  %v4953_v61 = vld [vmem:[#allocation2 + $0x28] sm:$0xf] }
 0x387   : > { %4909 = vst [vmem:[#allocation2 + $0x38] ss:$-4 sps:$4 sm:$0xff] %v4870_v8   ;;  %v4654_v5 = vadd.f32 %v12360_v63, %v4611_v16  ;;  %v5435_v6 = vor.u32 %v5434_v25, %v5431_v27  ;;  %v4986_v52 = vld [vmem:[#allocation2 + $0x20] sm:$0xf0]  ;;  %v5059_v58 = vshll.u32 %v4953_v61, 16  ;;  %v4689_v12 = vmax.f32 %v4653_v1, 0.0 }
 0x388   : > { %v5443_v7 = vrot.slane %v5441_v53, 3  ;;  %v5446_v19 = vrot.slane %v5444_v0, 4  ;;  %v5451_v56 = vrot.slane %v5449_v48, 3  ;;  %v5454_v59 = vrot.slane %v5452_v44, 4  ;;  %v10090_v1 = vld [vmem:[%s13540_s3] sm:$0xff]  }
 0x389   : > { %v4690_v32 = vmax.f32 %v4654_v5, 0.0  ;;  %v5054_v4 = vshll.u32 %v4986_v52, 16  ;;  %v5061_v8 = vrot.slane %v5059_v58, 1  ;;  %v5063_v20 = vshrl.u32 %v4953_v61, 16  ;;  %v10091_v61 = vld [vmem:[%s13540_s3 + $0x48] sm:$0xff]  }
 0x38a   : > { %v4499_v30 = vpop.f32.mrb[52].mxu0  ;;  %v5447_v26 = vor.u32 %v5446_v19, %v5443_v7  ;;  %v5455_v38 = vor.u32 %v5454_v59, %v5451_v56  ;;  %v5052_v27 = vshrl.u32 %v4986_v52, 16  ;;  %v12414_v48 = vsel %vm4793_vm9, %v5435_v6, %v5438_v29 }
 0x38b   : > { %v4721_v16 = vpack.c.bf16 %v4690_v32, %v4689_v12  ;;  %v4612_v47 = vadd.f32 %v4499_v30, %v12208_v23  ;;  %v4501_v3 = vpop.f32.mrb[53].mxu0  ;;  %v5056_v25 = vrot.slane %v5054_v4, 1  ;;  %v5065_v44 = vor.u32 %v5063_v20, %v5061_v8  ;;  %v4952_v32 = vld [vmem:[#allocation2 + $0x20] sm:$0xf8]  ;;  %v10093_v4 = vld [vmem:[%s13540_s3 + $0x50] sm:$0xff]  }
 0x38c   : > { %v4502_v53 = vpop.f32.mrb[54].mxu0  ;;  %v12411_v0 = vsel %vm4793_vm9, %v5447_v26, %v5455_v38  ;;  %v12421_v23 = vsel %vm5020_vm12, %v5027_v40, %v12381_v18  ;;  %v5482_v29 = vrot.slane %v5063_v20, 3  ;;  %v5483_v6 = vrot.slane %v5059_v58, 4 }
 0x38d   : > { %v4871_v5 = vrot.slane %v4721_v16, 4  ;;  %v4655_v52 = vadd.f32 %v12360_v63, %v4612_v47  ;;  %v4613_v7 = vadd.f32 %v4502_v53, %v12216_v54  ;;  %v4504_v19 = vpop.f32.mrb[55].mxu0  ;;  %6488 = vmatprep.mubr.bf16.mxu0 %v12411_v0  ;;  %v5057_v56 = vor.u32 %v5056_v25, %v5052_v27  ;;  %v10092_v54 = vld [vmem:[%s13540_s3 + $0x8] sm:$0xff]  }
 0x38e   : > { %6489 = vmatmul.mubr.bf16.vlgmr.msra.gmra.mrb[104].mxu0 %v12414_v48  ;;  %v5495_v59 = vshrl.u32 %v5065_v44, 16  ;;  %v5498_v12 = vshll.u32 %v5065_v44, 16  ;;  %v4955_v47 = vld [vmem:[#allocation2 + $0x38] sm:$0xf]  ;;  %v5475_v27 = vshrl.u32 %v4952_v32, 16  ;;  %v5478_v25 = vshll.u32 %v4952_v32, 16 }
 0x38f   : > { %4911 = vst [vmem:[#allocation2 + $0x48] ss:$-4 sps:$4 sm:$0xff] %v4871_v5   ;;  %v4656_v18 = vadd.f32 %v12360_v63, %v4613_v7  ;;  %v5062_v40 = vsel %vm5020_vm12, %v5057_v56, %v5061_v8  ;;  %9204 = vmatpush3.bf16.msra.mxu0 %v10090_v1  ;;  %v4691_v8 = vmax.f32 %v4655_v52, 0.0  ;;  %v4987_v1 = vld [vmem:[#allocation2 + $0x30] sm:$0xf0]  ;;  %v5484_v19 = vor.u32 %v5483_v6, %v5482_v29  ;;  %v10095_v29 = vld [vmem:[%s13540_s3 + $0x58] sm:$0xff]  }
 0x390   : > { %v5487_v26 = vshrl.u32 %v5062_v40, 16  ;;  %v5490_v38 = vshll.u32 %v5062_v40, 16  ;;  %v5497_v20 = vrot.slane %v5495_v59, 3  ;;  %v5500_v16 = vrot.slane %v5498_v12, 4  ;;  %9205 = vmatprep.subr.bf16.mxu0 %v10091_v61  ;;  %v10094_v61 = vld [vmem:[%s13540_s3 + $0x10] sm:$0xff]  }
 0x391   : > { %v4692_v3 = vmax.f32 %v4656_v18, 0.0  ;;  %v5477_v30 = vrot.slane %v5475_v27, 3  ;;  %v5480_v40 = vrot.slane %v5478_v25, 4  ;;  %v5067_v12 = vshrl.u32 %v4987_v1, 16 }
 0x392   : > { %v4507_v53 = vpop.f32.mrb[56].mxu0  ;;  %v5489_v44 = vrot.slane %v5487_v26, 3  ;;  %v5492_v5 = vrot.slane %v5490_v38, 4  ;;  %v5501_v7 = vor.u32 %v5500_v16, %v5497_v20  ;;  %v5069_v32 = vshll.u32 %v4987_v1, 16  ;;  %v4954_v38 = vld [vmem:[#allocation2 + $0x30] sm:$0xf8] }
 0x393   : > { %v4722_v56 = vpack.c.bf16 %v4692_v3, %v4691_v8  ;;  %v4614_v34 = vadd.f32 %v4507_v53, %v12237_v46  ;;  %v4509_v58 = vpop.f32.mrb[57].mxu0  ;;  %9206 = vmatpush3.bf16.msra.mxu0 %v10092_v54  ;;  %v5074_v18 = vshll.u32 %v4955_v47, 16  ;;  %v5481_v26 = vor.u32 %v5480_v40, %v5477_v30  ;;  %v10096_v30 = vld [vmem:[%s13540_s3 + $0x18] sm:$0xff]  }
 0x394   : > { %v4510_v52 = vpop.f32.mrb[58].mxu0  ;;  %v5493_v59 = vor.u32 %v5492_v5, %v5489_v44  ;;  %9207 = vmatprep.subr.bf16.mxu0 %v10093_v4  ;;  %v5071_v16 = vrot.slane %v5069_v32, 1  ;;  %v5078_v3 = vshrl.u32 %v4955_v47, 16  ;;  %v5521_v44 = vshrl.u32 %v4954_v38, 16  ;;  %v10097_v5 = vld [vmem:[%s13540_s3 + $0x60] sm:$0xff]  }
 0x395   : > { %v4872_v6 = vrot.slane %v4722_v56, 4  ;;  %v4657_v46 = vadd.f32 %v12360_v63, %v4614_v34  ;;  %v4615_v58 = vadd.f32 %v4510_v52, %v12248_v11  ;;  %v4512_v54 = vpop.f32.mrb[59].mxu0  ;;  %v5076_v8 = vrot.slane %v5074_v18, 1 }
 0x396   : > { %v12448_v20 = vsel %vm4793_vm9, %v5493_v59, %v5501_v7  ;;  %v12453_v25 = vsel %vm4793_vm9, %v5481_v26, %v5484_v19  ;;  %v5529_v34 = vrot.slane %v5074_v18, 4  ;;  %v4988_v11 = vld [vmem:[#allocation2 + $0x40] sm:$0xf0]  ;;  %v5072_v1 = vor.u32 %v5071_v16, %v5067_v12  ;;  %v10099_v26 = vld [vmem:[%s13540_s3 + $0x68] sm:$0xff]  }
 0x397   : > { %4913 = vst [vmem:[#allocation2 + $0x58] ss:$-4 sps:$4 sm:$0xff] %v4872_v6   ;;  %v4693_v4 = vmax.f32 %v4657_v46, 0.0  ;;  %v4658_v27 = vadd.f32 %v12360_v63, %v4615_v58  ;;  %6496 = vmatprep.mubr.bf16.mxu0 %v12448_v20  ;;  %9208 = vmatpush3.bf16.msra.mxu0 %v10094_v61  ;;  %v5080_v47 = vor.u32 %v5078_v3, %v5076_v8  ;;  %v5528_v53 = vrot.slane %v5078_v3, 3  ;;  %v10098_v54 = vld [vmem:[%s13540_s3 + $0x20] sm:$0xff]  }
 0x398   : > { %6497 = vmatmul.mubr.bf16.gmra.mrb[108].mxu0 %v12453_v25  ;;  %9209 = vmatprep.subr.bf16.mxu0 %v10095_v29  ;;  %v5524_v19 = vshll.u32 %v4954_v38, 16  ;;  %v5082_v56 = vshrl.u32 %v4988_v11, 16  ;;  %v5084_v40 = vshll.u32 %v4988_v11, 16  ;;  %v5077_v52 = vsel %vm5020_vm12, %v5072_v1, %v5076_v8 }
 0x399   : > { %v4694_v7 = vmax.f32 %v4658_v27, 0.0  ;;  %v5541_v59 = vshrl.u32 %v5080_v47, 16  ;;  %v5544_v32 = vshll.u32 %v5080_v47, 16  ;;  %v5523_v18 = vrot.slane %v5521_v44, 3 }
 0x39a   : > { %v4515_v61 = vpop.f32.mrb[60].mxu0  ;;  %v5533_v58 = vshrl.u32 %v5077_v52, 16  ;;  %v5536_v29 = vshll.u32 %v5077_v52, 16  ;;  %v5526_v3 = vrot.slane %v5524_v19, 4  ;;  %v5530_v27 = vor.u32 %v5529_v34, %v5528_v53  ;;  %v4956_v19 = vld [vmem:[#allocation2 + $0x40] sm:$0xf8] }
 0x39b   : > { %v4723_v6 = vpack.c.bf16 %v4694_v7, %v4693_v4  ;;  %v4616_v12 = vadd.f32 %v4515_v61, %v12264_v28  ;;  %v4517_v46 = vpop.f32.mrb[61].mxu0  ;;  %9210 = vmatpush3.bf16.msra.mxu0 %v10096_v30  ;;  %v5543_v16 = vrot.slane %v5541_v59, 3  ;;  %v5546_v8 = vrot.slane %v5544_v32, 4  ;;  %v4957_v4 = vld [vmem:[#allocation2 + $0x48] sm:$0xf] }
 0x39c   : > { %v4518_v38 = vpop.f32.mrb[62].mxu0  ;;  %9211 = vmatprep.subr.bf16.mxu0 %v10097_v5  ;;  %v5535_v47 = vrot.slane %v5533_v58, 3  ;;  %v5538_v44 = vrot.slane %v5536_v29, 4  ;;  %v5527_v61 = vor.u32 %v5526_v3, %v5523_v18  ;;  %v5086_v52 = vrot.slane %v5084_v40, 1  ;;  %v10101_v3 = vld [vmem:[%s13540_s3 + $0x70] sm:$0xff]  }
 0x39d   : > { %v4873_v28 = vrot.slane %v4723_v6, 4  ;;  %v4659_v11 = vadd.f32 %v12360_v63, %v4616_v12  ;;  %v4617_v30 = vadd.f32 %v4518_v38, %v12266_v49  ;;  %v4520_v1 = vpop.f32.mrb[63].mxu0  ;;  %v5547_v7 = vor.u32 %v5546_v8, %v5543_v16 }
 0x39e   : > { %v5089_v59 = vshll.u32 %v4957_v4, 16  ;;  %v5093_v32 = vshrl.u32 %v4957_v4, 16  ;;  %v5539_v5 = vor.u32 %v5538_v44, %v5535_v47  ;;  %v5087_v6 = vor.u32 %v5086_v52, %v5082_v56  ;;  %v4989_v1 = vld [vmem:[#allocation2 + $0x50] sm:$0xf0] }
 0x39f   : > { %4915 = vst [vmem:[#allocation2 + $0x68] ss:$-4 sps:$4 sm:$0xff] %v4873_v28   ;;  %v4660_v46 = vadd.f32 %v12360_v63, %v4617_v30  ;;  %9212 = vmatpush3.bf16.msra.mxu0 %v10098_v54  ;;  %v4695_v53 = vmax.f32 %v4659_v11, 0.0  ;;  %v13652_v49 = vshrl.u32 %v12421_v23, 16  ;;  %v12479_v40 = vsel %vm4793_vm9, %v5527_v61, %v5530_v27  ;;  %v10100_v54 = vld [vmem:[%s13540_s3 + $0x28] sm:$0xff]  }
 0x3a0   : > { %9213 = vmatprep.subr.bf16.mxu0 %v10099_v26  ;;  %v5091_v18 = vrot.slane %v5089_v59, 1  ;;  %v12481_v29 = vrot.slane %v5093_v32, 3  ;;  %v12487_v38 = vsel %vm4793_vm9, %v5539_v5, %v5547_v7  ;;  %v12489_v26 = vrot.slane %v5089_v59, 4 }
 0x3a1   : > { %v12476_v12 = vrot.slane %v13652_v49, 3  ;;  %v4696_v58 = vmax.f32 %v4660_v46, 0.0  ;;  %v5567_v16 = vshrl.u32 %v4956_v19, 16  ;;  %v5570_v8 = vshll.u32 %v4956_v19, 16  ;;  %6504 = vmatprep.mubr.bf16.mxu0 %v12487_v38  ;;  %v10102_v46 = vld [vmem:[%s13540_s3 + $0x30] sm:$0xff]  }
 0x3a2   : > { %v4523_v56 = vpop.f32.mrb[64].mxu0  ;;  %v5092_v11 = vsel %vm5020_vm12, %v5087_v6, %v5091_v18  ;;  %v5095_v30 = vor.u32 %v5093_v32, %v5091_v18  ;;  %6505 = vmatmul.mubr.bf16.gmra.mrb[112].mxu0 %v12479_v40  ;;  %v4959_v32 = vld [vmem:[#allocation2 + $0x58] sm:$0xf]  ;;  %v5576_v34 = vor.u32 %v12489_v26, %v12481_v29 }
 0x3a3   : > { %v4724_v27 = vpack.c.bf16 %v4696_v58, %v4695_v53  ;;  %v4618_v4 = vadd.f32 %v4523_v56, %v12273_v45  ;;  %v4525_v28 = vpop.f32.mrb[65].mxu0  ;;  %v5579_v44 = vshrl.u32 %v5092_v11, 16  ;;  %v5582_v7 = vshll.u32 %v5092_v11, 16  ;;  %9214 = vmatpush3.bf16.msra.mxu0 %v10100_v54  ;;  %v10103_v6 = vld [vmem:[%s13540_s3 + $0x78] sm:$0xff]  }
 0x3a4   : > { %v4526_v47 = vpop.f32.mrb[66].mxu0  ;;  %v5569_v61 = vrot.slane %v5567_v16, 3  ;;  %v5572_v52 = vrot.slane %v5570_v8, 4  ;;  %v5587_v5 = vshrl.u32 %v5095_v30, 16  ;;  %v5590_v18 = vshll.u32 %v5095_v30, 16  ;;  %9215 = vmatprep.subr.bf16.mxu0 %v10101_v3  ;;  %v10104_v3 = vld [vmem:[%s13540_s3 + $0x38] sm:$0xff]  }
 0x3a5   : > { %v4874_v59 = vrot.slane %v4724_v27, 4  ;;  %v4661_v19 = vadd.f32 %v12360_v63, %v4618_v4  ;;  %v4619_v45 = vadd.f32 %v4526_v47, %v12275_v31  ;;  %v4528_v53 = vpop.f32.mrb[67].mxu0  ;;  %v5581_v49 = vrot.slane %v5579_v44, 3  ;;  %v4958_v16 = vld [vmem:[#allocation2 + $0x50] sm:$0xf8] }
 0x3a6   : > { %v5584_v58 = vrot.slane %v5582_v7, 4  ;;  %v5097_v56 = vshrl.u32 %v4989_v1, 16  ;;  %v5589_v4 = vrot.slane %v5587_v5, 3  ;;  %v5573_v31 = vor.u32 %v5572_v52, %v5569_v61 }
 0x3a7   : > { %4917 = vst [vmem:[#allocation2 + $0x78] ss:$-4 sps:$4 sm:$0xff] %v4874_v59   ;;  %v4697_v8 = vmax.f32 %v4661_v19, 0.0  ;;  %v4662_v27 = vadd.f32 %v12360_v63, %v4619_v45  ;;  %v5592_v11 = vrot.slane %v5590_v18, 4  ;;  %v5099_v47 = vshll.u32 %v4989_v1, 16  ;;  %9216 = vmatpush3.bf16.msra.mxu0 %v10102_v46 }
 0x3a8   : > { %v5585_v28 = vor.u32 %v5584_v58, %v5581_v49  ;;  %v5104_v54 = vshll.u32 %v4959_v32, 16  ;;  %v5108_v44 = vshrl.u32 %v4959_v32, 16  ;;  %v5613_v7 = vshrl.u32 %v4958_v16, 16  ;;  %9217 = vmatprep.subr.bf16.mxu0 %v10103_v6 }
 0x3a9   : > { %v4698_v53 = vmax.f32 %v4662_v27, 0.0  ;;  %v5593_v30 = vor.u32 %v5592_v11, %v5589_v4  ;;  %v5101_v19 = vrot.slane %v5099_v47, 1  ;;  %v5616_v18 = vshll.u32 %v4958_v16, 16  ;;  %v4990_v16 = vld [vmem:[#allocation2 + $0x60] sm:$0xf0] }
 0x3aa   : > { %v4531_v59 = vpop.f32.mrb[68].mxu0  ;;  %v5106_v45 = vrot.slane %v5104_v54, 1  ;;  %v5621_v61 = vrot.slane %v5104_v54, 4  ;;  %v5620_v49 = vrot.slane %v5108_v44, 3  ;;  %v5615_v58 = vrot.slane %v5613_v7, 3 }
 0x3ab   : > { %v4725_v52 = vpack.c.bf16 %v4698_v53, %v4697_v8  ;;  %v4620_v1 = vadd.f32 %v4531_v59, %v12283_v57  ;;  %v4533_v5 = vpop.f32.mrb[69].mxu0  ;;  %v12514_v29 = vsel %vm4793_vm9, %v5585_v28, %v5593_v30  ;;  %v5102_v46 = vor.u32 %v5101_v19, %v5097_v56  ;;  %9218 = vmatpush3.bf16.msra.mxu0 %v10104_v3 }
 0x3ac   : > { %v4534_v26 = vpop.f32.mrb[70].mxu0  ;;  %v5110_v32 = vor.u32 %v5108_v44, %v5106_v45  ;;  %6512 = vmatprep.mubr.bf16.mxu0 %v12514_v29  ;;  %v12518_v4 = vsel %vm4793_vm9, %v5573_v31, %v5576_v34  ;;  %v5618_v47 = vrot.slane %v5616_v18, 4  ;;  %v5622_v31 = vor.u32 %v5621_v61, %v5620_v49  ;;  %v4961_v44 = vld [vmem:[#allocation2 + $0x68] sm:$0xf]  ;;  %v4960_v49 = vld [vmem:[#allocation2 + $0x60] sm:$0xf8] }
 0x3ad   : > { %v4875_v27 = vrot.slane %v4725_v52, 4  ;;  %v4663_v6 = vadd.f32 %v12360_v63, %v4620_v1  ;;  %v4621_v57 = vadd.f32 %v4534_v26, %v12285_v33  ;;  %v4536_v8 = vpop.f32.mrb[71].mxu0  ;;  %6513 = vmatmul.mubr.bf16.gmra.mrb[116].mxu0 %v12518_v4  ;;  %v5107_v28 = vsel %vm5020_vm12, %v5102_v46, %v5106_v45 }
 0x3ae   : > { %v5633_v11 = vshrl.u32 %v5110_v32, 16  ;;  %v5636_v56 = vshll.u32 %v5110_v32, 16  ;;  %v5625_v53 = vshrl.u32 %v5107_v28, 16  ;;  %v5628_v34 = vshll.u32 %v5107_v28, 16 }
 0x3af   : > { %4919 = vst [vmem:[#allocation2 + $0x88] ss:$-4 sps:$4 sm:$0xff] %v4875_v27   ;;  %v4664_v54 = vadd.f32 %v12360_v63, %v4621_v57  ;;  %v4699_v7 = vmax.f32 %v4663_v6, 0.0  ;;  %v5619_v59 = vor.u32 %v5618_v47, %v5615_v58  ;;  %v5114_v1 = vshll.u32 %v4990_v16, 16  ;;  %v4991_v47 = vld [vmem:[#allocation2 + $0x70] sm:$0xf0] }
 0x3b0   : > { %v5635_v30 = vrot.slane %v5633_v11, 3  ;;  %v5638_v33 = vrot.slane %v5636_v56, 4  ;;  %v5627_v19 = vrot.slane %v5625_v53, 3  ;;  %v5630_v52 = vrot.slane %v5628_v34, 4 }
 0x3b1   : > { %v4700_v3 = vmax.f32 %v4664_v54, 0.0  ;;  %v5112_v26 = vshrl.u32 %v4990_v16, 16  ;;  %v5119_v46 = vshll.u32 %v4961_v44, 16  ;;  %v5123_v32 = vshrl.u32 %v4961_v44, 16 }
 0x3b2   : > { %v5639_v45 = vor.u32 %v5638_v33, %v5635_v30  ;;  %v4539_v5 = vpop.f32.mrb[72].mxu0  ;;  %v5631_v27 = vor.u32 %v5630_v52, %v5627_v19  ;;  %v5116_v61 = vrot.slane %v5114_v1, 1  ;;  %v12527_v6 = vsel %vm4793_vm9, %v5619_v59, %v5622_v31  ;;  %v4963_v19 = vld [vmem:[#allocation2 + $0x78] sm:$0xf] }
 0x3b3   : > { %v4726_v18 = vpack.c.bf16 %v4700_v3, %v4699_v7  ;;  %v4622_v57 = vadd.f32 %v4539_v5, %v12291_v35  ;;  %v4541_v8 = vpop.f32.mrb[73].mxu0  ;;  %v5121_v28 = vrot.slane %v5119_v46, 1  ;;  %v5666_v11 = vrot.slane %v5123_v32, 3 }
 0x3b4   : > { %v4542_v58 = vpop.f32.mrb[74].mxu0  ;;  %v5667_v56 = vrot.slane %v5119_v46, 4  ;;  %v12530_v16 = vsel %vm4793_vm9, %v5631_v27, %v5639_v45  ;;  %v5117_v44 = vor.u32 %v5116_v61, %v5112_v26  ;;  %v5659_v31 = vshrl.u32 %v4960_v49, 16 }
 0x3b5   : > { %v4876_v54 = vrot.slane %v4726_v18, 4  ;;  %v4665_v53 = vadd.f32 %v12360_v63, %v4622_v57  ;;  %v4623_v34 = vadd.f32 %v4542_v58, %v12293_v41  ;;  %v4544_v35 = vpop.f32.mrb[75].mxu0  ;;  %6520 = vmatprep.mubr.bf16.mxu0 %v12530_v16  ;;  %v5125_v7 = vor.u32 %v5123_v32, %v5121_v28 }
 0x3b6   : > { %v5662_v30 = vshll.u32 %v4960_v49, 16  ;;  %6521 = vmatmul.mubr.bf16.gmra.mrb[120].mxu0 %v12527_v6  ;;  %v5668_v3 = vor.u32 %v5667_v56, %v5666_v11  ;;  %v5127_v52 = vshrl.u32 %v4991_v47, 16  ;;  %v5122_v1 = vsel %vm5020_vm12, %v5117_v44, %v5121_v28 }
 0x3b7   : > { %4921 = vst [vmem:[#allocation2 + $0x98] ss:$-4 sps:$4 sm:$0xff] %v4876_v54   ;;  %v4701_v33 = vmax.f32 %v4665_v53, 0.0  ;;  %v4666_v59 = vadd.f32 %v12360_v63, %v4623_v34  ;;  %v5679_v45 = vshrl.u32 %v5125_v7, 16  ;;  %v5682_v41 = vshll.u32 %v5125_v7, 16 }
 0x3b8   : > { %v5661_v5 = vrot.slane %v5659_v31, 3  ;;  %v5671_v18 = vshrl.u32 %v5122_v1, 16  ;;  %v5674_v26 = vshll.u32 %v5122_v1, 16  ;;  %v5664_v32 = vrot.slane %v5662_v30, 4  ;;  %v4962_v31 = vld [vmem:[#allocation2 + $0x70] sm:$0xf8] }
 0x3b9   : > { %v4702_v46 = vmax.f32 %v4666_v59, 0.0  ;;  %v5681_v27 = vrot.slane %v5679_v45, 3  ;;  %v5684_v57 = vrot.slane %v5682_v41, 4  ;;  %v5129_v61 = vshll.u32 %v4991_v47, 16 }
 0x3ba   : > { %v4547_v8 = vpop.f32.mrb[76].mxu0  ;;  %v5134_v49 = vshll.u32 %v4963_v19, 16  ;;  %v5673_v54 = vrot.slane %v5671_v18, 3  ;;  %v5676_v53 = vrot.slane %v5674_v26, 4  ;;  %v5665_v11 = vor.u32 %v5664_v32, %v5661_v5 }
 0x3bb   : > { %v4727_v58 = vpack.c.bf16 %v4702_v46, %v4701_v33  ;;  %v4549_v56 = vpop.f32.mrb[77].mxu0  ;;  %v5685_v34 = vor.u32 %v5684_v57, %v5681_v27  ;;  %v4624_v28 = vadd.f32 %v4547_v8, %v12299_v51  ;;  %v5131_v44 = vrot.slane %v5129_v61, 1 }
 0x3bc   : > { %v4550_v35 = vpop.f32.mrb[78].mxu0  ;;  %v5136_v7 = vrot.slane %v5134_v49, 1  ;;  %v5677_v1 = vor.u32 %v5676_v53, %v5673_v54  ;;  %v12540_v30 = vsel %vm4793_vm9, %v5665_v11, %v5668_v3  ;;  %v5138_v5 = vshrl.u32 %v4963_v19, 16  ;;  %v4965_v56 = vld [vmem:[#allocation2 + $0x88] sm:$0xf] }
 0x3bd   : > { %v4877_v59 = vrot.slane %v4727_v58, 4  ;;  %v4625_v47 = vadd.f32 %v4550_v35, %v12301_v62  ;;  %v4552_v45 = vpop.f32.mrb[79].mxu0  ;;  %v4667_v33 = vadd.f32 %v12360_v63, %v4624_v28  ;;  %v5132_v41 = vor.u32 %v5131_v44, %v5127_v52 }
 0x3be   : > { %v5713_v46 = vrot.slane %v5134_v49, 4  ;;  %v12545_v51 = vsel %vm4793_vm9, %v5677_v1, %v5685_v34  ;;  %v5705_v26 = vshrl.u32 %v4962_v31, 16  ;;  %v5708_v32 = vshll.u32 %v4962_v31, 16 }
 0x3bf   : > { %4923 = vst [vmem:[#allocation2 + $0xa8] ss:$-4 sps:$4 sm:$0xff] %v4877_v59   ;;  %v4668_v18 = vadd.f32 %v12360_v63, %v4625_v47  ;;  %6528 = vmatprep.mubr.bf16.mxu0 %v12545_v51  ;;  %v4703_v3 = vmax.f32 %v4667_v33, 0.0  ;;  %v5137_v27 = vsel %vm5020_vm12, %v5132_v41, %v5136_v7  ;;  %v5140_v62 = vor.u32 %v5138_v5, %v5136_v7  ;;  %v4992_v7 = vld [vmem:[#allocation2 + $0x80] sm:$0xf0] }
 0x3c0   : > { %v5712_v57 = vrot.slane %v5138_v5, 3  ;;  %6529 = vmatmul.mubr.bf16.gmra.mrb[124].mxu0 %v12540_v30  ;;  %v5717_v19 = vshrl.u32 %v5137_v27, 16  ;;  %v5720_v8 = vshll.u32 %v5137_v27, 16  ;;  %v5707_v61 = vrot.slane %v5705_v26, 3 }
 0x3c1   : > { %v4704_v52 = vmax.f32 %v4668_v18, 0.0  ;;  %v5725_v49 = vshrl.u32 %v5140_v62, 16  ;;  %v5728_v58 = vshll.u32 %v5140_v62, 16  ;;  %v5710_v54 = vrot.slane %v5708_v32, 4 }
 0x3c2   : > { %v5714_v53 = vor.u32 %v5713_v46, %v5712_v57  ;;  %v4555_v11 = vpop.f32.mrb[80].mxu0  ;;  %v5719_v28 = vrot.slane %v5717_v19, 3  ;;  %v5722_v35 = vrot.slane %v5720_v8, 4  ;;  %v13653_v33 = vshll.u32 %v12421_v23, 16  ;;  %v4964_v8 = vld [vmem:[#allocation2 + $0x80] sm:$0xf8] }
 0x3c3   : > { %v4728_v34 = vpack.c.bf16 %v4704_v52, %v4703_v3  ;;  %v4626_v44 = vadd.f32 %v4555_v11, %v12308_v60  ;;  %v4557_v31 = vpop.f32.mrb[81].mxu0  ;;  %v5727_v59 = vrot.slane %v5725_v49, 3  ;;  %v5730_v1 = vrot.slane %v5728_v58, 4 }
 0x3c4   : > { %v5711_v47 = vor.u32 %v5710_v54, %v5707_v61  ;;  %v4558_v45 = vpop.f32.mrb[82].mxu0  ;;  %v5400_v41 = vrot.slane %v13653_v33, 4  ;;  %v5723_v18 = vor.u32 %v5722_v35, %v5719_v28  ;;  %v5142_v27 = vshrl.u32 %v4992_v7, 16 }
 0x3c5   : > { %v4878_v5 = vrot.slane %v4728_v34, 4  ;;  %v4669_v46 = vadd.f32 %v12360_v63, %v4626_v44  ;;  %v4627_v26 = vadd.f32 %v4558_v45, %v12312_v24  ;;  %v4560_v32 = vpop.f32.mrb[83].mxu0  ;;  %v5731_v3 = vor.u32 %v5730_v1, %v5727_v59 }
 0x3c6   : > { %v5144_v62 = vshll.u32 %v4992_v7, 16  ;;  %v5149_v60 = vshll.u32 %v4965_v56, 16  ;;  %v12557_v57 = vsel %vm4793_vm9, %v5711_v47, %v5714_v53  ;;  %v5153_v23 = vshrl.u32 %v4965_v56, 16 }
 0x3c7   : > { %4925 = vst [vmem:[#allocation2 + $0xb8] ss:$-4 sps:$4 sm:$0xff] %v4878_v5   ;;  %13654 = vst [vmem:[#allocation7_spill] sm:$0xff] %v12557_v57  ;;  %v4705_v52 = vmax.f32 %v4669_v46, 0.0  ;;  %v4670_v19 = vadd.f32 %v12360_v63, %v4627_v26  ;;  %v12561_v61 = vsel %vm4793_vm9, %v5723_v18, %v5731_v3  ;;  %v5401_v34 = vor.u32 %v5400_v41, %v12476_v12 }
 0x3c8   : > { %13655 = vst [vmem:[#allocation10_spill] sm:$0xff] %v12561_v61  ;;  %v5146_v49 = vrot.slane %v5144_v62, 1  ;;  %v5151_v58 = vrot.slane %v5149_v60, 1  ;;  %v5759_v24 = vrot.slane %v5149_v60, 4  ;;  %6536 = vmatprep.mubr.bf16.mxu0 %v12561_v61  ;;  %v5758_v11 = vrot.slane %v5153_v23, 3 }
 0x3c9   : > { %v4706_v54 = vmax.f32 %v4670_v19, 0.0  ;;  %v5403_v53 = vshrl.u32 %v12396_v50, 16  ;;  %6537 = vmatmul.mubr.bf16.gmra.mrb[128].mxu0 %v12557_v57  ;;  %v5406_v56 = vshll.u32 %v12396_v50, 16  ;;  %v5751_v35 = vshrl.u32 %v4964_v8, 16 }
 0x3ca   : > { %v5147_v28 = vor.u32 %v5146_v49, %v5142_v27  ;;  %v5155_v63 = vor.u32 %v5153_v23, %v5151_v58  ;;  %v4563_v44 = vpop.f32.mrb[84].mxu0  ;;  %v5760_v7 = vor.u32 %v5759_v24, %v5758_v11  ;;  %v5754_v1 = vshll.u32 %v4964_v8, 16 }
 0x3cb   : > { %v4729_v31 = vpack.c.bf16 %v4706_v54, %v4705_v52  ;;  %v5405_v59 = vrot.slane %v5403_v53, 3  ;;  %v4565_v47 = vpop.f32.mrb[85].mxu0  ;;  %v5408_v12 = vrot.slane %v5406_v56, 4  ;;  %v5753_v32 = vrot.slane %v5751_v35, 3  ;;  %v12569_v52 = vld [vmem:[#allocation2 + $0x90] sm:$0xf0] }
 0x3cc   : > { %v5152_v45 = vsel %vm5020_vm12, %v5147_v28, %v5151_v58  ;;  %v5771_v33 = vshrl.u32 %v5155_v63, 16  ;;  %v5774_v5 = vshll.u32 %v5155_v63, 16  ;;  %v4566_v41 = vpop.f32.mrb[86].mxu0  ;;  %v5756_v60 = vrot.slane %v5754_v1, 4  ;;  %v4967_v54 = vld [vmem:[#allocation2 + $0x98] sm:$0xf] }
 0x3cd   : > { %v4879_v18 = vrot.slane %v4729_v31, 4  ;;  %v5763_v46 = vshrl.u32 %v5152_v45, 16  ;;  %v5766_v26 = vshll.u32 %v5152_v45, 16  ;;  %v4568_v3 = vpop.f32.mrb[87].mxu0  ;;  %v5409_v62 = vor.u32 %v5408_v12, %v5405_v59  ;;  %v4966_v56 = vld [vmem:[#allocation2 + $0x90] sm:$0xf8] }
 0x3ce   : > { %v5773_v27 = vrot.slane %v5771_v33, 3  ;;  %v5776_v50 = vrot.slane %v5774_v5, 4  ;;  %v13656_v8 = vor.u32 %v12390_v17, %v12387_v22  ;;  %v13657_v49 = vor.u32 %v12398_v14, %v12392_v15  ;;  %v12584_v22 = vld [vmem:[%s13539_s2] ss:$0 sm:$0xff]  ;;  %v10106_v33 = vld [vmem:[%s13540_s3 + $0x148] sm:$0xff]  }
 0x3cf   : > { %4927 = vst [vmem:[#allocation2 + $0xc8] ss:$-4 sps:$4 sm:$0xff] %v4879_v18   ;;  %v5765_v19 = vrot.slane %v5763_v46, 3  ;;  %v5768_v23 = vrot.slane %v5766_v26, 4  ;;  %v4628_v24 = vadd.f32 %v4563_v44, %v12316_v21  ;;  %v5410_v53 = vsel %vm4793_vm9, %v5401_v34, %v5409_v62 }
 0x3d0   : > { %v5393_v58 = vsel %vm4793_vm9, %v13657_v49, %v13656_v8  ;;  %v5777_v11 = vor.u32 %v5776_v50, %v5773_v27  ;;  %v5757_v28 = vor.u32 %v5756_v60, %v5753_v32  ;;  %v4629_v63 = vadd.f32 %v4566_v41, %v12318_v36  ;;  %6954 = vmatprep.mubr.bf16.mxu0 %v5410_v53  ;;  %v10211_v50 = vld [vmem:[%s13540_s3 + $0x140] sm:$0xff]  }
 0x3d1   : > { %v5769_v35 = vor.u32 %v5768_v23, %v5765_v19  ;;  %v4671_v17 = vadd.f32 %v12584_v22, %v4628_v24  ;;  %v5157_v15 = vshrl.u32 %v12569_v52, 16  ;;  %v5159_v21 = vshll.u32 %v12569_v52, 16  ;;  %6955 = vmatmul.mubr.bf16.vlgmr.msra.gmra.mrb[132].mxu0 %v5393_v58  ;;  %v12607_v23 = vld [vmem:[#allocation2 + $0xa0] sm:$0xf0] }
 0x3d2   : > { %v12590_v14 = vsel %vm4793_vm9, %v5757_v28, %v5760_v7  ;;  %v4672_v36 = vadd.f32 %v12584_v22, %v4629_v63  ;;  %v5164_v34 = vshll.u32 %v4967_v54, 16  ;;  %v5168_v44 = vshrl.u32 %v4967_v54, 16  ;;  %v4571_v31 = vpop.f32.mrb[88].mxu0  ;;  %6962 = vmatprep.mubr.bf16.mxu0 %v12411_v0  ;;  %v4969_v63 = vld [vmem:[#allocation2 + $0xa8] sm:$0xf] }
 0x3d3   : > { %13658 = vst [vmem:[#allocation11_spill] sm:$0xff] %v12590_v14  ;;  %v12594_v59 = vsel %vm4793_vm9, %v5769_v35, %v5777_v11  ;;  %v4707_v1 = vmax.f32 %v4671_v17, 0.0  ;;  %v5161_v47 = vrot.slane %v5159_v21, 1  ;;  %v5797_v45 = vshrl.u32 %v4966_v56, 16  ;;  %v4573_v7 = vpop.f32.mrb[89].mxu0 }
 0x3d4   : > { %13659 = vst [vmem:[#allocation12_spill] sm:$0xff] %v12594_v59  ;;  %6544 = vmatprep.mubr.bf16.mxu1 %v12594_v59  ;;  %v4708_v5 = vmax.f32 %v4672_v36, 0.0  ;;  %v5166_v12 = vrot.slane %v5164_v34, 1  ;;  %v5804_v41 = vrot.slane %v5168_v44, 3  ;;  %v5805_v18 = vrot.slane %v5164_v34, 4  ;;  %v4574_v46 = vpop.f32.mrb[90].mxu0 }
 0x3d5   : > { %6545 = vmatmul.mubr.bf16.vlgmr.msra.gmra.mrb[32].mxu1 %v12590_v14  ;;  %v5162_v26 = vor.u32 %v5161_v47, %v5157_v15  ;;  %v5799_v32 = vrot.slane %v5797_v45, 3  ;;  %v5800_v0 = vshll.u32 %v4966_v56, 16  ;;  %v4630_v3 = vadd.f32 %v4571_v31, %v12324_v55  ;;  %v4576_v27 = vpop.f32.mrb[91].mxu0  ;;  %v10107_v55 = vld [vmem:[%s13540_s3 + $0x150] sm:$0xff]   ;;  %v4968_v15 = vld [vmem:[#allocation2 + $0xa0] sm:$0xf8] }
 0x3d6   : > { %9496 = vmatpush3.bf16.msra.mxu1 %v10211_v50  ;;  %v4730_v62 = vpack.c.bf16 %v4708_v5, %v4707_v1  ;;  %v5170_v60 = vor.u32 %v5168_v44, %v5166_v12  ;;  %v4631_v19 = vadd.f32 %v4574_v46, %v12326_v39  ;;  %v5806_v58 = vor.u32 %v5805_v18, %v5804_v41 }
 0x3d7   : > { %v5167_v8 = vsel %vm5020_vm12, %v5162_v26, %v5166_v12  ;;  %v5802_v49 = vrot.slane %v5800_v0, 4  ;;  %9497 = vmatprep.subr.bf16.mxu1 %v10106_v33  ;;  %v4673_v24 = vadd.f32 %v12584_v22, %v4630_v3  ;;  %v5172_v17 = vshrl.u32 %v12607_v23, 16  ;;  %v10108_v12 = vld [vmem:[%s13540_s3 + $0x158] sm:$0xff]  }
 0x3d8   : > { %v4880_v54 = vrot.slane %v4730_v62, 4  ;;  %v5809_v11 = vshrl.u32 %v5167_v8, 16  ;;  %v5812_v53 = vshll.u32 %v5167_v8, 16  ;;  %v5817_v28 = vshrl.u32 %v5170_v60, 16 }
 0x3d9   : > { %v5820_v56 = vshll.u32 %v5170_v60, 16  ;;  %v5803_v39 = vor.u32 %v5802_v49, %v5799_v32  ;;  %v4674_v35 = vadd.f32 %v12584_v22, %v4631_v19  ;;  %6963 = vmatmul.mubr.bf16.gmra.mrb[136].mxu0 %v12414_v48  ;;  %v5174_v44 = vshll.u32 %v12607_v23, 16 }
 0x3da   : > { %4929 = vst [vmem:[#allocation2 + $0xd8] ss:$-4 sps:$4 sm:$0xff] %v4880_v54   ;;  %v5811_v21 = vrot.slane %v5809_v11, 3  ;;  %v5814_v36 = vrot.slane %v5812_v53, 4  ;;  %v5819_v34 = vrot.slane %v5817_v28, 3  ;;  %9498 = vmatpush3.bf16.msra.mxu1 %v10106_v33  ;;  %v4579_v31 = vpop.f32.mrb[92].mxu0  ;;  %6970 = vmatprep.mubr.bf16.mxu0 %v12448_v20 }
 0x3db   : > { %v5822_v1 = vrot.slane %v5820_v56, 4  ;;  %v4709_v47 = vmax.f32 %v4673_v24, 0.0  ;;  %v4710_v45 = vmax.f32 %v4674_v35, 0.0  ;;  %v5179_v7 = vshll.u32 %v4969_v63, 16  ;;  %9499 = vmatprep.subr.bf16.mxu1 %v10107_v55  ;;  %v4581_v5 = vpop.f32.mrb[93].mxu0  ;;  %v10109_v11 = vld [vmem:[%s13540_s3 + $0x160] sm:$0xff]  }
 0x3dc   : > { %v5815_v41 = vor.u32 %v5814_v36, %v5811_v21  ;;  %v12623_v18 = vsel %vm4793_vm9, %v5803_v39, %v5806_v58  ;;  %v5176_v48 = vrot.slane %v5174_v44, 1  ;;  %v5183_v33 = vshrl.u32 %v4969_v63, 16  ;;  %v4582_v46 = vpop.f32.mrb[94].mxu0  ;;  %v12629_v54 = vld [vmem:[#allocation2 + $0xb0] sm:$0xf0] }
 0x3dd   : > { %v5823_v26 = vor.u32 %v5822_v1, %v5819_v34  ;;  %v4731_v32 = vpack.c.bf16 %v4710_v45, %v4709_v47  ;;  %v5181_v0 = vrot.slane %v5179_v7, 1  ;;  %v5851_v3 = vrot.slane %v5179_v7, 4  ;;  %v4584_v27 = vpop.f32.mrb[95].mxu0  ;;  %v4971_v36 = vld [vmem:[#allocation2 + $0xb8] sm:$0xf] }
 0x3de   : > { %v5177_v50 = vor.u32 %v5176_v48, %v5172_v17  ;;  %v5850_v62 = vrot.slane %v5183_v33, 3  ;;  %v5843_v60 = vshrl.u32 %v4968_v15, 16  ;;  %v5846_v19 = vshll.u32 %v4968_v15, 16  ;;  %9500 = vmatpush3.bf16.msra.mxu1 %v10107_v55  ;;  %v4970_v44 = vld [vmem:[#allocation2 + $0xb0] sm:$0xf8] }
 0x3df   : > { %v12626_v8 = vsel %vm4793_vm9, %v5815_v41, %v5823_v26  ;;  %v4881_v49 = vrot.slane %v4731_v32, 4  ;;  %v5185_v24 = vor.u32 %v5183_v33, %v5181_v0  ;;  %v4632_v58 = vadd.f32 %v4579_v31, %v12332_v37  ;;  %9501 = vmatprep.subr.bf16.mxu1 %v10108_v12  ;;  %v10110_v41 = vld [vmem:[%s13540_s3 + $0x168] sm:$0xff]  }
 0x3e0   : > { %13660 = vst [vmem:[#allocation13_spill] sm:$0xff] %v12626_v8  ;;  %6552 = vmatprep.mubr.bf16.mxu1 %v12626_v8  ;;  %v5182_v53 = vsel %vm5020_vm12, %v5177_v50, %v5181_v0  ;;  %v5845_v28 = vrot.slane %v5843_v60, 3  ;;  %v5848_v55 = vrot.slane %v5846_v19, 4  ;;  %v5852_v63 = vor.u32 %v5851_v3, %v5850_v62 }
 0x3e1   : > { %6553 = vmatmul.mubr.bf16.gmra.mrb[36].mxu1 %v12623_v18  ;;  %4931 = vst [vmem:[#allocation2 + $0xe8] ss:$-4 sps:$4 sm:$0xff] %v4881_v49   ;;  %v5855_v56 = vshrl.u32 %v5182_v53, 16  ;;  %v5858_v39 = vshll.u32 %v5182_v53, 16  ;;  %v5863_v37 = vshrl.u32 %v5185_v24, 16  ;;  %v5866_v35 = vshll.u32 %v5185_v24, 16  ;;  %6971 = vmatmul.mubr.bf16.gmra.mrb[140].mxu0 %v12453_v25 }
 0x3e2   : > { %v5849_v17 = vor.u32 %v5848_v55, %v5845_v28  ;;  %v4675_v15 = vadd.f32 %v12584_v22, %v4632_v58  ;;  %v4633_v21 = vadd.f32 %v4582_v46, %v12336_v42  ;;  %v5187_v34 = vshrl.u32 %v12629_v54, 16  ;;  %v4587_v31 = vpop.f32.mrb[96].mxu0  ;;  %9502 = vmatpush3.bf16.msra.mxu1 %v10108_v12  ;;  %6978 = vmatprep.mubr.bf16.mxu0 %v12487_v38  ;;  %v10111_v28 = vld [vmem:[%s13540_s3 + $0x170] sm:$0xff]  }
 0x3e3   : > { %v5857_v1 = vrot.slane %v5855_v56, 3  ;;  %v5860_v47 = vrot.slane %v5858_v39, 4  ;;  %v5865_v45 = vrot.slane %v5863_v37, 3  ;;  %v5868_v7 = vrot.slane %v5866_v35, 4  ;;  %v4589_v5 = vpop.f32.mrb[97].mxu0  ;;  %9503 = vmatprep.subr.bf16.mxu1 %v10109_v11 }
 0x3e4   : > { %v12646_v42 = vsel %vm4793_vm9, %v5849_v17, %v5852_v63  ;;  %v4711_v48 = vmax.f32 %v4675_v15, 0.0  ;;  %v4676_v33 = vadd.f32 %v12584_v22, %v4633_v21  ;;  %v5189_v12 = vshll.u32 %v12629_v54, 16  ;;  %v4590_v46 = vpop.f32.mrb[98].mxu0  ;;  %v12657_v37 = vld [vmem:[#allocation2 + $0x20] sm:$0xf0] }
 0x3e5   : > { %v5861_v26 = vor.u32 %v5860_v47, %v5857_v1  ;;  %v5869_v32 = vor.u32 %v5868_v7, %v5865_v45  ;;  %v5194_v0 = vshll.u32 %v4971_v36, 16  ;;  %v5198_v3 = vshrl.u32 %v4971_v36, 16  ;;  %v4592_v27 = vpop.f32.mrb[99].mxu0  ;;  %v12663_v21 = vld [vmem:[#allocation2 + $0xc0] sm:$0xf0] }
 0x3e6   : > { %v4712_v50 = vmax.f32 %v4676_v33, 0.0  ;;  %v5191_v62 = vrot.slane %v5189_v12, 1  ;;  %v5889_v60 = vshrl.u32 %v4970_v44, 16  ;;  %v5892_v19 = vshll.u32 %v4970_v44, 16  ;;  %9504 = vmatpush3.bf16.msra.mxu1 %v10109_v11  ;;  %v4973_v47 = vld [vmem:[#allocation2 + $0xc8] sm:$0xf] }
 0x3e7   : > { %v12651_v49 = vsel %vm4793_vm9, %v5861_v26, %v5869_v32  ;;  %v5196_v24 = vrot.slane %v5194_v0, 1  ;;  %v5896_v58 = vrot.slane %v5198_v3, 3  ;;  %v5897_v53 = vrot.slane %v5194_v0, 4  ;;  %9505 = vmatprep.subr.bf16.mxu1 %v10110_v41 }
 0x3e8   : > { %6560 = vmatprep.mubr.bf16.mxu1 %v12651_v49  ;;  %v4732_v55 = vpack.c.bf16 %v4712_v50, %v4711_v48  ;;  %v5192_v63 = vor.u32 %v5191_v62, %v5187_v34  ;;  %v5891_v56 = vrot.slane %v5889_v60, 3  ;;  %v5894_v39 = vrot.slane %v5892_v19, 4 }
 0x3e9   : > { %v5334_v11 = vrot.slane %v12657_v37, 1  ;;  %6561 = vmatmul.mubr.bf16.gmra.mrb[40].mxu1 %v12646_v42  ;;  %v5200_v35 = vor.u32 %v5198_v3, %v5196_v24  ;;  %v4634_v17 = vadd.f32 %v4587_v31, %v12342_v10  ;;  %v4635_v15 = vadd.f32 %v4590_v46, %v12347_v13  ;;  %6979 = vmatmul.mubr.bf16.gmra.mrb[144].mxu0 %v12479_v40  ;;  %v10112_v13 = vld [vmem:[%s13540_s3 + $0x178] sm:$0xff]  }
 0x3ea   : > { %v4882_v36 = vrot.slane %v4732_v55, 4  ;;  %v5197_v44 = vsel %vm5020_vm12, %v5192_v63, %v5196_v24  ;;  %v5895_v1 = vor.u32 %v5894_v39, %v5891_v56  ;;  %v5898_v34 = vor.u32 %v5897_v53, %v5896_v58  ;;  %v4595_v45 = vpop.f32.mrb[100].mxu0  ;;  %9506 = vmatpush3.bf16.msra.mxu1 %v10110_v41  ;;  %6986 = vmatprep.mubr.bf16.mxu0 %v12514_v29  ;;  %v4972_v58 = vld [vmem:[#allocation2 + $0xc0] sm:$0xf8] }
 0x3eb   : > { %v5901_v7 = vshrl.u32 %v5197_v44, 16  ;;  %v5904_v5 = vshll.u32 %v5197_v44, 16  ;;  %v5909_v48 = vshrl.u32 %v5200_v35, 16  ;;  %v5912_v33 = vshll.u32 %v5200_v35, 16  ;;  %v4597_v10 = vpop.f32.mrb[101].mxu0  ;;  %9507 = vmatprep.subr.bf16.mxu1 %v10111_v28 }
 0x3ec   : > { %4933 = vst [vmem:[#allocation2 + $0xf8] ss:$-4 sps:$4 sm:$0xff] %v4882_v36   ;;  %v4677_v31 = vadd.f32 %v12584_v22, %v4634_v17  ;;  %v4678_v12 = vadd.f32 %v12584_v22, %v4635_v15  ;;  %v5202_v46 = vshrl.u32 %v12663_v21, 16  ;;  %v5204_v41 = vshll.u32 %v12663_v21, 16  ;;  %v4598_v26 = vpop.f32.mrb[102].mxu0 }
 0x3ed   : > { %v5903_v32 = vrot.slane %v5901_v7, 3  ;;  %v5906_v0 = vrot.slane %v5904_v5, 4  ;;  %v5911_v3 = vrot.slane %v5909_v48, 3  ;;  %v5914_v27 = vrot.slane %v5912_v33, 4  ;;  %v4600_v50 = vpop.f32.mrb[103].mxu0 }
 0x3ee   : > { %v4713_v62 = vmax.f32 %v4677_v31, 0.0  ;;  %v4714_v60 = vmax.f32 %v4678_v12, 0.0  ;;  %v5206_v19 = vrot.slane %v5204_v41, 1  ;;  %v5209_v24 = vshll.u32 %v4973_v47, 16  ;;  %9508 = vmatpush3.bf16.msra.mxu1 %v10111_v28  ;;  %v12684_v28 = vld [vmem:[%s13540_s3 + $0x80] sm:$0xff]  }
 0x3ef   : > { %v5907_v53 = vor.u32 %v5906_v0, %v5903_v32  ;;  %v5915_v55 = vor.u32 %v5914_v27, %v5911_v3  ;;  %v12676_v63 = vsel %vm4793_vm9, %v5895_v1, %v5898_v34  ;;  %v5213_v56 = vshrl.u32 %v4973_v47, 16  ;;  %9509 = vmatprep.subr.bf16.mxu1 %v10112_v13  ;;  %v5004_v33 = vld [vmem:[#allocation2 + $0x28] sm:$0x1f]  ;;  %v12693_v27 = vld [vmem:[#allocation2 + $0xd0] sm:$0xf0] }
 0x3f0   : > { %13661 = vst [vmem:[#allocation14_spill] sm:$0xff] %v12676_v63  ;;  %v4733_v39 = vpack.c.bf16 %v4714_v60, %v4713_v62  ;;  %v5207_v35 = vor.u32 %v5206_v19, %v5202_v46  ;;  %v5211_v17 = vrot.slane %v5209_v24, 1  ;;  %v5943_v15 = vrot.slane %v5209_v24, 4  ;;  %v4975_v60 = vld [vmem:[#allocation2 + $0xd8] sm:$0xf] }
 0x3f1   : > { %v12679_v36 = vsel %vm4793_vm9, %v5907_v53, %v5915_v55  ;;  %v5942_v44 = vrot.slane %v5213_v56, 3  ;;  %v5935_v7 = vshrl.u32 %v4972_v58, 16  ;;  %v5938_v5 = vshll.u32 %v4972_v58, 16  ;;  %6987 = vmatmul.mubr.bf16.gmra.mrb[148].mxu0 %v12518_v4  ;;  %v4974_v19 = vld [vmem:[#allocation2 + $0xd0] sm:$0xf8] }
 0x3f2   : > { %6568 = vmatprep.mubr.bf16.mxu1 %v12679_v36  ;;  %v4883_v1 = vrot.slane %v4733_v39, 4  ;;  %v5212_v34 = vsel %vm5020_vm12, %v5207_v35, %v5211_v17  ;;  %v5215_v47 = vor.u32 %v5213_v56, %v5211_v17  ;;  %v4636_v48 = vadd.f32 %v4595_v45, %v12351_v9  ;;  %6994 = vmatprep.mubr.bf16.mxu0 %v12530_v16 }
 0x3f3   : > { %6569 = vmatmul.mubr.bf16.gmra.mrb[44].mxu1 %v12676_v63  ;;  %v5947_v10 = vshrl.u32 %v5212_v34, 16  ;;  %v5950_v31 = vshll.u32 %v5212_v34, 16  ;;  %v5937_v12 = vrot.slane %v5935_v7, 3  ;;  %v5940_v46 = vrot.slane %v5938_v5, 4 }
 0x3f4   : > { %4935 = vst [vmem:[#allocation2 + $0x108] ss:$-4 sps:$4 sm:$0xff] %v4883_v1   ;;  %v5955_v41 = vshrl.u32 %v5215_v47, 16  ;;  %v5958_v32 = vshll.u32 %v5215_v47, 16  ;;  %v5944_v0 = vor.u32 %v5943_v15, %v5942_v44  ;;  %v4679_v3 = vadd.f32 %v12584_v22, %v4636_v48  ;;  %9510 = vmatpush3.bf16.msra.mxu1 %v10112_v13  ;;  %v12705_v47 = vld [vmem:[#allocation2 + $0xe0] sm:$0xf0] }
 0x3f5   : > { %v5949_v9 = vrot.slane %v5947_v10, 3  ;;  %v5952_v45 = vrot.slane %v5950_v31, 4  ;;  %v5941_v50 = vor.u32 %v5940_v46, %v5937_v12  ;;  %v4637_v62 = vadd.f32 %v4598_v26, %v12355_v2  ;;  %9543 = vmatprep.subr.bf16.mxu1 %v12684_v28  ;;  %v4977_v26 = vld [vmem:[#allocation2 + $0xe8] sm:$0xf] }
 0x3f6   : > { %v12697_v24 = vrot.slane %v5004_v33, 1  ;;  %v5957_v58 = vrot.slane %v5955_v41, 3  ;;  %v5960_v53 = vrot.slane %v5958_v32, 4  ;;  %v4715_v55 = vmax.f32 %v4679_v3, 0.0 }
 0x3f7   : > { %v5953_v56 = vor.u32 %v5952_v45, %v5949_v9  ;;  %v4680_v39 = vadd.f32 %v12584_v22, %v4637_v62  ;;  %v5217_v35 = vshrl.u32 %v12693_v27, 16  ;;  %v5219_v13 = vshll.u32 %v12693_v27, 16 }
 0x3f8   : > { %v5961_v17 = vor.u32 %v5960_v53, %v5957_v58  ;;  %v5224_v15 = vshll.u32 %v4975_v60, 16  ;;  %v5228_v44 = vshrl.u32 %v4975_v60, 16  ;;  %v5981_v2 = vshrl.u32 %v4974_v19, 16 }
 0x3f9   : > { %v12703_v7 = vsel %vm4793_vm9, %v5941_v50, %v5944_v0  ;;  %v4716_v5 = vmax.f32 %v4680_v39, 0.0  ;;  %v5221_v1 = vrot.slane %v5219_v13, 1  ;;  %v5984_v34 = vshll.u32 %v4974_v19, 16  ;;  %6995 = vmatmul.mubr.bf16.gmra.mrb[152].mxu0 %v12527_v6 }
 0x3fa   : > { %v12708_v48 = vsel %vm4793_vm9, %v5953_v56, %v5961_v17  ;;  %v5226_v22 = vrot.slane %v5224_v15, 1  ;;  %v5988_v33 = vrot.slane %v5228_v44, 3  ;;  %v5989_v10 = vrot.slane %v5224_v15, 4  ;;  %7002 = vmatprep.mubr.bf16.mxu0 %v12545_v51 }
 0x3fb   : > { %13662 = vst [vmem:[#allocation15_spill] sm:$0xff] %v12708_v48  ;;  %6576 = vmatprep.mubr.bf16.mxu1 %v12708_v48  ;;  %v4734_v31 = vpack.c.bf16 %v4716_v5, %v4715_v55  ;;  %v5222_v12 = vor.u32 %v5221_v1, %v5217_v35  ;;  %v5983_v46 = vrot.slane %v5981_v2, 3  ;;  %v5986_v41 = vrot.slane %v5984_v34, 4  ;;  %v4976_v35 = vld [vmem:[#allocation2 + $0xe0] sm:$0xf8] }
 0x3fc   : > { %v12717_v32 = vsel %vm5327_vm13, %v5334_v11, %v12697_v24  ;;  %6577 = vmatmul.mubr.bf16.gmra.mrb[48].mxu1 %v12703_v7  ;;  %v5230_v0 = vor.u32 %v5228_v44, %v5226_v22  ;;  %v5234_v3 = vshll.u32 %v12705_v47, 16  ;;  %v5239_v9 = vshll.u32 %v4977_v26, 16 }
 0x3fd   : > { %v4884_v45 = vrot.slane %v4734_v31, 4  ;;  %v5227_v50 = vsel %vm5020_vm12, %v5222_v12, %v5226_v22  ;;  %v5232_v62 = vshrl.u32 %v12705_v47, 16  ;;  %v5243_v60 = vshrl.u32 %v4977_v26, 16 }
 0x3fe   : > { %v5993_v19 = vshrl.u32 %v5227_v50, 16  ;;  %v5996_v58 = vshll.u32 %v5227_v50, 16  ;;  %v6001_v53 = vshrl.u32 %v5230_v0, 16  ;;  %v6004_v55 = vshll.u32 %v5230_v0, 16  ;;  %v12731_v0 = vld [vmem:[#allocation2 + $0xf0] sm:$0xf0] }
 0x3ff   : > { %4937 = vst [vmem:[#allocation2 + $0x118] ss:$-4 sps:$4 sm:$0xff] %v4884_v45   ;;  %v5987_v37 = vor.u32 %v5986_v41, %v5983_v46  ;;  %v5990_v11 = vor.u32 %v5989_v10, %v5988_v33  ;;  %v5236_v56 = vrot.slane %v5234_v3, 1  ;;  %v5241_v39 = vrot.slane %v5239_v9, 1  ;;  %v4979_v41 = vld [vmem:[#allocation2 + $0xf8] sm:$0xf] }
 0x400   : > { %4946 = vst [vmem:[#allocation2 + $0x110] sm:$0xf0] %v13651_v43  ;;  %4947 = vst [vmem:[#allocation2 + $0x118] sm:$0xf] %v13651_v43  ;;  %v5995_v13 = vrot.slane %v5993_v19, 3  ;;  %v5998_v17 = vrot.slane %v5996_v58, 4 }
 0x401   : > { %v6003_v15 = vrot.slane %v6001_v53, 3  ;;  %v6006_v44 = vrot.slane %v6004_v55, 4  ;;  %v5237_v2 = vor.u32 %v5236_v56, %v5232_v62  ;;  %v5245_v26 = vor.u32 %v5243_v60, %v5241_v39  ;;  %7003 = vmatmul.mubr.bf16.gmra.mrb[156].mxu0 %v12540_v30  ;;  %v4783_v62 = vld [vmem:[#allocation2 + $0xf0] sm:$0x8] }
 0x402   : > { %v6034_v5 = vrot.slane %v5243_v60, 3  ;;  %v6035_v1 = vrot.slane %v5239_v9, 4  ;;  %v5999_v34 = vor.u32 %v5998_v17, %v5995_v13  ;;  %v6027_v31 = vshrl.u32 %v4976_v35, 16  ;;  %7010 = vmatprep.mubr.bf16.mxu0 %v12561_v61 }
 0x403   : > { %v6007_v22 = vor.u32 %v6006_v44, %v6003_v15  ;;  %v6030_v12 = vshll.u32 %v4976_v35, 16  ;;  %v12727_v33 = vsel %vm4793_vm9, %v5987_v37, %v5990_v11  ;;  %v5242_v10 = vsel %vm5020_vm12, %v5237_v2, %v5241_v39  ;;  %v12739_v39 = vld [vmem:[#allocation2 + $0x100] sm:$0xf0]  ;;  %v4981_v2 = vld [vmem:[#allocation2 + $0x108] sm:$0xf] }
 0x404   : > { %13663 = vst [vmem:[#allocation16_spill] sm:$0xff] %v12727_v33  ;;  %v6047_v43 = vshrl.u32 %v5245_v26, 16  ;;  %v6050_v46 = vshll.u32 %v5245_v26, 16  ;;  %v6039_v9 = vshrl.u32 %v5242_v10, 16  ;;  %v6042_v45 = vshll.u32 %v5242_v10, 16 }
 0x405   : > { %v12734_v3 = vsel %vm4793_vm9, %v5999_v34, %v6007_v22  ;;  %v6029_v50 = vrot.slane %v6027_v31, 3  ;;  %v6032_v58 = vrot.slane %v6030_v12, 4  ;;  %v6036_v53 = vor.u32 %v6035_v1, %v6034_v5 }
 0x406   : > { %6584 = vmatprep.mubr.bf16.mxu1 %v12734_v3  ;;  %v6049_v60 = vrot.slane %v6047_v43, 3  ;;  %v6052_v19 = vrot.slane %v6050_v46, 4  ;;  %v6041_v55 = vrot.slane %v6039_v9, 3  ;;  %v6044_v37 = vrot.slane %v6042_v45, 4 }
 0x407   : > { %6585 = vmatmul.mubr.bf16.gmra.mrb[52].mxu1 %v12727_v33  ;;  %v5249_v11 = vshll.u32 %v12731_v0, 16  ;;  %v5254_v56 = vshll.u32 %v4979_v41, 16  ;;  %v6033_v13 = vor.u32 %v6032_v58, %v6029_v50  ;;  %v5258_v17 = vshrl.u32 %v4979_v41, 16 }
 0x408   : > { %v6053_v35 = vor.u32 %v6052_v19, %v6049_v60  ;;  %v4784_v44 = vsel %vm12199_vm8, 0, %v4783_v62  ;;  %v6045_v26 = vor.u32 %v6044_v37, %v6041_v55  ;;  %v5247_v34 = vshrl.u32 %v12731_v0, 16  ;;  %v4786_v37 = vld [vmem:[#allocation2 + $0x100] sm:$0x8] }
 0x409   : > { %v5251_v5 = vrot.slane %v5249_v11, 1  ;;  %v5256_v1 = vrot.slane %v5254_v56, 1  ;;  %4785 = vst [vmem:[#allocation2 + $0xf0] sm:$0x8] %v4784_v44  ;;  %v12746_v31 = vsel %vm4793_vm9, %v6033_v13, %v6036_v53  ;;  %v12748_v12 = vrot.slane %v5254_v56, 4  ;;  %7011 = vmatmul.mubr.bf16.gmra.mrb[160].mxu0 %v12557_v57 }
 0x40a   : > { %13665 = vst [vmem:[#allocation18_spill] sm:$0xff] %v12746_v31  ;;  %v5264_v10 = vshll.u32 %v12739_v39, 16  ;;  %v12752_v43 = vsel %vm4793_vm9, %v6045_v26, %v6053_v35  ;;  %v5269_v9 = vshll.u32 %v4981_v2, 16  ;;  %v6080_v45 = vrot.slane %v5258_v17, 3  ;;  %7018 = vmatprep.mubr.bf16.mxu0 %v12594_v59 }
 0x40b   : > { %13666 = vst [vmem:[#allocation17_spill] sm:$0xff] %v12752_v43  ;;  %v5252_v46 = vor.u32 %v5251_v5, %v5247_v34  ;;  %v5260_v41 = vor.u32 %v5258_v17, %v5256_v1  ;;  %6592 = vmatprep.mubr.bf16.mxu1 %v12752_v43  ;;  %v5262_v50 = vshrl.u32 %v12739_v39, 16  ;;  %v5273_v60 = vshrl.u32 %v4981_v2, 16 }
 0x40c   : > { %v5266_v62 = vrot.slane %v5264_v10, 1  ;;  %v5271_v55 = vrot.slane %v5269_v9, 1  ;;  %v12762_v34 = vrot.slane %v5269_v9, 4 }
 0x40d   : > { %v5257_v19 = vsel %vm5020_vm12, %v5252_v46, %v5256_v1  ;;  %v6093_v58 = vshrl.u32 %v5260_v41, 16  ;;  %v6096_v53 = vshll.u32 %v5260_v41, 16  ;;  %v12759_v13 = vrot.slane %v5273_v60, 3 }
 0x40e   : > { %v6085_v11 = vshrl.u32 %v5257_v19, 16  ;;  %v6088_v56 = vshll.u32 %v5257_v19, 16  ;;  %v5267_v35 = vor.u32 %v5266_v62, %v5262_v50  ;;  %v5275_v26 = vor.u32 %v5273_v60, %v5271_v55  ;;  %v5003_v60 = vld [vmem:[#allocation2 + $0x18] sm:$0x1f] }
 0x40f   : > { %6593 = vmatmul.mubr.bf16.gmra.mrb[56].mxu1 %v12746_v31  ;;  %v6095_v17 = vrot.slane %v6093_v58, 3  ;;  %v6098_v44 = vrot.slane %v6096_v53, 4  ;;  %v4787_v46 = vsel %vm12199_vm8, 0, %v4786_v37 }
 0x410   : > { %v6087_v5 = vrot.slane %v6085_v11, 3  ;;  %v6090_v2 = vrot.slane %v6088_v56, 4  ;;  %v4978_v10 = vld [vmem:[#allocation2 + $0xf0] sm:$0xf8]  ;;  %v5272_v1 = vsel %vm5020_vm12, %v5267_v35, %v5271_v55  ;;  %4788 = vst [vmem:[#allocation2 + $0x100] sm:$0x8] %v4787_v46  ;;  %v6082_v11 = vor.u32 %v12748_v12, %v6080_v45 }
 0x411   : > { %v6099_v41 = vor.u32 %v6098_v44, %v6095_v17  ;;  %v6073_v19 = vshrl.u32 %v4978_v10, 16  ;;  %v6076_v50 = vshll.u32 %v4978_v10, 16  ;;  %v6227_v62 = vshrl.u32 %v5272_v1, 16  ;;  %7019 = vmatmul.mubr.bf16.gmra.mrb[164].mxu0 %v12590_v14  ;;  %v12775_v12 = vld [vmem:[#allocation2 + $0x40] sm:$0xf0] }
 0x412   : > { %v6091_v22 = vor.u32 %v6090_v2, %v6087_v5  ;;  %v6230_v59 = vshll.u32 %v5272_v1, 16  ;;  %v6235_v58 = vshrl.u32 %v5275_v26, 16  ;;  %v6238_v53 = vshll.u32 %v5275_v26, 16  ;;  %7026 = vmatprep.mubr.bf16.mxu0 %v12626_v8  ;;  %v10213_v5 = vld [vmem:[#allocation2 + $0x10] sm:$0xf0] }
 0x413   : > { %v6075_v9 = vrot.slane %v6073_v19, 3  ;;  %v6078_v57 = vrot.slane %v6076_v50, 4  ;;  %v6229_v56 = vrot.slane %v6227_v62, 3  ;;  %v5507_v44 = vshll.u32 %v12717_v32, 16  ;;  %v4807_v62 = vld [vmem:[#allocation2 + $0x48] sm:$0x10] }
 0x414   : > { %v12770_v55 = vsel %vm4793_vm9, %v6091_v22, %v6099_v41  ;;  %v6232_v37 = vrot.slane %v6230_v59, 4  ;;  %v6237_v35 = vrot.slane %v6235_v58, 3  ;;  %v6240_v17 = vrot.slane %v6238_v53, 4  ;;  %v4822_v45 = vld [vmem:[#allocation2 + $0x98] sm:$0x10] }
 0x415   : > { %13667 = vst [vmem:[#allocation19_spill] sm:$0xff] %v12770_v55  ;;  %6600 = vmatprep.mubr.bf16.mxu1 %v12770_v55  ;;  %v6079_v26 = vor.u32 %v6078_v57, %v6075_v9  ;;  %v5331_v2 = vrot.slane %v10213_v5, 1  ;;  %v5332_v10 = vrot.slane %v5003_v60, 1  ;;  %v6224_v59 = vor.u32 %v12762_v34, %v12759_v13  ;;  %v4804_v57 = vld [vmem:[#allocation2 + $0x38] sm:$0x10] }
 0x416   : > { %v6233_v1 = vor.u32 %v6232_v37, %v6229_v56  ;;  %v6241_v22 = vor.u32 %v6240_v17, %v6237_v35  ;;  %v5512_v56 = vshrl.u32 %v12697_v24, 16  ;;  %v4810_v13 = vld [vmem:[#allocation2 + $0x58] sm:$0x10]  ;;  %v4813_v34 = vld [vmem:[#allocation2 + $0x68] sm:$0x10]  ;;  %v12795_v61 = vrot.slane %v5507_v44, 4 }
 0x417   : > { %v12781_v46 = vsel %vm4793_vm9, %v6079_v26, %v6082_v11  ;;  %v5333_v41 = vsel %vm5327_vm13, %v5331_v2, %v5332_v10  ;;  %v5466_v19 = vshrl.u32 %v5332_v10, 16  ;;  %v5469_v50 = vshll.u32 %v5332_v10, 16  ;;  %v4980_v53 = vld [vmem:[#allocation2 + $0x100] sm:$0xf8]  ;;  %v4816_v26 = vld [vmem:[#allocation2 + $0x78] sm:$0x10] }
 0x418   : > { %6601 = vmatmul.mubr.bf16.gmra.mrb[60].mxu1 %v12781_v46  ;;  %v12786_v58 = vsel %vm4793_vm9, %v6233_v1, %v6241_v22  ;;  %v5458_v60 = vshrl.u32 %v5333_v41, 16  ;;  %v5461_v9 = vshll.u32 %v5333_v41, 16  ;;  %v6215_v11 = vshrl.u32 %v4980_v53, 16  ;;  %v4819_v41 = vld [vmem:[#allocation2 + $0x88] sm:$0x10] }
 0x419   : > { %13668 = vst [vmem:[#allocation20_spill] sm:$0xff] %v12786_v58  ;;  %6608 = vmatprep.mubr.bf16.mxu1 %v12786_v58  ;;  %v6218_v37 = vshll.u32 %v4980_v53, 16  ;;  %v5468_v35 = vrot.slane %v5466_v19, 3  ;;  %v5471_v17 = vrot.slane %v5469_v50, 4  ;;  %v13669_v10 = vshrl.u32 %v12717_v32, 16  ;;  %7027 = vmatmul.mubr.bf16.gmra.mrb[168].mxu0 %v12623_v18 }
 0x41a   : > { %v5460_v5 = vrot.slane %v5458_v60, 3  ;;  %v5463_v2 = vrot.slane %v5461_v9, 4  ;;  %v5515_v22 = vshll.u32 %v12697_v24, 16  ;;  %v6217_v8 = vrot.slane %v6215_v11, 3  ;;  %v4825_v50 = vld [vmem:[#allocation2 + $0xa8] sm:$0x10]  ;;  %7034 = vmatprep.mubr.bf16.mxu0 %v12651_v49 }
 0x41b   : > { %v12792_v1 = vrot.slane %v13669_v10, 3  ;;  %v6220_v14 = vrot.slane %v6218_v37, 4  ;;  %v4805_v19 = vsel %vm12226_vm11, 0, %v4804_v57  ;;  %v5472_v9 = vor.u32 %v5471_v17, %v5468_v35  ;;  %v4828_v32 = vld [vmem:[#allocation2 + $0xb8] sm:$0x10] }
 0x41c   : > { %v5464_v60 = vor.u32 %v5463_v2, %v5460_v5  ;;  %v12800_v58 = vrot.slane %v5512_v56, 3  ;;  %4806 = vst [vmem:[#allocation2 + $0x38] sm:$0x10] %v4805_v19  ;;  %v4808_v24 = vsel %vm12226_vm11, 0, %v4807_v62  ;;  %v4831_v11 = vld [vmem:[#allocation2 + $0xc8] sm:$0x10] }
 0x41d   : > { %v6221_v44 = vor.u32 %v6220_v14, %v6217_v8  ;;  %v5517_v37 = vrot.slane %v5515_v22, 4  ;;  %4809 = vst [vmem:[#allocation2 + $0x48] sm:$0x10] %v4808_v24  ;;  %v4811_v10 = vsel %vm12226_vm11, 0, %v4810_v13  ;;  %v4814_v57 = vsel %vm12226_vm11, 0, %v4813_v34 }
 0x41e   : > { %v4834_v35 = vld [vmem:[#allocation2 + $0xd8] sm:$0x10]  ;;  %v12809_v56 = vld [vmem:[#allocation2 + $0x60] sm:$0xf0]  ;;  %4812 = vst [vmem:[#allocation2 + $0x58] sm:$0x10] %v4811_v10  ;;  %v12823_v19 = vsel %vm4793_vm9, %v5464_v60, %v5472_v9 }
 0x41f   : > { %4815 = vst [vmem:[#allocation2 + $0x68] sm:$0x10] %v4814_v57  ;;  %v4817_v62 = vsel %vm12226_vm11, 0, %v4816_v26  ;;  %v4837_v5 = vld [vmem:[#allocation2 + $0xe8] sm:$0x10]  ;;  %v12815_v8 = vsel %vm4793_vm9, %v6221_v44, %v6224_v59  ;;  %v4820_v13 = vsel %vm12226_vm11, 0, %v4819_v41  ;;  %v5510_v26 = vor.u32 %v12795_v61, %v12792_v1 }
 0x420   : > { %v4840_v14 = vld [vmem:[#allocation2 + $0xf8] sm:$0x10]  ;;  %13671 = vst [vmem:[#allocation22_spill] sm:$0xff] %v12815_v8  ;;  %4818 = vst [vmem:[#allocation2 + $0x78] sm:$0x10] %v4817_v62  ;;  %v4823_v34 = vsel %vm12226_vm11, 0, %v4822_v45  ;;  %6609 = vmatmul.mubr.bf16.gmra.mrb[64].mxu1 %v12815_v8  ;;  %v5518_v45 = vor.u32 %v5517_v37, %v12800_v58 }
 0x421   : > { %v4843_v2 = vld [vmem:[#allocation2 + $0x108] sm:$0x10]  ;;  %4821 = vst [vmem:[#allocation2 + $0x88] sm:$0x10] %v4820_v13  ;;  %4824 = vst [vmem:[#allocation2 + $0x98] sm:$0x10] %v4823_v34  ;;  %9511 = vmatprep.mubr.bf16.mxu1 %v12823_v19  ;;  %7035 = vmatmul.mubr.bf16.gmra.mrb[172].mxu0 %v12646_v42 }
 0x422   : > { %v4795_v22 = vld [vmem:[#allocation2 + $0x8] sm:$0x10]  ;;  %v4826_v59 = vsel %vm12226_vm11, 0, %v4825_v50  ;;  %v4829_v41 = vsel %vm12226_vm11, 0, %v4828_v32  ;;  %v4832_v60 = vsel %vm12226_vm11, 0, %v4831_v11  ;;  %v4835_v61 = vsel %vm12226_vm11, 0, %v4834_v35  ;;  %7042 = vmatprep.mubr.bf16.mxu0 %v12679_v36 }
 0x423   : > { %4827 = vst [vmem:[#allocation2 + $0xa8] sm:$0x10] %v4826_v59  ;;  %4830 = vst [vmem:[#allocation2 + $0xb8] sm:$0x10] %v4829_v41  ;;  %v4838_v1 = vsel %vm12226_vm11, 0, %v4837_v5  ;;  %v4841_v24 = vsel %vm12226_vm11, 0, %v4840_v14  ;;  %v12858_v59 = vsel %vm4793_vm9, %v5510_v26, %v5518_v45 }
 0x424   : > { %v10216_v9 = vld [vmem:[#allocation2 + $0x30] sm:$0xf0]  ;;  %4833 = vst [vmem:[#allocation2 + $0xc8] sm:$0x10] %v4832_v60  ;;  %4836 = vst [vmem:[#allocation2 + $0xd8] sm:$0x10] %v4835_v61 }
 0x425   : > { %v5337_v50 = vrot.slane %v10216_v9, 1  ;;  %4839 = vst [vmem:[#allocation2 + $0xe8] sm:$0x10] %v4838_v1  ;;  %v4844_v58 = vsel %vm12226_vm11, 0, %v4843_v2  ;;  %v4796_v32 = vsel %vm12226_vm11, 0, %v4795_v22  ;;  %v13672_v26 = vrot.slane %v12775_v12, 1 }
 0x426   : > { %v12845_v11 = vld [vmem:[#allocation2 + $0x80] sm:$0xf0]  ;;  %v5005_v35 = vld [vmem:[#allocation2 + $0x38] sm:$0x1f]  ;;  %4842 = vst [vmem:[#allocation2 + $0xf8] sm:$0x10] %v4841_v24 }
 0x427   : > { %4845 = vst [vmem:[#allocation2 + $0x108] sm:$0x10] %v4844_v58  ;;  %4797 = vst [vmem:[#allocation2 + $0x8] sm:$0x10] %v4796_v32  ;;  %v5338_v5 = vrot.slane %v5005_v35, 1  ;;  %v10114_v32 = vld [vmem:[%s13540_s3 + $0x88] sm:$0xff]  }
 0x428   : > { %v5006_v14 = vld [vmem:[#allocation2 + $0x48] sm:$0x1f]  ;;  %v10218_v13 = vld [vmem:[#allocation2 + $0x50] sm:$0xf0]  ;;  %v5007_v60 = vld [vmem:[#allocation2 + $0x58] sm:$0x1f]  ;;  %9512 = vmatmul.mubr.bf16.vlgmr.msra.gmra.mrb[68].mxu1 %v12858_v59 }
 0x429   : > { %v5343_v34 = vrot.slane %v10218_v13, 1  ;;  %v12854_v2 = vld [vmem:[#allocation2 + $0x70] sm:$0xf0]  ;;  %v5341_v41 = vrot.slane %v5006_v14, 1  ;;  %v5339_v9 = vsel %vm5327_vm13, %v5337_v50, %v5338_v5  ;;  %v5558_v24 = vshrl.u32 %v5338_v5, 16  ;;  %9544 = vmatpush3.bf16.msra.mxu1 %v12684_v28  ;;  %7043 = vmatmul.mubr.bf16.gmra.mrb[176].mxu0 %v12676_v63 }
 0x42a   : > { %v5561_v58 = vshll.u32 %v5338_v5, 16  ;;  %v5344_v35 = vrot.slane %v5007_v60, 1  ;;  %v5550_v13 = vshrl.u32 %v5339_v9, 16  ;;  %v5553_v62 = vshll.u32 %v5339_v9, 16  ;;  %v5008_v60 = vld [vmem:[#allocation2 + $0x68] sm:$0x1f]  ;;  %9545 = vmatprep.subr.bf16.mxu1 %v10114_v32  ;;  %7050 = vmatprep.mubr.bf16.mxu0 %v12708_v48 }
 0x42b   : > { %v5342_v45 = vsel %vm5327_vm13, %v13672_v26, %v5341_v41  ;;  %v5604_v14 = vshrl.u32 %v5341_v41, 16  ;;  %v5560_v57 = vrot.slane %v5558_v24, 3  ;;  %v5607_v44 = vshll.u32 %v5341_v41, 16  ;;  %v10115_v24 = vld [vmem:[%s13540_s3 + $0x90] sm:$0xff]  }
 0x42c   : > { %v5563_v10 = vrot.slane %v5561_v58, 4  ;;  %v5596_v1 = vshrl.u32 %v5342_v45, 16  ;;  %v5599_v50 = vshll.u32 %v5342_v45, 16  ;;  %v5552_v37 = vrot.slane %v5550_v13, 3 }
 0x42d   : > { %v5555_v5 = vrot.slane %v5553_v62, 4  ;;  %v5606_v61 = vrot.slane %v5604_v14, 3  ;;  %v5345_v12 = vsel %vm5327_vm13, %v5343_v34, %v5344_v35  ;;  %v5609_v26 = vrot.slane %v5607_v44, 4  ;;  %9546 = vmatpush3.bf16.msra.mxu1 %v10114_v32 }
 0x42e   : > { %v5564_v22 = vor.u32 %v5563_v10, %v5560_v57  ;;  %v5598_v9 = vrot.slane %v5596_v1, 3  ;;  %v5601_v17 = vrot.slane %v5599_v50, 4  ;;  %v5642_v45 = vshrl.u32 %v5345_v12, 16  ;;  %v5009_v50 = vld [vmem:[#allocation2 + $0x78] sm:$0x1f]  ;;  %9547 = vmatprep.subr.bf16.mxu1 %v10115_v24 }
 0x42f   : > { %v5556_v58 = vor.u32 %v5555_v5, %v5552_v37  ;;  %v5645_v13 = vshll.u32 %v5345_v12, 16  ;;  %v5650_v62 = vshrl.u32 %v5344_v35, 16  ;;  %v5653_v41 = vshll.u32 %v5344_v35, 16  ;;  %v5010_v37 = vld [vmem:[#allocation2 + $0x88] sm:$0x1f] }
 0x430   : > { %v5602_v28 = vor.u32 %v5601_v17, %v5598_v9  ;;  %v5347_v14 = vrot.slane %v5008_v60, 1  ;;  %v5610_v57 = vor.u32 %v5609_v26, %v5606_v61  ;;  %v5644_v34 = vrot.slane %v5642_v45, 3  ;;  %v5011_v61 = vld [vmem:[#allocation2 + $0x98] sm:$0x1f] }
 0x431   : > { %v12878_v10 = vsel %vm4793_vm9, %v5556_v58, %v5564_v22  ;;  %v5647_v1 = vrot.slane %v5645_v13, 4  ;;  %v5652_v44 = vrot.slane %v5650_v62, 3  ;;  %v5655_v5 = vrot.slane %v5653_v41, 4  ;;  %v10116_v22 = vld [vmem:[%s13540_s3 + $0x98] sm:$0xff]   ;;  %9548 = vmatpush3.bf16.msra.mxu1 %v10115_v24  ;;  %7051 = vmatmul.mubr.bf16.gmra.mrb[180].mxu0 %v12703_v7 }
 0x432   : > { %9515 = vmatprep.mubr.bf16.mxu1 %v12878_v10  ;;  %v13673_v17 = vrot.slane %v12809_v56, 1  ;;  %v5696_v60 = vshrl.u32 %v5347_v14, 16  ;;  %v12888_v9 = vsel %vm4793_vm9, %v5602_v28, %v5610_v57  ;;  %v5699_v56 = vshll.u32 %v5347_v14, 16  ;;  %9549 = vmatprep.subr.bf16.mxu1 %v10116_v22 }
 0x433   : > { %v5648_v32 = vor.u32 %v5647_v1, %v5644_v34  ;;  %9516 = vmatmul.mubr.bf16.gmra.mrb[72].mxu1 %v12888_v9  ;;  %v5656_v26 = vor.u32 %v5655_v5, %v5652_v44  ;;  %v5350_v13 = vrot.slane %v5009_v50, 1  ;;  %v5356_v8 = vrot.slane %v5011_v61, 1  ;;  %7058 = vmatprep.mubr.bf16.mxu0 %v12734_v3 }
 0x434   : > { %v5348_v35 = vsel %vm5327_vm13, %v13673_v17, %v5347_v14  ;;  %v5698_v45 = vrot.slane %v5696_v60, 3  ;;  %v5353_v17 = vrot.slane %v5010_v37, 1  ;;  %v5701_v63 = vrot.slane %v5699_v56, 4  ;;  %v10117_v14 = vld [vmem:[%s13540_s3 + $0xa0] sm:$0xff]  }
 0x435   : > { %v5688_v12 = vshrl.u32 %v5348_v35, 16  ;;  %v5691_v58 = vshll.u32 %v5348_v35, 16  ;;  %v12892_v48 = vsel %vm4793_vm9, %v5648_v32, %v5656_v26  ;;  %v13674_v28 = vrot.slane %v12854_v2, 1  ;;  %9550 = vmatpush3.bf16.msra.mxu1 %v10116_v22 }
 0x436   : > { %v5742_v34 = vshrl.u32 %v5350_v13, 16  ;;  %9519 = vmatprep.mubr.bf16.mxu1 %v12892_v48  ;;  %v5745_v37 = vshll.u32 %v5350_v13, 16  ;;  %v5702_v44 = vor.u32 %v5701_v63, %v5698_v45  ;;  %v13675_v2 = vrot.slane %v12845_v11, 1  ;;  %v5012_v63 = vld [vmem:[#allocation2 + $0xa8] sm:$0x1f]  ;;  %9551 = vmatprep.subr.bf16.mxu1 %v10117_v14 }
 0x437   : > { %v5690_v62 = vrot.slane %v5688_v12, 3  ;;  %v5693_v41 = vrot.slane %v5691_v58, 4  ;;  %v5351_v57 = vsel %vm5327_vm13, %v13674_v28, %v5350_v13  ;;  %v5788_v60 = vshrl.u32 %v5353_v17, 16  ;;  %v10118_v11 = vld [vmem:[%s13540_s3 + $0xa8] sm:$0xff]  }
 0x438   : > { %v5734_v24 = vshrl.u32 %v5351_v57, 16  ;;  %v5737_v50 = vshll.u32 %v5351_v57, 16  ;;  %v5744_v5 = vrot.slane %v5742_v34, 3  ;;  %v5354_v35 = vsel %vm5327_vm13, %v13675_v2, %v5353_v17 }
 0x439   : > { %v5694_v1 = vor.u32 %v5693_v41, %v5690_v62  ;;  %v5747_v12 = vrot.slane %v5745_v37, 4  ;;  %v5780_v58 = vshrl.u32 %v5354_v35, 16  ;;  %v5783_v56 = vshll.u32 %v5354_v35, 16  ;;  %9552 = vmatpush3.bf16.msra.mxu1 %v10117_v14  ;;  %7059 = vmatmul.mubr.bf16.gmra.mrb[184].mxu0 %v12727_v33  ;;  %v5014_v14 = vld [vmem:[#allocation2 + $0xc8] sm:$0x1f] }
 0x43a   : > { %v5736_v61 = vrot.slane %v5734_v24, 3  ;;  %v5739_v32 = vrot.slane %v5737_v50, 4  ;;  %v5790_v13 = vrot.slane %v5788_v60, 3  ;;  %v5791_v62 = vshll.u32 %v5353_v17, 16  ;;  %9553 = vmatprep.subr.bf16.mxu1 %v10118_v11  ;;  %7066 = vmatprep.mubr.bf16.mxu0 %v12752_v43 }
 0x43b   : > { %v12907_v26 = vsel %vm4793_vm9, %v5694_v1, %v5702_v44  ;;  %v5748_v41 = vor.u32 %v5747_v12, %v5744_v5  ;;  %v5782_v28 = vrot.slane %v5780_v58, 3  ;;  %v13676_v57 = vrot.slane %v12569_v52, 1 }
 0x43c   : > { %v5740_v45 = vor.u32 %v5739_v32, %v5736_v61  ;;  %9520 = vmatmul.mubr.bf16.gmra.mrb[76].mxu1 %v12907_v26  ;;  %v5785_v22 = vrot.slane %v5783_v56, 4  ;;  %v5793_v1 = vrot.slane %v5791_v62, 4  ;;  %v5834_v37 = vshrl.u32 %v5356_v8, 16  ;;  %v5013_v61 = vld [vmem:[#allocation2 + $0xb8] sm:$0x1f]  ;;  %v10119_v32 = vld [vmem:[%s13540_s3 + $0xb0] sm:$0xff]  }
 0x43d   : > { %v5357_v34 = vsel %vm5327_vm13, %v13676_v57, %v5356_v8  ;;  %v5837_v44 = vshll.u32 %v5356_v8, 16  ;;  %v5359_v2 = vrot.slane %v5012_v63, 1  ;;  %v13677_v56 = vrot.slane %v12607_v23, 1  ;;  %9554 = vmatpush3.bf16.msra.mxu1 %v10118_v11 }
 0x43e   : > { %v5826_v24 = vshrl.u32 %v5357_v34, 16  ;;  %v5829_v50 = vshll.u32 %v5357_v34, 16  ;;  %v12917_v17 = vsel %vm4793_vm9, %v5740_v45, %v5748_v41  ;;  %v5786_v5 = vor.u32 %v5785_v22, %v5782_v28  ;;  %v5015_v41 = vld [vmem:[#allocation2 + $0xd8] sm:$0x1f]  ;;  %9555 = vmatprep.subr.bf16.mxu1 %v10119_v32 }
 0x43f   : > { %9523 = vmatprep.mubr.bf16.mxu1 %v12917_v17  ;;  %v5794_v35 = vor.u32 %v5793_v1, %v5790_v13  ;;  %v5836_v12 = vrot.slane %v5834_v37, 3  ;;  %v5839_v58 = vrot.slane %v5837_v44, 4  ;;  %v5360_v8 = vsel %vm5327_vm13, %v13677_v56, %v5359_v2  ;;  %v10120_v44 = vld [vmem:[%s13540_s3 + $0xb8] sm:$0xff]  }
 0x440   : > { %v5828_v52 = vrot.slane %v5826_v24, 3  ;;  %v5831_v60 = vrot.slane %v5829_v50, 4  ;;  %v5880_v62 = vshrl.u32 %v5359_v2, 16  ;;  %v5872_v13 = vshrl.u32 %v5360_v8, 16 }
 0x441   : > { %v5875_v45 = vshll.u32 %v5360_v8, 16  ;;  %v5367_v28 = vrot.slane %v12693_v27, 1  ;;  %v12930_v57 = vsel %vm4793_vm9, %v5786_v5, %v5794_v35  ;;  %v5840_v34 = vor.u32 %v5839_v58, %v5836_v12  ;;  %9556 = vmatpush3.bf16.msra.mxu1 %v10119_v32  ;;  %7067 = vmatmul.mubr.bf16.gmra.mrb[188].mxu0 %v12746_v31 }
 0x442   : > { %v5832_v63 = vor.u32 %v5831_v60, %v5828_v52  ;;  %v5883_v22 = vshll.u32 %v5359_v2, 16  ;;  %v5362_v23 = vrot.slane %v5013_v61, 1  ;;  %v5874_v1 = vrot.slane %v5872_v13, 3  ;;  %9557 = vmatprep.subr.bf16.mxu1 %v10120_v44  ;;  %7074 = vmatprep.mubr.bf16.mxu0 %v12770_v55 }
 0x443   : > { %v5877_v24 = vrot.slane %v5875_v45, 4  ;;  %v5882_v50 = vrot.slane %v5880_v62, 3  ;;  %v5365_v37 = vrot.slane %v5014_v14, 1  ;;  %v13678_v60 = vrot.slane %v12629_v54, 1 }
 0x444   : > { %v5885_v52 = vrot.slane %v5883_v22, 4  ;;  %v5926_v5 = vshrl.u32 %v5362_v23, 16  ;;  %v5368_v35 = vrot.slane %v5015_v41, 1  ;;  %9524 = vmatmul.mubr.bf16.gmra.mrb[80].mxu1 %v12930_v57  ;;  %v12940_v11 = vsel %vm4793_vm9, %v5832_v63, %v5840_v34  ;;  %v10121_v63 = vld [vmem:[%s13540_s3 + $0x1c0] sm:$0xff]  }
 0x445   : > { %v5363_v27 = vsel %vm5327_vm13, %v13678_v60, %v5362_v23  ;;  %v5929_v12 = vshll.u32 %v5362_v23, 16  ;;  %9527 = vmatprep.mubr.bf16.mxu1 %v12940_v11  ;;  %v13679_v56 = vrot.slane %v12663_v21, 1  ;;  %v5972_v54 = vshrl.u32 %v5365_v37, 16  ;;  %v5016_v21 = vld [vmem:[#allocation2 + $0xe8] sm:$0x1f]  ;;  %9558 = vmatpush3.bf16.msra.mxu1 %v10120_v44 }
 0x446   : > { %v5918_v2 = vshrl.u32 %v5363_v27, 16  ;;  %v5921_v61 = vshll.u32 %v5363_v27, 16  ;;  %v5928_v58 = vrot.slane %v5926_v5, 3  ;;  %v5373_v62 = vrot.slane %v12731_v0, 1  ;;  %9339 = vmatprep.subr.bf16.mxu1 %v10121_v63 }
 0x447   : > { %v5366_v8 = vsel %vm5327_vm13, %v13679_v56, %v5365_v37  ;;  %v5931_v45 = vrot.slane %v5929_v12, 4  ;;  %v5878_v34 = vor.u32 %v5877_v24, %v5874_v1  ;;  %v5886_v22 = vor.u32 %v5885_v52, %v5882_v50 }
 0x448   : > { %v5920_v14 = vrot.slane %v5918_v2, 3  ;;  %v5923_v13 = vrot.slane %v5921_v61, 4  ;;  %v5964_v41 = vshrl.u32 %v5366_v8, 16  ;;  %v5967_v23 = vshll.u32 %v5366_v8, 16  ;;  %v5017_v8 = vld [vmem:[#allocation2 + $0xf8] sm:$0x1f] }
 0x449   : > { %v5975_v60 = vshll.u32 %v5365_v37, 16  ;;  %v5932_v5 = vor.u32 %v5931_v45, %v5928_v58  ;;  %v5974_v0 = vrot.slane %v5972_v54, 3  ;;  %v5369_v32 = vsel %vm5327_vm13, %v5367_v28, %v5368_v35  ;;  %v5018_v45 = vld [vmem:[#allocation2 + $0x108] sm:$0x1f]  ;;  %7075 = vmatmul.mubr.bf16.gmra.mrb[192].mxu0 %v12781_v46 }
 0x44a   : > { %v5924_v27 = vor.u32 %v5923_v13, %v5920_v14  ;;  %v5966_v2 = vrot.slane %v5964_v41, 3  ;;  %v5969_v61 = vrot.slane %v5967_v23, 4  ;;  %v6010_v12 = vshrl.u32 %v5369_v32, 16  ;;  %v10220_v23 = vld [vmem:[#allocation2] sm:$0xf0] }
 0x44b   : > { %v6013_v56 = vshll.u32 %v5369_v32, 16  ;;  %v5977_v43 = vrot.slane %v5975_v60, 4  ;;  %v6018_v1 = vshrl.u32 %v5368_v35, 16  ;;  %v6021_v24 = vshll.u32 %v5368_v35, 16 }
 0x44c   : > { %v5371_v50 = vrot.slane %v5016_v21, 1  ;;  %v12954_v37 = vsel %vm4793_vm9, %v5878_v34, %v5886_v22  ;;  %v12957_v52 = vsel %vm4793_vm9, %v5924_v27, %v5932_v5  ;;  %v6012_v58 = vrot.slane %v6010_v12, 3  ;;  %v5002_v22 = vld [vmem:[#allocation2 + $0x8] sm:$0x1f] }
 0x44d   : > { %v6015_v28 = vrot.slane %v6013_v56, 4  ;;  %9528 = vmatmul.mubr.bf16.gmra.mrb[84].mxu1 %v12954_v37  ;;  %v6020_v54 = vrot.slane %v6018_v1, 3  ;;  %v6023_v14 = vrot.slane %v6021_v24, 4  ;;  %v13680_v44 = vrot.slane %v12705_v47, 1 }
 0x44e   : > { %v6064_v35 = vshrl.u32 %v5371_v50, 16  ;;  %9531 = vmatprep.mubr.bf16.mxu1 %v12957_v52  ;;  %v5970_v41 = vor.u32 %v5969_v61, %v5966_v2  ;;  %v5328_v60 = vrot.slane %v10220_v23, 1  ;;  %v5978_v21 = vor.u32 %v5977_v43, %v5974_v0 }
 0x44f   : > { %v5372_v13 = vsel %vm5327_vm13, %v13680_v44, %v5371_v50  ;;  %v6016_v27 = vor.u32 %v6015_v28, %v6012_v58  ;;  %v6067_v5 = vshll.u32 %v5371_v50, 16  ;;  %v5374_v32 = vrot.slane %v5017_v8, 1 }
 0x450   : > { %v6056_v63 = vshrl.u32 %v5372_v13, 16  ;;  %v6059_v34 = vshll.u32 %v5372_v13, 16  ;;  %v6024_v12 = vor.u32 %v6023_v14, %v6020_v54  ;;  %v6066_v1 = vrot.slane %v6064_v35, 3 }
 0x451   : > { %v5377_v47 = vrot.slane %v5018_v45, 1  ;;  %v5375_v44 = vsel %vm5327_vm13, %v5373_v62, %v5374_v32  ;;  %v6110_v55 = vshrl.u32 %v5374_v32, 16  ;;  %v5329_v2 = vrot.slane %v5002_v22, 1 }
 0x452   : > { %v6058_v56 = vrot.slane %v6056_v63, 3  ;;  %v6061_v24 = vrot.slane %v6059_v34, 4  ;;  %v6069_v61 = vrot.slane %v6067_v5, 4  ;;  %v6102_v13 = vshrl.u32 %v5375_v44, 16 }
 0x453   : > { %v6105_v31 = vshll.u32 %v5375_v44, 16  ;;  %v6113_v33 = vshll.u32 %v5374_v32, 16  ;;  %v12967_v43 = vsel %vm4793_vm9, %v5970_v41, %v5978_v21  ;;  %v12970_v0 = vsel %vm4793_vm9, %v6016_v27, %v6024_v12 }
 0x454   : > { %v13681_v50 = vrot.slane %v12739_v39, 1  ;;  %v6104_v28 = vrot.slane %v6102_v13, 3  ;;  %v6112_v8 = vrot.slane %v6110_v55, 3  ;;  %v6062_v14 = vor.u32 %v6061_v24, %v6058_v56 }
 0x455   : > { %9532 = vmatmul.mubr.bf16.gmra.mrb[88].mxu1 %v12967_v43  ;;  %v6107_v62 = vrot.slane %v6105_v31, 4  ;;  %v6115_v54 = vrot.slane %v6113_v33, 4  ;;  %v6070_v35 = vor.u32 %v6069_v61, %v6066_v1  ;;  %v5330_v45 = vsel %vm5327_vm13, %v5328_v60, %v5329_v2 }
 0x456   : > { %v5378_v58 = vsel %vm5327_vm13, %v13681_v50, %v5377_v47  ;;  %9535 = vmatprep.mubr.bf16.mxu1 %v12970_v0  ;;  %v6252_v63 = vshrl.u32 %v5377_v47, 16  ;;  %v5412_v34 = vshrl.u32 %v5330_v45, 16  ;;  %v5415_v22 = vshll.u32 %v5330_v45, 16 }
 0x457   : > { %v6244_v41 = vshrl.u32 %v5378_v58, 16  ;;  %v6247_v23 = vshll.u32 %v5378_v58, 16  ;;  %v6255_v39 = vshll.u32 %v5377_v47, 16  ;;  %v5420_v21 = vshrl.u32 %v5329_v2, 16 }
 0x458   : > { %v5423_v27 = vshll.u32 %v5329_v2, 16  ;;  %v6108_v5 = vor.u32 %v6107_v62, %v6104_v28  ;;  %v6116_v32 = vor.u32 %v6115_v54, %v6112_v8  ;;  %v12979_v31 = vsel %vm4793_vm9, %v6062_v14, %v6070_v35  ;;  %v10122_v35 = vld [vmem:[%s13540_s3 + $0x180] sm:$0xff]  }
 0x459   : > { %v5414_v33 = vrot.slane %v5412_v34, 3  ;;  %v5417_v55 = vrot.slane %v5415_v22, 4  ;;  %v5422_v12 = vrot.slane %v5420_v21, 3  ;;  %v6246_v1 = vrot.slane %v6244_v41, 3  ;;  %v10123_v41 = vld [vmem:[%s13540_s3 + $0x1c8] sm:$0xff]   ;;  %v10125_v22 = vld [vmem:[%s13540_s3 + $0x1d0] sm:$0xff]  }
 0x45a   : > { %v5425_v56 = vrot.slane %v5423_v27, 4  ;;  %v6249_v24 = vrot.slane %v6247_v23, 4  ;;  %v6254_v60 = vrot.slane %v6252_v63, 3  ;;  %v6257_v44 = vrot.slane %v6255_v39, 4  ;;  %v10124_v34 = vld [vmem:[%s13540_s3 + $0x188] sm:$0xff]   ;;  %v10126_v39 = vld [vmem:[%s13540_s3 + $0x190] sm:$0xff]  }
 0x45b   : > { %v12983_v61 = vsel %vm4793_vm9, %v6108_v5, %v6116_v32  ;;  %v5418_v47 = vor.u32 %v5417_v55, %v5414_v33  ;;  %v10128_v55 = vld [vmem:[%s13540_s3 + $0x198] sm:$0xff]  }
 0x45c   : > { %v5426_v2 = vor.u32 %v5425_v56, %v5422_v12  ;;  %v6250_v13 = vor.u32 %v6249_v24, %v6246_v1  ;;  %v6258_v50 = vor.u32 %v6257_v44, %v6254_v60  ;;  %v10129_v12 = vld [vmem:[%s13540_s3 + $0x1e0] sm:$0xff]   ;;  %v10131_v1 = vld [vmem:[%s13540_s3 + $0x1e8] sm:$0xff]  }
 0x45d   : > { %9536 = vmatmul.mubr.bf16.gmra.mrb[92].mxu1 %v12979_v31  ;;  %v10130_v56 = vld [vmem:[%s13540_s3 + $0x1a0] sm:$0xff]   ;;  %v10132_v44 = vld [vmem:[%s13540_s3 + $0x1a8] sm:$0xff]  }
 0x45e   : > { %9539 = vmatprep.mubr.bf16.mxu1 %v12983_v61  ;;  %v5427_v58 = vsel %vm4793_vm9, %v5418_v47, %v5426_v2  ;;  %v12988_v28 = vsel %vm4793_vm9, %v6250_v13, %v6258_v50  ;;  %v10133_v13 = vld [vmem:[%s13540_s3 + $0x1f0] sm:$0xff]  }
 0x461   : > { %v9083_v62 = vpop.f32.mrb[104].mxu0 }
 0x462   : > { %v9084_v8 = vpop.f32.mrb[105].mxu0 }
 0x463   : > { %v12991_v54 = vadd.f32 %v9084_v8, %v9083_v62  ;;  %v9086_v14 = vpop.f32.mrb[106].mxu0  ;;  %v10134_v62 = vld [vmem:[%s13540_s3 + $0x1b0] sm:$0xff]   ;;  %v10135_v8 = vld [vmem:[%s13540_s3 + $0x1f8] sm:$0xff]  }
 0x464   : > { %v9087_v45 = vpop.f32.mrb[107].mxu0 }
 0x465   : > { %9540 = vmatmul.mubr.bf16.gmra.mrb[96].mxu1 %v12988_v28  ;;  %v12999_v63 = vadd.f32 %v9087_v45, %v9086_v14  ;;  %v10136_v14 = vld [vmem:[%s13540_s3 + $0x1b8] sm:$0xff]   ;;  %v10137_v45 = vld [vmem:[%s13540_s3 + $0x200] sm:$0xff]  }
 0x466   : > { %9559 = vmatprep.mubr.bf16.mxu1 %v5427_v58 }
 0x46b   : > { %v9089_v23 = vpop.f32.mrb[108].mxu0 }
 0x46c   : > { %v9090_v21 = vpop.f32.mrb[109].mxu0 }
 0x46d   : > { %9560 = vmatmul.mubr.bf16.vlgmr.msra.gmra.mrb[68].mxu1 %v12823_v19  ;;  %v10127_v19 = vld [vmem:[%s13540_s3 + $0x1d8] sm:$0xff]   ;;  %v13015_v27 = vadd.f32 %v9090_v21, %v9089_v23  ;;  %v9092_v5 = vpop.f32.mrb[110].mxu0 }
 0x46e   : > { %9563 = vmatprep.mubr.bf16.mxu1 %v12858_v59  ;;  %9340 = vmatpush3.bf16.msra.mxu1 %v10122_v35  ;;  %v9093_v32 = vpop.f32.mrb[111].mxu0 }
 0x46f   : > { %9341 = vmatprep.subr.bf16.mxu1 %v10123_v41  ;;  %v13018_v33 = vadd.f32 %v9093_v32, %v9092_v5 }
 0x472   : > { %9342 = vmatpush3.bf16.msra.mxu1 %v10124_v34 }
 0x473   : > { %9343 = vmatprep.subr.bf16.mxu1 %v10125_v22 }
 0x475   : > { %9564 = vmatmul.mubr.bf16.gmra.mrb[72].mxu1 %v12878_v10  ;;  %v9095_v24 = vpop.f32.mrb[112].mxu0 }
 0x476   : > { %9567 = vmatprep.mubr.bf16.mxu1 %v12888_v9  ;;  %9344 = vmatpush3.bf16.msra.mxu1 %v10126_v39  ;;  %v9096_v60 = vpop.f32.mrb[113].mxu0 }
 0x477   : > { %9345 = vmatprep.subr.bf16.mxu1 %v10127_v19  ;;  %v13038_v47 = vadd.f32 %v9096_v60, %v9095_v24  ;;  %v9098_v2 = vpop.f32.mrb[114].mxu0 }
 0x478   : > { %v9099_v50 = vpop.f32.mrb[115].mxu0 }
 0x479   : > { %v13043_v58 = vadd.f32 %v9099_v50, %v9098_v2 }
 0x47a   : > { %9346 = vmatpush3.bf16.msra.mxu1 %v10128_v55 }
 0x47b   : > { %9347 = vmatprep.subr.bf16.mxu1 %v10129_v12 }
 0x47d   : > { %9568 = vmatmul.mubr.bf16.gmra.mrb[76].mxu1 %v12892_v48 }
 0x47e   : > { %9571 = vmatprep.mubr.bf16.mxu1 %v12907_v26  ;;  %9348 = vmatpush3.bf16.msra.mxu1 %v10130_v56 }
 0x47f   : > { %9349 = vmatprep.subr.bf16.mxu1 %v10131_v1 }
 0x480   : > { %v9101_v35 = vpop.f32.mrb[116].mxu0 }
 0x481   : > { %v9102_v41 = vpop.f32.mrb[117].mxu0 }
 0x482   : > { %9350 = vmatpush3.bf16.msra.mxu1 %v10132_v44  ;;  %v13059_v34 = vadd.f32 %v9102_v41, %v9101_v35  ;;  %v9104_v22 = vpop.f32.mrb[118].mxu0 }
 0x483   : > { %9351 = vmatprep.subr.bf16.mxu1 %v10133_v13  ;;  %v9105_v23 = vpop.f32.mrb[119].mxu0  ;;  %v4789_v13 = vld [vmem:[#allocation2 + $0x110] sm:$0x8] }
 0x484   : > { %v13061_v39 = vadd.f32 %v9105_v23, %v9104_v22  ;;  %v4790_v50 = vsel %vm12199_vm8, 0, %v4789_v13 }
 0x485   : > { %9572 = vmatmul.mubr.bf16.gmra.mrb[80].mxu1 %v12917_v17  ;;  %4791 = vst [vmem:[#allocation2 + $0x110] sm:$0x8] %v4790_v50 }
 0x486   : > { %9575 = vmatprep.mubr.bf16.mxu1 %v12930_v57  ;;  %9352 = vmatpush3.bf16.msra.mxu1 %v10134_v62 }
 0x487   : > { %9353 = vmatprep.subr.bf16.mxu1 %v10135_v8 }
 0x489   : > { %v9107_v21 = vpop.f32.mrb[120].mxu0 }
 0x48a   : > { %9354 = vmatpush3.bf16.msra.mxu1 %v10136_v14  ;;  %v9108_v19 = vpop.f32.mrb[121].mxu0 }
 0x48b   : > { %9591 = vmatprep.subr.bf16.mxu1 %v10137_v45  ;;  %v13065_v5 = vadd.f32 %v9108_v19, %v9107_v21  ;;  %v9110_v32 = vpop.f32.mrb[122].mxu0  ;;  %v10138_v21 = vld [vmem:[%s13540_s3 + $0x208] sm:$0xff]  }
 0x48c   : > { %v9111_v55 = vpop.f32.mrb[123].mxu0 }
 0x48d   : > { %9576 = vmatmul.mubr.bf16.gmra.mrb[84].mxu1 %v12940_v11  ;;  %v13067_v12 = vadd.f32 %v9111_v55, %v9110_v32 }
 0x48e   : > { %9579 = vmatprep.mubr.bf16.mxu1 %v12954_v37 }
 0x493   : > { %v9113_v56 = vpop.f32.mrb[124].mxu0 }
 0x494   : > { %v9114_v1 = vpop.f32.mrb[125].mxu0 }
 0x495   : > { %9580 = vmatmul.mubr.bf16.gmra.mrb[88].mxu1 %v12957_v52  ;;  %v13071_v24 = vadd.f32 %v9114_v1, %v9113_v56  ;;  %v9116_v60 = vpop.f32.mrb[126].mxu0 }
 0x496   : > { %9583 = vmatprep.mubr.bf16.mxu1 %v12967_v43  ;;  %v9117_v44 = vpop.f32.mrb[127].mxu0 }
 0x497   : > { %v13075_v2 = vadd.f32 %v9117_v44, %v9116_v60  ;;  %v10139_v44 = vld [vmem:[%s13540_s3 + $0x210] sm:$0xff]  }
 0x49c   : > { %v9119_v62 = vpop.f32.mrb[128].mxu0 }
 0x49d   : > { %9584 = vmatmul.mubr.bf16.gmra.mrb[92].mxu1 %v12970_v0  ;;  %v9120_v8 = vpop.f32.mrb[129].mxu0 }
 0x49e   : > { %9587 = vmatprep.mubr.bf16.mxu1 %v12979_v31  ;;  %v13080_v14 = vadd.f32 %v9120_v8, %v9119_v62  ;;  %v9122_v35 = vpop.f32.mrb[130].mxu0 }
 0x49f   : > { %v9123_v41 = vpop.f32.mrb[131].mxu0 }
 0x4a0   : > { %v13083_v22 = vadd.f32 %v9123_v41, %v9122_v35 }
 0x4a4   : > { %v9219_v23 = vpop.f32.mrb[132].mxu0 }
 0x4a5   : > { %9588 = vmatmul.mubr.bf16.gmra.mrb[96].mxu1 %v12983_v61  ;;  %v9220_v15 = vpop.f32.mrb[133].mxu0 }
 0x4a6   : > { %7518 = vmatprep.mubr.bf16.mxu1 %v12448_v20  ;;  %v9221_v19 = vadd.f32 %v9220_v15, %v9219_v23  ;;  %v9222_v32 = vpop.f32.mrb[134].mxu0 }
 0x4a7   : > { %v9223_v56 = vpop.f32.mrb[135].mxu0 }
 0x4a8   : > { %v9125_v55 = vpop.f32.mrb[32].mxu1  ;;  %v13091_v20 = vadd.f32 %v9221_v19, %v12991_v54  ;;  %v9224_v60 = vadd.f32 %v9223_v56, %v9222_v32  ;;  %v10140_v54 = vld [vmem:[%s13540_s3 + $0x218] sm:$0xff]  }
 0x4a9   : > { %v9126_v1 = vpop.f32.mrb[33].mxu1 }
 0x4aa   : > { %v13096_v13 = vadd.f32 %v9126_v1, %v9125_v55  ;;  %v13099_v62 = vadd.f32 %v9224_v60, %v12999_v63 }
 0x4ad   : > { %7519 = vmatmul.mubr.bf16.vlgmr.msra.gmra.mrb[100].mxu1 %v12453_v25  ;;  %v9128_v25 = vpop.f32.mrb[34].mxu1 }
 0x4ae   : > { %7526 = vmatprep.mubr.bf16.mxu1 %v12487_v38  ;;  %9592 = vmatpush3.bf16.msra.mxu1 %v10137_v45  ;;  %v9129_v50 = vpop.f32.mrb[35].mxu1  ;;  %v9225_v45 = vpop.f32.mrb[136].mxu0 }
 0x4af   : > { %9593 = vmatprep.subr.bf16.mxu1 %v10138_v21  ;;  %v13101_v38 = vadd.f32 %v9129_v50, %v9128_v25  ;;  %v9226_v8 = vpop.f32.mrb[137].mxu0 }
 0x4b0   : > { %v9227_v35 = vadd.f32 %v9226_v8, %v9225_v45  ;;  %v9228_v41 = vpop.f32.mrb[138].mxu0  ;;  %v10143_v8 = vld [vmem:[%s13540_s3 + $0x230] sm:$0xff]  }
 0x4b1   : > { %v9229_v23 = vpop.f32.mrb[139].mxu0 }
 0x4b2   : > { %9594 = vmatpush3.bf16.msra.mxu1 %v10138_v21  ;;  %v13109_v63 = vadd.f32 %v9227_v35, %v13015_v27  ;;  %v9230_v15 = vadd.f32 %v9229_v23, %v9228_v41  ;;  %v10141_v21 = vld [vmem:[%s13540_s3 + $0x220] sm:$0xff]   ;;  %v10144_v23 = vld [vmem:[%s13540_s3 + $0x238] sm:$0xff]  }
 0x4b3   : > { %9595 = vmatprep.subr.bf16.mxu1 %v10139_v44 }
 0x4b4   : > { %v13115_v19 = vadd.f32 %v9230_v15, %v13018_v33  ;;  %v9131_v32 = vpop.f32.mrb[36].mxu1  ;;  %v9231_v55 = vpop.f32.mrb[140].mxu0 }
 0x4b5   : > { %7527 = vmatmul.mubr.bf16.gmra.mrb[104].mxu1 %v12479_v40  ;;  %v9132_v40 = vpop.f32.mrb[37].mxu1  ;;  %v9232_v1 = vpop.f32.mrb[141].mxu0 }
 0x4b6   : > { %7534 = vmatprep.mubr.bf16.mxu1 %v12514_v29  ;;  %9596 = vmatpush3.bf16.msra.mxu1 %v10139_v44  ;;  %v10142_v29 = vld [vmem:[%s13540_s3 + $0x228] sm:$0xff]   ;;  %v13120_v27 = vadd.f32 %v9132_v40, %v9131_v32  ;;  %v9134_v56 = vpop.f32.mrb[38].mxu1  ;;  %v9233_v44 = vadd.f32 %v9232_v1, %v9231_v55  ;;  %v9234_v25 = vpop.f32.mrb[142].mxu0 }
 0x4b7   : > { %9597 = vmatprep.subr.bf16.mxu1 %v10140_v54  ;;  %v9135_v60 = vpop.f32.mrb[39].mxu1  ;;  %v9235_v50 = vpop.f32.mrb[143].mxu0 }
 0x4b8   : > { %v13124_v33 = vadd.f32 %v9135_v60, %v9134_v56  ;;  %v13127_v45 = vadd.f32 %v9233_v44, %v13038_v47 }
 0x4ba   : > { %9598 = vmatpush3.bf16.msra.mxu1 %v10140_v54  ;;  %v9236_v54 = vadd.f32 %v9235_v50, %v9234_v25 }
 0x4bb   : > { %9599 = vmatprep.subr.bf16.mxu1 %v10141_v21 }
 0x4bc   : > { %v9137_v35 = vpop.f32.mrb[40].mxu1 }
 0x4bd   : > { %7535 = vmatmul.mubr.bf16.gmra.mrb[108].mxu1 %v12518_v4  ;;  %v13133_v4 = vadd.f32 %v9236_v54, %v13043_v58  ;;  %v9138_v41 = vpop.f32.mrb[41].mxu1 }
 0x4be   : > { %7542 = vmatprep.mubr.bf16.mxu1 %v12530_v16  ;;  %9600 = vmatpush3.bf16.msra.mxu1 %v10141_v21  ;;  %v9237_v16 = vpop.f32.mrb[144].mxu0  ;;  %v13138_v47 = vadd.f32 %v9138_v41, %v9137_v35  ;;  %v9140_v15 = vpop.f32.mrb[42].mxu1  ;;  %v13682_v35 = vld [vmem:[#allocation10_spill] sm:$0xff] }
 0x4bf   : > { %9601 = vmatprep.subr.bf16.mxu1 %v10142_v29  ;;  %v9238_v21 = vpop.f32.mrb[145].mxu0  ;;  %v9141_v32 = vpop.f32.mrb[43].mxu1 }
 0x4c0   : > { %v9239_v40 = vadd.f32 %v9238_v21, %v9237_v16  ;;  %v9240_v55 = vpop.f32.mrb[146].mxu0  ;;  %v13142_v58 = vadd.f32 %v9141_v32, %v9140_v15 }
 0x4c2   : > { %9602 = vmatpush3.bf16.msra.mxu1 %v10142_v29  ;;  %v9241_v29 = vpop.f32.mrb[147].mxu0  ;;  %v13145_v56 = vadd.f32 %v9239_v40, %v13059_v34  ;;  %v13683_v40 = vld [vmem:[#allocation7_spill] sm:$0xff] }
 0x4c3   : > { %9603 = vmatprep.subr.bf16.mxu1 %v10143_v8  ;;  %v9242_v1 = vadd.f32 %v9241_v29, %v9240_v55 }
 0x4c4   : > { %v9243_v44 = vpop.f32.mrb[148].mxu0 }
 0x4c5   : > { %7543 = vmatmul.mubr.bf16.gmra.mrb[112].mxu1 %v12527_v6  ;;  %v13148_v60 = vadd.f32 %v9242_v1, %v13061_v39  ;;  %v9244_v25 = vpop.f32.mrb[149].mxu0 }
 0x4c6   : > { %7550 = vmatprep.mubr.bf16.mxu1 %v12545_v51  ;;  %9604 = vmatpush3.bf16.msra.mxu1 %v10143_v8  ;;  %v9143_v6 = vpop.f32.mrb[44].mxu1  ;;  %v9245_v51 = vadd.f32 %v9244_v25, %v9243_v44  ;;  %v9246_v54 = vpop.f32.mrb[150].mxu0  ;;  %v13684_v44 = vld [vmem:[#allocation12_spill] sm:$0xff] }
 0x4c7   : > { %9605 = vmatprep.subr.bf16.mxu1 %v10144_v23  ;;  %v9144_v50 = vpop.f32.mrb[45].mxu1  ;;  %v9247_v41 = vpop.f32.mrb[151].mxu0 }
 0x4c8   : > { %v13152_v8 = vadd.f32 %v9144_v50, %v9143_v6  ;;  %v9146_v34 = vpop.f32.mrb[46].mxu1  ;;  %v13155_v15 = vadd.f32 %v9245_v51, %v13065_v5  ;;  %v9248_v39 = vadd.f32 %v9247_v41, %v9246_v54 }
 0x4c9   : > { %v9147_v16 = vpop.f32.mrb[47].mxu1 }
 0x4ca   : > { %9606 = vmatpush3.bf16.msra.mxu1 %v10144_v23  ;;  %v13157_v23 = vadd.f32 %v9147_v16, %v9146_v34  ;;  %v13160_v21 = vadd.f32 %v9248_v39, %v13067_v12  ;;  %v13685_v39 = vld [vmem:[#allocation11_spill] sm:$0xff] }
 0x4cd   : > { %7551 = vmatmul.mubr.bf16.gmra.mrb[116].mxu1 %v12540_v30  ;;  %v9249_v30 = vpop.f32.mrb[152].mxu0 }
 0x4ce   : > { %7558 = vmatprep.mubr.bf16.mxu1 %v13682_v35  ;;  %v9250_v32 = vpop.f32.mrb[153].mxu0 }
 0x4cf   : > { %v9149_v55 = vpop.f32.mrb[48].mxu1  ;;  %v9251_v29 = vadd.f32 %v9250_v32, %v9249_v30  ;;  %v9252_v1 = vpop.f32.mrb[154].mxu0 }
 0x4d0   : > { %v9150_v6 = vpop.f32.mrb[49].mxu1  ;;  %v9253_v25 = vpop.f32.mrb[155].mxu0 }
 0x4d1   : > { %v13164_v50 = vadd.f32 %v9150_v6, %v9149_v55  ;;  %v9152_v5 = vpop.f32.mrb[50].mxu1  ;;  %v13167_v51 = vadd.f32 %v9251_v29, %v13071_v24  ;;  %v9254_v54 = vadd.f32 %v9253_v25, %v9252_v1 }
 0x4d2   : > { %v9153_v12 = vpop.f32.mrb[51].mxu1 }
 0x4d3   : > { %v13169_v35 = vadd.f32 %v9153_v12, %v9152_v5  ;;  %v13172_v34 = vadd.f32 %v9254_v54, %v13075_v2 }
 0x4d4   : > { %v9255_v41 = vpop.f32.mrb[156].mxu0 }
 0x4d5   : > { %7559 = vmatmul.mubr.bf16.gmra.mrb[120].mxu1 %v13683_v40  ;;  %v9256_v16 = vpop.f32.mrb[157].mxu0  ;;  %v13686_v40 = vld [vmem:[#allocation13_spill] sm:$0xff] }
 0x4d6   : > { %7566 = vmatprep.mubr.bf16.mxu1 %v13684_v44  ;;  %v9257_v30 = vadd.f32 %v9256_v16, %v9255_v41  ;;  %v9258_v32 = vpop.f32.mrb[158].mxu0  ;;  %v4846_v44 = vld [vmem:[#allocation2 + $0x118] sm:$0x10] }
 0x4d7   : > { %v9259_v55 = vpop.f32.mrb[159].mxu0  ;;  %v4847_v1 = vsel %vm12226_vm11, 0, %v4846_v44 }
 0x4d8   : > { %v13177_v24 = vadd.f32 %v9257_v30, %v13080_v14  ;;  %v9260_v29 = vadd.f32 %v9259_v55, %v9258_v32  ;;  %4848 = vst [vmem:[#allocation2 + $0x118] sm:$0x10] %v4847_v1 }
 0x4da   : > { %v9155_v6 = vpop.f32.mrb[52].mxu1  ;;  %v13184_v54 = vadd.f32 %v9260_v29, %v13083_v22 }
 0x4db   : > { %v9156_v2 = vpop.f32.mrb[53].mxu1 }
 0x4dc   : > { %v13181_v25 = vadd.f32 %v9156_v2, %v9155_v6  ;;  %v9158_v5 = vpop.f32.mrb[54].mxu1  ;;  %v9261_v16 = vpop.f32.mrb[160].mxu0 }
 0x4dd   : > { %7567 = vmatmul.mubr.bf16.gmra.mrb[124].mxu1 %v13685_v39  ;;  %v9159_v12 = vpop.f32.mrb[55].mxu1  ;;  %v9262_v39 = vpop.f32.mrb[161].mxu0 }
 0x4de   : > { %7574 = vmatprep.mubr.bf16.mxu1 %v13686_v40  ;;  %v13186_v41 = vadd.f32 %v9159_v12, %v9158_v5  ;;  %v9263_v14 = vadd.f32 %v9262_v39, %v9261_v16  ;;  %v9264_v30 = vpop.f32.mrb[162].mxu0 }
 0x4df   : > { %v9265_v53 = vpop.f32.mrb[163].mxu0 }
 0x4e0   : > { %v13191_v40 = vadd.f32 %v9263_v14, %v13096_v13  ;;  %v9266_v55 = vadd.f32 %v9265_v53, %v9264_v30 }
 0x4e2   : > { %v9161_v32 = vpop.f32.mrb[56].mxu1  ;;  %v13196_v29 = vadd.f32 %v9266_v55, %v13101_v38 }
 0x4e3   : > { %v9162_v44 = vpop.f32.mrb[57].mxu1 }
 0x4e4   : > { %v13193_v22 = vadd.f32 %v9162_v44, %v9161_v32  ;;  %v9164_v6 = vpop.f32.mrb[58].mxu1 }
 0x4e5   : > { %7575 = vmatmul.mubr.bf16.gmra.mrb[128].mxu1 %v12623_v18  ;;  %v9165_v1 = vpop.f32.mrb[59].mxu1  ;;  %v9267_v18 = vpop.f32.mrb[164].mxu0 }
 0x4e6   : > { %7582 = vmatprep.mubr.bf16.mxu1 %v12651_v49  ;;  %v13198_v2 = vadd.f32 %v9165_v1, %v9164_v6  ;;  %v9268_v5 = vpop.f32.mrb[165].mxu0  ;;  %v13689_v1 = vld [vmem:[#allocation14_spill] sm:$0xff] }
 0x4e7   : > { %v9269_v49 = vadd.f32 %v9268_v5, %v9267_v18  ;;  %v9270_v12 = vpop.f32.mrb[166].mxu0 }
 0x4e8   : > { %v9271_v13 = vpop.f32.mrb[167].mxu0 }
 0x4e9   : > { %v13203_v16 = vadd.f32 %v9269_v49, %v13120_v27  ;;  %v9272_v39 = vadd.f32 %v9271_v13, %v9270_v12  ;;  %v13690_v27 = vld [vmem:[#allocation15_spill] sm:$0xff] }
 0x4eb   : > { %13687 = vst [vmem:[#allocation21_spill] sm:$0xff] %v13203_v16  ;;  %v9167_v14 = vpop.f32.mrb[60].mxu1  ;;  %v13206_v38 = vadd.f32 %v9272_v39, %v13124_v33 }
 0x4ec   : > { %v9168_v30 = vpop.f32.mrb[61].mxu1  ;;  %v9273_v44 = vpop.f32.mrb[168].mxu0 }
 0x4ed   : > { %7583 = vmatmul.mubr.bf16.gmra.mrb[132].mxu1 %v12646_v42  ;;  %13688 = vst [vmem:[#allocation23_spill] sm:$0xff] %v13206_v38  ;;  %v13208_v53 = vadd.f32 %v9168_v30, %v9167_v14  ;;  %v9170_v32 = vpop.f32.mrb[62].mxu1  ;;  %v9274_v6 = vpop.f32.mrb[169].mxu0 }
 0x4ee   : > { %7590 = vmatprep.mubr.bf16.mxu1 %v12679_v36  ;;  %v9171_v55 = vpop.f32.mrb[63].mxu1  ;;  %v9275_v36 = vadd.f32 %v9274_v6, %v9273_v44  ;;  %v9276_v18 = vpop.f32.mrb[170].mxu0 }
 0x4ef   : > { %v13210_v42 = vadd.f32 %v9171_v55, %v9170_v32  ;;  %v9277_v5 = vpop.f32.mrb[171].mxu0 }
 0x4f0   : > { %v13215_v49 = vadd.f32 %v9275_v36, %v13138_v47  ;;  %v9278_v33 = vadd.f32 %v9277_v5, %v9276_v18  ;;  %v13225_v47 = vld [vmem:[#allocation2 + $0x110] sm:$0xf0]  ;;  %v4983_v5 = vld [vmem:[#allocation2 + $0x118] sm:$0xf] }
 0x4f2   : > { %13691 = vst [vmem:[#allocation3_spill] sm:$0xff] %v13215_v49  ;;  %v13218_v39 = vadd.f32 %v9278_v33, %v13142_v58  ;;  %v5279_v33 = vshll.u32 %v13225_v47, 16  ;;  %v13696_v49 = vld [vmem:[#allocation17_spill] sm:$0xff] }
 0x4f3   : > { %v9173_v12 = vpop.f32.mrb[64].mxu1 }
 0x4f4   : > { %v9174_v13 = vpop.f32.mrb[65].mxu1  ;;  %13692 = vst [vmem:[#allocation8_spill] sm:$0xff] %v13218_v39  ;;  %v9279_v55 = vpop.f32.mrb[172].mxu0 }
 0x4f5   : > { %7591 = vmatmul.mubr.bf16.gmra.mrb[136].mxu1 %v13689_v1  ;;  %v13220_v14 = vadd.f32 %v9174_v13, %v9173_v12  ;;  %v9176_v30 = vpop.f32.mrb[66].mxu1  ;;  %v9280_v44 = vpop.f32.mrb[173].mxu0  ;;  %v5284_v13 = vshll.u32 %v4983_v5, 16 }
 0x4f6   : > { %7598 = vmatprep.mubr.bf16.mxu1 %v13690_v27  ;;  %v9177_v32 = vpop.f32.mrb[67].mxu1  ;;  %v9281_v6 = vadd.f32 %v9280_v44, %v9279_v55  ;;  %v9282_v27 = vpop.f32.mrb[174].mxu0  ;;  %v5281_v55 = vrot.slane %v5279_v33, 1  ;;  %v13695_v44 = vld [vmem:[#allocation16_spill] sm:$0xff] }
 0x4f7   : > { %v13222_v1 = vadd.f32 %v9177_v32, %v9176_v30  ;;  %v9283_v36 = vpop.f32.mrb[175].mxu0  ;;  %v5277_v32 = vshrl.u32 %v13225_v47, 16 }
 0x4f8   : > { %v13229_v58 = vadd.f32 %v9281_v6, %v13152_v8  ;;  %v9284_v18 = vadd.f32 %v9283_v36, %v9282_v27  ;;  %v5286_v6 = vrot.slane %v5284_v13, 1  ;;  %v5288_v27 = vshrl.u32 %v4983_v5, 16 }
 0x4fa   : > { %13693 = vst [vmem:[#allocation4_spill] sm:$0xff] %v13229_v58  ;;  %v13233_v12 = vadd.f32 %v9284_v18, %v13157_v23  ;;  %v5282_v18 = vor.u32 %v5281_v55, %v5277_v32  ;;  %v5290_v58 = vor.u32 %v5288_v27, %v5286_v6 }
 0x4fc   : > { %13694 = vst [vmem:[#allocation5_spill] sm:$0xff] %v13233_v12  ;;  %v9285_v30 = vpop.f32.mrb[176].mxu0  ;;  %v7265_v32 = vshrl.u32 %v5290_v58, 16  ;;  %v7268_v55 = vshll.u32 %v5290_v58, 16 }
 0x4fd   : > { %7599 = vmatmul.mubr.bf16.gmra.mrb[140].mxu1 %v12703_v7  ;;  %v9286_v7 = vpop.f32.mrb[177].mxu0 }
 0x4fe   : > { %7606 = vmatprep.mubr.bf16.mxu1 %v12734_v3  ;;  %v9287_v3 = vadd.f32 %v9286_v7, %v9285_v30  ;;  %v9288_v39 = vpop.f32.mrb[178].mxu0  ;;  %v13699_v30 = vld [vmem:[#allocation18_spill] sm:$0xff] }
 0x4ff   : > { %v9289_v8 = vpop.f32.mrb[179].mxu0 }
 0x500   : > { %v13239_v36 = vadd.f32 %v9287_v3, %v13164_v50  ;;  %v9290_v23 = vadd.f32 %v9289_v8, %v9288_v39  ;;  %v13700_v50 = vld [vmem:[#allocation19_spill] sm:$0xff] }
 0x502   : > { %13697 = vst [vmem:[#allocation24_spill] sm:$0xff] %v13239_v36  ;;  %v13242_v12 = vadd.f32 %v9290_v23, %v13169_v35 }
 0x504   : > { %13698 = vst [vmem:[#allocation25_spill] sm:$0xff] %v13242_v12  ;;  %v9291_v38 = vpop.f32.mrb[180].mxu0  ;;  %v7270_v12 = vrot.slane %v7268_v55, 4  ;;  %v7252_v55 = vrot.slane %v5288_v27, 3 }
 0x505   : > { %7607 = vmatmul.mubr.bf16.gmra.mrb[144].mxu1 %v13695_v44  ;;  %v9292_v33 = vpop.f32.mrb[181].mxu0  ;;  %v5287_v44 = vsel %vm5020_vm12, %v5282_v18, %v5286_v6  ;;  %v7267_v18 = vrot.slane %v7265_v32, 3 }
 0x506   : > { %7614 = vmatprep.mubr.bf16.mxu1 %v13696_v49  ;;  %v10145_v49 = vld [vmem:[%s13542_s5] sm:$0xff]   ;;  %v9293_v5 = vadd.f32 %v9292_v33, %v9291_v38  ;;  %v9294_v7 = vpop.f32.mrb[182].mxu0  ;;  %v7257_v8 = vshrl.u32 %v5287_v44, 16  ;;  %v7260_v6 = vshll.u32 %v5287_v44, 16 }
 0x507   : > { %v9295_v39 = vpop.f32.mrb[183].mxu0  ;;  %9639 = vmatprep.subr.bf16.mxu0 %v10145_v49  ;;  %v7271_v32 = vor.u32 %v7270_v12, %v7267_v18 }
 0x508   : > { %v13251_v35 = vadd.f32 %v9293_v5, %v13181_v25  ;;  %v9296_v3 = vadd.f32 %v9295_v39, %v9294_v7  ;;  %9640 = vmatpush3.bf16.msra.mxu0 %v10145_v49  ;;  %v7259_v38 = vrot.slane %v7257_v8, 3  ;;  %v7262_v33 = vrot.slane %v7260_v6, 4  ;;  %v13703_v25 = vld [vmem:[#allocation20_spill] sm:$0xff] }
 0x509   : > { %v7253_v8 = vrot.slane %v5284_v13, 4 }
 0x50a   : > { %13701 = vst [vmem:[#allocation26_spill] sm:$0xff] %v13251_v35  ;;  %v13254_v23 = vadd.f32 %v9296_v3, %v13186_v41  ;;  %v7263_v39 = vor.u32 %v7262_v33, %v7259_v38 }
 0x50c   : > { %13702 = vst [vmem:[#allocation6_spill] sm:$0xff] %v13254_v23  ;;  %v13704_v23 = vld [vmem:[#allocation22_spill] sm:$0xff] }
 0x50d   : > { %7615 = vmatmul.mubr.bf16.gmra.mrb[148].mxu1 %v13699_v30  ;;  %v9297_v30 = vpop.f32.mrb[184].mxu0 }
 0x50e   : > { %7622 = vmatprep.mubr.bf16.mxu1 %v13700_v50  ;;  %v4982_v50 = vld [vmem:[#allocation2 + $0x110] sm:$0xf8]  ;;  %v9298_v36 = vpop.f32.mrb[185].mxu0 }
 0x50f   : > { %v9299_v58 = vadd.f32 %v9298_v36, %v9297_v30  ;;  %v9300_v16 = vpop.f32.mrb[186].mxu0  ;;  %v7245_v7 = vshrl.u32 %v4982_v50, 16  ;;  %v7248_v44 = vshll.u32 %v4982_v50, 16  ;;  %v7272_v36 = vsel %vm4793_vm9, %v7263_v39, %v7271_v32 }
 0x510   : > { %v9301_v5 = vpop.f32.mrb[187].mxu0 }
 0x511   : > { %v13259_v49 = vadd.f32 %v9299_v58, %v13193_v22  ;;  %v9302_v41 = vadd.f32 %v9301_v5, %v9300_v16  ;;  %v7247_v6 = vrot.slane %v7245_v7, 3  ;;  %v7254_v16 = vor.u32 %v7253_v8, %v7252_v55 }
 0x513   : > { %v13262_v3 = vadd.f32 %v9302_v41, %v13198_v2 }
 0x514   : > { %v9303_v30 = vpop.f32.mrb[188].mxu0 }
 0x515   : > { %7623 = vmatmul.mubr.bf16.gmra.mrb[152].mxu1 %v12781_v46  ;;  %v7250_v46 = vrot.slane %v7248_v44, 4 }
 0x516   : > { %7630 = vmatprep.mubr.bf16.mxu1 %v13703_v25  ;;  %v9304_v25 = vpop.f32.mrb[189].mxu0 }
 0x517   : > { %v9305_v50 = vadd.f32 %v9304_v25, %v9303_v30  ;;  %v9306_v35 = vpop.f32.mrb[190].mxu0  ;;  %v7251_v22 = vor.u32 %v7250_v46, %v7247_v6 }
 0x518   : > { %v9307_v38 = vpop.f32.mrb[191].mxu0 }
 0x519   : > { %v13267_v12 = vadd.f32 %v9305_v50, %v13208_v53  ;;  %v9308_v2 = vadd.f32 %v9307_v38, %v9306_v35  ;;  %v7255_v27 = vsel %vm4793_vm9, %v7251_v22, %v7254_v16 }
 0x51b   : > { %v13270_v13 = vadd.f32 %v9308_v2, %v13210_v42  ;;  %v10146_v42 = vld [vmem:[%s13542_s5 + $0x8] sm:$0xff]  }
 0x51c   : > { %v9309_v18 = vpop.f32.mrb[192].mxu0  ;;  %9641 = vmatprep.subr.bf16.mxu0 %v10146_v42 }
 0x51d   : > { %7631 = vmatmul.mubr.bf16.gmra.mrb[156].mxu1 %v13704_v23  ;;  %v9310_v33 = vpop.f32.mrb[193].mxu0  ;;  %9642 = vmatpush3.bf16.msra.mxu0 %v10146_v42 }
 0x51e   : > { %7638 = vmatprep.mubr.bf16.mxu1 %v7272_v36  ;;  %v9311_v58 = vadd.f32 %v9310_v33, %v9309_v18  ;;  %v9312_v23 = vpop.f32.mrb[194].mxu0 }
 0x51f   : > { %v9313_v5 = vpop.f32.mrb[195].mxu0 }
 0x520   : > { %v13275_v7 = vadd.f32 %v9311_v58, %v13220_v14  ;;  %v9314_v44 = vadd.f32 %v9313_v5, %v9312_v23 }
 0x522   : > { %v13278_v53 = vadd.f32 %v9314_v44, %v13222_v1 }
 0x525   : > { %7639 = vmatmul.mubr.bf16.gmra.mrb[160].mxu1 %v7255_v27 }
 0x526   : > { %9607 = vmatprep.mubr.bf16.mxu1 %v12858_v59  ;;  %v5019_v59 = vld [vmem:[#allocation2 + $0x118] sm:$0x1f] }
 0x52d   : > { %9608 = vmatmul.mubr.bf16.vlgmr.msra.gmra.mrb[68].mxu1 %v12878_v10  ;;  %v10147_v10 = vld [vmem:[%s13542_s5 + $0x10] sm:$0xff]  }
 0x52e   : > { %9611 = vmatprep.mubr.bf16.mxu1 %v12888_v9  ;;  %9643 = vmatprep.subr.bf16.mxu0 %v10147_v10  ;;  %v5380_v9 = vrot.slane %v5019_v59, 1 }
 0x52f   : > { %9644 = vmatpush3.bf16.msra.mxu0 %v10147_v10 }
 0x535   : > { %9612 = vmatmul.mubr.bf16.gmra.mrb[72].mxu1 %v12892_v48  ;;  %v5379_v48 = vrot.slane %v13225_v47, 1 }
 0x536   : > { %9615 = vmatprep.mubr.bf16.mxu1 %v12907_v26 }
 0x537   : > { %v5381_v26 = vsel %vm5327_vm13, %v5379_v48, %v5380_v9 }
 0x53d   : > { %9616 = vmatmul.mubr.bf16.gmra.mrb[76].mxu1 %v12917_v17  ;;  %v7274_v17 = vshrl.u32 %v5381_v26, 16 }
 0x53e   : > { %9619 = vmatprep.mubr.bf16.mxu1 %v12930_v57  ;;  %v7277_v57 = vshll.u32 %v5381_v26, 16 }
 0x53f   : > { %v7276_v14 = vrot.slane %v7274_v17, 3 }
 0x540   : > { %v7279_v1 = vrot.slane %v7277_v57, 4 }
 0x545   : > { %9620 = vmatmul.mubr.bf16.gmra.mrb[80].mxu1 %v12940_v11  ;;  %v7282_v11 = vshrl.u32 %v5380_v9, 16 }
 0x546   : > { %9623 = vmatprep.mubr.bf16.mxu1 %v12954_v37  ;;  %v7285_v37 = vshll.u32 %v5380_v9, 16 }
 0x548   : > { %v7287_v35 = vrot.slane %v7285_v37, 4 }
 0x54d   : > { %9624 = vmatmul.mubr.bf16.gmra.mrb[84].mxu1 %v12957_v52  ;;  %v7284_v52 = vrot.slane %v7282_v11, 3 }
 0x54e   : > { %9627 = vmatprep.mubr.bf16.mxu1 %v12967_v43  ;;  %v7280_v43 = vor.u32 %v7279_v1, %v7276_v14 }
 0x54f   : > { %v7288_v47 = vor.u32 %v7287_v35, %v7284_v52 }
 0x551   : > { %v7289_v41 = vsel %vm4793_vm9, %v7280_v43, %v7288_v47 }
 0x555   : > { %9628 = vmatmul.mubr.bf16.gmra.mrb[88].mxu1 %v12970_v0  ;;  %v10148_v0 = vld [vmem:[%s13542_s5 + $0x18] sm:$0xff]  }
 0x556   : > { %9631 = vmatprep.mubr.bf16.mxu1 %v12979_v31  ;;  %9645 = vmatprep.subr.bf16.mxu0 %v10148_v0 }
 0x557   : > { %9646 = vmatpush3.bf16.msra.mxu0 %v10148_v0 }
 0x55d   : > { %9632 = vmatmul.mubr.bf16.gmra.mrb[92].mxu1 %v12983_v61 }
 0x55e   : > { %9635 = vmatprep.mubr.bf16.mxu1 %v12988_v28 }
 0x565   : > { %9636 = vmatmul.mubr.bf16.gmra.mrb[96].mxu1 %v7289_v41 }
 0x580   : > { %v9355_v31 = vpop.f32.mrb[100].mxu1 }
 0x581   : > { %v9356_v39 = vpop.f32.mrb[101].mxu1 }
 0x582   : > { %v9357_v32 = vadd.f32 %v9356_v39, %v9355_v31  ;;  %v9358_v55 = vpop.f32.mrb[102].mxu1 }
 0x583   : > { %v9359_v8 = vpop.f32.mrb[103].mxu1 }
 0x584   : > { %v9360_v6 = vadd.f32 %v9359_v8, %v9358_v55  ;;  %v13307_v61 = vadd.f32 %v13091_v20, %v9357_v32 }
 0x586   : > { %v13310_v28 = vadd.f32 %v13099_v62, %v9360_v6 }
 0x588   : > { %v9361_v46 = vpop.f32.mrb[104].mxu1 }
 0x589   : > { %v9362_v36 = vpop.f32.mrb[105].mxu1 }
 0x58a   : > { %v9363_v30 = vadd.f32 %v9362_v36, %v9361_v46  ;;  %v9364_v25 = vpop.f32.mrb[106].mxu1 }
 0x58b   : > { %v9365_v50 = vpop.f32.mrb[107].mxu1 }
 0x58c   : > { %v9366_v22 = vadd.f32 %v9365_v50, %v9364_v25  ;;  %v13313_v16 = vadd.f32 %v13109_v63, %v9363_v30 }
 0x58e   : > { %v13316_v38 = vadd.f32 %v13115_v19, %v9366_v22 }
 0x590   : > { %v9367_v2 = vpop.f32.mrb[108].mxu1 }
 0x591   : > { %v9368_v27 = vpop.f32.mrb[109].mxu1 }
 0x592   : > { %v9369_v18 = vadd.f32 %v9368_v27, %v9367_v2  ;;  %v9370_v20 = vpop.f32.mrb[110].mxu1 }
 0x593   : > { %v9371_v33 = vpop.f32.mrb[111].mxu1 }
 0x594   : > { %v9372_v58 = vadd.f32 %v9371_v33, %v9370_v20  ;;  %v13319_v62 = vadd.f32 %v13127_v45, %v9369_v18  ;;  %v13706_v33 = vld [vmem:[#allocation23_spill] sm:$0xff] }
 0x596   : > { %v13322_v23 = vadd.f32 %v13133_v4, %v9372_v58 }
 0x598   : > { %v9373_v5 = vpop.f32.mrb[112].mxu1 }
 0x599   : > { %v9374_v44 = vpop.f32.mrb[113].mxu1 }
 0x59a   : > { %v9375_v42 = vadd.f32 %v9374_v44, %v9373_v5  ;;  %v9376_v63 = vpop.f32.mrb[114].mxu1 }
 0x59b   : > { %v9377_v59 = vpop.f32.mrb[115].mxu1 }
 0x59c   : > { %v9378_v10 = vadd.f32 %v9377_v59, %v9376_v63  ;;  %v13325_v19 = vadd.f32 %v13145_v56, %v9375_v42 }
 0x59e   : > { %v13328_v48 = vadd.f32 %v13148_v60, %v9378_v10 }
 0x5a0   : > { %v9379_v9 = vpop.f32.mrb[116].mxu1 }
 0x5a1   : > { %v9380_v26 = vpop.f32.mrb[117].mxu1 }
 0x5a2   : > { %v9381_v17 = vadd.f32 %v9380_v26, %v9379_v9  ;;  %v9382_v45 = vpop.f32.mrb[118].mxu1  ;;  %v13708_v9 = vld [vmem:[#allocation8_spill] sm:$0xff] }
 0x5a3   : > { %v9383_v57 = vpop.f32.mrb[119].mxu1 }
 0x5a4   : > { %v9384_v11 = vadd.f32 %v9383_v57, %v9382_v45  ;;  %v13331_v4 = vadd.f32 %v13155_v15, %v9381_v17 }
 0x5a6   : > { %v13334_v37 = vadd.f32 %v13160_v21, %v9384_v11 }
 0x5a8   : > { %v9385_v14 = vpop.f32.mrb[120].mxu1 }
 0x5a9   : > { %v9386_v1 = vpop.f32.mrb[121].mxu1 }
 0x5aa   : > { %v9387_v52 = vadd.f32 %v9386_v1, %v9385_v14  ;;  %v9388_v56 = vpop.f32.mrb[122].mxu1 }
 0x5ab   : > { %v9389_v35 = vpop.f32.mrb[123].mxu1 }
 0x5ac   : > { %v9390_v43 = vadd.f32 %v9389_v35, %v9388_v56  ;;  %v13337_v60 = vadd.f32 %v13167_v51, %v9387_v52  ;;  %v13709_v52 = vld [vmem:[#allocation4_spill] sm:$0xff]  ;;  %v13710_v35 = vld [vmem:[#allocation5_spill] sm:$0xff] }
 0x5ae   : > { %v13340_v47 = vadd.f32 %v13172_v34, %v9390_v43 }
 0x5b0   : > { %v9391_v41 = vpop.f32.mrb[124].mxu1 }
 0x5b1   : > { %v9392_v0 = vpop.f32.mrb[125].mxu1 }
 0x5b2   : > { %v9393_v31 = vadd.f32 %v9392_v0, %v9391_v41  ;;  %v9394_v15 = vpop.f32.mrb[126].mxu1 }
 0x5b3   : > { %v9395_v39 = vpop.f32.mrb[127].mxu1 }
 0x5b4   : > { %v9396_v32 = vadd.f32 %v9395_v39, %v9394_v15  ;;  %v13343_v21 = vadd.f32 %v13177_v24, %v9393_v31 }
 0x5b6   : > { %v13346_v55 = vadd.f32 %v13184_v54, %v9396_v32  ;;  %v13705_v54 = vld [vmem:[#allocation21_spill] sm:$0xff] }
 0x5b8   : > { %v9397_v8 = vpop.f32.mrb[128].mxu1 }
 0x5b9   : > { %v9398_v6 = vpop.f32.mrb[129].mxu1 }
 0x5ba   : > { %v9399_v46 = vadd.f32 %v9398_v6, %v9397_v8  ;;  %v9400_v51 = vpop.f32.mrb[130].mxu1  ;;  %v13711_v8 = vld [vmem:[#allocation24_spill] sm:$0xff] }
 0x5bb   : > { %v9401_v36 = vpop.f32.mrb[131].mxu1 }
 0x5bc   : > { %v9402_v30 = vadd.f32 %v9401_v36, %v9400_v51  ;;  %v13349_v34 = vadd.f32 %v13191_v40, %v9399_v46  ;;  %v13712_v46 = vld [vmem:[#allocation25_spill] sm:$0xff] }
 0x5be   : > { %v13352_v25 = vadd.f32 %v13196_v29, %v9402_v30  ;;  %v13707_v29 = vld [vmem:[#allocation3_spill] sm:$0xff] }
 0x5c0   : > { %v9403_v50 = vpop.f32.mrb[132].mxu1 }
 0x5c1   : > { %v9404_v22 = vpop.f32.mrb[133].mxu1 }
 0x5c2   : > { %v9405_v2 = vadd.f32 %v9404_v22, %v9403_v50  ;;  %v9406_v24 = vpop.f32.mrb[134].mxu1 }
 0x5c3   : > { %v9407_v27 = vpop.f32.mrb[135].mxu1 }
 0x5c4   : > { %v9408_v18 = vadd.f32 %v9407_v27, %v9406_v24  ;;  %v13355_v20 = vadd.f32 %v13705_v54, %v9405_v2  ;;  %v13713_v27 = vld [vmem:[#allocation26_spill] sm:$0xff] }
 0x5c5   : > { %v13714_v54 = vld [vmem:[#allocation6_spill] sm:$0xff] }
 0x5c6   : > { %v13358_v58 = vadd.f32 %v13706_v33, %v9408_v18 }
 0x5c8   : > { %v9409_v5 = vpop.f32.mrb[136].mxu1 }
 0x5c9   : > { %v9410_v44 = vpop.f32.mrb[137].mxu1 }
 0x5ca   : > { %v9411_v42 = vadd.f32 %v9410_v44, %v9409_v5  ;;  %v9412_v40 = vpop.f32.mrb[138].mxu1 }
 0x5cb   : > { %v9413_v63 = vpop.f32.mrb[139].mxu1 }
 0x5cc   : > { %v9414_v59 = vadd.f32 %v9413_v63, %v9412_v40  ;;  %v13361_v10 = vadd.f32 %v13707_v29, %v9411_v42 }
 0x5ce   : > { %v13364_v26 = vadd.f32 %v13708_v9, %v9414_v59 }
 0x5d0   : > { %v9415_v17 = vpop.f32.mrb[140].mxu1 }
 0x5d1   : > { %v9416_v45 = vpop.f32.mrb[141].mxu1 }
 0x5d2   : > { %v9417_v57 = vadd.f32 %v9416_v45, %v9415_v17  ;;  %v9418_v11 = vpop.f32.mrb[142].mxu1 }
 0x5d3   : > { %v9419_v14 = vpop.f32.mrb[143].mxu1 }
 0x5d4   : > { %v9420_v1 = vadd.f32 %v9419_v14, %v9418_v11  ;;  %v13367_v56 = vadd.f32 %v13709_v52, %v9417_v57 }
 0x5d6   : > { %v13370_v43 = vadd.f32 %v13710_v35, %v9420_v1 }
 0x5d8   : > { %v9421_v41 = vpop.f32.mrb[144].mxu1 }
 0x5d9   : > { %v9422_v0 = vpop.f32.mrb[145].mxu1 }
 0x5da   : > { %v9423_v31 = vadd.f32 %v9422_v0, %v9421_v41  ;;  %v9424_v15 = vpop.f32.mrb[146].mxu1 }
 0x5db   : > { %v9425_v39 = vpop.f32.mrb[147].mxu1 }
 0x5dc   : > { %v9426_v32 = vadd.f32 %v9425_v39, %v9424_v15  ;;  %v13373_v6 = vadd.f32 %v13711_v8, %v9423_v31 }
 0x5de   : > { %v13376_v51 = vadd.f32 %v13712_v46, %v9426_v32 }
 0x5e0   : > { %v9427_v36 = vpop.f32.mrb[148].mxu1 }
 0x5e1   : > { %v9428_v30 = vpop.f32.mrb[149].mxu1 }
 0x5e2   : > { %v9429_v50 = vadd.f32 %v9428_v30, %v9427_v36  ;;  %v9430_v22 = vpop.f32.mrb[150].mxu1 }
 0x5e3   : > { %v9431_v2 = vpop.f32.mrb[151].mxu1 }
 0x5e4   : > { %v9432_v24 = vadd.f32 %v9431_v2, %v9430_v22  ;;  %v13379_v18 = vadd.f32 %v13713_v27, %v9429_v50 }
 0x5e6   : > { %v13382_v33 = vadd.f32 %v13714_v54, %v9432_v24 }
 0x5e8   : > { %v9433_v5 = vpop.f32.mrb[152].mxu1 }
 0x5e9   : > { %v9434_v44 = vpop.f32.mrb[153].mxu1 }
 0x5ea   : > { %v9435_v42 = vadd.f32 %v9434_v44, %v9433_v5  ;;  %v9436_v40 = vpop.f32.mrb[154].mxu1 }
 0x5eb   : > { %v9437_v63 = vpop.f32.mrb[155].mxu1 }
 0x5ec   : > { %v9438_v59 = vadd.f32 %v9437_v63, %v9436_v40  ;;  %v13385_v29 = vadd.f32 %v13259_v49, %v9435_v42 }
 0x5ee   : > { %v13388_v9 = vadd.f32 %v13262_v3, %v9438_v59 }
 0x5f0   : > { %v9439_v17 = vpop.f32.mrb[156].mxu1 }
 0x5f1   : > { %v9440_v45 = vpop.f32.mrb[157].mxu1 }
 0x5f2   : > { %v9441_v57 = vadd.f32 %v9440_v45, %v9439_v17  ;;  %v9442_v11 = vpop.f32.mrb[158].mxu1 }
 0x5f3   : > { %v9443_v14 = vpop.f32.mrb[159].mxu1 }
 0x5f4   : > { %v9444_v1 = vadd.f32 %v9443_v14, %v9442_v11  ;;  %v13391_v52 = vadd.f32 %v13267_v12, %v9441_v57  ;;  %v13405_v12 = vld [vmem:[%s13541_s4] ss:$0 sm:$0xff] }
 0x5f6   : > { %v13394_v35 = vadd.f32 %v13270_v13, %v9444_v1 }
 0x5f8   : > { %v9445_v41 = vpop.f32.mrb[160].mxu1 }
 0x5f9   : > { %v9446_v0 = vpop.f32.mrb[161].mxu1 }
 0x5fa   : > { %v9447_v31 = vadd.f32 %v9446_v0, %v9445_v41  ;;  %v9448_v49 = vpop.f32.mrb[162].mxu1 }
 0x5fb   : > { %v9449_v15 = vpop.f32.mrb[163].mxu1 }
 0x5fc   : > { %v9450_v39 = vadd.f32 %v9449_v15, %v9448_v49  ;;  %v13397_v3 = vadd.f32 %v13275_v7, %v9447_v31 }
 0x5fe   : > { %v13400_v32 = vadd.f32 %v13278_v53, %v9450_v39 }
 0x600   : > { %v9609_v8 = vpop.f32.mrb[68].mxu1 }
 0x601   : > { %v9697_v13 = vadd.f32 %v13313_v16, %v9609_v8  ;;  %v7681_v46 = vpop.f32.mrb[69].mxu1 }
 0x602   : > { %v9700_v36 = vadd.f32 %v13307_v61, %v7681_v46  ;;  %v9610_v30 = vpop.f32.mrb[70].mxu1 }
 0x603   : > { %v7849_v50 = vadd.f32 %v9697_v13, %v13405_v12  ;;  %v9703_v7 = vadd.f32 %v13316_v38, %v9610_v30  ;;  %v7684_v22 = vpop.f32.mrb[71].mxu1 }
 0x604   : > { %v7847_v53 = vadd.f32 %v9700_v36, %v13405_v12  ;;  %v9706_v2 = vadd.f32 %v13310_v28, %v7684_v22 }
 0x605   : > { %v7850_v24 = vadd.f32 %v9703_v7, %v13405_v12  ;;  %v7881_v54 = vmax.f32 %v7849_v50, 0.0 }
 0x606   : > { %v7848_v27 = vadd.f32 %v9706_v2, %v13405_v12  ;;  %v7879_v16 = vmax.f32 %v7847_v53, 0.0 }
 0x607   : > { %v7882_v5 = vmax.f32 %v7850_v24, 0.0 }
 0x608   : > { %v7880_v44 = vmax.f32 %v7848_v27, 0.0  ;;  %v9613_v42 = vpop.f32.mrb[72].mxu1 }
 0x609   : > { %v7912_v61 = vpack.c.bf16 %v7882_v5, %v7881_v54  ;;  %v9709_v40 = vadd.f32 %v13325_v19, %v9613_v42  ;;  %v7697_v63 = vpop.f32.mrb[73].mxu1 }
 0x60a   : > { %v7911_v38 = vpack.c.bf16 %v7880_v44, %v7879_v16  ;;  %v9712_v59 = vadd.f32 %v13319_v62, %v7697_v63  ;;  %v9614_v17 = vpop.f32.mrb[74].mxu1 }
 0x60b   : > { %v7853_v28 = vadd.f32 %v9709_v40, %v13405_v12  ;;  %v9715_v45 = vadd.f32 %v13328_v48, %v9614_v17  ;;  %v7700_v57 = vpop.f32.mrb[75].mxu1 }
 0x60c   : > { %v7851_v11 = vadd.f32 %v9712_v59, %v13405_v12  ;;  %v9718_v14 = vadd.f32 %v13322_v23, %v7700_v57  ;;  %9647 = vmatprep.mubr.msk.bf16.mxu0 %vm7966_vm14, %v7911_v38 }
 0x60d   : > { %v7854_v1 = vadd.f32 %v9715_v45, %v13405_v12  ;;  %9648 = vmatmul.mubr.msk.bf16.vlgmr.msra.gmra.mrb[196].mxu0 %vm7966_vm14, %v7912_v61  ;;  %v7885_v41 = vmax.f32 %v7853_v28, 0.0 }
 0x60e   : > { %v7852_v19 = vadd.f32 %v9718_v14, %v13405_v12  ;;  %v7883_v0 = vmax.f32 %v7851_v11, 0.0 }
 0x60f   : > { %v7886_v62 = vmax.f32 %v7854_v1, 0.0 }
 0x610   : > { %v7884_v31 = vmax.f32 %v7852_v19, 0.0  ;;  %v9617_v49 = vpop.f32.mrb[76].mxu1 }
 0x611   : > { %v7914_v15 = vpack.c.bf16 %v7886_v62, %v7885_v41  ;;  %v9721_v48 = vadd.f32 %v13337_v60, %v9617_v49  ;;  %v7713_v39 = vpop.f32.mrb[77].mxu1 }
 0x612   : > { %v7913_v8 = vpack.c.bf16 %v7884_v31, %v7883_v0  ;;  %v9724_v23 = vadd.f32 %v13331_v4, %v7713_v39  ;;  %v9618_v13 = vpop.f32.mrb[78].mxu1 }
 0x613   : > { %v7857_v46 = vadd.f32 %v9721_v48, %v13405_v12  ;;  %v9727_v36 = vadd.f32 %v13340_v47, %v9618_v13  ;;  %v7716_v30 = vpop.f32.mrb[79].mxu1 }
 0x614   : > { %v7855_v50 = vadd.f32 %v9724_v23, %v13405_v12  ;;  %v9730_v7 = vadd.f32 %v13334_v37, %v7716_v30  ;;  %9651 = vmatprep.mubr.msk.bf16.mxu0 %vm7966_vm14, %v7913_v8 }
 0x615   : > { %v7858_v22 = vadd.f32 %v9727_v36, %v13405_v12  ;;  %9652 = vmatmul.mubr.msk.bf16.gmra.mrb[200].mxu0 %vm7966_vm14, %v7914_v15  ;;  %v7889_v53 = vmax.f32 %v7857_v46, 0.0 }
 0x616   : > { %v7856_v60 = vadd.f32 %v9730_v7, %v13405_v12  ;;  %v7887_v2 = vmax.f32 %v7855_v50, 0.0 }
 0x617   : > { %v7890_v4 = vmax.f32 %v7858_v22, 0.0 }
 0x618   : > { %v7888_v24 = vmax.f32 %v7856_v60, 0.0  ;;  %v9621_v27 = vpop.f32.mrb[80].mxu1 }
 0x619   : > { %v7916_v54 = vpack.c.bf16 %v7890_v4, %v7889_v53  ;;  %v9733_v47 = vadd.f32 %v13349_v34, %v9621_v27  ;;  %v7729_v5 = vpop.f32.mrb[81].mxu1 }
 0x61a   : > { %v7915_v16 = vpack.c.bf16 %v7888_v24, %v7887_v2  ;;  %v9736_v37 = vadd.f32 %v13343_v21, %v7729_v5  ;;  %v9622_v44 = vpop.f32.mrb[82].mxu1 }
 0x61b   : > { %v7861_v42 = vadd.f32 %v9733_v47, %v13405_v12  ;;  %v9739_v61 = vadd.f32 %v13352_v25, %v9622_v44  ;;  %v7732_v40 = vpop.f32.mrb[83].mxu1 }
 0x61c   : > { %v7859_v63 = vadd.f32 %v9736_v37, %v13405_v12  ;;  %v9742_v38 = vadd.f32 %v13346_v55, %v7732_v40  ;;  %9655 = vmatprep.mubr.msk.bf16.mxu0 %vm7966_vm14, %v7915_v16 }
 0x61d   : > { %v7862_v59 = vadd.f32 %v9739_v61, %v13405_v12  ;;  %9656 = vmatmul.mubr.msk.bf16.gmra.mrb[204].mxu0 %vm7966_vm14, %v7916_v54  ;;  %v7893_v17 = vmax.f32 %v7861_v42, 0.0 }
 0x61e   : > { %v7860_v34 = vadd.f32 %v9742_v38, %v13405_v12  ;;  %v7891_v28 = vmax.f32 %v7859_v63, 0.0 }
 0x61f   : > { %v7894_v21 = vmax.f32 %v7862_v59, 0.0 }
 0x620   : > { %v7892_v45 = vmax.f32 %v7860_v34, 0.0  ;;  %v9625_v57 = vpop.f32.mrb[84].mxu1 }
 0x621   : > { %v7918_v11 = vpack.c.bf16 %v7894_v21, %v7893_v17  ;;  %v9745_v25 = vadd.f32 %v13361_v10, %v9625_v57  ;;  %v7745_v14 = vpop.f32.mrb[85].mxu1 }
 0x622   : > { %v7917_v1 = vpack.c.bf16 %v7892_v45, %v7891_v28  ;;  %v9748_v55 = vadd.f32 %v13355_v20, %v7745_v14  ;;  %v9626_v19 = vpop.f32.mrb[86].mxu1 }
 0x623   : > { %v7865_v41 = vadd.f32 %v9745_v25, %v13405_v12  ;;  %v9751_v62 = vadd.f32 %v13364_v26, %v9626_v19  ;;  %v7748_v0 = vpop.f32.mrb[87].mxu1 }
 0x624   : > { %v7863_v31 = vadd.f32 %v9748_v55, %v13405_v12  ;;  %v9754_v49 = vadd.f32 %v13358_v58, %v7748_v0  ;;  %9659 = vmatprep.mubr.msk.bf16.mxu0 %vm7966_vm14, %v7917_v1 }
 0x625   : > { %v7866_v15 = vadd.f32 %v9751_v62, %v13405_v12  ;;  %9660 = vmatmul.mubr.msk.bf16.gmra.mrb[208].mxu0 %vm7966_vm14, %v7918_v11  ;;  %v7897_v48 = vmax.f32 %v7865_v41, 0.0 }
 0x626   : > { %v7864_v10 = vadd.f32 %v9754_v49, %v13405_v12  ;;  %v7895_v39 = vmax.f32 %v7863_v31, 0.0 }
 0x627   : > { %v7898_v20 = vmax.f32 %v7866_v15, 0.0 }
 0x628   : > { %v7896_v8 = vmax.f32 %v7864_v10, 0.0  ;;  %v9629_v23 = vpop.f32.mrb[88].mxu1 }
 0x629   : > { %v7920_v13 = vpack.c.bf16 %v7898_v20, %v7897_v48  ;;  %v9757_v26 = vadd.f32 %v13373_v6, %v9629_v23  ;;  %v7761_v46 = vpop.f32.mrb[89].mxu1 }
 0x62a   : > { %v7919_v36 = vpack.c.bf16 %v7896_v8, %v7895_v39  ;;  %v9760_v58 = vadd.f32 %v13367_v56, %v7761_v46  ;;  %v9630_v30 = vpop.f32.mrb[90].mxu1 }
 0x62b   : > { %v7869_v50 = vadd.f32 %v9757_v26, %v13405_v12  ;;  %v9763_v7 = vadd.f32 %v13376_v51, %v9630_v30  ;;  %v7764_v22 = vpop.f32.mrb[91].mxu1 }
 0x62c   : > { %v7867_v60 = vadd.f32 %v9760_v58, %v13405_v12  ;;  %v9766_v53 = vadd.f32 %v13370_v43, %v7764_v22  ;;  %9663 = vmatprep.mubr.msk.bf16.mxu0 %vm7966_vm14, %v7919_v36 }
 0x62d   : > { %v7870_v4 = vadd.f32 %v9763_v7, %v13405_v12  ;;  %9664 = vmatmul.mubr.msk.bf16.gmra.mrb[212].mxu0 %vm7966_vm14, %v7920_v13  ;;  %v7901_v2 = vmax.f32 %v7869_v50, 0.0 }
 0x62e   : > { %v7868_v6 = vadd.f32 %v9766_v53, %v13405_v12  ;;  %v7899_v24 = vmax.f32 %v7867_v60, 0.0 }
 0x62f   : > { %v7902_v56 = vmax.f32 %v7870_v4, 0.0 }
 0x630   : > { %v7900_v27 = vmax.f32 %v7868_v6, 0.0  ;;  %v9633_v54 = vpop.f32.mrb[92].mxu1 }
 0x631   : > { %v7922_v47 = vpack.c.bf16 %v7902_v56, %v7901_v2  ;;  %v9769_v51 = vadd.f32 %v13385_v29, %v9633_v54  ;;  %v7777_v5 = vpop.f32.mrb[93].mxu1 }
 0x632   : > { %v7921_v16 = vpack.c.bf16 %v7900_v27, %v7899_v24  ;;  %v9772_v43 = vadd.f32 %v13379_v18, %v7777_v5  ;;  %v9634_v37 = vpop.f32.mrb[94].mxu1 }
 0x633   : > { %v7873_v44 = vadd.f32 %v9769_v51, %v13405_v12  ;;  %v9775_v42 = vadd.f32 %v13388_v9, %v9634_v37  ;;  %v7780_v61 = vpop.f32.mrb[95].mxu1 }
 0x634   : > { %v7871_v40 = vadd.f32 %v9772_v43, %v13405_v12  ;;  %v9778_v63 = vadd.f32 %v13382_v33, %v7780_v61  ;;  %9667 = vmatprep.mubr.msk.bf16.mxu0 %vm7966_vm14, %v7921_v16 }
 0x635   : > { %v7874_v38 = vadd.f32 %v9775_v42, %v13405_v12  ;;  %9668 = vmatmul.mubr.msk.bf16.gmra.mrb[216].mxu0 %vm7966_vm14, %v7922_v47  ;;  %v7905_v59 = vmax.f32 %v7873_v44, 0.0 }
 0x636   : > { %v7872_v29 = vadd.f32 %v9778_v63, %v13405_v12  ;;  %v7903_v34 = vmax.f32 %v7871_v40, 0.0 }
 0x637   : > { %v7906_v18 = vmax.f32 %v7874_v38, 0.0 }
 0x638   : > { %v7904_v17 = vmax.f32 %v7872_v29, 0.0  ;;  %v9637_v21 = vpop.f32.mrb[96].mxu1 }
 0x639   : > { %v7924_v28 = vpack.c.bf16 %v7906_v18, %v7905_v59  ;;  %v9781_v9 = vadd.f32 %v13397_v3, %v9637_v21  ;;  %v7793_v45 = vpop.f32.mrb[97].mxu1 }
 0x63a   : > { %v7923_v57 = vpack.c.bf16 %v7904_v17, %v7903_v34  ;;  %v9784_v33 = vadd.f32 %v13391_v52, %v7793_v45  ;;  %v9638_v11 = vpop.f32.mrb[98].mxu1 }
 0x63b   : > { %v7877_v25 = vadd.f32 %v9781_v9, %v13405_v12  ;;  %v9787_v14 = vadd.f32 %v13400_v32, %v9638_v11  ;;  %v7796_v1 = vpop.f32.mrb[99].mxu1 }
 0x63c   : > { %v7875_v55 = vadd.f32 %v9784_v33, %v13405_v12  ;;  %v9790_v19 = vadd.f32 %v13394_v35, %v7796_v1  ;;  %9671 = vmatprep.mubr.msk.bf16.mxu0 %vm7966_vm14, %v7923_v57  ;;  %v13490_v35 = vld [vmem:[%s13543_s6] ss:$0 sm:$0xff] }
 0x63d   : > { %v7878_v41 = vadd.f32 %v9787_v14, %v13405_v12  ;;  %9672 = vmatmul.mubr.msk.bf16.gmra.mrb[220].mxu0 %vm7966_vm14, %v7924_v28  ;;  %v7909_v62 = vmax.f32 %v7877_v25, 0.0 }
 0x63e   : > { %v7876_v3 = vadd.f32 %v9790_v19, %v13405_v12  ;;  %v7907_v0 = vmax.f32 %v7875_v55, 0.0 }
 0x63f   : > { %v7910_v52 = vmax.f32 %v7878_v41, 0.0 }
 0x640   : > { %v7908_v31 = vmax.f32 %v7876_v3, 0.0 }
 0x641   : > { %v7926_v49 = vpack.c.bf16 %v7910_v52, %v7909_v62 }
 0x642   : > { %v7925_v15 = vpack.c.bf16 %v7908_v31, %v7907_v0 }
 0x644   : > { %9675 = vmatprep.mubr.msk.bf16.mxu0 %vm7966_vm14, %v7925_v15 }
 0x645   : > { %9676 = vmatmul.mubr.msk.bf16.gmra.mrb[224].mxu0 %vm7966_vm14, %v7926_v49 }
 0x6e0   : > { %v9649_v32 = vpop.f32.mrb[196].mxu0 }
 0x6e1   : > { %v8049_v10 = vpop.f32.mrb[197].mxu0  ;;  %v8058_v13 = vadd.f32 %v9649_v32, %v13490_v35 }
 0x6e2   : > { %v9650_v48 = vpop.f32.mrb[198].mxu0  ;;  %v8050_v12 = vadd.f32 %v13490_v35, %v8049_v10 }
 0x6e3   : > { %v8052_v20 = vpop.f32.mrb[199].mxu0  ;;  %v8061_v36 = vadd.f32 %v9650_v48, %v13490_v35 }
 0x6e4   : > { %8176 = vxpose.xlu0.b32.start [1/16] (narrow) %v8050_v12, 8  ;;  %v8053_v39 = vadd.f32 %v13490_v35, %v8052_v20 }
 0x6e8   : > { %v9653_v8 = vpop.f32.mrb[200].mxu0  ;;  %8177 = vxpose.xlu0.b32.cont [2/16] (narrow) %v8053_v39, 8 }
 0x6e9   : > { %v8065_v23 = vpop.f32.mrb[201].mxu0  ;;  %v8074_v6 = vadd.f32 %v9653_v8, %v13490_v35 }
 0x6ea   : > { %v9654_v26 = vpop.f32.mrb[202].mxu0  ;;  %v8066_v50 = vadd.f32 %v13490_v35, %v8065_v23 }
 0x6eb   : > { %v8068_v46 = vpop.f32.mrb[203].mxu0  ;;  %v8077_v24 = vadd.f32 %v9654_v26, %v13490_v35 }
 0x6ec   : > { %8178 = vxpose.xlu0.b32.cont [3/16] (narrow) %v8058_v13, 8  ;;  %v8069_v60 = vadd.f32 %v13490_v35, %v8068_v46 }
 0x6f0   : > { %v9657_v58 = vpop.f32.mrb[204].mxu0  ;;  %8179 = vxpose.xlu0.b32.cont [4/16] (narrow) %v8061_v36, 8 }
 0x6f1   : > { %v8081_v30 = vpop.f32.mrb[205].mxu0  ;;  %v8090_v61 = vadd.f32 %v9657_v58, %v13490_v35 }
 0x6f2   : > { %v9658_v7 = vpop.f32.mrb[206].mxu0  ;;  %v8082_v47 = vadd.f32 %v13490_v35, %v8081_v30 }
 0x6f3   : > { %v8084_v22 = vpop.f32.mrb[207].mxu0  ;;  %v8093_v29 = vadd.f32 %v9658_v7, %v13490_v35 }
 0x6f4   : > { %8180 = vxpose.xlu0.b32.cont [5/16] (narrow) %v8066_v50, 8  ;;  %v8085_v43 = vadd.f32 %v13490_v35, %v8084_v22 }
 0x6f8   : > { %v9661_v53 = vpop.f32.mrb[208].mxu0  ;;  %8181 = vxpose.xlu0.b32.cont [6/16] (narrow) %v8069_v60, 8 }
 0x6f9   : > { %v8097_v4 = vpop.f32.mrb[209].mxu0  ;;  %v8106_v41 = vadd.f32 %v9661_v53, %v13490_v35 }
 0x6fa   : > { %v9662_v2 = vpop.f32.mrb[210].mxu0  ;;  %v8098_v21 = vadd.f32 %v13490_v35, %v8097_v4 }
 0x6fb   : > { %v8100_v56 = vpop.f32.mrb[211].mxu0  ;;  %v8109_v15 = vadd.f32 %v9662_v2, %v13490_v35 }
 0x6fc   : > { %8182 = vxpose.xlu0.b32.cont [7/16] (narrow) %v8074_v6, 8  ;;  %v8101_v25 = vadd.f32 %v13490_v35, %v8100_v56 }
 0x700   : > { %v9665_v27 = vpop.f32.mrb[212].mxu0  ;;  %8183 = vxpose.xlu0.b32.cont [8/16] (narrow) %v8077_v24, 8 }
 0x701   : > { %v8113_v54 = vpop.f32.mrb[213].mxu0  ;;  %v8122_v40 = vadd.f32 %v9665_v27, %v13490_v35 }
 0x702   : > { %v9666_v51 = vpop.f32.mrb[214].mxu0  ;;  %v8114_v5 = vadd.f32 %v13490_v35, %v8113_v54 }
 0x703   : > { %v8116_v16 = vpop.f32.mrb[215].mxu0  ;;  %v8125_v59 = vadd.f32 %v9666_v51, %v13490_v35 }
 0x704   : > { %8208 = vxpose.xlu1.b32.start [1/16] (narrow) %v8114_v5, 8  ;;  %8184 = vxpose.xlu0.b32.cont [9/16] (narrow) %v8082_v47, 8  ;;  %v8117_v37 = vadd.f32 %v13490_v35, %v8116_v16 }
 0x708   : > { %v9669_v44 = vpop.f32.mrb[216].mxu0  ;;  %8209 = vxpose.xlu1.b32.cont [2/16] (narrow) %v8117_v37, 8  ;;  %8185 = vxpose.xlu0.b32.cont [10/16] (narrow) %v8085_v43, 8 }
 0x709   : > { %v8129_v42 = vpop.f32.mrb[217].mxu0  ;;  %v8138_v3 = vadd.f32 %v9669_v44, %v13490_v35 }
 0x70a   : > { %v9670_v63 = vpop.f32.mrb[218].mxu0  ;;  %v8130_v28 = vadd.f32 %v13490_v35, %v8129_v42 }
 0x70b   : > { %v8132_v38 = vpop.f32.mrb[219].mxu0  ;;  %v8141_v32 = vadd.f32 %v9670_v63, %v13490_v35 }
 0x70c   : > { %8210 = vxpose.xlu1.b32.cont [3/16] (narrow) %v8122_v40, 8  ;;  %8186 = vxpose.xlu0.b32.cont [11/16] (narrow) %v8090_v61, 8  ;;  %v8133_v14 = vadd.f32 %v13490_v35, %v8132_v38 }
 0x710   : > { %v9673_v18 = vpop.f32.mrb[220].mxu0  ;;  %8211 = vxpose.xlu1.b32.cont [4/16] (narrow) %v8125_v59, 8  ;;  %8187 = vxpose.xlu0.b32.cont [12/16] (narrow) %v8093_v29, 8 }
 0x711   : > { %v8154_v34 = vadd.f32 %v9673_v18, %v13490_v35  ;;  %v8145_v17 = vpop.f32.mrb[221].mxu0 }
 0x712   : > { %v8146_v9 = vadd.f32 %v13490_v35, %v8145_v17  ;;  %v9674_v45 = vpop.f32.mrb[222].mxu0 }
 0x713   : > { %v8157_v57 = vadd.f32 %v9674_v45, %v13490_v35  ;;  %v8148_v33 = vpop.f32.mrb[223].mxu0 }
 0x714   : > { %v8149_v11 = vadd.f32 %v13490_v35, %v8148_v33  ;;  %8212 = vxpose.xlu1.b32.cont [5/16] (narrow) %v8130_v28, 8  ;;  %8188 = vxpose.xlu0.b32.cont [13/16] (narrow) %v8098_v21, 8 }
 0x718   : > { %v9677_v1 = vpop.f32.mrb[224].mxu0  ;;  %8213 = vxpose.xlu1.b32.cont [6/16] (narrow) %v8133_v14, 8  ;;  %8189 = vxpose.xlu0.b32.cont [14/16] (narrow) %v8101_v25, 8 }
 0x719   : > { %v8170_v55 = vadd.f32 %v9677_v1, %v13490_v35  ;;  %v8161_v19 = vpop.f32.mrb[225].mxu0 }
 0x71a   : > { %v8162_v62 = vadd.f32 %v13490_v35, %v8161_v19  ;;  %v9678_v52 = vpop.f32.mrb[226].mxu0 }
 0x71b   : > { %v8173_v0 = vadd.f32 %v9678_v52, %v13490_v35  ;;  %v8164_v31 = vpop.f32.mrb[227].mxu0 }
 0x71c   : > { %v8165_v49 = vadd.f32 %v13490_v35, %v8164_v31  ;;  %8214 = vxpose.xlu1.b32.cont [7/16] (narrow) %v8138_v3, 8  ;;  %8190 = vxpose.xlu0.b32.cont [15/16] (narrow) %v8106_v41, 8 }
 0x720   : > { %8215 = vxpose.xlu1.b32.cont [8/16] (narrow) %v8141_v32, 8  ;;  %8191 = vxpose.xlu0.b32.end [16/16] (narrow) %v8109_v15, 8 }
 0x724   : > { %8216 = vxpose.xlu1.b32.cont [9/16] (narrow) %v8146_v9, 8 }
 0x728   : > { %8217 = vxpose.xlu1.b32.cont [10/16] (narrow) %v8149_v11, 8 }
 0x72c   : > { %8218 = vxpose.xlu1.b32.cont [11/16] (narrow) %v8154_v34, 8 }
 0x730   : > { %8219 = vxpose.xlu1.b32.cont [12/16] (narrow) %v8157_v57, 8 }
 0x734   : > { %8220 = vxpose.xlu1.b32.cont [13/16] (narrow) %v8162_v62, 8 }
 0x738   : > { %8221 = vxpose.xlu1.b32.cont [14/16] (narrow) %v8165_v49, 8 }
 0x73c   : > { %8222 = vxpose.xlu1.b32.cont [15/16] (narrow) %v8170_v55, 8 }
 0x740   : > { %8223 = vxpose.xlu1.b32.end [16/16] (narrow) %v8173_v0, 8 }
 0x764   : > { %v8192_v10 = vpop.trf.xlu0 }
 0x765   : > { %8240 = vst [vmem:[%s300_s20] sm:$0xff] %v8192_v10 }
 0x784   : > { %v8224_v48 = vpop.trf.xlu1 }
 0x785   : > { %8241 = vst [vmem:[%s300_s20 + $0x8] sm:$0xff] %v8224_v48 }
 0x786 PF: > { %s17_s26 = sadd.s32 1, %s10243_s26   ;;  %s13715_s24 = smov %s10239_s25 }
 0x787   : > { %p14_p5 = scmp.ge.s32.totalorder %s17_s26, 4   ;;  %s13716_s25 = smov %s13718_s27 }
 0x789   :  { %16 = sbr.rel (!%p14_p5) target bundleno = 2 (0x2), region = 94 }

</bundles_post_ra>
